<compile_context>
chip_gen: v7x
topology: tpu7x:2x2x1
jax: 0.10.0
libtpu: 0.0.40
codegen_flags: <defaults>
</compile_context>

<pallas_src>
import jax
import jax.numpy as jnp
import numpy as np
from jax import lax
from jax.experimental import pallas as pl
from jax.experimental.pallas import tpu as pltpu

jax.config.update("jax_default_matmul_precision", "highest")

# --------------------------- small, module-consistent config ---------------------------
N_BATCH  = 2
D_MODEL  = 32
D_FFN    = 64
N_HEADS  = 4
HEAD_DIM = D_MODEL // N_HEADS
N_LEVELS = 2
N_POINTS = 4
SPATIAL_SHAPES = ((4, 4), (2, 2))                         # (H_l, W_l) per level

_starts, _acc = [], 0
for _h, _w in SPATIAL_SHAPES:
    _starts.append(_acc)
    _acc += _h * _w
LEVEL_START = tuple(_starts)
LEN_IN  = _acc                                            # 20 (== Lq for encoder self-attn)
LQ      = LEN_IN
LP      = N_LEVELS * N_POINTS                             # 8  sampling points per head
K       = N_HEADS * LP                                    # 32 sampling points per query
NS      = 4 * K                                           # 128 bilinear-corner samples per query
P_ROWS  = LEN_IN * LQ                                     # 400 expanded (row, query) pairs
REF_PAD = 8                                               # ref features padded 2*L=4 -> 8
LN_EPS  = 1e-5


# --------------------------------- in-kernel helpers -----------------------------------
def _layernorm(x, g, b):
    mu = jnp.mean(x, axis=-1, keepdims=True)
    xc = x - mu
    var = jnp.mean(xc * xc, axis=-1, keepdims=True)
    return xc * lax.rsqrt(var + LN_EPS) * g + b


def _gelu_tanh(x):
    # tanh-form GELU: the transcendental runs on the EUP slot, keeping the VALU clear.
    return 0.5 * x * (1.0 + jnp.tanh(0.7978845608028654 * (x + 0.044715 * x * x * x)))


# -------------------------------------- kernel -----------------------------------------
def encoder_layer_kernel(src_ref, pos_ref, ref_ref,
                         ln1_g, ln1_b, wbig_ref, bbig_ref,
                         wv_ref, bv_ref, wo_ref, bo_ref,
                         ln2_g, ln2_b, w1_ref, b1_ref, w2_ref, b2_ref,
                         seg_ref, hod_ref, lvlc_ref, corn_ref, refmap_ref,
                         repq_ref, repr_ref, segq_ref, rowid_ref,
                         out_ref):
    f32 = jnp.float32
    x   = src_ref[...]                # (LQ, D)
    pos = pos_ref[...]                # (LQ, D)
    ref = ref_ref[...]                # (LQ, REF_PAD) = [x_l0, y_l0, x_l1, y_l1, 0...]

    # ---- pre-norm on the attention path + positional embedding (query only) ----
    xn = _layernorm(x, ln1_g[...], ln1_b[...])
    q = xn + pos

    # ---- fused sampling_offsets + attention_weights projection, already at 128 lanes ----
    # columns: [x-offsets | y-offsets | attn-logits], each replicated per bilinear corner,
    # lane s = corner*32 + head*8 + level*4 + point.
    qp = jnp.dot(q, wbig_ref[...], preferred_element_type=f32) + bbig_ref[...]   # (LQ, 3*NS)
    ox    = qp[:, :NS]
    oy    = qp[:, NS:2 * NS]
    logit = qp[:, 2 * NS:3 * NS]

    val = jnp.dot(x, wv_ref[...], preferred_element_type=f32) + bv_ref[...]      # value_proj(src)

    # ---- softmax over (level, point) per head, at 128 lanes ----
    # seg sums each head's 8 distinct logits exactly once (corner-0 columns only).
    m = jnp.max(logit, axis=-1, keepdims=True)
    e = jnp.exp(logit - m)
    denom = jnp.dot(e, seg_ref[...], preferred_element_type=f32)                 # (LQ, NS)
    # denom floor guards against a whole head segment underflowing (global-row-max subtraction).
    a = e * pl.reciprocal(jnp.maximum(denom, 1e-20), approx=True)                # EUP rcp

    # ---- per-lane static constants (loaded once; constant index_map) ----
    lvlc = lvlc_ref[...]              # (3, NS): rows W, H, level_start
    corn = corn_ref[...]              # (2, NS): rows dx, dy
    Wl = lvlc[0:1, :]
    Hl = lvlc[1:2, :]
    St = lvlc[2:3, :]
    dx = corn[0:1, :]
    dy = corn[1:2, :]

    # reference points replicated per lane via a tiny one-hot matmul
    refxy = jnp.dot(ref, refmap_ref[...], preferred_element_type=f32)            # (LQ, 2*NS)
    refx = refxy[:, :NS]
    refy = refxy[:, NS:]

    # ---- bilinear sampling coords / weights, full 128-lane width (no concats) ----
    # grid_sample(align_corners=False) pixel coords; (ref + off/W)*W - 0.5 == ref*W + off - 0.5
    ix = refx * Wl + ox - 0.5
    iy = refy * Hl + oy - 0.5
    x0 = jnp.floor(ix)
    y0 = jnp.floor(iy)
    fx = ix - x0
    fy = iy - y0
    cx = x0 + dx
    cy = y0 + dy
    wx = jnp.where(dx > 0.5, fx, 1.0 - fx)
    wy = jnp.where(dy > 0.5, fy, 1.0 - fy)
    # padding_mode='zeros' => out-of-bounds corners get weight 0 (key collisions are harmless)
    valid = (cx >= 0.0) & (cx <= Wl - 1.0) & (cy >= 0.0) & (cy <= Hl - 1.0)
    wgt = jnp.where(valid, a * (wx * wy), 0.0)                                   # (LQ, NS)
    key = St + cy * Wl + cx                                                      # exact small ints

    # ---- scatter over LEN_IN=20 bins only (4x fewer compares than heads*LEN_IN bins) ----
    # Expand to P_ROWS = LEN_IN*LQ rows (p = row*LQ + query) with one-hot MXU matmuls
    # (exact copies: 0/1 matrix times exact-integer / f32 values).
    key_rep = jnp.dot(repq_ref[...], key, preferred_element_type=f32)            # (P, NS)
    wgt_rep = jnp.dot(repq_ref[...], wgt, preferred_element_type=f32)            # (P, NS)
    hits = key_rep == rowid_ref[...]                                             # (P, NS)
    T = jnp.where(hits, wgt_rep, 0.0)

    # head split + lane reduction on the MXU, then per-row value product + per-query segment sum
    G = jnp.dot(T, hod_ref[...], preferred_element_type=f32)                     # (P, D)
    val_rep = jnp.dot(repr_ref[...], val, preferred_element_type=f32)            # (P, D)
    out_pre = jnp.dot(segq_ref[...], G * val_rep, preferred_element_type=f32)    # (LQ, D)

    attn = jnp.dot(out_pre, wo_ref[...], preferred_element_type=f32) + bo_ref[...]

    # residual 1 (dropout1 = identity at inference)
    src1 = x + attn

    # ---- FFN path: pre-norm -> linear1 -> gelu -> linear2 -> residual ----
    xn2 = _layernorm(src1, ln2_g[...], ln2_b[...])
    hid = _gelu_tanh(jnp.dot(xn2, w1_ref[...], preferred_element_type=f32) + b1_ref[...])
    ffn = jnp.dot(hid, w2_ref[...], preferred_element_type=f32) + b2_ref[...]

    out_ref[...] = src1 + ffn


# ------------------------------ parameters (synthetic init) -----------------------------
def init_params(key):
    ks = jax.random.split(key, 8)

    def linear(k, out_dim, in_dim, w_scale):
        kw, kb = jax.random.split(k)
        w = w_scale * jax.random.normal(kw, (out_dim, in_dim), jnp.float32)   # torch (out, in)
        b = w_scale * jax.random.normal(kb, (out_dim,), jnp.float32)
        return w, b

    p = {}
    p['w_so'], p['b_so'] = linear(ks[0], N_HEADS * N_LEVELS * N_POINTS * 2, D_MODEL, 0.15)
    p['w_aw'], p['b_aw'] = linear(ks[1], N_HEADS * N_LEVELS * N_POINTS, D_MODEL, 0.15)
    p['w_v'],  p['b_v']  = linear(ks[2], D_MODEL, D_MODEL, 0.08)
    p['w_o'],  p['b_o']  = linear(ks[3], D_MODEL, D_MODEL, 0.08)
    p['w_1'],  p['b_1']  = linear(ks[4], D_FFN, D_MODEL, 0.08)
    p['w_2'],  p['b_2']  = linear(ks[5], D_MODEL, D_FFN, 0.08)
    p['ln1_g'] = 1.0 + 0.05 * jax.random.normal(ks[6], (D_MODEL,), jnp.float32)
    p['ln1_b'] = 0.05 * jax.random.normal(jax.random.fold_in(ks[6], 1), (D_MODEL,), jnp.float32)
    p['ln2_g'] = 1.0 + 0.05 * jax.random.normal(ks[7], (D_MODEL,), jnp.float32)
    p['ln2_b'] = 0.05 * jax.random.normal(jax.random.fold_in(ks[7], 1), (D_MODEL,), jnp.float32)
    return p


def to_kernel_params(p):
    # nn.Linear computes x @ W.T + b; the kernel uses (in, out) matrices.
    # Fused projection weight: columns [x-offsets | y-offsets | attn-logits], each block ordered
    # (head, level, point) and replicated 4x for the bilinear corners (corner-major lane layout).
    wso_t = p['w_so'].T.reshape(D_MODEL, N_HEADS, N_LEVELS, N_POINTS, 2)
    wox = wso_t[..., 0].reshape(D_MODEL, K)
    woy = wso_t[..., 1].reshape(D_MODEL, K)
    waw = p['w_aw'].T                                           # (D, K)
    wbig = jnp.concatenate([jnp.tile(wox, (1, 4)),
                            jnp.tile(woy, (1, 4)),
                            jnp.tile(waw, (1, 4))], axis=1)     # (D, 3*NS)

    bso = p['b_so'].reshape(N_HEADS, N_LEVELS, N_POINTS, 2)
    box = bso[..., 0].reshape(K)
    boy = bso[..., 1].reshape(K)
    baw = p['b_aw'].reshape(K)
    bbig = jnp.concatenate([jnp.tile(box, (4,)),
                            jnp.tile(boy, (4,)),
                            jnp.tile(baw, (4,))]).reshape(1, 3 * NS)

    return (
        p['ln1_g'].reshape(1, D_MODEL), p['ln1_b'].reshape(1, D_MODEL),
        wbig, bbig,
        p['w_v'].T, p['b_v'].reshape(1, D_MODEL),
        p['w_o'].T, p['b_o'].reshape(1, D_MODEL),
        p['ln2_g'].reshape(1, D_MODEL), p['ln2_b'].reshape(1, D_MODEL),
        p['w_1'].T, p['b_1'].reshape(1, D_FFN),
        p['w_2'].T, p['b_2'].reshape(1, D_MODEL),
    )


def build_static_constants():
    """Static masks / lane constants passed to the kernel as constant-index inputs."""
    s = np.arange(NS)
    corner = s // K
    k = s % K
    head = k // LP
    lp = k % LP
    level = lp // N_POINTS

    W_per = np.array([w for (h, w) in SPATIAL_SHAPES], np.float32)[level]
    H_per = np.array([h for (h, w) in SPATIAL_SHAPES], np.float32)[level]
    S_per = np.array(LEVEL_START, np.float32)[level]
    lvlc = np.stack([W_per, H_per, S_per], axis=0).astype(np.float32)            # (3, NS)

    dx = np.array([0., 1., 0., 1.], np.float32)[corner]
    dy = np.array([0., 0., 1., 1.], np.float32)[corner]
    corn = np.stack([dx, dy], axis=0).astype(np.float32)                          # (2, NS)

    # softmax denominator matrix: denom[:, s] = sum_{s'} e[:, s'] * seg[s', s]
    # each head's 8 distinct logits are summed exactly once (corner-0 rows only).
    seg = ((head[:, None] == head[None, :]) & (corner[:, None] == 0)).astype(np.float32)  # (NS, NS)

    # head one-hot over output channels: hod[s, d] = 1 iff head(s) owns channel d
    hod = (head[:, None] == (np.arange(D_MODEL)[None, :] // HEAD_DIM)).astype(np.float32)  # (NS, D)

    # reference-point replication: refxy = ref_pad @ refmap (ref_pad cols [x0,y0,x1,y1,0...])
    refmap = np.zeros((REF_PAD, 2 * NS), np.float32)
    refmap[2 * level, np.arange(NS)] = 1.0
    refmap[2 * level + 1, NS + np.arange(NS)] = 1.0

    # row expansion / segment-sum one-hots over p = row*LQ + query
    p = np.arange(P_ROWS)
    repq = (p[:, None] % LQ == np.arange(LQ)[None, :]).astype(np.float32)         # (P, LQ)
    repr_ = (p[:, None] // LQ == np.arange(LEN_IN)[None, :]).astype(np.float32)   # (P, LEN_IN)
    segq = np.ascontiguousarray(repq.T)                                           # (LQ, P)
    rowid = (p // LQ).astype(np.float32).reshape(P_ROWS, 1)                       # (P, 1)

    consts = dict(seg=seg, hod=hod, lvlc=lvlc, corn=corn, refmap=refmap,
                  repq=repq, repr=repr_, segq=segq, rowid=rowid)
    return {name: jnp.asarray(v) for name, v in consts.items()}


# ------------------------------------- wrapper ------------------------------------------
def msdeform_encoder_layer_pallas(src, pos, reference_points, params, constants):
    N, Lq, D = src.shape
    assert (Lq, D) == (LQ, D_MODEL)
    ref_flat = reference_points.reshape(N, Lq, 2 * N_LEVELS).astype(jnp.float32)
    ref_pad = jnp.zeros((N, Lq, REF_PAD), jnp.float32).at[:, :, :2 * N_LEVELS].set(ref_flat)

    kparams = to_kernel_params(params)
    kconsts = (constants['seg'], constants['hod'], constants['lvlc'], constants['corn'],
               constants['refmap'], constants['repq'], constants['repr'],
               constants['segq'], constants['rowid'])

    data_specs = [
        pl.BlockSpec((None, Lq, D_MODEL), lambda b: (b, 0, 0)),
        pl.BlockSpec((None, Lq, D_MODEL), lambda b: (b, 0, 0)),
        pl.BlockSpec((None, Lq, REF_PAD), lambda b: (b, 0, 0)),
    ]
    # parameters & static constants: whole-array blocks, same block for every grid step (no re-DMA)
    const_specs = [pl.BlockSpec(c.shape, lambda b: (0, 0)) for c in kparams + kconsts]

    return pl.pallas_call(
        encoder_layer_kernel,
        out_shape=jax.ShapeDtypeStruct((N, Lq, D_MODEL), jnp.float32),
        grid=(N,),
        in_specs=data_specs + const_specs,
        out_specs=pl.BlockSpec((None, Lq, D_MODEL), lambda b: (b, 0, 0)),
        compiler_params=pltpu.CompilerParams(dimension_semantics=("parallel",)),
    )(src, pos, ref_pad, *kparams, *kconsts)


# -------------------------- pure-JAX reference (for validation) -------------------------
def reference_forward(src, pos, refpts, p):
    def layernorm(x, g, b):
        mu = x.mean(-1, keepdims=True)
        var = ((x - mu) ** 2).mean(-1, keepdims=True)
        return (x - mu) / jnp.sqrt(var + LN_EPS) * g + b

    N, Lq, D = src.shape
    xn = layernorm(src, p['ln1_g'], p['ln1_b'])
    q = xn + pos

    so = (q @ p['w_so'].T + p['b_so']).reshape(N, Lq, N_HEADS, N_LEVELS, N_POINTS, 2)
    aw = q @ p['w_aw'].T + p['b_aw']
    aw = jax.nn.softmax(aw.reshape(N, Lq, N_HEADS, N_LEVELS * N_POINTS), axis=-1)
    aw = aw.reshape(N, Lq, N_HEADS, N_LEVELS, N_POINTS)
    val = (src @ p['w_v'].T + p['b_v']).reshape(N, LEN_IN, N_HEADS, HEAD_DIM)

    norm = jnp.array([[w, h] for (h, w) in SPATIAL_SHAPES], jnp.float32)     # (L, 2) = (W, H)
    loc = refpts[:, :, None, :, None, :] + so / norm[None, None, None, :, None, :]

    out = jnp.zeros((N, Lq, N_HEADS, HEAD_DIM), jnp.float32)
    for l, (Hl, Wl) in enumerate(SPATIAL_SHAPES):
        start = LEVEL_START[l]
        v_l = val[:, start:start + Hl * Wl]                                  # (N, S_l, H, hd)
        v_t = jnp.transpose(v_l, (0, 2, 1, 3))                               # (N, H, S_l, hd)
        ix = loc[:, :, :, l, :, 0] * Wl - 0.5                                # (N, Lq, H, P)
        iy = loc[:, :, :, l, :, 1] * Hl - 0.5
        x0 = jnp.floor(ix); y0 = jnp.floor(iy)
        lx = ix - x0; ly = iy - y0
        acc = jnp.zeros((N, Lq, N_HEADS, N_POINTS, HEAD_DIM), jnp.float32)
        for cx, cy, cw in ((x0, y0, (1 - lx) * (1 - ly)), (x0 + 1, y0, lx * (1 - ly)),
                           (x0, y0 + 1, (1 - lx) * ly), (x0 + 1, y0 + 1, lx * ly)):
            valid = (cx >= 0) & (cx <= Wl - 1) & (cy >= 0) & (cy <= Hl - 1)
            idx = (jnp.clip(cy, 0, Hl - 1).astype(jnp.int32) * Wl
                   + jnp.clip(cx, 0, Wl - 1).astype(jnp.int32))              # (N, Lq, H, P)
            idx_r = jnp.transpose(idx, (0, 2, 1, 3)).reshape(N, N_HEADS, Lq * N_POINTS)
            g = jnp.take_along_axis(v_t, idx_r[:, :, :, None], axis=2)       # (N, H, Lq*P, hd)
            g = g.reshape(N, N_HEADS, Lq, N_POINTS, HEAD_DIM).transpose(0, 2, 1, 3, 4)
            acc = acc + jnp.where(valid, cw, 0.0)[..., None] * g
        out = out + jnp.sum(aw[:, :, :, l, :, None] * acc, axis=3)

    attn = out.reshape(N, Lq, D) @ p['w_o'].T + p['b_o']
    src1 = src + attn
    xn2 = layernorm(src1, p['ln2_g'], p['ln2_b'])
    h = xn2 @ p['w_1'].T + p['b_1']
    h = 0.5 * h * (1.0 + jax.lax.erf(h * 0.7071067811865476))                # exact-erf GELU
    ffn = h @ p['w_2'].T + p['b_2']
    return src1 + ffn


# --------------------------------------- main -------------------------------------------
if __name__ == "__main__":
    key = jax.random.PRNGKey(0)
    k_src, k_pos, k_ref, k_par = jax.random.split(key, 4)

    src = jax.random.normal(k_src, (N_BATCH, LQ, D_MODEL), jnp.float32)
    pos = 0.1 * jax.random.normal(k_pos, (N_BATCH, LQ, D_MODEL), jnp.float32)
    reference_points = jax.random.uniform(k_ref, (N_BATCH, LQ, N_LEVELS, 2), jnp.float32,
                                          minval=0.05, maxval=0.95)
    params = init_params(k_par)
    constants = build_static_constants()

    out = msdeform_encoder_layer_pallas(src, pos, reference_points, params, constants)
    out = jax.block_until_ready(out)
    assert out.shape == (N_BATCH, LQ, D_MODEL)

    ref_out = jax.block_until_ready(reference_forward(src, pos, reference_points, params))
    max_err = float(jnp.max(jnp.abs(out - ref_out)))
    # tolerance covers tanh-GELU (vs exact erf) and approx-reciprocal softmax (~2^-12 rel)
    if not bool(jnp.allclose(out, ref_out, atol=3e-3, rtol=3e-3)):
        raise AssertionError(f"Pallas kernel mismatch vs JAX reference, max abs err = {max_err}")

    print("KERNEL_OK")
</pallas_src>

<mosaic_0001>
module attributes {stable_mosaic.version = 11 : i64} {
  func.func @encoder_layer_kernel(%arg0: i32, %arg1: memref<1x20x32xf32, #tpu.memory_space<vmem>>, %arg2: memref<1x20x32xf32, #tpu.memory_space<vmem>>, %arg3: memref<1x20x8xf32, #tpu.memory_space<vmem>>, %arg4: memref<1x32xf32, #tpu.memory_space<vmem>>, %arg5: memref<1x32xf32, #tpu.memory_space<vmem>>, %arg6: memref<32x384xf32, #tpu.memory_space<vmem>>, %arg7: memref<1x384xf32, #tpu.memory_space<vmem>>, %arg8: memref<32x32xf32, #tpu.memory_space<vmem>>, %arg9: memref<1x32xf32, #tpu.memory_space<vmem>>, %arg10: memref<32x32xf32, #tpu.memory_space<vmem>>, %arg11: memref<1x32xf32, #tpu.memory_space<vmem>>, %arg12: memref<1x32xf32, #tpu.memory_space<vmem>>, %arg13: memref<1x32xf32, #tpu.memory_space<vmem>>, %arg14: memref<32x64xf32, #tpu.memory_space<vmem>>, %arg15: memref<1x64xf32, #tpu.memory_space<vmem>>, %arg16: memref<64x32xf32, #tpu.memory_space<vmem>>, %arg17: memref<1x32xf32, #tpu.memory_space<vmem>>, %arg18: memref<128x128xf32, #tpu.memory_space<vmem>>, %arg19: memref<128x32xf32, #tpu.memory_space<vmem>>, %arg20: memref<3x128xf32, #tpu.memory_space<vmem>>, %arg21: memref<2x128xf32, #tpu.memory_space<vmem>>, %arg22: memref<8x256xf32, #tpu.memory_space<vmem>>, %arg23: memref<400x20xf32, #tpu.memory_space<vmem>>, %arg24: memref<400x20xf32, #tpu.memory_space<vmem>>, %arg25: memref<20x400xf32, #tpu.memory_space<vmem>>, %arg26: memref<400x1xf32, #tpu.memory_space<vmem>>, %arg27: memref<1x20x32xf32, #tpu.memory_space<vmem>>) attributes {dimension_semantics = [#tpu.dimension_semantics<parallel>], iteration_bounds = array<i64: 2>, scalar_prefetch = 0 : i64, scratch_operands = 0 : i64, tpu.core_type = #tpu.core_type<tc>, window_params = [{transform_indices = @transform_0, window_bounds = array<i64: 1, 20, 32>}, {transform_indices = @transform_1, window_bounds = array<i64: 1, 20, 32>}, {transform_indices = @transform_2, window_bounds = array<i64: 1, 20, 8>}, {pipeline_mode = #tpu.pipeline_mode<synchronous>, transform_indices = @transform_3, window_bounds = array<i64: 1, 32>}, {pipeline_mode = #tpu.pipeline_mode<synchronous>, transform_indices = @transform_4, window_bounds = array<i64: 1, 32>}, {pipeline_mode = #tpu.pipeline_mode<synchronous>, transform_indices = @transform_5, window_bounds = array<i64: 32, 384>}, {pipeline_mode = #tpu.pipeline_mode<synchronous>, transform_indices = @transform_6, window_bounds = array<i64: 1, 384>}, {pipeline_mode = #tpu.pipeline_mode<synchronous>, transform_indices = @transform_7, window_bounds = array<i64: 32, 32>}, {pipeline_mode = #tpu.pipeline_mode<synchronous>, transform_indices = @transform_8, window_bounds = array<i64: 1, 32>}, {pipeline_mode = #tpu.pipeline_mode<synchronous>, transform_indices = @transform_9, window_bounds = array<i64: 32, 32>}, {pipeline_mode = #tpu.pipeline_mode<synchronous>, transform_indices = @transform_10, window_bounds = array<i64: 1, 32>}, {pipeline_mode = #tpu.pipeline_mode<synchronous>, transform_indices = @transform_11, window_bounds = array<i64: 1, 32>}, {pipeline_mode = #tpu.pipeline_mode<synchronous>, transform_indices = @transform_12, window_bounds = array<i64: 1, 32>}, {pipeline_mode = #tpu.pipeline_mode<synchronous>, transform_indices = @transform_13, window_bounds = array<i64: 32, 64>}, {pipeline_mode = #tpu.pipeline_mode<synchronous>, transform_indices = @transform_14, window_bounds = array<i64: 1, 64>}, {pipeline_mode = #tpu.pipeline_mode<synchronous>, transform_indices = @transform_15, window_bounds = array<i64: 64, 32>}, {pipeline_mode = #tpu.pipeline_mode<synchronous>, transform_indices = @transform_16, window_bounds = array<i64: 1, 32>}, {pipeline_mode = #tpu.pipeline_mode<synchronous>, transform_indices = @transform_17, window_bounds = array<i64: 128, 128>}, {pipeline_mode = #tpu.pipeline_mode<synchronous>, transform_indices = @transform_18, window_bounds = array<i64: 128, 32>}, {pipeline_mode = #tpu.pipeline_mode<synchronous>, transform_indices = @transform_19, window_bounds = array<i64: 3, 128>}, {pipeline_mode = #tpu.pipeline_mode<synchronous>, transform_indices = @transform_20, window_bounds = array<i64: 2, 128>}, {pipeline_mode = #tpu.pipeline_mode<synchronous>, transform_indices = @transform_21, window_bounds = array<i64: 8, 256>}, {pipeline_mode = #tpu.pipeline_mode<synchronous>, transform_indices = @transform_22, window_bounds = array<i64: 400, 20>}, {pipeline_mode = #tpu.pipeline_mode<synchronous>, transform_indices = @transform_23, window_bounds = array<i64: 400, 20>}, {pipeline_mode = #tpu.pipeline_mode<synchronous>, transform_indices = @transform_24, window_bounds = array<i64: 20, 400>}, {pipeline_mode = #tpu.pipeline_mode<synchronous>, transform_indices = @transform_25, window_bounds = array<i64: 400, 1>}, {transform_indices = @transform_26, window_bounds = array<i64: 1, 20, 32>}]} {
    %c0 = arith.constant 0 : index
    %c0_0 = arith.constant 0 : index
    %c0_1 = arith.constant 0 : index
    %0 = vector.load %arg1[%c0, %c0_0, %c0_1] : memref<1x20x32xf32, #tpu.memory_space<vmem>>, vector<1x20x32xf32>
    %1 = vector.shape_cast %0 : vector<1x20x32xf32> to vector<20x32xf32>
    %c0_2 = arith.constant 0 : index
    %c0_3 = arith.constant 0 : index
    %c0_4 = arith.constant 0 : index
    %2 = vector.load %arg2[%c0_2, %c0_3, %c0_4] : memref<1x20x32xf32, #tpu.memory_space<vmem>>, vector<1x20x32xf32>
    %3 = vector.shape_cast %2 : vector<1x20x32xf32> to vector<20x32xf32>
    %c0_5 = arith.constant 0 : index
    %c0_6 = arith.constant 0 : index
    %c0_7 = arith.constant 0 : index
    %4 = vector.load %arg3[%c0_5, %c0_6, %c0_7] : memref<1x20x8xf32, #tpu.memory_space<vmem>>, vector<1x20x8xf32>
    %5 = vector.shape_cast %4 : vector<1x20x8xf32> to vector<20x8xf32>
    %c0_8 = arith.constant 0 : index
    %c0_9 = arith.constant 0 : index
    %6 = vector.load %arg4[%c0_8, %c0_9] : memref<1x32xf32, #tpu.memory_space<vmem>>, vector<1x32xf32>
    %c0_10 = arith.constant 0 : index
    %c0_11 = arith.constant 0 : index
    %7 = vector.load %arg5[%c0_10, %c0_11] : memref<1x32xf32, #tpu.memory_space<vmem>>, vector<1x32xf32>
    %cst = arith.constant dense<0.000000e+00> : vector<20xf32>
    %8 = vector.multi_reduction <add>, %1, %cst [1] : vector<20x32xf32> to vector<20xf32>
    %9 = vector.shape_cast %8 : vector<20xf32> to vector<20x1xf32>
    %cst_12 = arith.constant 3.200000e+01 : f32
    %10 = vector.broadcast %cst_12 : f32 to vector<20x1xf32>
    %11 = arith.divf %9, %10 : vector<20x1xf32>
    %12 = vector.broadcast %11 : vector<20x1xf32> to vector<20x32xf32>
    %13 = arith.subf %1, %12 : vector<20x32xf32>
    %14 = arith.mulf %13, %13 : vector<20x32xf32>
    %cst_13 = arith.constant dense<0.000000e+00> : vector<20xf32>
    %15 = vector.multi_reduction <add>, %14, %cst_13 [1] : vector<20x32xf32> to vector<20xf32>
    %16 = vector.shape_cast %15 : vector<20xf32> to vector<20x1xf32>
    %cst_14 = arith.constant 3.200000e+01 : f32
    %17 = vector.broadcast %cst_14 : f32 to vector<20x1xf32>
    %18 = arith.divf %16, %17 : vector<20x1xf32>
    %cst_15 = arith.constant 9.99999974E-6 : f32
    %19 = vector.broadcast %cst_15 : f32 to vector<20x1xf32>
    %20 = arith.addf %18, %19 : vector<20x1xf32>
    %21 = math.rsqrt %20 : vector<20x1xf32>
    %22 = vector.broadcast %21 : vector<20x1xf32> to vector<20x32xf32>
    %23 = arith.mulf %13, %22 : vector<20x32xf32>
    %24 = vector.broadcast %6 : vector<1x32xf32> to vector<20x32xf32>
    %25 = arith.mulf %23, %24 : vector<20x32xf32>
    %26 = vector.broadcast %7 : vector<1x32xf32> to vector<20x32xf32>
    %27 = arith.addf %25, %26 : vector<20x32xf32>
    %28 = arith.addf %27, %3 : vector<20x32xf32>
    %c0_16 = arith.constant 0 : index
    %c0_17 = arith.constant 0 : index
    %29 = vector.load %arg6[%c0_16, %c0_17] : memref<32x384xf32, #tpu.memory_space<vmem>>, vector<32x384xf32>
    %cst_18 = arith.constant dense<0.000000e+00> : vector<20x384xf32>
    %30 = tpu.matmul %28, %29, %cst_18 {dimension_numbers = #tpu.dot_dimension_numbers<[1], [0], [0], [1], [0, 0, 1, 1], [], []>, precision = #tpu.contract_precision<fp32>} : vector<20x32xf32>, vector<32x384xf32>, vector<20x384xf32> -> vector<20x384xf32>
    %c0_19 = arith.constant 0 : index
    %c0_20 = arith.constant 0 : index
    %31 = vector.load %arg7[%c0_19, %c0_20] : memref<1x384xf32, #tpu.memory_space<vmem>>, vector<1x384xf32>
    %32 = vector.broadcast %31 : vector<1x384xf32> to vector<20x384xf32>
    %33 = arith.addf %30, %32 : vector<20x384xf32>
    %34 = vector.extract_strided_slice %33 {offsets = [0, 0], sizes = [20, 128], strides = [1, 1]} : vector<20x384xf32> to vector<20x128xf32>
    %35 = vector.extract_strided_slice %33 {offsets = [0, 128], sizes = [20, 128], strides = [1, 1]} : vector<20x384xf32> to vector<20x128xf32>
    %36 = vector.extract_strided_slice %33 {offsets = [0, 256], sizes = [20, 128], strides = [1, 1]} : vector<20x384xf32> to vector<20x128xf32>
    %c0_21 = arith.constant 0 : index
    %c0_22 = arith.constant 0 : index
    %37 = vector.load %arg8[%c0_21, %c0_22] : memref<32x32xf32, #tpu.memory_space<vmem>>, vector<32x32xf32>
    %cst_23 = arith.constant dense<0.000000e+00> : vector<20x32xf32>
    %38 = tpu.matmul %1, %37, %cst_23 {dimension_numbers = #tpu.dot_dimension_numbers<[1], [0], [0], [1], [0, 0, 1, 1], [], []>, precision = #tpu.contract_precision<fp32>} : vector<20x32xf32>, vector<32x32xf32>, vector<20x32xf32> -> vector<20x32xf32>
    %c0_24 = arith.constant 0 : index
    %c0_25 = arith.constant 0 : index
    %39 = vector.load %arg9[%c0_24, %c0_25] : memref<1x32xf32, #tpu.memory_space<vmem>>, vector<1x32xf32>
    %40 = vector.broadcast %39 : vector<1x32xf32> to vector<20x32xf32>
    %41 = arith.addf %38, %40 : vector<20x32xf32>
    %cst_26 = arith.constant dense<0xFF800000> : vector<20xf32>
    %42 = vector.multi_reduction <maximumf>, %36, %cst_26 [1] : vector<20x128xf32> to vector<20xf32>
    %43 = vector.shape_cast %42 : vector<20xf32> to vector<20x1xf32>
    %44 = vector.broadcast %43 : vector<20x1xf32> to vector<20x128xf32>
    %45 = arith.subf %36, %44 : vector<20x128xf32>
    %46 = math.exp %45 : vector<20x128xf32>
    %c0_27 = arith.constant 0 : index
    %c0_28 = arith.constant 0 : index
    %47 = vector.load %arg18[%c0_27, %c0_28] : memref<128x128xf32, #tpu.memory_space<vmem>>, vector<128x128xf32>
    %cst_29 = arith.constant dense<0.000000e+00> : vector<20x128xf32>
    %48 = tpu.matmul %46, %47, %cst_29 {dimension_numbers = #tpu.dot_dimension_numbers<[1], [0], [0], [1], [0, 0, 1, 1], [], []>, precision = #tpu.contract_precision<fp32>} : vector<20x128xf32>, vector<128x128xf32>, vector<20x128xf32> -> vector<20x128xf32>
    %cst_30 = arith.constant 9.99999968E-21 : f32
    %49 = vector.broadcast %cst_30 : f32 to vector<20x128xf32>
    %50 = arith.maximumf %48, %49 : vector<20x128xf32>
    %51 = tpu.reciprocal %50 {approx = true} : vector<20x128xf32> -> vector<20x128xf32>
    %52 = arith.mulf %46, %51 : vector<20x128xf32>
    %c0_31 = arith.constant 0 : index
    %c0_32 = arith.constant 0 : index
    %53 = vector.load %arg20[%c0_31, %c0_32] : memref<3x128xf32, #tpu.memory_space<vmem>>, vector<3x128xf32>
    %c0_33 = arith.constant 0 : index
    %c0_34 = arith.constant 0 : index
    %54 = vector.load %arg21[%c0_33, %c0_34] : memref<2x128xf32, #tpu.memory_space<vmem>>, vector<2x128xf32>
    %55 = vector.extract_strided_slice %53 {offsets = [0, 0], sizes = [1, 128], strides = [1, 1]} : vector<3x128xf32> to vector<1x128xf32>
    %56 = vector.extract_strided_slice %53 {offsets = [1, 0], sizes = [1, 128], strides = [1, 1]} : vector<3x128xf32> to vector<1x128xf32>
    %57 = vector.extract_strided_slice %53 {offsets = [2, 0], sizes = [1, 128], strides = [1, 1]} : vector<3x128xf32> to vector<1x128xf32>
    %58 = vector.extract_strided_slice %54 {offsets = [0, 0], sizes = [1, 128], strides = [1, 1]} : vector<2x128xf32> to vector<1x128xf32>
    %59 = vector.extract_strided_slice %54 {offsets = [1, 0], sizes = [1, 128], strides = [1, 1]} : vector<2x128xf32> to vector<1x128xf32>
    %c0_35 = arith.constant 0 : index
    %c0_36 = arith.constant 0 : index
    %60 = vector.load %arg22[%c0_35, %c0_36] : memref<8x256xf32, #tpu.memory_space<vmem>>, vector<8x256xf32>
    %cst_37 = arith.constant dense<0.000000e+00> : vector<20x256xf32>
    %61 = tpu.matmul %5, %60, %cst_37 {dimension_numbers = #tpu.dot_dimension_numbers<[1], [0], [0], [1], [0, 0, 1, 1], [], []>, precision = #tpu.contract_precision<fp32>} : vector<20x8xf32>, vector<8x256xf32>, vector<20x256xf32> -> vector<20x256xf32>
    %62 = vector.extract_strided_slice %61 {offsets = [0, 0], sizes = [20, 128], strides = [1, 1]} : vector<20x256xf32> to vector<20x128xf32>
    %63 = vector.extract_strided_slice %61 {offsets = [0, 128], sizes = [20, 128], strides = [1, 1]} : vector<20x256xf32> to vector<20x128xf32>
    %64 = vector.broadcast %55 : vector<1x128xf32> to vector<20x128xf32>
    %65 = arith.mulf %62, %64 : vector<20x128xf32>
    %66 = arith.addf %65, %34 : vector<20x128xf32>
    %cst_38 = arith.constant 5.000000e-01 : f32
    %67 = vector.broadcast %cst_38 : f32 to vector<20x128xf32>
    %68 = arith.subf %66, %67 : vector<20x128xf32>
    %69 = vector.broadcast %56 : vector<1x128xf32> to vector<20x128xf32>
    %70 = arith.mulf %63, %69 : vector<20x128xf32>
    %71 = arith.addf %70, %35 : vector<20x128xf32>
    %cst_39 = arith.constant 5.000000e-01 : f32
    %72 = vector.broadcast %cst_39 : f32 to vector<20x128xf32>
    %73 = arith.subf %71, %72 : vector<20x128xf32>
    %74 = math.floor %68 : vector<20x128xf32>
    %75 = math.floor %73 : vector<20x128xf32>
    %76 = arith.subf %68, %74 : vector<20x128xf32>
    %77 = arith.subf %73, %75 : vector<20x128xf32>
    %78 = vector.broadcast %58 : vector<1x128xf32> to vector<20x128xf32>
    %79 = arith.addf %74, %78 : vector<20x128xf32>
    %80 = vector.broadcast %59 : vector<1x128xf32> to vector<20x128xf32>
    %81 = arith.addf %75, %80 : vector<20x128xf32>
    %cst_40 = arith.constant 5.000000e-01 : f32
    %82 = vector.broadcast %cst_40 : f32 to vector<1x128xf32>
    %83 = arith.cmpf ogt, %58, %82 : vector<1x128xf32>
    %cst_41 = arith.constant 1.000000e+00 : f32
    %84 = vector.broadcast %cst_41 : f32 to vector<20x128xf32>
    %85 = arith.subf %84, %76 : vector<20x128xf32>
    %86 = vector.shape_cast %83 : vector<1x128xi1> to vector<1x128xi1>
    %87 = vector.broadcast %86 : vector<1x128xi1> to vector<20x128xi1>
    %88 = arith.select %87, %76, %85 : vector<20x128xi1>, vector<20x128xf32>
    %cst_42 = arith.constant 5.000000e-01 : f32
    %89 = vector.broadcast %cst_42 : f32 to vector<1x128xf32>
    %90 = arith.cmpf ogt, %59, %89 : vector<1x128xf32>
    %cst_43 = arith.constant 1.000000e+00 : f32
    %91 = vector.broadcast %cst_43 : f32 to vector<20x128xf32>
    %92 = arith.subf %91, %77 : vector<20x128xf32>
    %93 = vector.shape_cast %90 : vector<1x128xi1> to vector<1x128xi1>
    %94 = vector.broadcast %93 : vector<1x128xi1> to vector<20x128xi1>
    %95 = arith.select %94, %77, %92 : vector<20x128xi1>, vector<20x128xf32>
    %cst_44 = arith.constant 0.000000e+00 : f32
    %96 = vector.broadcast %cst_44 : f32 to vector<20x128xf32>
    %97 = arith.cmpf oge, %79, %96 : vector<20x128xf32>
    %cst_45 = arith.constant 1.000000e+00 : f32
    %98 = vector.broadcast %cst_45 : f32 to vector<1x128xf32>
    %99 = arith.subf %55, %98 : vector<1x128xf32>
    %100 = vector.broadcast %99 : vector<1x128xf32> to vector<20x128xf32>
    %101 = arith.cmpf ole, %79, %100 : vector<20x128xf32>
    %102 = arith.andi %97, %101 : vector<20x128xi1>
    %cst_46 = arith.constant 0.000000e+00 : f32
    %103 = vector.broadcast %cst_46 : f32 to vector<20x128xf32>
    %104 = arith.cmpf oge, %81, %103 : vector<20x128xf32>
    %105 = arith.andi %102, %104 : vector<20x128xi1>
    %cst_47 = arith.constant 1.000000e+00 : f32
    %106 = vector.broadcast %cst_47 : f32 to vector<1x128xf32>
    %107 = arith.subf %56, %106 : vector<1x128xf32>
    %108 = vector.broadcast %107 : vector<1x128xf32> to vector<20x128xf32>
    %109 = arith.cmpf ole, %81, %108 : vector<20x128xf32>
    %110 = arith.andi %105, %109 : vector<20x128xi1>
    %111 = arith.mulf %88, %95 : vector<20x128xf32>
    %112 = arith.mulf %52, %111 : vector<20x128xf32>
    %cst_48 = arith.constant 0.000000e+00 : f32
    %113 = vector.broadcast %cst_48 : f32 to vector<20x128xf32>
    %114 = arith.select %110, %112, %113 : vector<20x128xi1>, vector<20x128xf32>
    %115 = vector.broadcast %55 : vector<1x128xf32> to vector<20x128xf32>
    %116 = arith.mulf %81, %115 : vector<20x128xf32>
    %117 = vector.broadcast %57 : vector<1x128xf32> to vector<20x128xf32>
    %118 = arith.addf %117, %116 : vector<20x128xf32>
    %119 = arith.addf %118, %79 : vector<20x128xf32>
    %c0_49 = arith.constant 0 : index
    %c0_50 = arith.constant 0 : index
    %120 = vector.load %arg23[%c0_49, %c0_50] : memref<400x20xf32, #tpu.memory_space<vmem>>, vector<400x20xf32>
    %cst_51 = arith.constant dense<0.000000e+00> : vector<400x128xf32>
    %121 = tpu.matmul %120, %119, %cst_51 {dimension_numbers = #tpu.dot_dimension_numbers<[1], [0], [0], [1], [0, 0, 1, 1], [], []>, precision = #tpu.contract_precision<fp32>} : vector<400x20xf32>, vector<20x128xf32>, vector<400x128xf32> -> vector<400x128xf32>
    %c0_52 = arith.constant 0 : index
    %c0_53 = arith.constant 0 : index
    %122 = vector.load %arg23[%c0_52, %c0_53] : memref<400x20xf32, #tpu.memory_space<vmem>>, vector<400x20xf32>
    %cst_54 = arith.constant dense<0.000000e+00> : vector<400x128xf32>
    %123 = tpu.matmul %122, %114, %cst_54 {dimension_numbers = #tpu.dot_dimension_numbers<[1], [0], [0], [1], [0, 0, 1, 1], [], []>, precision = #tpu.contract_precision<fp32>} : vector<400x20xf32>, vector<20x128xf32>, vector<400x128xf32> -> vector<400x128xf32>
    %c0_55 = arith.constant 0 : index
    %c0_56 = arith.constant 0 : index
    %124 = vector.load %arg26[%c0_55, %c0_56] : memref<400x1xf32, #tpu.memory_space<vmem>>, vector<400x1xf32>
    %125 = vector.broadcast %124 : vector<400x1xf32> to vector<400x128xf32>
    %126 = arith.cmpf oeq, %121, %125 : vector<400x128xf32>
    %cst_57 = arith.constant 0.000000e+00 : f32
    %127 = vector.broadcast %cst_57 : f32 to vector<400x128xf32>
    %128 = arith.select %126, %123, %127 : vector<400x128xi1>, vector<400x128xf32>
    %c0_58 = arith.constant 0 : index
    %c0_59 = arith.constant 0 : index
    %129 = vector.load %arg19[%c0_58, %c0_59] : memref<128x32xf32, #tpu.memory_space<vmem>>, vector<128x32xf32>
    %cst_60 = arith.constant dense<0.000000e+00> : vector<400x32xf32>
    %130 = tpu.matmul %128, %129, %cst_60 {dimension_numbers = #tpu.dot_dimension_numbers<[1], [0], [0], [1], [0, 0, 1, 1], [], []>, precision = #tpu.contract_precision<fp32>} : vector<400x128xf32>, vector<128x32xf32>, vector<400x32xf32> -> vector<400x32xf32>
    %c0_61 = arith.constant 0 : index
    %c0_62 = arith.constant 0 : index
    %131 = vector.load %arg24[%c0_61, %c0_62] : memref<400x20xf32, #tpu.memory_space<vmem>>, vector<400x20xf32>
    %cst_63 = arith.constant dense<0.000000e+00> : vector<400x32xf32>
    %132 = tpu.matmul %131, %41, %cst_63 {dimension_numbers = #tpu.dot_dimension_numbers<[1], [0], [0], [1], [0, 0, 1, 1], [], []>, precision = #tpu.contract_precision<fp32>} : vector<400x20xf32>, vector<20x32xf32>, vector<400x32xf32> -> vector<400x32xf32>
    %c0_64 = arith.constant 0 : index
    %c0_65 = arith.constant 0 : index
    %133 = vector.load %arg25[%c0_64, %c0_65] : memref<20x400xf32, #tpu.memory_space<vmem>>, vector<20x400xf32>
    %134 = arith.mulf %130, %132 : vector<400x32xf32>
    %cst_66 = arith.constant dense<0.000000e+00> : vector<20x32xf32>
    %135 = tpu.matmul %133, %134, %cst_66 {dimension_numbers = #tpu.dot_dimension_numbers<[1], [0], [0], [1], [0, 0, 1, 1], [], []>, precision = #tpu.contract_precision<fp32>} : vector<20x400xf32>, vector<400x32xf32>, vector<20x32xf32> -> vector<20x32xf32>
    %c0_67 = arith.constant 0 : index
    %c0_68 = arith.constant 0 : index
    %136 = vector.load %arg10[%c0_67, %c0_68] : memref<32x32xf32, #tpu.memory_space<vmem>>, vector<32x32xf32>
    %cst_69 = arith.constant dense<0.000000e+00> : vector<20x32xf32>
    %137 = tpu.matmul %135, %136, %cst_69 {dimension_numbers = #tpu.dot_dimension_numbers<[1], [0], [0], [1], [0, 0, 1, 1], [], []>, precision = #tpu.contract_precision<fp32>} : vector<20x32xf32>, vector<32x32xf32>, vector<20x32xf32> -> vector<20x32xf32>
    %c0_70 = arith.constant 0 : index
    %c0_71 = arith.constant 0 : index
    %138 = vector.load %arg11[%c0_70, %c0_71] : memref<1x32xf32, #tpu.memory_space<vmem>>, vector<1x32xf32>
    %139 = vector.broadcast %138 : vector<1x32xf32> to vector<20x32xf32>
    %140 = arith.addf %137, %139 : vector<20x32xf32>
    %141 = arith.addf %1, %140 : vector<20x32xf32>
    %c0_72 = arith.constant 0 : index
    %c0_73 = arith.constant 0 : index
    %142 = vector.load %arg12[%c0_72, %c0_73] : memref<1x32xf32, #tpu.memory_space<vmem>>, vector<1x32xf32>
    %c0_74 = arith.constant 0 : index
    %c0_75 = arith.constant 0 : index
    %143 = vector.load %arg13[%c0_74, %c0_75] : memref<1x32xf32, #tpu.memory_space<vmem>>, vector<1x32xf32>
    %cst_76 = arith.constant dense<0.000000e+00> : vector<20xf32>
    %144 = vector.multi_reduction <add>, %141, %cst_76 [1] : vector<20x32xf32> to vector<20xf32>
    %145 = vector.shape_cast %144 : vector<20xf32> to vector<20x1xf32>
    %cst_77 = arith.constant 3.200000e+01 : f32
    %146 = vector.broadcast %cst_77 : f32 to vector<20x1xf32>
    %147 = arith.divf %145, %146 : vector<20x1xf32>
    %148 = vector.broadcast %147 : vector<20x1xf32> to vector<20x32xf32>
    %149 = arith.subf %141, %148 : vector<20x32xf32>
    %150 = arith.mulf %149, %149 : vector<20x32xf32>
    %cst_78 = arith.constant dense<0.000000e+00> : vector<20xf32>
    %151 = vector.multi_reduction <add>, %150, %cst_78 [1] : vector<20x32xf32> to vector<20xf32>
    %152 = vector.shape_cast %151 : vector<20xf32> to vector<20x1xf32>
    %cst_79 = arith.constant 3.200000e+01 : f32
    %153 = vector.broadcast %cst_79 : f32 to vector<20x1xf32>
    %154 = arith.divf %152, %153 : vector<20x1xf32>
    %cst_80 = arith.constant 9.99999974E-6 : f32
    %155 = vector.broadcast %cst_80 : f32 to vector<20x1xf32>
    %156 = arith.addf %154, %155 : vector<20x1xf32>
    %157 = math.rsqrt %156 : vector<20x1xf32>
    %158 = vector.broadcast %157 : vector<20x1xf32> to vector<20x32xf32>
    %159 = arith.mulf %149, %158 : vector<20x32xf32>
    %160 = vector.broadcast %142 : vector<1x32xf32> to vector<20x32xf32>
    %161 = arith.mulf %159, %160 : vector<20x32xf32>
    %162 = vector.broadcast %143 : vector<1x32xf32> to vector<20x32xf32>
    %163 = arith.addf %161, %162 : vector<20x32xf32>
    %c0_81 = arith.constant 0 : index
    %c0_82 = arith.constant 0 : index
    %164 = vector.load %arg14[%c0_81, %c0_82] : memref<32x64xf32, #tpu.memory_space<vmem>>, vector<32x64xf32>
    %cst_83 = arith.constant dense<0.000000e+00> : vector<20x64xf32>
    %165 = tpu.matmul %163, %164, %cst_83 {dimension_numbers = #tpu.dot_dimension_numbers<[1], [0], [0], [1], [0, 0, 1, 1], [], []>, precision = #tpu.contract_precision<fp32>} : vector<20x32xf32>, vector<32x64xf32>, vector<20x64xf32> -> vector<20x64xf32>
    %c0_84 = arith.constant 0 : index
    %c0_85 = arith.constant 0 : index
    %166 = vector.load %arg15[%c0_84, %c0_85] : memref<1x64xf32, #tpu.memory_space<vmem>>, vector<1x64xf32>
    %167 = vector.broadcast %166 : vector<1x64xf32> to vector<20x64xf32>
    %168 = arith.addf %165, %167 : vector<20x64xf32>
    %cst_86 = arith.constant 5.000000e-01 : f32
    %169 = vector.broadcast %cst_86 : f32 to vector<20x64xf32>
    %170 = arith.mulf %169, %168 : vector<20x64xf32>
    %cst_87 = arith.constant 4.471500e-02 : f32
    %171 = vector.broadcast %cst_87 : f32 to vector<20x64xf32>
    %172 = arith.mulf %171, %168 : vector<20x64xf32>
    %173 = arith.mulf %172, %168 : vector<20x64xf32>
    %174 = arith.mulf %173, %168 : vector<20x64xf32>
    %175 = arith.addf %168, %174 : vector<20x64xf32>
    %cst_88 = arith.constant 0.797884583 : f32
    %176 = vector.broadcast %cst_88 : f32 to vector<20x64xf32>
    %177 = arith.mulf %176, %175 : vector<20x64xf32>
    %178 = math.tanh %177 : vector<20x64xf32>
    %cst_89 = arith.constant 1.000000e+00 : f32
    %179 = vector.broadcast %cst_89 : f32 to vector<20x64xf32>
    %180 = arith.addf %179, %178 : vector<20x64xf32>
    %181 = arith.mulf %170, %180 : vector<20x64xf32>
    %c0_90 = arith.constant 0 : index
    %c0_91 = arith.constant 0 : index
    %182 = vector.load %arg16[%c0_90, %c0_91] : memref<64x32xf32, #tpu.memory_space<vmem>>, vector<64x32xf32>
    %cst_92 = arith.constant dense<0.000000e+00> : vector<20x32xf32>
    %183 = tpu.matmul %181, %182, %cst_92 {dimension_numbers = #tpu.dot_dimension_numbers<[1], [0], [0], [1], [0, 0, 1, 1], [], []>, precision = #tpu.contract_precision<fp32>} : vector<20x64xf32>, vector<64x32xf32>, vector<20x32xf32> -> vector<20x32xf32>
    %c0_93 = arith.constant 0 : index
    %c0_94 = arith.constant 0 : index
    %184 = vector.load %arg17[%c0_93, %c0_94] : memref<1x32xf32, #tpu.memory_space<vmem>>, vector<1x32xf32>
    %185 = vector.broadcast %184 : vector<1x32xf32> to vector<20x32xf32>
    %186 = arith.addf %183, %185 : vector<20x32xf32>
    %187 = arith.addf %141, %186 : vector<20x32xf32>
    %c0_95 = arith.constant 0 : index
    %c0_96 = arith.constant 0 : index
    %c0_97 = arith.constant 0 : index
    %188 = vector.load %arg27[%c0_95, %c0_96, %c0_97] : memref<1x20x32xf32, #tpu.memory_space<vmem>>, vector<1x20x32xf32>
    %189 = vector.shape_cast %188 : vector<1x20x32xf32> to vector<20x32xf32>
    %190 = vector.shape_cast %187 : vector<20x32xf32> to vector<1x20x32xf32>
    tpu.vector_store %arg27[%c0_95, %c0_96, %c0_97], %190 {strides = array<i32>} : memref<1x20x32xf32, #tpu.memory_space<vmem>>, vector<1x20x32xf32>,
    return
  }
  func.func @transform_0(%arg0: i32) -> (i32, i32, i32) {
    %c0_i32 = arith.constant 0 : i32
    %c0_i32_0 = arith.constant 0 : i32
    %c0_i32_1 = arith.constant 0 : i32
    return %arg0, %c0_i32, %c0_i32_0 : i32, i32, i32
  }
  func.func @transform_1(%arg0: i32) -> (i32, i32, i32) {
    %c0_i32 = arith.constant 0 : i32
    %c0_i32_0 = arith.constant 0 : i32
    %c0_i32_1 = arith.constant 0 : i32
    return %arg0, %c0_i32, %c0_i32_0 : i32, i32, i32
  }
  func.func @transform_2(%arg0: i32) -> (i32, i32, i32) {
    %c0_i32 = arith.constant 0 : i32
    %c0_i32_0 = arith.constant 0 : i32
    %c0_i32_1 = arith.constant 0 : i32
    return %arg0, %c0_i32, %c0_i32_0 : i32, i32, i32
  }
  func.func @transform_3(%arg0: i32) -> (i32, i32) {
    %c0_i32 = arith.constant 0 : i32
    %c0_i32_0 = arith.constant 0 : i32
    %c0_i32_1 = arith.constant 0 : i32
    return %c0_i32, %c0_i32_0 : i32, i32
  }
  func.func @transform_4(%arg0: i32) -> (i32, i32) {
    %c0_i32 = arith.constant 0 : i32
    %c0_i32_0 = arith.constant 0 : i32
    %c0_i32_1 = arith.constant 0 : i32
    return %c0_i32, %c0_i32_0 : i32, i32
  }
  func.func @transform_5(%arg0: i32) -> (i32, i32) {
    %c0_i32 = arith.constant 0 : i32
    %c0_i32_0 = arith.constant 0 : i32
    %c0_i32_1 = arith.constant 0 : i32
    return %c0_i32, %c0_i32_0 : i32, i32
  }
  func.func @transform_6(%arg0: i32) -> (i32, i32) {
    %c0_i32 = arith.constant 0 : i32
    %c0_i32_0 = arith.constant 0 : i32
    %c0_i32_1 = arith.constant 0 : i32
    return %c0_i32, %c0_i32_0 : i32, i32
  }
  func.func @transform_7(%arg0: i32) -> (i32, i32) {
    %c0_i32 = arith.constant 0 : i32
    %c0_i32_0 = arith.constant 0 : i32
    %c0_i32_1 = arith.constant 0 : i32
    return %c0_i32, %c0_i32_0 : i32, i32
  }
  func.func @transform_8(%arg0: i32) -> (i32, i32) {
    %c0_i32 = arith.constant 0 : i32
    %c0_i32_0 = arith.constant 0 : i32
    %c0_i32_1 = arith.constant 0 : i32
    return %c0_i32, %c0_i32_0 : i32, i32
  }
  func.func @transform_9(%arg0: i32) -> (i32, i32) {
    %c0_i32 = arith.constant 0 : i32
    %c0_i32_0 = arith.constant 0 : i32
    %c0_i32_1 = arith.constant 0 : i32
    return %c0_i32, %c0_i32_0 : i32, i32
  }
  func.func @transform_10(%arg0: i32) -> (i32, i32) {
    %c0_i32 = arith.constant 0 : i32
    %c0_i32_0 = arith.constant 0 : i32
    %c0_i32_1 = arith.constant 0 : i32
    return %c0_i32, %c0_i32_0 : i32, i32
  }
  func.func @transform_11(%arg0: i32) -> (i32, i32) {
    %c0_i32 = arith.constant 0 : i32
    %c0_i32_0 = arith.constant 0 : i32
    %c0_i32_1 = arith.constant 0 : i32
    return %c0_i32, %c0_i32_0 : i32, i32
  }
  func.func @transform_12(%arg0: i32) -> (i32, i32) {
    %c0_i32 = arith.constant 0 : i32
    %c0_i32_0 = arith.constant 0 : i32
    %c0_i32_1 = arith.constant 0 : i32
    return %c0_i32, %c0_i32_0 : i32, i32
  }
  func.func @transform_13(%arg0: i32) -> (i32, i32) {
    %c0_i32 = arith.constant 0 : i32
    %c0_i32_0 = arith.constant 0 : i32
    %c0_i32_1 = arith.constant 0 : i32
    return %c0_i32, %c0_i32_0 : i32, i32
  }
  func.func @transform_14(%arg0: i32) -> (i32, i32) {
    %c0_i32 = arith.constant 0 : i32
    %c0_i32_0 = arith.constant 0 : i32
    %c0_i32_1 = arith.constant 0 : i32
    return %c0_i32, %c0_i32_0 : i32, i32
  }
  func.func @transform_15(%arg0: i32) -> (i32, i32) {
    %c0_i32 = arith.constant 0 : i32
    %c0_i32_0 = arith.constant 0 : i32
    %c0_i32_1 = arith.constant 0 : i32
    return %c0_i32, %c0_i32_0 : i32, i32
  }
  func.func @transform_16(%arg0: i32) -> (i32, i32) {
    %c0_i32 = arith.constant 0 : i32
    %c0_i32_0 = arith.constant 0 : i32
    %c0_i32_1 = arith.constant 0 : i32
    return %c0_i32, %c0_i32_0 : i32, i32
  }
  func.func @transform_17(%arg0: i32) -> (i32, i32) {
    %c0_i32 = arith.constant 0 : i32
    %c0_i32_0 = arith.constant 0 : i32
    %c0_i32_1 = arith.constant 0 : i32
    return %c0_i32, %c0_i32_0 : i32, i32
  }
  func.func @transform_18(%arg0: i32) -> (i32, i32) {
    %c0_i32 = arith.constant 0 : i32
    %c0_i32_0 = arith.constant 0 : i32
    %c0_i32_1 = arith.constant 0 : i32
    return %c0_i32, %c0_i32_0 : i32, i32
  }
  func.func @transform_19(%arg0: i32) -> (i32, i32) {
    %c0_i32 = arith.constant 0 : i32
    %c0_i32_0 = arith.constant 0 : i32
    %c0_i32_1 = arith.constant 0 : i32
    return %c0_i32, %c0_i32_0 : i32, i32
  }
  func.func @transform_20(%arg0: i32) -> (i32, i32) {
    %c0_i32 = arith.constant 0 : i32
    %c0_i32_0 = arith.constant 0 : i32
    %c0_i32_1 = arith.constant 0 : i32
    return %c0_i32, %c0_i32_0 : i32, i32
  }
  func.func @transform_21(%arg0: i32) -> (i32, i32) {
    %c0_i32 = arith.constant 0 : i32
    %c0_i32_0 = arith.constant 0 : i32
    %c0_i32_1 = arith.constant 0 : i32
    return %c0_i32, %c0_i32_0 : i32, i32
  }
  func.func @transform_22(%arg0: i32) -> (i32, i32) {
    %c0_i32 = arith.constant 0 : i32
    %c0_i32_0 = arith.constant 0 : i32
    %c0_i32_1 = arith.constant 0 : i32
    return %c0_i32, %c0_i32_0 : i32, i32
  }
  func.func @transform_23(%arg0: i32) -> (i32, i32) {
    %c0_i32 = arith.constant 0 : i32
    %c0_i32_0 = arith.constant 0 : i32
    %c0_i32_1 = arith.constant 0 : i32
    return %c0_i32, %c0_i32_0 : i32, i32
  }
  func.func @transform_24(%arg0: i32) -> (i32, i32) {
    %c0_i32 = arith.constant 0 : i32
    %c0_i32_0 = arith.constant 0 : i32
    %c0_i32_1 = arith.constant 0 : i32
    return %c0_i32, %c0_i32_0 : i32, i32
  }
  func.func @transform_25(%arg0: i32) -> (i32, i32) {
    %c0_i32 = arith.constant 0 : i32
    %c0_i32_0 = arith.constant 0 : i32
    %c0_i32_1 = arith.constant 0 : i32
    return %c0_i32, %c0_i32_0 : i32, i32
  }
  func.func @transform_26(%arg0: i32) -> (i32, i32, i32) {
    %c0_i32 = arith.constant 0 : i32
    %c0_i32_0 = arith.constant 0 : i32
    %c0_i32_1 = arith.constant 0 : i32
    return %arg0, %c0_i32, %c0_i32_0 : i32, i32, i32
  }
}

</mosaic_0001>

<bundles_post_ra>
// kernel: tpu_custom_call.1
= control target key start
LH: loop header
LB: loop body
LE: loop exit
PB: predicated region body
PF: predicated region fallthrough
CT: control target
= control target key end

     0   :  { %s26703_s27 = smov 0   ;;  %s33223_s0 = inlined_call_operand.vmem [shape: f32[2,20,32], index: 0, kind: input, shape index: {}]   ;;  %s33224_s1 = inlined_call_operand.vmem [shape: f32[2,20,32], index: 1, kind: input, shape index: {}]   ;;  %s33225_s2 = inlined_call_operand.vmem [shape: f32[2,20,8], index: 2, kind: input, shape index: {}]   ;;  %s33226_s3 = inlined_call_operand.vmem [shape: f32[1,32], index: 3, kind: input, shape index: {}]   ;;  %s33227_s4 = inlined_call_operand.vmem [shape: f32[1,32], index: 4, kind: input, shape index: {}]   ;;  %s33228_s5 = inlined_call_operand.vmem [shape: f32[32,384], index: 5, kind: input, shape index: {}]   ;;  %s33229_s6 = inlined_call_operand.vmem [shape: f32[1,384], index: 6, kind: input, shape index: {}]   ;;  %s33230_s7 = inlined_call_operand.vmem [shape: f32[32,32], index: 7, kind: input, shape index: {}]   ;;  %s33231_s8 = inlined_call_operand.vmem [shape: f32[1,32], index: 8, kind: input, shape index: {}]   ;;  %s33232_s9 = inlined_call_operand.vmem [shape: f32[32,32], index: 9, kind: input, shape index: {}]   ;;  %s33233_s10 = inlined_call_operand.vmem [shape: f32[1,32], index: 10, kind: input, shape index: {}]   ;;  %s33234_s11 = inlined_call_operand.vmem [shape: f32[1,32], index: 11, kind: input, shape index: {}]   ;;  %s33235_s12 = inlined_call_operand.vmem [shape: f32[1,32], index: 12, kind: input, shape index: {}]   ;;  %s33236_s13 = inlined_call_operand.vmem [shape: f32[32,64], index: 13, kind: input, shape index: {}]   ;;  %s33237_s14 = inlined_call_operand.vmem [shape: f32[1,64], index: 14, kind: input, shape index: {}]   ;;  %s33238_s15 = inlined_call_operand.vmem [shape: f32[64,32], index: 15, kind: input, shape index: {}]   ;;  %s33239_s16 = inlined_call_operand.vmem [shape: f32[1,32], index: 16, kind: input, shape index: {}]   ;;  %s33240_s17 = inlined_call_operand.vmem [shape: f32[128,128], index: 17, kind: input, shape index: {}]   ;;  %s33241_s18 = inlined_call_operand.vmem [shape: f32[128,32], index: 18, kind: input, shape index: {}]   ;;  %s33242_s19 = inlined_call_operand.vmem [shape: f32[3,128], index: 19, kind: input, shape index: {}]   ;;  %s33243_s20 = inlined_call_operand.vmem [shape: f32[2,128], index: 20, kind: input, shape index: {}]   ;;  %s33244_s21 = inlined_call_operand.vmem [shape: f32[8,256], index: 21, kind: input, shape index: {}]   ;;  %s33245_s22 = inlined_call_operand.vmem [shape: f32[400,20], index: 22, kind: input, shape index: {}]   ;;  %s33246_s23 = inlined_call_operand.vmem [shape: f32[400,20], index: 23, kind: input, shape index: {}]   ;;  %s33247_s24 = inlined_call_operand.vmem [shape: f32[20,400], index: 24, kind: input, shape index: {}]   ;;  %s33248_s25 = inlined_call_operand.vmem [shape: f32[400,1], index: 25, kind: input, shape index: {}]   ;;  %s33249_s26 = inlined_call_operand.vmem [shape: f32[2,20,32], index: 26, kind: output, shape index: {}]  }
   0x1   :  { %34102 = sst [smem:[#allocation222_spill]] %s33223_s0 }
   0x2   :  { %34103 = sst [smem:[#allocation223_spill]] %s33224_s1 }
   0x3   :  { %34104 = sst [smem:[#allocation224_spill]] %s33225_s2 }
   0x4   :  { %34105 = sst [smem:[#allocation225_spill]] %s33226_s3 }
   0x5   :  { %34106 = sst [smem:[#allocation226_spill]] %s33227_s4 }
   0x6   :  { %34107 = sst [smem:[#allocation227_spill]] %s33228_s5 }
   0x7   :  { %34108 = sst [smem:[#allocation228_spill]] %s33229_s6 }
   0x8   :  { %34109 = sst [smem:[#allocation229_spill]] %s33230_s7 }
   0x9   :  { %34110 = sst [smem:[#allocation230_spill]] %s33231_s8 }
   0xa   :  { %34111 = sst [smem:[#allocation231_spill]] %s33232_s9 }
   0xb   :  { %34112 = sst [smem:[#allocation232_spill]] %s33233_s10 }
   0xc LB: > { %s19374_s3 = sadd.s32 4294967295, %s26562_s27   ;;  %p19378_p0 = scmp.ge.s32.totalorder %s26562_s27, 1  ;;  %s26562_s27 = sphi %s26703_s27, %s36_s27  }
   0xd   : > { %p732_p1 = scmp.lt.s32.totalorder %s26562_s27, 3 }
   0xf   : > { %p733_p2 = pnand %p19378_p0, %p732_p1 }
  0x11   : > { %736 = sbr.rel (%p733_p2) target bundleno = 4403 (0x1133), region = 124 }
  0x18   : > { %p812_p3 = scmp.lt.s32.totalorder %s19374_s3, 1  ;;  %vm843_vm0 = vcmask 261120   ;;  %vm850_vm1 = vcmask 257024   ;;  %s34113_s4 = sld [smem:[#allocation222_spill]]  ;;  %v33270_v36 = vmov 0.0|0.0   ;;  %vm26566_vm2 = vmmov 0  }
  0x19   : > { %s34114_s30 = sld [smem:[#allocation227_spill]]  ;;  %24296 = vmatprep.subr.bf16.mxu1 %v33270_v36  ;;  %s34115_s10 = sld [smem:[#allocation225_spill]]  ;;  %vm3520_vm3 = vcmask 64512   ;;  %vm2751_vm4 = vcmask 1043456  }
  0x1a   : > { %s35417_s3 = smov (!%p812_p3, %s19374_s3), 1  ;;  %s34117_s0 = sld [smem:[#allocation226_spill]] }
  0x1b   : > { %s26711_s7 = smul.u32 24, %s35417_s3  ;;  %s34116_s3 = sld [smem:[#allocation223_spill]] }
  0x1c   : > { %s34118_s5 = sld [smem:[#allocation229_spill]]  ;;  %s35414_s1 = sld [smem:[#allocation231_spill]] }
  0x1e   : > { %s26717_s29 = scalar_lea.vmem %s34113_s4, %s26711_s7  ;;  %s831_s4 = scalar_lea.vmem %s33249_s26, %s26711_s7 }
  0x1f   : > { %v26720_v0 = vld [vmem:[%s26717_s29] sm:$0xff]  ;;  %v26723_v1 = vld [vmem:[%s26717_s29 + $0x10] sm:$0xf]  ;;  %v26726_v2 = vld [vmem:[%s26717_s29 + $0x8] sm:$0xff] }
  0x20   : > { %v844_v3 = vsel %vm843_vm0, %v26720_v0, 0.0  ;;  %v851_v4 = vsel %vm850_vm1, %v26723_v1, 0.0  ;;  %v847_v5 = vsel %vm843_vm0, %v26726_v2, 0.0  ;;  %v907_v21 = vld [vmem:[%s34114_s30 + $0x8] sm:$0xff]  ;;  %v910_v22 = vld [vmem:[%s34114_s30 + $0x20] sm:$0xff]  ;;  %v909_v26 = vld [vmem:[%s34114_s30 + $0x18] sm:$0xff] }
  0x21   : > { %845 = vadd.xlane.f32.xlu0 %v844_v3  ;;  %852 = vadd.xlane.f32.xlu1 %v851_v4  ;;  %v944_v23 = vand.u32 4294901760, %v907_v21  ;;  %v948_v24 = vand.u32 4294901760, %v910_v22  ;;  %v906_v25 = vld [vmem:[%s34114_s30] sm:$0xff]  ;;  %v908_v27 = vld [vmem:[%s34114_s30 + $0x10] sm:$0xff]  ;;  %v950_v29 = vand.u32 4294901760, %v909_v26  ;;  %v911_v30 = vld [vmem:[%s34114_s30 + $0x28] sm:$0xff]  ;;  %s821_s28 = scalar_lea.vmem %s34116_s3, %s26711_s7 }
  0x22   : > { %v946_v28 = vand.u32 4294901760, %v906_v25  ;;  %v1586_v31 = vand.u32 4294901760, %v908_v27  ;;  %v913_v32 = vld [vmem:[%s34114_s30 + $0x38] sm:$0xff]  ;;  %v1589_v37 = vand.u32 4294901760, %v911_v30  ;;  %v916_v38 = vld [vmem:[%s34114_s30 + $0x50] sm:$0xff]  ;;  %v915_v40 = vld [vmem:[%s34114_s30 + $0x48] sm:$0xff] }
  0x23   : > { %v26773_v33 = vpack.c.bf16 %v948_v24, %v944_v23  ;;  %v26775_v34 = vsub.f32 %v907_v21, %v944_v23  ;;  %v26777_v35 = vsub.f32 %v910_v22, %v948_v24  ;;  %v912_v39 = vld [vmem:[%s34114_s30 + $0x30] sm:$0xff]  ;;  %v26793_v43 = vsub.f32 %v909_v26, %v950_v29  ;;  %v914_v45 = vld [vmem:[%s34114_s30 + $0x40] sm:$0xff]  ;;  %v917_v46 = vld [vmem:[%s34114_s30 + $0x58] sm:$0xff]  ;;  %s34125_s3 = sld [smem:[#allocation230_spill]] }
  0x24   : > { %v26789_v41 = vpack.c.bf16 %v950_v29, %v946_v28  ;;  %v26791_v42 = vsub.f32 %v906_v25, %v946_v28  ;;  %v26795_v44 = vsub.f32 %v908_v27, %v1586_v31  ;;  %v26804_v47 = vpack.c.bf16 %v1589_v37, %v1586_v31 }
  0x25   : > { %848 = vadd.xlane.f32.xlu0 %v847_v5  ;;  %24249 = vmatprep.subr.bf16.mxu0 %v26773_v33  ;;  %v26806_v48 = vsub.f32 %v911_v30, %v1589_v37  ;;  %v952_v49 = vand.u32 4294901760, %v913_v32  ;;  %v956_v50 = vand.u32 4294901760, %v916_v38  ;;  %v954_v51 = vand.u32 4294901760, %v912_v39 }
  0x26   : > { %24251 = vmatpush1.bf16.msra.mxu0 %v26789_v41  ;;  %v958_v52 = vand.u32 4294901760, %v915_v40  ;;  %v1592_v53 = vand.u32 4294901760, %v914_v45  ;;  %v1595_v54 = vand.u32 4294901760, %v917_v46  ;;  %24298 = vmatpush3.bf16.msra.mxu1 %v26804_v47  ;;  %v33253_v3 = vmov 0.0  }
  0x27   : > { %v26810_v55 = vpack.c.bf16 %v956_v50, %v952_v49  ;;  %v26812_v56 = vsub.f32 %v913_v32, %v952_v49  ;;  %v26814_v57 = vsub.f32 %v916_v38, %v956_v50  ;;  %24299 = vmatprep.subr.bf16.mxu1 %v33270_v36  ;;  %v26819_v59 = vsub.f32 %v912_v39, %v954_v51 }
  0x28   : > { %v26817_v58 = vpack.c.bf16 %v958_v52, %v954_v51  ;;  %v26821_v60 = vsub.f32 %v915_v40, %v958_v52  ;;  %v26823_v61 = vpack.c.bf16 %v1595_v54, %v1592_v53  ;;  %v26826_v62 = vsub.f32 %v914_v45, %v1592_v53  ;;  %1016 = vmatprep.mubr.f32.mxu0 %v33253_v3 }
  0x29   : > { %24253 = vmatprep.subr.bf16.mxu0 %v26810_v55  ;;  %v26828_v63 = vsub.f32 %v917_v46, %v1595_v54  ;;  %v1052_v4 = vand.u32 4294901760, %v26775_v34  ;;  %21352 = vmatprep.mubr.msk.f32.mxu1 %vm26566_vm2, %v33253_v3  ;;  %v1064_v5 = vand.u32 4294901760, %v26777_v35  ;;  %v1088_v21 = vand.u32 4294901760, %v26814_v57 }
  0x2a   : > { %24255 = vmatpush1.bf16.msra.mxu0 %v26817_v58  ;;  %24301 = vmatpush3.bf16.msra.mxu1 %v26823_v61  ;;  %v1082_v29 = vand.u32 4294901760, %v26819_v59  ;;  %v1094_v32 = vand.u32 4294901760, %v26821_v60  ;;  %v1701_v37 = vand.u32 4294901760, %v26826_v62 }
  0x2b   : > { %24302 = vmatprep.subr.bf16.mxu1 %v33270_v36  ;;  %v1089_v28 = vsub.f32 %v26814_v57, %v1088_v21  ;;  %v1708_v50 = vand.u32 4294901760, %v26828_v63 }
  0x2c   : > { %v1083_v45 = vsub.f32 %v26819_v59, %v1082_v29  ;;  %v1095_v46 = vsub.f32 %v26821_v60, %v1094_v32  ;;  %v1702_v49 = vsub.f32 %v26826_v62, %v1701_v37 }
  0x2d   : > { %v1090_v40 = vand.u32 4294901760, %v1089_v28 }
  0x2e   : > { %v1084_v52 = vand.u32 4294901760, %v1083_v45  ;;  %v1096_v53 = vand.u32 4294901760, %v1095_v46  ;;  %v1703_v54 = vand.u32 4294901760, %v1702_v49 }
  0xae   : > { %v846_v6 = vpop.xlane.xlu0 %845  ;;  %v853_v7 = vpop.xlane.xlu1 %852 }
  0xaf   : > { %v855_v8 = vmul.f32 0.03125, %v846_v6  ;;  %v857_v9 = vmul.f32 0.03125, %v853_v7  ;;  %v1058_v6 = vand.u32 4294901760, %v26791_v42  ;;  %v1070_v7 = vand.u32 4294901760, %v26793_v43 }
  0xb1   : > { %v26735_v10 = vsub.f32 %v26720_v0, %v855_v8  ;;  %v26738_v11 = vsub.f32 %v26723_v1, %v857_v9  ;;  %v1687_v8 = vand.u32 4294901760, %v26795_v44  ;;  %v1053_v9 = vsub.f32 %v26775_v34, %v1052_v4 }
  0xb2   : > { %v849_v12 = vpop.xlane.xlu0 %848 }
  0xb3   : > { %v856_v13 = vmul.f32 0.03125, %v849_v12  ;;  %v861_v14 = vmul.f32 %v26735_v10, %v26735_v10  ;;  %v863_v15 = vmul.f32 %v26738_v11, %v26738_v11  ;;  %v1694_v12 = vand.u32 4294901760, %v26806_v48 }
  0xb5   : > { %v26745_v16 = vsub.f32 %v26726_v2, %v856_v13  ;;  %v864_v17 = vsel %vm843_vm0, %v861_v14, 0.0  ;;  %v870_v18 = vsel %vm850_vm1, %v863_v15, 0.0  ;;  %v1065_v13 = vsub.f32 %v26777_v35, %v1064_v5 }
  0xb6   : > { %865 = vadd.xlane.f32.xlu1 %v864_v17  ;;  %v1059_v14 = vsub.f32 %v26791_v42, %v1058_v6  ;;  %v1071_v15 = vsub.f32 %v26793_v43, %v1070_v7  ;;  %v1688_v17 = vsub.f32 %v26795_v44, %v1687_v8 }
  0xb7   : > { %v862_v19 = vmul.f32 %v26745_v16, %v26745_v16  ;;  %v1066_v22 = vand.u32 4294901760, %v1065_v13  ;;  %v26866_v13 = vpack.c.bf16 %v1096_v53, %v1084_v52 }
  0xb8   : > { %v1060_v23 = vand.u32 4294901760, %v1059_v14  ;;  %v1072_v24 = vand.u32 4294901760, %v1071_v15  ;;  %v1689_v25 = vand.u32 4294901760, %v1688_v17  ;;  %v24264_v17 = vpack.c.bf16 %v26777_v35, %v26775_v34  ;;  %v2156_v34 = vld [vmem:[%s34118_s5] sm:$0xff] }
  0xb9   : > { %v867_v20 = vsel %vm843_vm0, %v862_v19, 0.0  ;;  %v1695_v19 = vsub.f32 %v26806_v48, %v1694_v12  ;;  %v2168_v35 = vsel %vm843_vm0, %v26720_v0, 0  ;;  %v2158_v0 = vld [vmem:[%s34118_s5 + $0x10] sm:$0xff] }
  0xba   : > { %871 = vadd.xlane.f32.xlu1 %v870_v18  ;;  %868 = vadd.xlane.f32.xlu0 %v867_v20  ;;  %v1054_v18 = vand.u32 4294901760, %v1053_v9  ;;  %v1076_v20 = vand.u32 4294901760, %v26812_v56  ;;  %v26853_v31 = vpack.c.bf16 %v1072_v24, %v1060_v23  ;;  %v1709_v9 = vsub.f32 %v26828_v63, %v1708_v50 }
  0xbb   : > { %v1696_v26 = vand.u32 4294901760, %v1695_v19  ;;  %v24309_v19 = vpack.c.bf16 %v26806_v48, %v26795_v44  ;;  %v24270_v23 = vpack.c.bf16 %v26821_v60, %v26819_v59  ;;  %v24312_v24 = vpack.c.bf16 %v26828_v63, %v26826_v62 }
  0xbc   : > { %v1077_v27 = vsub.f32 %v26812_v56, %v1076_v20  ;;  %v24256_v30 = vpack.c.bf16 %v1066_v22, %v1054_v18  ;;  %v1710_v14 = vand.u32 4294901760, %v1709_v9  ;;  %v24266_v18 = vpack.c.bf16 %v26793_v43, %v26791_v42 }
  0xbd   : > { %v26857_v38 = vpack.c.bf16 %v1696_v26, %v1689_v25  ;;  %v24268_v22 = vpack.c.bf16 %v26814_v57, %v26812_v56  ;;  %v26882_v25 = vpack.c.bf16 %v1064_v5, %v1052_v4  ;;  %v26884_v26 = vpack.c.bf16 %v1070_v7, %v1058_v6 }
  0xbe   : > { %v1078_v39 = vand.u32 4294901760, %v1077_v27  ;;  %24257 = vmatprep.subr.bf16.mxu0 %v24256_v30  ;;  %v26868_v15 = vpack.c.bf16 %v1710_v14, %v1703_v54  ;;  %v26886_v27 = vpack.c.bf16 %v1694_v12, %v1687_v8  ;;  %v26888_v28 = vpack.c.bf16 %v1088_v21, %v1076_v20  ;;  %v19383_v8 = vld [vmem:[%s34115_s10] ss:$0 sm:$0xff]  ;;  %s34119_s10 = sld [smem:[#allocation224_spill]] }
  0xbf   : > { %v26890_v30 = vpack.c.bf16 %v1094_v32, %v1082_v29  ;;  %v19384_v20 = vld [vmem:[%s34117_s0] ss:$0 sm:$0xff]  ;;  %v2177_v42 = vand.u32 4294901760, %v2156_v34  ;;  %v27043_v44 = vand.u32 4294901760, %v2168_v35  ;;  %v2183_v56 = vand.u32 4294901760, %v2158_v0 }
  0xc0   : > { %v26863_v51 = vpack.c.bf16 %v1090_v40, %v1078_v39  ;;  %v26892_v39 = vpack.c.bf16 %v1708_v50, %v1701_v37  ;;  %v835_v32 = vld [vmem:[%s821_s28] sm:$0xff]  ;;  %v2174_v59 = vsel %vm843_vm0, %v26723_v1, 0 }
  0xc1   : > { %v27058_v48 = vsub.f32 %v2156_v34, %v2177_v42 }
  0xc3   : > { %v2278_v62 = vand.u32 4294901760, %v27058_v48 }
  0xc4   : > { %s826_s6 = scalar_lea.vmem %s34119_s10, %s26711_s7 }
 0x143   : > { %v866_v40 = vpop.xlane.xlu1 %865 }
 0x144   : > { %v873_v45 = vmul.f32 0.03125, %v866_v40 }
 0x146   : > { %v876_v46 = vadd.f32 1e-05, %v873_v45  ;;  %v837_v45 = vld [vmem:[%s821_s28 + $0x10] sm:$0xf] }
 0x147   : > { %v872_v49 = vpop.xlane.xlu1 %871  ;;  %v869_v52 = vpop.xlane.xlu0 %868 }
 0x148   : > { %26519 = vrsqrt.f32 %v876_v46  ;;  %v875_v53 = vmul.f32 0.03125, %v872_v49  ;;  %v874_v4 = vmul.f32 0.03125, %v869_v52  ;;  %v836_v52 = vld [vmem:[%s821_s28 + $0x8] sm:$0xff]  ;;  %s34122_s28 = sld [smem:[#allocation228_spill]] }
 0x14a   : > { %v878_v5 = vadd.f32 1e-05, %v875_v53  ;;  %v877_v6 = vadd.f32 1e-05, %v874_v4 }
 0x14c   : > { %26521 = vrsqrt.f32 %v878_v5 }
 0x14d   : > { %26523 = vrsqrt.f32 %v877_v6 }
 0x152   : > { %v26520_v7 = vpop.eup %26519 }
 0x153   : > { %v882_v12 = vmul.f32 %v26520_v7, %v26735_v10 }
 0x155   : > { %v891_v21 = vmul.f32 %v19383_v8, %v882_v12 }
 0x156   : > { %v26522_v29 = vpop.eup %26521 }
 0x157   : > { %v26524_v37 = vpop.eup %26523  ;;  %v900_v50 = vadd.f32 %v19384_v20, %v891_v21  ;;  %v884_v54 = vmul.f32 %v26522_v29, %v26738_v11 }
 0x158   : > { %v883_v9 = vmul.f32 %v26524_v37, %v26745_v16 }
 0x159   : > { %v893_v14 = vmul.f32 %v19383_v8, %v884_v54  ;;  %v903_v40 = vadd.f32 %v900_v50, %v835_v32 }
 0x15a   : > { %v892_v10 = vmul.f32 %v19383_v8, %v883_v9 }
 0x15b   : > { %v902_v46 = vadd.f32 %v19384_v20, %v893_v14  ;;  %v936_v49 = vsel %vm843_vm0, %v903_v40, 0 }
 0x15c   : > { %v901_v53 = vadd.f32 %v19384_v20, %v892_v10  ;;  %v26908_v4 = vand.u32 4294901760, %v936_v49 }
 0x15d   : > { %v905_v5 = vadd.f32 %v902_v46, %v837_v45 }
 0x15e   : > { %v1018_v6 = vsub.f32 %v936_v49, %v26908_v4  ;;  %v904_v7 = vadd.f32 %v901_v53, %v836_v52 }
 0x15f   : > { %v942_v12 = vsel %vm843_vm0, %v905_v5, 0 }
 0x160   : > { %v26912_v11 = vand.u32 4294901760, %v1018_v6  ;;  %v939_v16 = vsel %vm843_vm0, %v904_v7, 0  ;;  %v26915_v21 = vand.u32 4294901760, %v942_v12 }
 0x161   : > { %v26917_v8 = vand.u32 4294901760, %v939_v16 }
 0x162   : > { %v1020_v29 = vsub.f32 %v1018_v6, %v26912_v11  ;;  %v26921_v20 = vsub.f32 %v942_v12, %v26915_v21 }
 0x163   : > { %v1029_v32 = vsub.f32 %v939_v16, %v26917_v8 }
 0x164   : > { %v1021_v37 = vand.u32 4294901760, %v1020_v29  ;;  %v26927_v54 = vand.u32 4294901760, %v26921_v20  ;;  %v838_v29 = vld [vmem:[%s826_s6] sm:$0xff] }
 0x165   : > { %v26924_v50 = vand.u32 4294901760, %v1029_v32 }
 0x166   : > { %1022 = vmatmul.mubr.f32.vlgmr.msra.gmra.mrb[0].mxu0 %v1021_v37  ;;  %21353 = vmatmul.mubr.f32.vlgmr.msra.gmra.mrb[0].mxu1 %v1021_v37  ;;  %v1042_v40 = vsub.f32 %v26921_v20, %v26927_v54  ;;  %v839_v37 = vld [vmem:[%s826_s6 + $0x8] sm:$0xff] }
 0x167   : > { %1027 = vmatprep.mubr.f32.mxu0 %v33253_v3  ;;  %21355 = vmatprep.mubr.msk.f32.mxu1 %vm26566_vm2, %v33253_v3  ;;  %v1031_v9 = vsub.f32 %v1029_v32, %v26924_v50 }
 0x168   : > { %24259 = vmatpush1.bf16.msra.mxu0 %v26853_v31  ;;  %24304 = vmatpush3.bf16.msra.mxu1 %v26857_v38  ;;  %v1043_v10 = vand.u32 4294901760, %v1042_v40  ;;  %v27087_v38 = vand.u32 4294901760, %v2174_v59  ;;  %v840_v40 = vld [vmem:[%s826_s6 + $0x10] sm:$0xf]  ;;  %s35415_s6 = sld [smem:[#allocation232_spill]] }
 0x169   : > { %v1032_v14 = vand.u32 4294901760, %v1031_v9  ;;  %24261 = vmatprep.subr.bf16.mxu0 %v26863_v51  ;;  %24305 = vmatprep.subr.bf16.mxu1 %v33270_v36 }
 0x16b   : > { %1033 = vmatmul.mubr.f32.gmra.mrb[2].mxu0 %v1032_v14  ;;  %21356 = vmatmul.mubr.f32.gmra.mrb[2].mxu1 %v1032_v14  ;;  %v3525_v14 = vsel %vm3520_vm3, %v839_v37, 0 }
 0x16c   : > { %1038 = vmatprep.mubr.f32.mxu0 %v33253_v3  ;;  %21358 = vmatprep.mubr.msk.f32.mxu1 %vm26566_vm2, %v33253_v3 }
 0x16d   : > { %24263 = vmatpush1.bf16.msra.mxu0 %v26866_v13  ;;  %24307 = vmatpush3.bf16.msra.mxu1 %v26868_v15  ;;  %v2279_v13 = vsub.f32 %v27058_v48, %v2278_v62 }
 0x16e   : > { %24265 = vmatprep.subr.bf16.mxu0 %v24264_v17  ;;  %24308 = vmatprep.subr.bf16.mxu1 %v33270_v36 }
 0x16f   : > { %1044 = vmatmul.mubr.f32.gmra.mrb[4].mxu0 %v1043_v10  ;;  %21359 = vmatmul.mubr.f32.gmra.mrb[4].mxu1 %v1043_v10 }
 0x170   : > { %1154 = vmatprep.mubr.f32.mxu0 %v33253_v3  ;;  %21369 = vmatprep.mubr.msk.f32.mxu1 %vm26566_vm2, %v33253_v3 }
 0x173   : > { %1156 = vmatmul.mubr.f32.vlgmr.msra.gmra.mrb[0].mxu0 %v26908_v4  ;;  %21370 = vmatmul.mubr.f32.vlgmr.msra.gmra.mrb[0].mxu1 %v26908_v4 }
 0x174   : > { %1161 = vmatprep.mubr.f32.mxu0 %v33253_v3  ;;  %21372 = vmatprep.mubr.msk.f32.mxu1 %vm26566_vm2, %v33253_v3 }
 0x175   : > { %24267 = vmatpush1.bf16.msra.mxu0 %v24266_v18  ;;  %24310 = vmatpush3.bf16.msra.mxu1 %v24309_v19 }
 0x176   : > { %24269 = vmatprep.subr.bf16.mxu0 %v24268_v22  ;;  %24311 = vmatprep.subr.bf16.mxu1 %v33270_v36  ;;  %v27110_v22 = vsub.f32 %v2174_v59, %v27087_v38 }
 0x177   : > { %1163 = vmatmul.mubr.f32.gmra.mrb[2].mxu0 %v26917_v8  ;;  %21373 = vmatmul.mubr.f32.gmra.mrb[2].mxu1 %v26917_v8 }
 0x178   : > { %1168 = vmatprep.mubr.f32.mxu0 %v33253_v3  ;;  %21375 = vmatprep.mubr.msk.f32.mxu1 %vm26566_vm2, %v33253_v3  ;;  %v2267_v45 = vand.u32 4294901760, %v27110_v22 }
 0x179   : > { %24271 = vmatpush1.bf16.msra.mxu0 %v24270_v23  ;;  %24313 = vmatpush3.bf16.msra.mxu1 %v24312_v24 }
 0x17a   : > { %24273 = vmatprep.subr.bf16.mxu0 %v26773_v33  ;;  %24314 = vmatprep.subr.bf16.mxu1 %v33270_v36 }
 0x17b   : > { %1170 = vmatmul.mubr.f32.gmra.mrb[4].mxu0 %v26915_v21  ;;  %21376 = vmatmul.mubr.f32.gmra.mrb[4].mxu1 %v26915_v21 }
 0x17c   : > { %1256 = vmatprep.mubr.f32.mxu0 %v33253_v3  ;;  %21386 = vmatprep.mubr.msk.f32.mxu1 %vm26566_vm2, %v33253_v3 }
 0x17f   : > { %1259 = vmatmul.mubr.f32.vlgmr.msra.gmra.mrb[0].mxu0 %v1018_v6  ;;  %21387 = vmatmul.mubr.f32.vlgmr.msra.gmra.mrb[0].mxu1 %v1018_v6 }
 0x180   : > { %1264 = vmatprep.mubr.f32.mxu0 %v33253_v3  ;;  %21389 = vmatprep.mubr.msk.f32.mxu1 %vm26566_vm2, %v33253_v3 }
 0x181   : > { %24275 = vmatpush1.bf16.msra.mxu0 %v26789_v41  ;;  %24316 = vmatpush3.bf16.msra.mxu1 %v26804_v47 }
 0x182   : > { %24277 = vmatprep.subr.bf16.mxu0 %v26810_v55  ;;  %24317 = vmatprep.subr.bf16.mxu1 %v33270_v36 }
 0x183   : > { %1267 = vmatmul.mubr.f32.gmra.mrb[2].mxu0 %v1029_v32  ;;  %21390 = vmatmul.mubr.f32.gmra.mrb[2].mxu1 %v1029_v32  ;;  %v3522_v32 = vsel %vm3520_vm3, %v838_v29, 0 }
 0x184   : > { %1272 = vmatprep.mubr.f32.mxu0 %v33253_v3  ;;  %21392 = vmatprep.mubr.msk.f32.mxu1 %vm26566_vm2, %v33253_v3  ;;  %v27215_v9 = vand.u32 4294901760, %v3522_v32 }
 0x185   : > { %24279 = vmatpush1.bf16.msra.mxu0 %v26817_v58  ;;  %24319 = vmatpush3.bf16.msra.mxu1 %v26823_v61 }
 0x186   : > { %24281 = vmatprep.subr.bf16.mxu0 %v26882_v25  ;;  %24320 = vmatprep.subr.bf16.mxu1 %v33270_v36  ;;  %v2280_v25 = vand.u32 4294901760, %v2279_v13 }
 0x187   : > { %1275 = vmatmul.mubr.f32.gmra.mrb[4].mxu0 %v26921_v20  ;;  %21393 = vmatmul.mubr.f32.gmra.mrb[4].mxu1 %v26921_v20 }
 0x188   : > { %1353 = vmatprep.mubr.f32.mxu0 %v33253_v3  ;;  %21403 = vmatprep.mubr.msk.f32.mxu1 %vm26566_vm2, %v33253_v3 }
 0x18b   : > { %1357 = vmatmul.mubr.f32.vlgmr.msra.gmra.mrb[0].mxu0 %v26912_v11  ;;  %21404 = vmatmul.mubr.f32.vlgmr.msra.gmra.mrb[0].mxu1 %v26912_v11 }
 0x18c   : > { %1362 = vmatprep.mubr.f32.mxu0 %v33253_v3  ;;  %21406 = vmatprep.mubr.msk.f32.mxu1 %vm26566_vm2, %v33253_v3 }
 0x18d   : > { %24283 = vmatpush1.bf16.msra.mxu0 %v26884_v26  ;;  %24322 = vmatpush3.bf16.msra.mxu1 %v26886_v27 }
 0x18e   : > { %24285 = vmatprep.subr.bf16.mxu0 %v26888_v28  ;;  %24323 = vmatprep.subr.bf16.mxu1 %v33270_v36 }
 0x18f   : > { %1366 = vmatmul.mubr.f32.gmra.mrb[2].mxu0 %v26924_v50  ;;  %21407 = vmatmul.mubr.f32.gmra.mrb[2].mxu1 %v26924_v50 }
 0x190   : > { %1371 = vmatprep.mubr.f32.mxu0 %v33253_v3  ;;  %21409 = vmatprep.mubr.msk.f32.mxu1 %vm26566_vm2, %v33253_v3 }
 0x191   : > { %24287 = vmatpush1.bf16.msra.mxu0 %v26890_v30  ;;  %24325 = vmatpush3.bf16.msra.mxu1 %v26892_v39 }
 0x192   : > { %24289 = vmatprep.subr.bf16.mxu0 %v26773_v33  ;;  %24326 = vmatprep.subr.bf16.mxu1 %v33270_v36  ;;  %v2157_v33 = vld [vmem:[%s34118_s5 + $0x8] sm:$0xff] }
 0x193   : > { %1375 = vmatmul.mubr.f32.gmra.mrb[4].mxu0 %v26927_v54  ;;  %21410 = vmatmul.mubr.f32.gmra.mrb[4].mxu1 %v26927_v54  ;;  %v2180_v43 = vand.u32 4294901760, %v2157_v33  ;;  %v3518_v54 = vld [vmem:[%s33244_s21] sm:$0xff] }
 0x194   : > { %1469 = vmatprep.mubr.f32.mxu0 %v33253_v3  ;;  %21420 = vmatprep.mubr.msk.f32.mxu1 %vm26566_vm2, %v33253_v3  ;;  %v27223_v34 = vand.u32 4294901760, %v3518_v54 }
 0x195   : > { %v27084_v1 = vpack.c.bf16 %v2180_v43, %v2177_v42  ;;  %v3528_v42 = vsel %vm3520_vm3, %v840_v40, 0 }
 0x196   : > { %34120 = vst [vmem:[#allocation2_spill] sm:$0xff] %v27223_v34 }
 0x197   : > { %1471 = vmatmul.mubr.f32.vlgmr.msra.gmra.mrb[0].mxu0 %v26908_v4  ;;  %21421 = vmatmul.mubr.f32.vlgmr.msra.gmra.mrb[0].mxu1 %v26908_v4 }
 0x198   : > { %1476 = vmatprep.mubr.f32.mxu0 %v33253_v3  ;;  %21423 = vmatprep.mubr.msk.f32.mxu1 %vm26566_vm2, %v33253_v3 }
 0x199   : > { %24291 = vmatpush1.bf16.msra.mxu0 %v26789_v41  ;;  %24328 = vmatpush3.bf16.msra.mxu1 %v26804_v47  ;;  %v2159_v41 = vld [vmem:[%s34118_s5 + $0x18] sm:$0xff]  ;;  %v2171_v47 = vsel %vm843_vm0, %v26726_v2, 0  ;;  %v27067_v2 = vsub.f32 %v2168_v35, %v27043_v44  ;;  %v27227_v35 = vand.u32 4294901760, %v3525_v14 }
 0x19a   : > { %24293 = vmatprep.subr.bf16.mxu0 %v26810_v55  ;;  %24329 = vmatprep.subr.bf16.mxu1 %v33270_v36  ;;  %v27060_v55 = vsub.f32 %v2157_v33, %v2180_v43  ;;  %v2186_v57 = vand.u32 4294901760, %v2159_v41  ;;  %v27071_v60 = vand.u32 4294901760, %v2171_v47  ;;  %v3598_v33 = vsub.f32 %v3522_v32, %v27215_v9 }
 0x19b   : > { %1478 = vmatmul.mubr.f32.gmra.mrb[2].mxu0 %v26917_v8  ;;  %21424 = vmatmul.mubr.f32.gmra.mrb[2].mxu1 %v26917_v8  ;;  %v2247_v31 = vand.u32 4294901760, %v27067_v2  ;;  %v3637_v43 = vsub.f32 %v3518_v54, %v27223_v34 }
 0x19c   : > { %1483 = vmatprep.mubr.f32.mxu0 %v33253_v3  ;;  %21426 = vmatprep.mubr.msk.f32.mxu1 %vm26566_vm2, %v33253_v3  ;;  %v2285_v63 = vand.u32 4294901760, %v27060_v55  ;;  %v27092_v51 = vsub.f32 %v2171_v47, %v27071_v60  ;;  %v27106_v19 = vpack.c.bf16 %v2186_v57, %v2183_v56  ;;  %v24345_v7 = vpack.c.bf16 %v27060_v55, %v27058_v48 }
 0x19d   : > { %24295 = vmatpush1.bf16.msra.mxu0 %v26817_v58  ;;  %24331 = vmatpush3.bf16.msra.mxu1 %v26823_v61  ;;  %v27078_v58 = vsub.f32 %v2158_v0, %v2183_v56  ;;  %v27080_v61 = vsub.f32 %v2159_v41, %v2186_v57  ;;  %v2248_v23 = vsub.f32 %v27067_v2, %v2247_v31  ;;  %v3599_v41 = vand.u32 4294901760, %v3598_v33 }
 0x19e   : > { %24332 = vmatprep.subr.bf16.mxu0 %v33270_v36  ;;  %24368 = vmatprep.subr.bf16.mxu1 %v33270_v36  ;;  %v2286_v15 = vsub.f32 %v27060_v55, %v2285_v63  ;;  %v2257_v24 = vand.u32 4294901760, %v27092_v51  ;;  %v24357_v11 = vpack.c.bf16 %v2285_v63, %v2278_v62  ;;  %v3609_v47 = vsub.f32 %v3525_v14, %v27227_v35 }
 0x19f   : > { %1485 = vmatmul.mubr.f32.gmra.mrb[4].mxu0 %v26915_v21  ;;  %21427 = vmatmul.mubr.f32.gmra.mrb[4].mxu1 %v26915_v21  ;;  %v2292_v17 = vand.u32 4294901760, %v27078_v58  ;;  %v2299_v18 = vand.u32 4294901760, %v27080_v61  ;;  %v2249_v30 = vand.u32 4294901760, %v2248_v23  ;;  %v24348_v12 = vpack.c.bf16 %v27080_v61, %v27078_v58 }
 0x1a0   : > { %1563 = vmatprep.mubr.f32.mxu0 %v33253_v3  ;;  %21437 = vmatprep.mubr.msk.f32.mxu1 %vm26566_vm2, %v33253_v3  ;;  %v2287_v26 = vand.u32 4294901760, %v2286_v15  ;;  %v2258_v39 = vsub.f32 %v27092_v51, %v2257_v24  ;;  %v27235_v48 = vand.u32 4294901760, %v3528_v42  ;;  %v3638_v55 = vand.u32 4294901760, %v3637_v43 }
 0x1a1   : > { %v2293_v27 = vsub.f32 %v27078_v58, %v2292_v17  ;;  %v2300_v28 = vsub.f32 %v27080_v61, %v2299_v18  ;;  %v24360_v16 = vpack.c.bf16 %v2299_v18, %v2292_v17  ;;  %v3600_v56 = vsub.f32 %v3598_v33, %v3599_v41 }
 0x1a2   : > { %v24339_v46 = vpack.c.bf16 %v2287_v26, %v2280_v25  ;;  %v2259_v53 = vand.u32 4294901760, %v2258_v39  ;;  %34121 = vst [vmem:[#allocation3_spill] sm:$0xff] %v27235_v48  ;;  %v3610_v57 = vand.u32 4294901760, %v3609_v47 }
 0x1a3   : > { %1565 = vmatmul.mubr.f32.vlgmr.msra.gmra.mrb[0].mxu0 %v26908_v4  ;;  %21438 = vmatmul.mubr.f32.vlgmr.msra.gmra.mrb[0].mxu1 %v26908_v4  ;;  %v2294_v49 = vand.u32 4294901760, %v2293_v27  ;;  %v2301_v52 = vand.u32 4294901760, %v2300_v28  ;;  %v2268_v4 = vsub.f32 %v27110_v22, %v2267_v45  ;;  %v3601_v59 = vand.u32 4294901760, %v3600_v56 }
 0x1a4   : > { %1570 = vmatprep.mubr.f32.mxu0 %v33253_v3  ;;  %21440 = vmatprep.mubr.msk.f32.mxu1 %vm26566_vm2, %v33253_v3  ;;  %v3611_v58 = vsub.f32 %v3609_v47, %v3610_v57  ;;  %v920_v28 = vlaneseq }
 0x1a5   : > { %24334 = vmatpush3.bf16.msra.mxu0 %v27084_v1  ;;  %v24342_v5 = vpack.c.bf16 %v2301_v52, %v2294_v49  ;;  %v2269_v6 = vand.u32 4294901760, %v2268_v4 }
 0x1a6   : > { %24335 = vmatprep.subr.bf16.mxu0 %v33270_v36  ;;  %v3612_v63 = vand.u32 4294901760, %v3611_v58 }
 0x1a7   : > { %1572 = vmatmul.mubr.f32.gmra.mrb[2].mxu0 %v26917_v8  ;;  %21441 = vmatmul.mubr.f32.gmra.mrb[2].mxu1 %v26917_v8 }
 0x1a8   : > { %1577 = vmatprep.mubr.f32.mxu0 %v33253_v3  ;;  %21443 = vmatprep.mubr.msk.f32.mxu1 %vm26566_vm2, %v33253_v3 }
 0x1a9   : > { %24337 = vmatpush3.bf16.msra.mxu0 %v27106_v19 }
 0x1aa   : > { %24338 = vmatprep.subr.bf16.mxu0 %v33270_v36 }
 0x1ab   : > { %1579 = vmatmul.mubr.f32.gmra.mrb[4].mxu0 %v26915_v21  ;;  %21444 = vmatmul.mubr.f32.gmra.mrb[4].mxu1 %v26915_v21  ;;  %v3519_v21 = vld [vmem:[%s33244_s21 + $0x8] sm:$0xff] }
 0x1ac   : > { %21454 = vmatprep.mubr.msk.f32.mxu0 %vm26566_vm2, %v33253_v3  ;;  %21580 = vmatprep.mubr.msk.f32.mxu1 %vm26566_vm2, %v33253_v3  ;;  %v27197_v8 = vand.u32 4294901760, %v3519_v21 }
 0x1ae   : > { %v27202_v20 = vsub.f32 %v3519_v21, %v27197_v8 }
 0x1af   : > { %21455 = vmatmul.mubr.f32.vlgmr.msra.gmra.mrb[6].mxu0 %v2249_v30  ;;  %v27303_v30 = vshrl.u32 %v920_v28, 7 }
 0x1b0   : > { %21457 = vmatprep.mubr.msk.f32.mxu0 %vm26566_vm2, %v33253_v3  ;;  %24340 = vmatpush3.bf16.msra.mxu0 %v24339_v46  ;;  %v3632_v50 = vand.u32 4294901760, %v27202_v20  ;;  %v918_v46 = vld [vmem:[%s34122_s28] sm:$0x7] }
 0x1b1   : > { %24341 = vmatprep.subr.bf16.mxu0 %v33270_v36  ;;  %v27306_v39 = vsub.s32 0, %v27303_v30  ;;  %v27313_v49 = vsub.s32 1, %v27303_v30 }
 0x1b2   : > { %v3633_v10 = vsub.f32 %v27202_v20, %v3632_v50 }
 0x1b3   : > { %21458 = vmatmul.mubr.f32.gmra.mrb[8].mxu0 %v2259_v53  ;;  %v923_v52 = vrot.slane %v918_v46, %v27306_v39  ;;  %v927_v4 = vrot.slane %v918_v46, %v27313_v49 }
 0x1b4   : > { %21460 = vmatprep.mubr.msk.f32.mxu0 %vm26566_vm2, %v33253_v3  ;;  %24343 = vmatpush3.bf16.msra.mxu0 %v24342_v5  ;;  %v3634_v0 = vand.u32 4294901760, %v3633_v10 }
 0x1b5   : > { %24344 = vmatprep.subr.bf16.mxu0 %v33270_v36 }
 0x1b7   : > { %21461 = vmatmul.mubr.f32.gmra.mrb[10].mxu0 %v2269_v6 }
 0x1b8   : > { %21471 = vmatprep.mubr.msk.f32.mxu0 %vm26566_vm2, %v33253_v3 }
 0x1bb   : > { %21472 = vmatmul.mubr.f32.vlgmr.msra.gmra.mrb[6].mxu0 %v27043_v44 }
 0x1bc   : > { %21474 = vmatprep.mubr.msk.f32.mxu0 %vm26566_vm2, %v33253_v3  ;;  %24346 = vmatpush3.bf16.msra.mxu0 %v24345_v7 }
 0x1bd   : > { %24347 = vmatprep.subr.bf16.mxu0 %v33270_v36 }
 0x1bf   : > { %21475 = vmatmul.mubr.f32.gmra.mrb[8].mxu0 %v27071_v60 }
 0x1c0   : > { %21477 = vmatprep.mubr.msk.f32.mxu0 %vm26566_vm2, %v33253_v3  ;;  %24349 = vmatpush3.bf16.msra.mxu0 %v24348_v12 }
 0x1c1   : > { %24350 = vmatprep.subr.bf16.mxu0 %v33270_v36 }
 0x1c3   : > { %21478 = vmatmul.mubr.f32.gmra.mrb[10].mxu0 %v27087_v38 }
 0x1c4   : > { %21488 = vmatprep.mubr.msk.f32.mxu0 %vm26566_vm2, %v33253_v3 }
 0x1c7   : > { %21489 = vmatmul.mubr.f32.vlgmr.msra.gmra.mrb[6].mxu0 %v27067_v2  ;;  %v3620_v2 = vsub.f32 %v3528_v42, %v27235_v48 }
 0x1c8   : > { %21491 = vmatprep.mubr.msk.f32.mxu0 %vm26566_vm2, %v33253_v3  ;;  %24352 = vmatpush3.bf16.msra.mxu0 %v27084_v1 }
 0x1c9   : > { %24353 = vmatprep.subr.bf16.mxu0 %v33270_v36  ;;  %v3621_v61 = vand.u32 4294901760, %v3620_v2 }
 0x1cb   : > { %21492 = vmatmul.mubr.f32.gmra.mrb[8].mxu0 %v27092_v51 }
 0x1cc   : > { %21494 = vmatprep.mubr.msk.f32.mxu0 %vm26566_vm2, %v33253_v3  ;;  %24355 = vmatpush3.bf16.msra.mxu0 %v27106_v19 }
 0x1cd   : > { %24356 = vmatprep.subr.bf16.mxu0 %v33270_v36 }
 0x1cf   : > { %21495 = vmatmul.mubr.f32.gmra.mrb[10].mxu0 %v27110_v22  ;;  %v2767_v22 = vld [vmem:[%s33240_s17 + $0x18] sm:$0xff] }
 0x1d0   : > { %21505 = vmatprep.mubr.msk.f32.mxu0 %vm26566_vm2, %v33253_v3 }
 0x1d3   : > { %21506 = vmatmul.mubr.f32.vlgmr.msra.gmra.mrb[6].mxu0 %v2247_v31  ;;  %v2764_v31 = vld [vmem:[%s33240_s17] sm:$0xff] }
 0x1d4   : > { %21508 = vmatprep.mubr.msk.f32.mxu0 %vm26566_vm2, %v33253_v3  ;;  %24358 = vmatpush3.bf16.msra.mxu0 %v24357_v11  ;;  %v2781_v51 = vand.u32 4294901760, %v2764_v31 }
 0x1d5   : > { %24359 = vmatprep.subr.bf16.mxu0 %v33270_v36 }
 0x1d6   : > { %v27283_v17 = vsub.f32 %v2764_v31, %v2781_v51 }
 0x1d7   : > { %21509 = vmatmul.mubr.f32.gmra.mrb[8].mxu0 %v2257_v24  ;;  %v2790_v24 = vand.u32 4294901760, %v2767_v22 }
 0x1d8   : > { %21511 = vmatprep.mubr.msk.f32.mxu0 %vm26566_vm2, %v33253_v3  ;;  %24361 = vmatpush3.bf16.msra.mxu0 %v24360_v16 }
 0x1d9   : > { %24362 = vmatprep.subr.bf16.mxu0 %v33270_v36  ;;  %v27299_v27 = vsub.f32 %v2767_v22, %v2790_v24  ;;  %v2775_v22 = vld [vmem:[%s33240_s17 + $0x58] sm:$0xff] }
 0x1db   : > { %21512 = vmatmul.mubr.f32.gmra.mrb[10].mxu0 %v2267_v45  ;;  %v33273_v45 = vsub.s32 2, %v27303_v30 }
 0x1dc   : > { %21522 = vmatprep.mubr.msk.f32.mxu0 %vm26566_vm2, %v33253_v3 }
 0x1dd   : > { %v931_v53 = vrot.slane %v918_v46, %v33273_v45  ;;  %v2776_v46 = vld [vmem:[%s33240_s17 + $0x60] sm:$0xff] }
 0x1df   : > { %21523 = vmatmul.mubr.f32.vlgmr.msra.gmra.mrb[6].mxu0 %v27043_v44 }
 0x1e0   : > { %21525 = vmatprep.mubr.msk.f32.mxu0 %vm26566_vm2, %v33253_v3  ;;  %24364 = vmatpush3.bf16.msra.mxu0 %v27084_v1  ;;  %v3622_v1 = vsub.f32 %v3620_v2, %v3621_v61 }
 0x1e1   : > { %24365 = vmatprep.subr.bf16.mxu0 %v33270_v36 }
 0x1e3   : > { %21526 = vmatmul.mubr.f32.gmra.mrb[8].mxu0 %v27071_v60 }
 0x1e4   : > { %21528 = vmatprep.mubr.msk.f32.mxu0 %vm26566_vm2, %v33253_v3  ;;  %24367 = vmatpush3.bf16.msra.mxu0 %v27106_v19  ;;  %v2766_v19 = vld [vmem:[%s33240_s17 + $0x10] sm:$0xff] }
 0x1e5   : > { %3531 = vmatprep.subr.mxu0 %v27197_v8  ;;  %v2787_v23 = vand.u32 4294901760, %v2766_v19 }
 0x1e7   : > { %21529 = vmatmul.mubr.f32.gmra.mrb[10].mxu0 %v27087_v38  ;;  %v27295_v25 = vpack.c.bf16 %v2790_v24, %v2787_v23  ;;  %v27297_v26 = vsub.f32 %v2766_v19, %v2787_v23  ;;  %v2774_v19 = vld [vmem:[%s33240_s17 + $0x50] sm:$0xff]  ;;  %v2814_v24 = vand.u32 4294901760, %v2775_v22 }
 0x1e8   : > { %21539 = vmatprep.mubr.msk.f32.mxu0 %vm26566_vm2, %v33253_v3  ;;  %v2811_v23 = vand.u32 4294901760, %v2774_v19 }
 0x1ea   : > { %v27385_v28 = vpack.c.bf16 %v2814_v24, %v2811_v23 }
 0x1eb   : > { %21540 = vmatmul.mubr.f32.vlgmr.msra.gmra.mrb[6].mxu0 %v27043_v44  ;;  %v3639_v44 = vsub.f32 %v3637_v43, %v3638_v55 }
 0x1ec   : > { %21542 = vmatprep.mubr.msk.f32.mxu0 %vm26566_vm2, %v33253_v3  ;;  %3533 = vmatpush1.msra.mxu0 %v27223_v34 }
 0x1ed   : > { %3635 = vmatprep.subr.mxu0 %v3634_v0  ;;  %v3640_v62 = vand.u32 4294901760, %v3639_v44  ;;  %v2771_v44 = vld [vmem:[%s33240_s17 + $0x38] sm:$0xff] }
 0x1ef   : > { %21543 = vmatmul.mubr.f32.gmra.mrb[8].mxu0 %v27071_v60  ;;  %v3623_v60 = vand.u32 4294901760, %v3622_v1  ;;  %v2773_v1 = vld [vmem:[%s33240_s17 + $0x48] sm:$0xff] }
 0x1f0   : > { %21545 = vmatprep.mubr.msk.f32.mxu0 %vm26566_vm2, %v33253_v3 }
 0x1f3   : > { %21546 = vmatmul.mubr.f32.gmra.mrb[10].mxu0 %v27087_v38  ;;  %v2765_v38 = vld [vmem:[%s33240_s17 + $0x8] sm:$0xff] }
 0x1f4   : > { %3596 = vmatprep.mubr.f32.mxu0 %v33253_v3  ;;  %v2784_v13 = vand.u32 4294901760, %v2765_v38 }
 0x1f6   : > { %v27281_v15 = vpack.c.bf16 %v2784_v13, %v2781_v51  ;;  %v27285_v18 = vsub.f32 %v2765_v38, %v2784_v13  ;;  %v2808_v51 = vand.u32 4294901760, %v2773_v1 }
 0x1f7   : > { %3602 = vmatmul.mubr.f32.vlgmr.msra.gmra.mrb[12].mxu0 %v3601_v59  ;;  %v27360_v59 = vld [vmem:[%s33243_s20] sm:$0x3] }
 0x1f8   : > { %3607 = vmatprep.mubr.f32.mxu0 %v33253_v3  ;;  %3641 = vmatpush1.msra.mxu0 %v3640_v62  ;;  %vm4145_vm5 = vcmp.gt.f32.partialorder %v27360_v59, 0.5 }
 0x1f9   : > { %3728 = vmatprep.subr.mxu0 %v27202_v20  ;;  %24370 = vmatpush3.bf16.msra.mxu1 %v27281_v15 }
 0x1fa   : > { %24371 = vmatprep.subr.bf16.mxu1 %v33270_v36 }
 0x1fb   : > { %3613 = vmatmul.mubr.f32.gmra.mrb[14].mxu0 %v3612_v63  ;;  %v2772_v63 = vld [vmem:[%s33240_s17 + $0x40] sm:$0xff] }
 0x1fc   : > { %3618 = vmatprep.mubr.f32.mxu0 %v33253_v3  ;;  %v2805_v38 = vand.u32 4294901760, %v2772_v63 }
 0x1fd   : > { %24373 = vmatpush3.bf16.msra.mxu1 %v27295_v25 }
 0x1fe   : > { %24374 = vmatprep.subr.bf16.mxu1 %v33270_v36  ;;  %v27375_v13 = vpack.c.bf16 %v2808_v51, %v2805_v38 }
 0x1ff   : > { %3624 = vmatmul.mubr.f32.gmra.mrb[16].mxu0 %v3623_v60  ;;  %v26567_v60 = vmov 0  }
 0x200   : > { %3704 = vmatprep.mubr.f32.mxu0 %v33253_v3  ;;  %v27371_v31 = vsel %vm4145_vm5, 1, %v26567_v60  ;;  %26517 = vset.pattern.permute.xlu1 %v26567_v60 }
 0x201   : > { %26518 = vset.pattern.permute.xlu0 %v26567_v60  ;;  %v27430_v60 = vsub.f32 %v2775_v22, %v2814_v24 }
 0x203   : > { %3706 = vmatmul.mubr.f32.vlgmr.msra.gmra.mrb[12].mxu0 %v27215_v9 }
 0x204   : > { %3711 = vmatprep.mubr.f32.mxu0 %v33253_v3  ;;  %3731 = vmatpush1.msra.mxu0 %v3637_v43 }
 0x205   : > { %3820 = vmatprep.subr.mxu0 %v27197_v8 }
 0x207   : > { %3713 = vmatmul.mubr.f32.gmra.mrb[14].mxu0 %v27227_v35 }
 0x208   : > { %3718 = vmatprep.mubr.f32.mxu0 %v33253_v3 }
 0x20b   : > { %3720 = vmatmul.mubr.f32.gmra.mrb[16].mxu0 %v27235_v48 }
 0x20c   : > { %3794 = vmatprep.mubr.f32.mxu0 %v33253_v3 }
 0x20f   : > { %3797 = vmatmul.mubr.f32.vlgmr.msra.gmra.mrb[12].mxu0 %v3598_v33 }
 0x210   : > { %3802 = vmatprep.mubr.f32.mxu0 %v33253_v3  ;;  %3822 = vmatpush1.msra.mxu0 %v27223_v34 }
 0x211   : > { %3916 = vmatprep.subr.mxu0 %v3632_v50 }
 0x213   : > { %3805 = vmatmul.mubr.f32.gmra.mrb[14].mxu0 %v3609_v47  ;;  %v2769_v47 = vld [vmem:[%s33240_s17 + $0x28] sm:$0xff] }
 0x214   : > { %3810 = vmatprep.mubr.f32.mxu0 %v33253_v3  ;;  %v2796_v56 = vand.u32 4294901760, %v2769_v47 }
 0x217   : > { %3813 = vmatmul.mubr.f32.gmra.mrb[16].mxu0 %v3620_v2  ;;  %v2770_v2 = vld [vmem:[%s33240_s17 + $0x30] sm:$0xff] }
 0x218   : > { %3885 = vmatprep.mubr.f32.mxu0 %v33253_v3  ;;  %v2799_v58 = vand.u32 4294901760, %v2770_v2 }
 0x21b   : > { %3889 = vmatmul.mubr.f32.vlgmr.msra.gmra.mrb[12].mxu0 %v3599_v41  ;;  %v2768_v41 = vld [vmem:[%s33240_s17 + $0x20] sm:$0xff] }
 0x21c   : > { %3894 = vmatprep.mubr.f32.mxu0 %v33253_v3  ;;  %3920 = vmatpush1.msra.mxu0 %v3638_v55  ;;  %v2793_v55 = vand.u32 4294901760, %v2768_v41 }
 0x21d   : > { %4006 = vmatprep.subr.mxu0 %v27197_v8 }
 0x21f   : > { %3898 = vmatmul.mubr.f32.gmra.mrb[14].mxu0 %v3610_v57  ;;  %v27347_v57 = vpack.c.bf16 %v2796_v56, %v2793_v55 }
 0x220   : > { %3903 = vmatprep.mubr.f32.mxu0 %v33253_v3 }
 0x221   : > { %24376 = vmatpush3.bf16.msra.mxu1 %v27347_v57 }
 0x222   : > { %24377 = vmatprep.subr.bf16.mxu1 %v33270_v36 }
 0x223   : > { %3907 = vmatmul.mubr.f32.gmra.mrb[16].mxu0 %v3621_v61  ;;  %v2802_v61 = vand.u32 4294901760, %v2771_v44 }
 0x224   : > { %3983 = vmatprep.mubr.f32.mxu0 %v33253_v3 }
 0x225   : > { %v27362_v62 = vpack.c.bf16 %v2802_v61, %v2799_v58 }
 0x227   : > { %3985 = vmatmul.mubr.f32.vlgmr.msra.gmra.mrb[12].mxu0 %v27215_v9  ;;  %24379 = vmatpush3.bf16.msra.mxu1 %v27362_v62 }
 0x228   : > { %3990 = vmatprep.mubr.f32.mxu0 %v33253_v3  ;;  %4008 = vmatpush1.msra.mxu0 %v27223_v34  ;;  %v27577_v34 = vrot.slane %v27360_v59, %v27313_v49 }
 0x229   : > { %24380 = vmatprep.subr.bf16.mxu1 %v33270_v36 }
 0x22b   : > { %3992 = vmatmul.mubr.f32.gmra.mrb[14].mxu0 %v27227_v35  ;;  %24382 = vmatpush3.bf16.msra.mxu1 %v27375_v13 }
 0x22c   : > { %3997 = vmatprep.mubr.f32.mxu0 %v33253_v3  ;;  %24383 = vmatprep.subr.bf16.mxu1 %v33270_v36 }
 0x22f   : > { %3999 = vmatmul.mubr.f32.gmra.mrb[16].mxu0 %v27235_v48  ;;  %24385 = vmatpush3.bf16.msra.mxu1 %v27385_v28 }
 0x230   : > { %4071 = vmatprep.mubr.f32.mxu0 %v33253_v3  ;;  %24386 = vmatprep.subr.bf16.mxu1 %v33270_v36 }
 0x233   : > { %4073 = vmatmul.mubr.f32.vlgmr.msra.gmra.mrb[12].mxu0 %v27215_v9 }
 0x234   : > { %4078 = vmatprep.mubr.f32.mxu0 %v33253_v3 }
 0x237   : > { %4080 = vmatmul.mubr.f32.gmra.mrb[14].mxu0 %v27227_v35 }
 0x276   : > { %v1566_v5 = vpop.f32.mrb[0].mxu0  ;;  %v2140_v6 = vpop.f32.mrb[0].mxu1 }
 0x277   : > { %v27319_v7 = vadd.f32 %v1566_v5, %v923_v52  ;;  %v27321_v12 = vadd.f32 %v2140_v6, %v931_v53  ;;  %v1568_v11 = vpop.f32.mrb[1].mxu0  ;;  %v21439_v16 = vpop.f32.mrb[1].mxu1  ;;  %v27394_v5 = vsub.f32 %v2768_v41, %v2793_v55  ;;  %v27396_v6 = vsub.f32 %v2769_v47, %v2796_v56 }
 0x278   : > { %v27323_v21 = vadd.f32 %v1568_v11, %v927_v4  ;;  %v2778_v16 = vld [vmem:[%s33240_s17 + $0x70] sm:$0xff]  ;;  %v27421_v41 = vsub.f32 %v2771_v44, %v2802_v61  ;;  %v27423_v47 = vsub.f32 %v2772_v63, %v2805_v38  ;;  %v27425_v55 = vsub.f32 %v2773_v1, %v2808_v51 }
 0x279   : > { %2747 = vmax.xlane.f32.xlu0 %v27321_v12  ;;  %v27428_v56 = vsub.f32 %v2774_v19, %v2811_v23  ;;  %v33267_v63 = vand.u32 4294901760, %v27297_v26  ;;  %v33266_v1 = vand.u32 4294901760, %v27299_v27  ;;  %v33264_v51 = vand.u32 4294901760, %v27394_v5 }
 0x27a   : > { %v1573_v29 = vpop.f32.mrb[2].mxu0  ;;  %v2146_v20 = vpop.f32.mrb[2].mxu1  ;;  %v33261_v19 = vand.u32 4294901760, %v27396_v6 }
 0x27b   : > { %v27326_v32 = vadd.f32 %v1573_v29, %v923_v52  ;;  %v27328_v37 = vadd.f32 %v2146_v20, %v931_v53  ;;  %v1575_v50 = vpop.f32.mrb[3].mxu0  ;;  %v21442_v54 = vpop.f32.mrb[3].mxu1  ;;  %v2779_v29 = vld [vmem:[%s33240_s17 + $0x78] sm:$0xff]  ;;  %v2823_v20 = vand.u32 4294901760, %v2778_v16  ;;  %v2909_v22 = vsub.f32 %v27297_v26, %v33267_v63 }
 0x27c   : > { %v27330_v9 = vadd.f32 %v1575_v50, %v927_v4  ;;  %v2826_v50 = vand.u32 4294901760, %v2779_v29  ;;  %v33255_v54 = vand.u32 4294901760, %v27283_v17  ;;  %v2916_v23 = vsub.f32 %v27299_v27, %v33266_v1 }
 0x27d   : > { %2749 = vmax.xlane.f32.xlu1 %v27328_v37  ;;  %v2923_v24 = vsub.f32 %v27394_v5, %v33264_v51 }
 0x27e   : > { %v1580_v14 = vpop.f32.mrb[4].mxu0  ;;  %v2152_v40 = vpop.f32.mrb[4].mxu1  ;;  %v27439_v44 = vsub.f32 %v2779_v29, %v2826_v50 }
 0x27f   : > { %v27333_v10 = vadd.f32 %v1580_v14, %v923_v52  ;;  %v27335_v33 = vadd.f32 %v2152_v40, %v931_v53  ;;  %v1582_v35 = vpop.f32.mrb[5].mxu0  ;;  %v21445_v42 = vpop.f32.mrb[5].mxu1  ;;  %v2777_v52 = vld [vmem:[%s33240_s17 + $0x68] sm:$0xff]  ;;  %v2817_v53 = vand.u32 4294901760, %v2776_v46  ;;  %v33269_v14 = vand.u32 4294901760, %v27285_v18 }
 0x280   : > { %v27337_v43 = vadd.f32 %v1582_v35, %v927_v4  ;;  %v2820_v4 = vand.u32 4294901760, %v2777_v52  ;;  %v27411_v40 = vpack.c.bf16 %v2826_v50, %v2823_v20  ;;  %v2895_v35 = vsub.f32 %v27283_v17, %v33255_v54 }
 0x281   : > { %34123 = vst [vmem:[#allocation4_spill] sm:$0xff] %v27333_v10  ;;  %v2752_v0 = vsel %vm2751_vm4, %v27335_v33, -inf  ;;  %v2902_v42 = vsub.f32 %v27285_v18, %v33269_v14  ;;  %v27432_v3 = vsub.f32 %v2776_v46, %v2817_v53  ;;  %v2930_v46 = vsub.f32 %v27396_v6, %v33261_v19 }
 0x282   : > { %34124 = vst [vmem:[#allocation5_spill] sm:$0xff] %v27337_v43  ;;  %2753 = vmax.xlane.f32.xlu0 %v2752_v0  ;;  %v27399_v11 = vpack.c.bf16 %v2820_v4, %v2817_v53  ;;  %v27419_v0 = vsub.f32 %v2770_v2, %v2799_v58  ;;  %v27434_v54 = vsub.f32 %v2777_v52, %v2820_v4  ;;  %v2896_v58 = vand.u32 4294901760, %v2895_v35 }
 0x283   : > { %v27437_v2 = vsub.f32 %v2778_v16, %v2823_v20  ;;  %v2903_v61 = vand.u32 4294901760, %v2902_v42  ;;  %v2910_v52 = vand.u32 4294901760, %v2909_v22  ;;  %v2917_v53 = vand.u32 4294901760, %v2916_v23 }
 0x284   : > { %24388 = vmatpush3.bf16.msra.mxu1 %v27399_v11  ;;  %v2924_v4 = vand.u32 4294901760, %v2923_v24  ;;  %v2931_v16 = vand.u32 4294901760, %v2930_v46  ;;  %v33258_v29 = vand.u32 4294901760, %v27419_v0  ;;  %v33256_v20 = vand.u32 4294901760, %v27421_v41 }
 0x285   : > { %24389 = vmatprep.subr.bf16.mxu1 %v33270_v36  ;;  %v27443_v38 = vpack.c.bf16 %v2903_v61, %v2896_v58  ;;  %v27461_v50 = vpack.c.bf16 %v2917_v53, %v2910_v52  ;;  %v33257_v23 = vand.u32 4294901760, %v27423_v47  ;;  %v33259_v24 = vand.u32 4294901760, %v27425_v55 }
 0x286   : > { %v27463_v35 = vpack.c.bf16 %v2931_v16, %v2924_v4  ;;  %v2937_v42 = vsub.f32 %v27419_v0, %v33258_v29  ;;  %v2944_v58 = vsub.f32 %v27421_v41, %v33256_v20  ;;  %v33260_v20 = vand.u32 4294901760, %v27428_v56 }
 0x287   : > { %v2951_v52 = vsub.f32 %v27423_v47, %v33257_v23  ;;  %v2958_v53 = vsub.f32 %v27425_v55, %v33259_v24  ;;  %v33263_v24 = vand.u32 4294901760, %v27432_v3 }
 0x288   : > { %24391 = vmatpush3.bf16.msra.mxu1 %v27411_v40  ;;  %v2938_v61 = vand.u32 4294901760, %v2937_v42  ;;  %v2945_v22 = vand.u32 4294901760, %v2944_v58  ;;  %v33262_v42 = vand.u32 4294901760, %v27430_v60 }
 0x289   : > { %24392 = vmatprep.subr.bf16.mxu1 %v33270_v36  ;;  %v2952_v4 = vand.u32 4294901760, %v2951_v52  ;;  %v2959_v16 = vand.u32 4294901760, %v2958_v53  ;;  %v33265_v52 = vand.u32 4294901760, %v27434_v54 }
 0x28a   : > { %v27473_v46 = vpack.c.bf16 %v2945_v22, %v2938_v61  ;;  %v2965_v61 = vsub.f32 %v27428_v56, %v33260_v20  ;;  %v2972_v22 = vsub.f32 %v27430_v60, %v33262_v42  ;;  %v33268_v42 = vand.u32 4294901760, %v27437_v2 }
 0x28b   : > { %v27483_v58 = vpack.c.bf16 %v2959_v16, %v2952_v4  ;;  %v2979_v4 = vsub.f32 %v27432_v3, %v33263_v24  ;;  %v2986_v16 = vsub.f32 %v27434_v54, %v33265_v52 }
 0x28c   : > { %v2966_v23 = vand.u32 4294901760, %v2965_v61  ;;  %v2973_v29 = vand.u32 4294901760, %v2972_v22  ;;  %v33272_v61 = vand.u32 4294901760, %v27439_v44 }
 0x28d   : > { %v2980_v20 = vand.u32 4294901760, %v2979_v4  ;;  %v2987_v19 = vand.u32 4294901760, %v2986_v16  ;;  %v19385_v4 = vld [vmem:[%s34125_s3] ss:$0 sm:$0xff] }
 0x28e   : > { %v27493_v53 = vpack.c.bf16 %v2973_v29, %v2966_v23  ;;  %v2993_v29 = vsub.f32 %v27437_v2, %v33268_v42  ;;  %v3000_v23 = vsub.f32 %v27439_v44, %v33272_v61 }
 0x28f   : > { %v27503_v22 = vpack.c.bf16 %v2987_v19, %v2980_v20 }
 0x290   : > { %v2994_v24 = vand.u32 4294901760, %v2993_v29  ;;  %v3001_v51 = vand.u32 4294901760, %v3000_v23 }
 0x292   : > { %v27514_v16 = vpack.c.bf16 %v3001_v51, %v2994_v24 }
 0x2be   : > { %v2731_v52 = vpop.f32.mrb[6].mxu0 }
 0x2bf   : > { %v25285_v1 = vadd.f32 %v19385_v4, %v2731_v52  ;;  %v21541_v19 = vpop.f32.mrb[7].mxu0 }
 0x2c1   : > { %v12954_v20 = vand.u32 4294901760, %v25285_v1 }
 0x2c2   : > { %v2737_v42 = vpop.f32.mrb[8].mxu0 }
 0x2c3   : > { %v27518_v14 = vsub.f32 %v25285_v1, %v12954_v20  ;;  %v25286_v36 = vadd.f32 %v19385_v4, %v2737_v42  ;;  %v21544_v61 = vpop.f32.mrb[9].mxu0 }
 0x2c5   : > { %34126 = vst [vmem:[#allocation6_spill] sm:$0xff] %v27518_v14  ;;  %v12957_v29 = vand.u32 4294901760, %v25286_v36 }
 0x2c6   : > { %v2743_v45 = vpop.f32.mrb[10].mxu0 }
 0x2c7   : > { %v27522_v43 = vpack.c.bf16 %v12957_v29, %v12954_v20  ;;  %v27524_v51 = vsub.f32 %v25286_v36, %v12957_v29  ;;  %v27526_v24 = vadd.f32 %v19385_v4, %v2743_v45  ;;  %v21547_v52 = vpop.f32.mrb[11].mxu0  ;;  %v3516_v45 = vld [vmem:[%s33242_s19] sm:$0x7] }
 0x2c8   : > { %v27546_v29 = vrot.slane %v3516_v45, %v27306_v39  ;;  %v27551_v42 = vrot.slane %v3516_v45, %v27313_v49  ;;  %v19392_v23 = vadd.f32 -1.0, %v3516_v45 }
 0x2c9   : > { %34127 = vst [vmem:[#allocation7_spill] sm:$0xff] %v27522_v43  ;;  %34128 = vst [vmem:[#allocation8_spill] sm:$0xff] %v27524_v51 }
 0x2ca   : > { %34129 = vst [vmem:[#allocation9_spill] sm:$0xff] %v27526_v24  ;;  %34132 = vst [vmem:[#allocation12_spill] sm:$0xff] %v27551_v42  ;;  %v34133_v24 = vsub.s32 2, %v27303_v30 }
 0x2cc   : > { %v27558_v43 = vrot.slane %v3516_v45, %v34133_v24 }
 0x2ce   : > { %34134 = vst [vmem:[#allocation13_spill] sm:$0xff] %v27558_v43 }
 0x302   : > { %v27543_v4 = vpop.f32.mrb[16].mxu0 }
 0x303   : > { %34130 = vst [vmem:[#allocation10_spill] sm:$0xff] %v27543_v4  ;;  %v27548_v52 = vpop.f32.mrb[17].mxu0  ;;  %v27563_v4 = vrot.slane %v27360_v59, %v27306_v39 }
 0x304   : > { %34131 = vst [vmem:[#allocation11_spill] sm:$0xff] %v27548_v52 }
 0x306   : > { %v2748_v61 = vpop.xlane.xlu0 %2747  ;;  %v4074_v1 = vpop.f32.mrb[12].mxu0 }
 0x307   : > { %v2755_v20 = vsub.f32 %v27321_v12, %v2748_v61  ;;  %v4097_v36 = vmul.f32 %v27546_v29, %v4074_v1  ;;  %v4076_v19 = vpop.f32.mrb[13].mxu0  ;;  %v4153_v12 = vrot.slane %v27371_v31, %v27306_v39  ;;  %v4164_v61 = vrot.slane %v27371_v31, %v27313_v49 }
 0x308   : > { %v4110_v63 = vmul.f32 %v27551_v42, %v4076_v19 }
 0x309   : > { %v2758_v10 = vmul.f32 1.442695, %v2755_v20  ;;  %v4100_v52 = vadd.f32 %v27319_v7, %v4097_v36  ;;  %v27573_v36 = vrot.slane %v19392_v23, %v27306_v39  ;;  %vm27584_vm6 = vcmp.eq.s32.totalorder %v4153_v12, 1 }
 0x30a   : > { %v4113_v1 = vadd.f32 %v27323_v21, %v4110_v63  ;;  %v2750_v19 = vpop.xlane.xlu1 %2749  ;;  %v4081_v48 = vpop.f32.mrb[14].mxu0  ;;  %v27581_v63 = vrot.slane %v19392_v23, %v27313_v49  ;;  %vm27588_vm7 = vcmp.eq.s32.totalorder %v4164_v61, 1 }
 0x30b   : > { %26525 = vpow2.f32 %v2758_v10  ;;  %v19386_v30 = vadd.f32 -0.5, %v4100_v52  ;;  %v2756_v24 = vsub.f32 %v27328_v37, %v2750_v19  ;;  %v4098_v7 = vmul.f32 %v27546_v29, %v4081_v48  ;;  %v4083_v20 = vpop.f32.mrb[15].mxu0  ;;  %34135 = vst [vmem:[#allocation14_spill] sm:$0xff] %v27573_v36 }
 0x30c   : > { %v19389_v45 = vadd.f32 -0.5, %v4113_v1  ;;  %v4111_v21 = vmul.f32 %v27551_v42, %v4083_v20  ;;  %34136 = vst [vmem:[#allocation15_spill] sm:$0xff] %v27581_v63  ;;  %v34137_v48 = vmov 0  ;;  %v34140_v52 = vmov 0 }
 0x30d   : > { %v4119_v31 = vfloor.f32 %v19386_v30  ;;  %v2760_v10 = vmul.f32 1.442695, %v2756_v24  ;;  %v4101_v37 = vadd.f32 %v27326_v32, %v4098_v7  ;;  %v34138_v48 = vsel %vm27584_vm6, 4294967295, %v34137_v48 }
 0x30e   : > { %34139 = vst [vmem:[#allocation16_spill] sm:$0xff] %v34138_v48  ;;  %v4122_v39 = vfloor.f32 %v19389_v45  ;;  %v34141_v52 = vsel %vm27588_vm7, 4294967295, %v34140_v52  ;;  %v4114_v59 = vadd.f32 %v27330_v9, %v4111_v21 }
 0x30f   : > { %34142 = vst [vmem:[#allocation17_spill] sm:$0xff] %v34141_v52  ;;  %v4125_v1 = vsub.f32 %v19386_v30, %v4119_v31  ;;  %v4135_v19 = vadd.f32 %v27563_v4, %v4119_v31  ;;  %26527 = vpow2.f32 %v2760_v10  ;;  %v19387_v49 = vadd.f32 -0.5, %v4101_v37  ;;  %v2754_v23 = vpop.xlane.xlu0 %2753 }
 0x310   : > { %v4128_v24 = vsub.f32 %v19389_v45, %v4122_v39  ;;  %v4142_v32 = vadd.f32 %v27577_v34, %v4122_v39  ;;  %v19390_v12 = vadd.f32 -0.5, %v4114_v59  ;;  %v2757_v7 = vsub.f32 %v27335_v33, %v2754_v23 }
 0x311   : > { %v4146_v20 = vsub.f32 1.0, %v4125_v1  ;;  %vm4169_vm8 = vcmp.ge.f32.partialorder %v4135_v19, 0.0  ;;  %vm4177_vm9 = vcmp.le.f32.partialorder %v4135_v19, %v27573_v36  ;;  %v4120_v61 = vfloor.f32 %v19387_v49 }
 0x312   : > { %vm4180_vm10 = vmand %vm4169_vm8, %vm4177_vm9  ;;  %v4158_v42 = vsub.f32 1.0, %v4128_v24  ;;  %vm4183_vm11 = vcmp.ge.f32.partialorder %v4142_v32, 0.0  ;;  %vm4193_vm12 = vcmp.le.f32.partialorder %v4142_v32, %v27581_v63  ;;  %v4208_v9 = vmul.f32 %v4142_v32, %v27546_v29 }
 0x313   : > { %v4155_v30 = vsel %vm27584_vm6, %v4125_v1, %v4146_v20  ;;  %vm4186_vm13 = vmand %vm4180_vm10, %vm4183_vm11  ;;  %v4126_v45 = vsub.f32 %v19387_v49, %v4120_v61  ;;  %v4136_v21 = vadd.f32 %v27563_v4, %v4120_v61  ;;  %v4123_v33 = vfloor.f32 %v19390_v12 }
 0x314   : > { %v4166_v31 = vsel %vm27588_vm7, %v4128_v24, %v4158_v42  ;;  %vm27604_vm14 = vmand %vm4186_vm13, %vm4193_vm12  ;;  %v4215_v37 = vadd.f32 %v27558_v43, %v4208_v9  ;;  %v2762_v39 = vmul.f32 1.442695, %v2757_v7  ;;  %vm4271_vm12 = vcmask 162816  }
 0x315   : > { %v27609_v59 = vpop.eup %26525  ;;  %v27611_v23 = vmul.f32 %v4166_v31, %v4155_v30  ;;  %v4147_v1 = vsub.f32 1.0, %v4126_v45  ;;  %vm4170_vm15 = vcmp.ge.f32.partialorder %v4136_v21, 0.0  ;;  %vm4178_vm3 = vcmp.le.f32.partialorder %v4136_v21, %v27573_v36 }
 0x316   : > { %v4218_v49 = vadd.f32 %v4215_v37, %v4135_v19  ;;  %vm4181_vm5 = vmand %vm4170_vm15, %vm4178_vm3  ;;  %v4129_v32 = vsub.f32 %v19390_v12, %v4123_v33  ;;  %v4143_v42 = vadd.f32 %v27577_v34, %v4123_v33  ;;  %26529 = vpow2.f32 %v2762_v39 }
 0x317   : > { %v4156_v24 = vsel %vm27584_vm6, %v4126_v45, %v4147_v1  ;;  %v27618_v20 = vand.u32 4294901760, %v27609_v59  ;;  %v4230_v45 = vld [vmem:[%s33245_s22 + $0x48] sm:$0xff] }
 0x318   : > { %v4426_v7 = vand.u32 4294901760, %v4218_v49  ;;  %v4159_v61 = vsub.f32 1.0, %v4129_v32  ;;  %vm4184_vm8 = vcmp.ge.f32.partialorder %v4143_v42, 0.0  ;;  %vm4194_vm9 = vcmp.le.f32.partialorder %v4143_v42, %v27581_v63 }
 0x319   : > { %v27621_v9 = vpop.eup %26527  ;;  %vm4187_vm10 = vmand %vm4181_vm5, %vm4184_vm8  ;;  %v4209_v19 = vmul.f32 %v4143_v42, %v27546_v29  ;;  %v27626_v12 = vsub.f32 %v27609_v59, %v27618_v20 }
 0x31a   : > { %v4167_v30 = vsel %vm27588_vm7, %v4129_v32, %v4159_v61  ;;  %vm27630_vm11 = vmand %vm4187_vm10, %vm4194_vm9  ;;  %v27635_v33 = vand.u32 4294901760, %v27621_v9  ;;  %v4995_v31 = vsub.f32 %v4218_v49, %v4426_v7 }
 0x31b   : > { %v27637_v37 = vmul.f32 %v4167_v30, %v4156_v24  ;;  %v4216_v39 = vadd.f32 %v27558_v43, %v4209_v19  ;;  %v33281_v1 = vand.u32 4294901760, %v27626_v12  ;;  %v34149_v43 = vmov 0.0|0.0  }
 0x31c   : > { %v27643_v42 = vsub.f32 %v27621_v9, %v27635_v33  ;;  %v4996_v49 = vand.u32 4294901760, %v4995_v31 }
 0x31d   : > { %v4219_v52 = vadd.f32 %v4216_v39, %v4136_v21  ;;  %v2864_v32 = vsub.f32 %v27626_v12, %v33281_v1  ;;  %v34148_v1 = vmov 0.0  }
 0x31e   : > { %v33283_v61 = vand.u32 4294901760, %v27643_v42 }
 0x31f   : > { %v4429_v48 = vand.u32 4294901760, %v4219_v52  ;;  %v2865_v63 = vand.u32 4294901760, %v2864_v32 }
 0x320   : > { %v27649_v24 = vpop.eup %26529  ;;  %v2874_v19 = vsub.f32 %v27643_v42, %v33283_v61 }
 0x321   : > { %21581 = vmatmul.mubr.f32.vlgmr.msra.gmra.mrb[6].mxu1 %v2865_v63  ;;  %v27654_v30 = vpack.c.bf16 %v4429_v48, %v4426_v7  ;;  %v27657_v21 = vand.u32 4294901760, %v27649_v24  ;;  %v5002_v39 = vsub.f32 %v4219_v52, %v4429_v48  ;;  %v4997_v63 = vsub.f32 %v4995_v31, %v4996_v49 }
 0x322   : > { %24394 = vmatpush3.bf16.msra.mxu1 %v27443_v38  ;;  %21583 = vmatprep.mubr.msk.f32.mxu1 %vm26566_vm2, %v34148_v1  ;;  %v2875_v32 = vand.u32 4294901760, %v2874_v19 }
 0x323   : > { %34147 = vst [vmem:[#allocation18_spill] sm:$0xff] %v27654_v30  ;;  %24513 = vmatprep.subr.bf16.mxu0 %v27654_v30  ;;  %24395 = vmatprep.subr.bf16.mxu1 %v34149_v43  ;;  %v27666_v61 = vsub.f32 %v27649_v24, %v27657_v21  ;;  %v5003_v7 = vand.u32 4294901760, %v5002_v39  ;;  %v27668_v36 = vpack.c.bf16 %v5002_v39, %v4995_v31  ;;  %v4998_v19 = vand.u32 4294901760, %v4997_v63 }
 0x324   : > { %24515 = vmatpush3.bf16.msra.mxu0 %v27654_v30  ;;  %v34162_v63 = vand.u32 4294901760, %v27626_v12 }
 0x325   : > { %34150 = vst [vmem:[#allocation19_spill] sm:$0xff] %v27668_v36  ;;  %21584 = vmatmul.mubr.f32.gmra.mrb[8].mxu1 %v2875_v32  ;;  %v2883_v38 = vand.u32 4294901760, %v27666_v61  ;;  %v5004_v48 = vsub.f32 %v5002_v39, %v5003_v7  ;;  %v27672_v52 = vpack.c.bf16 %v5003_v7, %v4996_v49  ;;  %v34160_v49 = vand.u32 4294901760, %v27283_v17 }
 0x326   : > { %24397 = vmatpush3.bf16.msra.mxu1 %v27461_v50  ;;  %21586 = vmatprep.mubr.msk.f32.mxu1 %vm26566_vm2, %v34148_v1  ;;  %v34152_v50 = vpack.c.bf16 %v27285_v18, %v27283_v17  ;;  %v34163_v7 = vand.u32 4294901760, %v27297_v26  ;;  %v34165_v17 = vand.u32 4294901760, %v27643_v42 }
 0x327   : > { %34151 = vst [vmem:[#allocation20_spill] sm:$0xff] %v27672_v52  ;;  %24398 = vmatprep.subr.bf16.mxu1 %v34149_v43  ;;  %v2884_v31 = vsub.f32 %v27666_v61, %v2883_v38  ;;  %v5005_v36 = vand.u32 4294901760, %v5004_v48  ;;  %v34164_v48 = vand.u32 4294901760, %v27299_v27 }
 0x329   : > { %v2885_v30 = vand.u32 4294901760, %v2884_v31  ;;  %v27681_v32 = vpack.c.bf16 %v5005_v36, %v4998_v19  ;;  %v34159_v36 = vpack.c.bf16 %v27439_v44, %v27437_v2  ;;  %v24468_v31 = vpack.c.bf16 %v34164_v48, %v34163_v7  ;;  %v4225_v48 = vld [vmem:[%s33245_s22 + $0x20] sm:$0xff] }
 0x32a   : > { %24400 = vmatpush3.bf16.msra.mxu1 %v27463_v35  ;;  %v34153_v35 = vpack.c.bf16 %v27299_v27, %v27297_v26  ;;  %v34168_v26 = vand.u32 4294901760, %v27419_v0  ;;  %v34169_v27 = vand.u32 4294901760, %v27421_v41 }
 0x32b   : > { %21587 = vmatmul.mubr.f32.gmra.mrb[10].mxu1 %v2885_v30  ;;  %24401 = vmatprep.subr.bf16.mxu1 %v34149_v43  ;;  %v34161_v30 = vand.u32 4294901760, %v27285_v18  ;;  %v34166_v18 = vand.u32 4294901760, %v27394_v5 }
 0x32c   : > { %21621 = vmatprep.mubr.msk.f32.mxu1 %vm26566_vm2, %v34148_v1 }
 0x32d   : > { %v24465_v39 = vpack.c.bf16 %v34161_v30, %v34160_v49 }
 0x32e   : > { %24403 = vmatpush3.bf16.msra.mxu1 %v27473_v46  ;;  %v34154_v46 = vpack.c.bf16 %v27396_v6, %v27394_v5  ;;  %v34170_v5 = vand.u32 4294901760, %v27423_v47 }
 0x32f   : > { %24404 = vmatprep.subr.bf16.mxu1 %v34149_v43 }
 0x332   : > { %24406 = vmatpush3.bf16.msra.mxu1 %v27483_v58  ;;  %v34155_v58 = vpack.c.bf16 %v27421_v41, %v27419_v0  ;;  %v34173_v0 = vand.u32 4294901760, %v27430_v60 }
 0x333   : > { %24407 = vmatprep.subr.bf16.mxu1 %v34149_v43 }
 0x336   : > { %24409 = vmatpush3.bf16.msra.mxu1 %v27493_v53  ;;  %v34156_v53 = vpack.c.bf16 %v27425_v55, %v27423_v47  ;;  %v34176_v47 = vand.u32 4294901760, %v27437_v2  ;;  %v4223_v2 = vld [vmem:[%s33245_s22 + $0x10] sm:$0xff] }
 0x337   : > { %24410 = vmatprep.subr.bf16.mxu1 %v34149_v43 }
 0x33a   : > { %24412 = vmatpush3.bf16.msra.mxu1 %v27503_v22  ;;  %v34157_v22 = vpack.c.bf16 %v27430_v60, %v27428_v56  ;;  %v33288_v60 = vand.u32 4294901760, %v27524_v51  ;;  %v4237_v51 = vld [vmem:[%s33245_s22 + $0x80] sm:$0xff] }
 0x33b   : > { %24413 = vmatprep.subr.bf16.mxu1 %v34149_v43 }
 0x33e   : > { %24415 = vmatpush3.bf16.msra.mxu1 %v27514_v16  ;;  %v34158_v16 = vpack.c.bf16 %v27434_v54, %v27432_v3 }
 0x33f   : > { %24416 = vmatprep.subr.bf16.mxu1 %v34149_v43 }
 0x341   : > { %21622 = vmatmul.mubr.f32.vlgmr.msra.gmra.mrb[6].mxu1 %v27618_v20 }
 0x342   : > { %24418 = vmatpush3.bf16.msra.mxu1 %v34152_v50  ;;  %21624 = vmatprep.mubr.msk.f32.mxu1 %vm26566_vm2, %v34148_v1 }
 0x343   : > { %24419 = vmatprep.subr.bf16.mxu1 %v34149_v43 }
 0x345   : > { %21625 = vmatmul.mubr.f32.gmra.mrb[8].mxu1 %v27635_v33 }
 0x346   : > { %24421 = vmatpush3.bf16.msra.mxu1 %v34153_v35  ;;  %21627 = vmatprep.mubr.msk.f32.mxu1 %vm26566_vm2, %v34148_v1  ;;  %v34175_v35 = vand.u32 4294901760, %v27434_v54 }
 0x347   : > { %24422 = vmatprep.subr.bf16.mxu1 %v34149_v43 }
 0x349   : > { %21628 = vmatmul.mubr.f32.gmra.mrb[10].mxu1 %v27657_v21 }
 0x34a   : > { %24424 = vmatpush3.bf16.msra.mxu1 %v34154_v46  ;;  %21662 = vmatprep.mubr.msk.f32.mxu1 %vm26566_vm2, %v34148_v1 }
 0x34b   : > { %24425 = vmatprep.subr.bf16.mxu1 %v34149_v43 }
 0x34e   : > { %24427 = vmatpush3.bf16.msra.mxu1 %v34155_v58 }
 0x34f   : > { %24428 = vmatprep.subr.bf16.mxu1 %v34149_v43 }
 0x352   : > { %24430 = vmatpush3.bf16.msra.mxu1 %v34156_v53  ;;  %v4279_v53 = vsel %vm4271_vm12, %v4223_v2, 0 }
 0x353   : > { %24431 = vmatprep.subr.bf16.mxu1 %v34149_v43 }
 0x356   : > { %24433 = vmatpush3.bf16.msra.mxu1 %v34157_v22  ;;  %v4224_v22 = vld [vmem:[%s33245_s22 + $0x18] sm:$0xff] }
 0x357   : > { %24434 = vmatprep.subr.bf16.mxu1 %v34149_v43 }
 0x35a   : > { %24436 = vmatpush3.bf16.msra.mxu1 %v34158_v16 }
 0x35b   : > { %24437 = vmatprep.subr.bf16.mxu1 %v34149_v43 }
 0x35e   : > { %24439 = vmatpush3.bf16.msra.mxu1 %v34159_v36 }
 0x35f   : > { %24440 = vmatprep.subr.bf16.mxu1 %v34149_v43 }
 0x361   : > { %21663 = vmatmul.mubr.f32.vlgmr.msra.gmra.mrb[6].mxu1 %v27626_v12  ;;  %v34167_v12 = vand.u32 4294901760, %v27396_v6  ;;  %v34171_v6 = vand.u32 4294901760, %v27425_v55  ;;  %v34177_v55 = vand.u32 4294901760, %v27439_v44 }
 0x362   : > { %24442 = vmatpush3.bf16.msra.mxu1 %v27281_v15  ;;  %21665 = vmatprep.mubr.msk.f32.mxu1 %vm26566_vm2, %v34148_v1 }
 0x363   : > { %24443 = vmatprep.subr.bf16.mxu1 %v34149_v43  ;;  %v24471_v19 = vpack.c.bf16 %v34167_v12, %v34166_v18  ;;  %v24477_v50 = vpack.c.bf16 %v34171_v6, %v34170_v5  ;;  %v24486_v58 = vpack.c.bf16 %v34177_v55, %v34176_v47  ;;  %v4226_v18 = vld [vmem:[%s33245_s22 + $0x28] sm:$0xff] }
 0x364   : > { %v4288_v5 = vsel %vm4271_vm12, %v4226_v18, 0  ;;  %v34189_v55 = vld [vmem:[#allocation11_spill] sm:$0xff] }
 0x365   : > { %21666 = vmatmul.mubr.f32.gmra.mrb[8].mxu1 %v27643_v42  ;;  %v24474_v42 = vpack.c.bf16 %v34169_v27, %v34168_v26  ;;  %v4285_v26 = vsel %vm4271_vm12, %v4225_v48, 0 }
 0x366   : > { %24445 = vmatpush3.bf16.msra.mxu1 %v27295_v25  ;;  %21668 = vmatprep.mubr.msk.f32.mxu1 %vm26566_vm2, %v34148_v1 }
 0x367   : > { %24446 = vmatprep.subr.bf16.mxu1 %v34149_v43 }
 0x369   : > { %21669 = vmatmul.mubr.f32.gmra.mrb[10].mxu1 %v27666_v61  ;;  %v34172_v61 = vand.u32 4294901760, %v27428_v56  ;;  %v33289_v56 = vand.u32 4294901760, %v27518_v14 }
 0x36a   : > { %24448 = vmatpush3.bf16.msra.mxu1 %v27347_v57  ;;  %21703 = vmatprep.mubr.msk.f32.mxu1 %vm26566_vm2, %v34148_v1 }
 0x36b   : > { %24449 = vmatprep.subr.bf16.mxu1 %v34149_v43  ;;  %v24480_v41 = vpack.c.bf16 %v34173_v0, %v34172_v61  ;;  %v34187_v0 = vld [vmem:[#allocation10_spill] sm:$0xff] }
 0x36e   : > { %24451 = vmatpush3.bf16.msra.mxu1 %v27362_v62 }
 0x36f   : > { %24452 = vmatprep.subr.bf16.mxu1 %v34149_v43 }
 0x372   : > { %24454 = vmatpush3.bf16.msra.mxu1 %v27375_v13 }
 0x373   : > { %24455 = vmatprep.subr.bf16.mxu1 %v34149_v43 }
 0x376   : > { %24457 = vmatpush3.bf16.msra.mxu1 %v27385_v28 }
 0x377   : > { %24458 = vmatprep.subr.bf16.mxu1 %v34149_v43 }
 0x37a   : > { %24460 = vmatpush3.bf16.msra.mxu1 %v27399_v11 }
 0x37b   : > { %24461 = vmatprep.subr.bf16.mxu1 %v34149_v43 }
 0x37e   : > { %24463 = vmatpush3.bf16.msra.mxu1 %v27411_v40 }
 0x37f   : > { %24464 = vmatprep.subr.bf16.mxu1 %v34149_v43 }
 0x381   : > { %21704 = vmatmul.mubr.f32.vlgmr.msra.gmra.mrb[6].mxu1 %v34162_v63  ;;  %v4282_v63 = vsel %vm4271_vm12, %v4224_v22, 0 }
 0x382   : > { %24466 = vmatpush3.bf16.msra.mxu1 %v24465_v39  ;;  %21706 = vmatprep.mubr.msk.f32.mxu1 %vm26566_vm2, %v34148_v1  ;;  %v27885_v39 = vand.u32 4294901760, %v4279_v53 }
 0x383   : > { %24467 = vmatprep.subr.bf16.mxu1 %v34149_v43 }
 0x385   : > { %21707 = vmatmul.mubr.f32.gmra.mrb[8].mxu1 %v34165_v17  ;;  %v27894_v17 = vand.u32 4294901760, %v4282_v63 }
 0x386   : > { %24469 = vmatpush3.bf16.msra.mxu1 %v24468_v31  ;;  %21709 = vmatprep.mubr.msk.f32.mxu1 %vm26566_vm2, %v34148_v1 }
 0x387   : > { %24470 = vmatprep.subr.bf16.mxu1 %v34149_v43 }
 0x389   : > { %21710 = vmatmul.mubr.f32.gmra.mrb[10].mxu1 %v2883_v38  ;;  %v34174_v38 = vand.u32 4294901760, %v27432_v3  ;;  %v27821_v3 = vpack.c.bf16 %v33288_v60, %v33289_v56 }
 0x38a   : > { %24472 = vmatpush3.bf16.msra.mxu1 %v24471_v19  ;;  %21744 = vmatprep.mubr.msk.f32.mxu1 %vm26566_vm2, %v34148_v1  ;;  %v27900_v19 = vsub.f32 %v4279_v53, %v27885_v39 }
 0x38b   : > { %24473 = vmatprep.subr.bf16.mxu1 %v34149_v43  ;;  %v24483_v46 = vpack.c.bf16 %v34175_v35, %v34174_v38  ;;  %34178 = vst [vmem:[#allocation21_spill] sm:$0xff] %v27821_v3 }
 0x38c   : > { %34184 = vst [vmem:[#allocation23_spill] sm:$0xff] %v27900_v19  ;;  %v27912_v35 = vand.u32 4294901760, %v27900_v19 }
 0x38e   : > { %24475 = vmatpush3.bf16.msra.mxu1 %v24474_v42  ;;  %34188 = vst [vmem:[#allocation10_spill] sm:$0xff] %v27912_v35 }
 0x38f   : > { %24476 = vmatprep.subr.bf16.mxu1 %v34149_v43 }
 0x392   : > { %24478 = vmatpush3.bf16.msra.mxu1 %v24477_v50  ;;  %v27908_v50 = vsub.f32 %v4282_v63, %v27894_v17 }
 0x393   : > { %24479 = vmatprep.subr.bf16.mxu1 %v34149_v43 }
 0x394   : > { %34186 = vst [vmem:[#allocation25_spill] sm:$0xff] %v27908_v50 }
 0x396   : > { %24481 = vmatpush3.bf16.msra.mxu1 %v24480_v41 }
 0x397   : > { %24482 = vmatprep.subr.bf16.mxu1 %v34149_v43 }
 0x39a   : > { %24484 = vmatpush3.bf16.msra.mxu1 %v24483_v46  ;;  %v27914_v46 = vand.u32 4294901760, %v4285_v26 }
 0x39b   : > { %24485 = vmatprep.subr.bf16.mxu1 %v34149_v43 }
 0x39e   : > { %24487 = vmatpush3.bf16.msra.mxu1 %v24486_v58 }
 0x39f   : > { %24488 = vmatprep.subr.bf16.mxu1 %v34149_v43 }
 0x3a1   : > { %21745 = vmatmul.mubr.f32.vlgmr.msra.gmra.mrb[6].mxu1 %v27618_v20 }
 0x3a2   : > { %24490 = vmatpush3.bf16.msra.mxu1 %v27281_v15  ;;  %21747 = vmatprep.mubr.msk.f32.mxu1 %vm26566_vm2, %v34148_v1  ;;  %v34179_v15 = vld [vmem:[#allocation2_spill] sm:$0xff] }
 0x3a3   : > { %24491 = vmatprep.subr.bf16.mxu1 %v34149_v43 }
 0x3a5   : > { %21748 = vmatmul.mubr.f32.gmra.mrb[8].mxu1 %v27635_v33 }
 0x3a6   : > { %24493 = vmatpush3.bf16.msra.mxu1 %v27295_v25  ;;  %21750 = vmatprep.mubr.msk.f32.mxu1 %vm26566_vm2, %v34148_v1  ;;  %v34180_v25 = vld [vmem:[#allocation3_spill] sm:$0xff] }
 0x3a7   : > { %24494 = vmatprep.subr.bf16.mxu1 %v34149_v43 }
 0x3a9   : > { %21751 = vmatmul.mubr.f32.gmra.mrb[10].mxu1 %v27657_v21 }
 0x3aa   : > { %24496 = vmatpush3.bf16.msra.mxu1 %v27347_v57  ;;  %21785 = vmatprep.mubr.msk.f32.mxu1 %vm26566_vm2, %v34148_v1 }
 0x3ab   : > { %24497 = vmatprep.subr.bf16.mxu1 %v34149_v43 }
 0x3ae   : > { %24499 = vmatpush3.bf16.msra.mxu1 %v27362_v62 }
 0x3af   : > { %24500 = vmatprep.subr.bf16.mxu1 %v34149_v43 }
 0x3b2   : > { %24502 = vmatpush3.bf16.msra.mxu1 %v27375_v13 }
 0x3b3   : > { %24503 = vmatprep.subr.bf16.mxu1 %v34149_v43 }
 0x3b6   : > { %24505 = vmatpush3.bf16.msra.mxu1 %v27385_v28 }
 0x3b7   : > { %24506 = vmatprep.subr.bf16.mxu1 %v34149_v43 }
 0x3ba   : > { %24508 = vmatpush3.bf16.msra.mxu1 %v27399_v11 }
 0x3bb   : > { %24509 = vmatprep.subr.bf16.mxu1 %v34149_v43 }
 0x3be   : > { %24511 = vmatpush3.bf16.msra.mxu1 %v27411_v40  ;;  %v4222_v40 = vld [vmem:[%s33245_s22 + $0x8] sm:$0xff] }
 0x3bf   : > { %25274 = vmatprep.subr.mxu1 %v27197_v8  ;;  %v4221_v8 = vld [vmem:[%s33245_s22] sm:$0xff] }
 0x3c0   : > { %v4273_v57 = vsel %vm4271_vm12, %v4221_v8, 0 }
 0x3c1   : > { %21786 = vmatmul.mubr.f32.vlgmr.msra.gmra.mrb[6].mxu1 %v27618_v20  ;;  %v27862_v62 = vand.u32 4294901760, %v4273_v57  ;;  %v4276_v20 = vsel %vm4271_vm12, %v4222_v40, 0  ;;  %v27926_v40 = vand.u32 4294901760, %v27908_v50 }
 0x3c2   : > { %21788 = vmatprep.mubr.msk.f32.mxu1 %vm26566_vm2, %v34148_v1  ;;  %25275 = vmatpush1.msra.mxu1 %v34179_v15  ;;  %v27883_v16 = vand.u32 4294901760, %v4276_v20  ;;  %v27918_v15 = vand.u32 4294901760, %v4288_v5 }
 0x3c3   : > { %v27865_v13 = vsub.f32 %v4273_v57, %v27862_v62  ;;  %34191 = vst [vmem:[#allocation11_spill] sm:$0xff] %v27926_v40  ;;  %v4526_v10 = vsub.f32 %v27908_v50, %v27926_v40 }
 0x3c4   : > { %v27889_v7 = vsub.f32 %v4276_v20, %v27883_v16 }
 0x3c5   : > { %21789 = vmatmul.mubr.f32.gmra.mrb[8].mxu1 %v27635_v33  ;;  %34181 = vst [vmem:[#allocation2_spill] sm:$0xff] %v27865_v13  ;;  %v27868_v28 = vand.u32 4294901760, %v27865_v13 }
 0x3c6   : > { %21791 = vmatprep.mubr.msk.f32.mxu1 %vm26566_vm2, %v34148_v1  ;;  %34183 = vst [vmem:[#allocation22_spill] sm:$0xff] %v27889_v7  ;;  %v27904_v42 = vand.u32 4294901760, %v27889_v7 }
 0x3c7   : > { %34182 = vst [vmem:[#allocation3_spill] sm:$0xff] %v27868_v28  ;;  %v4496_v11 = vsub.f32 %v27865_v13, %v27868_v28 }
 0x3c8   : > { %34185 = vst [vmem:[#allocation24_spill] sm:$0xff] %v27904_v42  ;;  %v4506_v8 = vsub.f32 %v27889_v7, %v27904_v42 }
 0x3c9   : > { %21792 = vmatmul.mubr.f32.gmra.mrb[10].mxu1 %v27657_v21  ;;  %v4497_v54 = vand.u32 4294901760, %v4496_v11  ;;  %v34190_v11 = vld [vmem:[#allocation12_spill] sm:$0xff] }
 0x3ca   : > { %4085 = vmatprep.mubr.f32.mxu1 %v34148_v1 }
 0x3cb   : > { %21800 = vmatprep.mubr.f32.mxu0 %v4497_v54 }
 0x3cd   : > { %4087 = vmatmul.mubr.f32.vlgmr.msra.gmra.mrb[12].mxu1 %v34180_v25 }
 0x3ce   : > { %22286 = vmatprep.mubr.f32.mxu1 %v4497_v54 }
 0x494   : > { %v3491_v44 = vpop.f32.mrb[6].mxu1 }
 0x495   : > { %v3507_v33 = vmax.f32 %v3491_v44, 1e-20  ;;  %v21787_v21 = vpop.f32.mrb[7].mxu1  ;;  %v34192_v44 = vld [vmem:[#allocation4_spill] sm:$0xff] }
 0x496   : > { %v27935_v21 = vsub.f32 %v4285_v26, %v27914_v46 }
 0x497   : > { %26531 = vrcp.f32 %v3507_v33  ;;  %v4516_v33 = vsub.f32 %v27900_v19, %v27912_v35 }
 0x498   : > { %v3497_v36 = vpop.f32.mrb[8].mxu1  ;;  %34193 = vst [vmem:[#allocation12_spill] sm:$0xff] %v27935_v21 }
 0x499   : > { %v3508_v49 = vmax.f32 %v3497_v36, 1e-20  ;;  %v21790_v30 = vpop.f32.mrb[9].mxu1  ;;  %v34194_v36 = vld [vmem:[#allocation5_spill] sm:$0xff] }
 0x49a   : > { %v27945_v30 = vsub.f32 %v4288_v5, %v27918_v15  ;;  %v27957_v5 = vand.u32 4294901760, %v27935_v21 }
 0x49b   : > { %26533 = vrcp.f32 %v3508_v49 }
 0x49c   : > { %v3503_v31 = vpop.f32.mrb[10].mxu1  ;;  %34195 = vst [vmem:[#allocation4_spill] sm:$0xff] %v27945_v30  ;;  %34196 = vst [vmem:[#allocation5_spill] sm:$0xff] %v27957_v5 }
 0x49d   : > { %v21793_v12 = vpop.f32.mrb[11].mxu1  ;;  %v3509_v27 = vmax.f32 %v3503_v31, 1e-20  ;;  %v27947_v31 = vand.u32 4294901760, %v4506_v8 }
 0x49f   : > { %26535 = vrcp.f32 %v3509_v27 }
 0x4a0   : > { %v4088_v6 = vpop.f32.mrb[12].mxu1 }
 0x4a1   : > { %v26532_v61 = vpop.eup %26531  ;;  %v25288_v41 = vadd.f32 %v4088_v6, %v34187_v0  ;;  %v4090_v38 = vpop.f32.mrb[13].mxu1  ;;  %v4229_v0 = vld [vmem:[%s33245_s22 + $0x40] sm:$0xff] }
 0x4a2   : > { %v3513_v47 = vmul.f32 %v26532_v61, %v27609_v59  ;;  %v25289_v58 = vadd.f32 %v4090_v38, %v34189_v55  ;;  %v4227_v59 = vld [vmem:[%s33245_s22 + $0x30] sm:$0xff]  ;;  %v27954_v61 = vand.u32 4294901760, %v4516_v33  ;;  %v27965_v38 = vand.u32 4294901760, %v27945_v30 }
 0x4a3   : > { %v4099_v25 = vmul.f32 %v25288_v41, %v27546_v29  ;;  %v4291_v18 = vsel %vm4271_vm12, %v4227_v59, 0  ;;  %v4297_v59 = vsel %vm4271_vm12, %v4229_v0, 0  ;;  %v4234_v0 = vld [vmem:[%s33245_s22 + $0x68] sm:$0xff] }
 0x4a4   : > { %v4202_v57 = vmul.f32 %v27611_v23, %v3513_v47  ;;  %v4112_v54 = vmul.f32 %v25289_v58, %v34190_v11  ;;  %v4228_v23 = vld [vmem:[%s33245_s22 + $0x38] sm:$0xff]  ;;  %34197 = vst [vmem:[#allocation26_spill] sm:$0xff] %v27965_v38  ;;  %v27967_v47 = vand.u32 4294901760, %v4291_v18 }
 0x4a5   : > { %v26534_v2 = vpop.eup %26533  ;;  %v4102_v20 = vadd.f32 %v34192_v44, %v4099_v25  ;;  %v4294_v27 = vsel %vm4271_vm12, %v4228_v23, 0  ;;  %v34199_v23 = vld [vmem:[#allocation15_spill] sm:$0xff] }
 0x4a6   : > { %v4205_v53 = vsel %vm27604_vm14, %v4202_v57, 0.0  ;;  %v3514_v22 = vmul.f32 %v26534_v2, %v27621_v9  ;;  %v4115_v49 = vadd.f32 %v34194_v36, %v4112_v54  ;;  %v27970_v8 = vand.u32 4294901760, %v4294_v27 }
 0x4a7   : > { %v7008_v63 = vand.u32 4294901760, %v4205_v53  ;;  %v19388_v48 = vadd.f32 -0.5, %v4102_v20  ;;  %v34198_v20 = vld [vmem:[#allocation14_spill] sm:$0xff] }
 0x4a8   : > { %v4203_v12 = vmul.f32 %v27637_v37, %v3514_v22  ;;  %v19391_v26 = vadd.f32 -0.5, %v4115_v49 }
 0x4a9   : > { %v4121_v9 = vfloor.f32 %v19388_v48  ;;  %v7577_v6 = vsub.f32 %v4205_v53, %v7008_v63  ;;  %v26536_v2 = vpop.eup %26535 }
 0x4aa   : > { %v4206_v37 = vsel %vm27630_vm11, %v4203_v12, 0.0  ;;  %v4124_v41 = vfloor.f32 %v19391_v26  ;;  %v3515_v12 = vmul.f32 %v26536_v2, %v27649_v24  ;;  %v4232_v24 = vld [vmem:[%s33245_s22 + $0x58] sm:$0xff]  ;;  %v28009_v2 = vsub.f32 %v4291_v18, %v27967_v47  ;;  %v4233_v18 = vld [vmem:[%s33245_s22 + $0x60] sm:$0xff] }
 0x4ab   : > { %v7011_v55 = vand.u32 4294901760, %v4206_v37  ;;  %v4127_v58 = vsub.f32 %v19388_v48, %v4121_v9  ;;  %v4137_v25 = vadd.f32 %v27563_v4, %v4121_v9  ;;  %v7578_v54 = vand.u32 4294901760, %v7577_v6  ;;  %v4231_v4 = vld [vmem:[%s33245_s22 + $0x50] sm:$0xff] }
 0x4ac   : > { %v4130_v57 = vsub.f32 %v19391_v26, %v4124_v41  ;;  %v4144_v11 = vadd.f32 %v27577_v34, %v4124_v41  ;;  %v4300_v48 = vsel %vm4271_vm12, %v4230_v45, 0  ;;  %v4536_v45 = vsub.f32 %v27935_v21, %v27957_v5  ;;  %34205 = vst [vmem:[#allocation14_spill] sm:$0xff] %v28009_v2 }
 0x4ad   : > { %v4148_v44 = vsub.f32 1.0, %v4127_v58  ;;  %vm4171_vm13 = vcmp.ge.f32.partialorder %v4137_v25, 0.0  ;;  %vm4179_vm14 = vcmp.le.f32.partialorder %v4137_v25, %v34198_v20  ;;  %v27978_v33 = vpack.c.bf16 %v7011_v55, %v7008_v63 }
 0x4ae   : > { %vm4182_vm15 = vmand %vm4171_vm13, %vm4179_vm14  ;;  %v4160_v34 = vsub.f32 1.0, %v4130_v57  ;;  %vm4185_vm3 = vcmp.ge.f32.partialorder %v4144_v11, 0.0  ;;  %vm4195_vm5 = vcmp.le.f32.partialorder %v4144_v11, %v34199_v23  ;;  %v4210_v53 = vmul.f32 %v4144_v11, %v27546_v29  ;;  %v34204_v29 = vld [vmem:[#allocation13_spill] sm:$0xff] }
 0x4af   : > { %v4157_v36 = vsel %vm27584_vm6, %v4127_v58, %v4148_v44  ;;  %vm4188_vm8 = vmand %vm4182_vm15, %vm4185_vm3  ;;  %24537 = vmatprep.subr.bf16.mxu1 %v27978_v33  ;;  %v7584_v49 = vsub.f32 %v4206_v37, %v7011_v55  ;;  %v27988_v63 = vand.u32 4294901760, %v4297_v59  ;;  %v4303_v58 = vsel %vm4271_vm12, %v4231_v4, 0 }
 0x4b0   : > { %v4168_v9 = vsel %vm27588_vm7, %v4130_v57, %v4160_v34  ;;  %vm27994_vm9 = vmand %vm4188_vm8, %vm4195_vm5  ;;  %v4217_v41 = vadd.f32 %v34204_v29, %v4210_v53  ;;  %24539 = vmatpush3.bf16.msra.mxu1 %v27978_v33  ;;  %v7579_v55 = vsub.f32 %v7577_v6, %v7578_v54  ;;  %v28012_v20 = vsub.f32 %v4294_v27, %v27970_v8 }
 0x4b1   : > { %v4201_v37 = vmul.f32 %v4168_v9, %v4157_v36  ;;  %v7585_v11 = vand.u32 4294901760, %v7584_v49  ;;  %v28001_v44 = vpack.c.bf16 %v7584_v49, %v7577_v6  ;;  %v28014_v23 = vand.u32 4294901760, %v4300_v48 }
 0x4b2   : > { %v4220_v57 = vadd.f32 %v4217_v41, %v4137_v25  ;;  %34206 = vst [vmem:[#allocation15_spill] sm:$0xff] %v28012_v20  ;;  %v28020_v22 = vsub.f32 %v4297_v59, %v27988_v63  ;;  %v28022_v25 = vand.u32 4294901760, %v4303_v58  ;;  %v4306_v36 = vsel %vm4271_vm12, %v4232_v24, 0 }
 0x4b3   : > { %v4204_v4 = vmul.f32 %v4201_v37, %v3515_v12  ;;  %v7586_v34 = vsub.f32 %v7584_v49, %v7585_v11  ;;  %v28016_v6 = vpack.c.bf16 %v7585_v11, %v7578_v54  ;;  %v7580_v54 = vand.u32 4294901760, %v7579_v55 }
 0x4b4   : > { %v4423_v53 = vsel %vm2751_vm4, %v4220_v57, 0  ;;  %34208 = vst [vmem:[#allocation17_spill] sm:$0xff] %v28020_v22  ;;  %v4546_v59 = vsub.f32 %v27945_v30, %v27965_v38  ;;  %v28036_v9 = vand.u32 4294901760, %v28009_v2  ;;  %v28039_v29 = vand.u32 4294901760, %v28012_v20 }
 0x4b5   : > { %34207 = vst [vmem:[#allocation16_spill] sm:$0xff] %v28016_v6  ;;  %v4207_v27 = vsel %vm27994_vm9, %v4204_v4, 0.0  ;;  %v28030_v49 = vand.u32 4294901760, %v4423_v53  ;;  %v7587_v12 = vand.u32 4294901760, %v7586_v34  ;;  %v4309_v11 = vsel %vm4271_vm12, %v4233_v18, 0 }
 0x4b6   : > { %v7005_v26 = vsel %vm2751_vm4, %v4207_v27, 0  ;;  %34210 = vst [vmem:[#allocation27_spill] sm:$0xff] %v28036_v9  ;;  %34211 = vst [vmem:[#allocation28_spill] sm:$0xff] %v28039_v29  ;;  %v4527_v24 = vand.u32 4294901760, %v4526_v10  ;;  %v28056_v57 = vand.u32 4294901760, %v28020_v22  ;;  %v28059_v4 = vsub.f32 %v4300_v48, %v28014_v23 }
 0x4b7   : > { %34209 = vst [vmem:[#allocation13_spill] sm:$0xff] %v28030_v49  ;;  %v28044_v41 = vand.u32 4294901760, %v7005_v26  ;;  %21798 = vmatprep.subr.mxu0 %v28030_v49  ;;  %v24540_v37 = vpack.c.bf16 %v7587_v12, %v7580_v54  ;;  %v28048_v55 = vsub.f32 %v4423_v53, %v28030_v49  ;;  %v28061_v34 = vand.u32 4294901760, %v4306_v36  ;;  %v4235_v53 = vld [vmem:[%s33245_s22 + $0x70] sm:$0xff]  ;;  %v4236_v54 = vld [vmem:[%s33245_s22 + $0x78] sm:$0xff] }
 0x4b8   : > { %21799 = vmatpush3.msra.mxu0 %v28030_v49  ;;  %34213 = vst [vmem:[#allocation30_spill] sm:$0xff] %v28056_v57  ;;  %34214 = vst [vmem:[#allocation31_spill] sm:$0xff] %v28059_v4  ;;  %v28075_v27 = vsub.f32 %v4303_v58, %v28022_v25  ;;  %v4312_v48 = vsel %vm4271_vm12, %v4234_v0, 0  ;;  %v4537_v12 = vand.u32 4294901760, %v4536_v45  ;;  %v4547_v60 = vand.u32 4294901760, %v4546_v59 }
 0x4b9   : > { %34212 = vst [vmem:[#allocation29_spill] sm:$0xff] %v28044_v41  ;;  %21801 = vmatmul.mubr.f32.vlgmr.msra.gmra.mrb[18].mxu0 %v27947_v31  ;;  %24517 = vmatprep.subr.bf16.mxu0 %v27681_v32  ;;  %v28069_v18 = vand.u32 4294901760, %v28048_v55  ;;  %v28072_v10 = vsub.f32 %v7005_v26, %v28044_v41  ;;  %v4556_v56 = vsub.f32 %v28009_v2, %v28036_v9  ;;  %v28085_v26 = vand.u32 4294901760, %v4309_v11 }
 0x4ba   : > { %34216 = vst [vmem:[#allocation33_spill] sm:$0xff] %v28075_v27  ;;  %22284 = vmatprep.subr.mxu1 %v28044_v41  ;;  %24519 = vmatpush3.bf16.msra.mxu0 %v27681_v32  ;;  %v4566_v32 = vsub.f32 %v28012_v20, %v28039_v29  ;;  %v4315_v45 = vsel %vm4271_vm12, %v4235_v53, 0  ;;  %v4576_v59 = vsub.f32 %v28020_v22, %v28056_v57  ;;  %v28101_v1 = vand.u32 4294901760, %v28059_v4 }
 0x4bb   : > { %34215 = vst [vmem:[#allocation32_spill] sm:$0xff] %v28069_v18  ;;  %22285 = vmatpush3.msra.mxu1 %v28044_v41  ;;  %21803 = vmatprep.mubr.f32.mxu0 %v27954_v61  ;;  %v5011_v58 = vsub.f32 %v28048_v55, %v28069_v18  ;;  %v28092_v0 = vand.u32 4294901760, %v28072_v10  ;;  %v28103_v43 = vand.u32 4294901760, %v4312_v48  ;;  %v4318_v3 = vsel %vm4271_vm12, %v4236_v54, 0 }
 0x4bc   : > { %22287 = vmatmul.mubr.f32.vlgmr.msra.gmra.mrb[14].mxu1 %v27947_v31  ;;  %24541 = vmatprep.subr.bf16.mxu1 %v24540_v37  ;;  %34218 = vst [vmem:[#allocation35_spill] sm:$0xff] %v28101_v1  ;;  %v28112_v14 = vand.u32 4294901760, %v28075_v27  ;;  %v28115_v57 = vsub.f32 %v4306_v36, %v28061_v34  ;;  %v28119_v54 = vsub.f32 %v4309_v11, %v28085_v26  ;;  %v28121_v29 = vand.u32 4294901760, %v4315_v45 }
 0x4bd   : > { %34217 = vst [vmem:[#allocation34_spill] sm:$0xff] %v28092_v0  ;;  %24543 = vmatpush3.bf16.msra.mxu1 %v24540_v37  ;;  %21804 = vmatmul.mubr.f32.gmra.mrb[20].mxu0 %v4527_v24  ;;  %v5012_v53 = vand.u32 4294901760, %v5011_v58  ;;  %v7593_v31 = vsub.f32 %v28072_v10, %v28092_v0  ;;  %v4238_v37 = vld [vmem:[%s33245_s22 + $0x88] sm:$0xff]  ;;  %v4557_v9 = vand.u32 4294901760, %v4556_v56  ;;  %v28126_v38 = vand.u32 4294901760, %v4318_v3 }
 0x4be   : > { %34219 = vst [vmem:[#allocation36_spill] sm:$0xff] %v28112_v14  ;;  %34220 = vst [vmem:[#allocation37_spill] sm:$0xff] %v28115_v57  ;;  %22289 = vmatprep.mubr.f32.mxu1 %v27954_v61  ;;  %21806 = vmatprep.mubr.f32.mxu0 %v4537_v12  ;;  %v4321_v36 = vsel %vm4271_vm12, %v4237_v51, 0  ;;  %v4239_v61 = vld [vmem:[%s33245_s22 + $0x90] sm:$0xff]  ;;  %v4567_v11 = vand.u32 4294901760, %v4566_v32  ;;  %v4586_v5 = vsub.f32 %v28059_v4, %v28101_v1  ;;  %v4577_v56 = vand.u32 4294901760, %v4576_v59 }
 0x4bf   : > { %34221 = vst [vmem:[#allocation38_spill] sm:$0xff] %v28119_v54  ;;  %21879 = vmatprep.subr.mxu0 %v5012_v53  ;;  %v7594_v58 = vand.u32 4294901760, %v7593_v31  ;;  %v28135_v0 = vsub.f32 %v4312_v48, %v28103_v43  ;;  %v34223_v31 = vld [vmem:[#allocation19_spill] sm:$0xff]  ;;  %v4596_v51 = vsub.f32 %v28075_v27, %v28112_v14  ;;  %v28141_v40 = vand.u32 4294901760, %v28115_v57  ;;  %v4240_v14 = vld [vmem:[%s33245_s22 + $0x98] sm:$0xff] }
 0x4c0   : > { %22290 = vmatmul.mubr.f32.gmra.mrb[16].mxu1 %v4527_v24  ;;  %21880 = vmatpush3.msra.mxu0 %v5012_v53  ;;  %v4324_v24 = vsel %vm4271_vm12, %v4238_v37, 0  ;;  %v28145_v32 = vand.u32 4294901760, %v28119_v54  ;;  %v28148_v48 = vsub.f32 %v4315_v45, %v28121_v29  ;;  %v28150_v53 = vand.u32 4294901760, %v4321_v36  ;;  %v4246_v4 = vld [vmem:[%s33245_s22 + $0xc8] sm:$0xff] }
 0x4c1   : > { %34222 = vst [vmem:[#allocation39_spill] sm:$0xff] %v28135_v0  ;;  %21807 = vmatmul.mubr.f32.gmra.mrb[22].mxu0 %v4547_v60  ;;  %24521 = vmatprep.subr.bf16.mxu0 %v34223_v31  ;;  %34224 = vst [vmem:[#allocation19_spill] sm:$0xff] %v28141_v40  ;;  %v4327_v59 = vsel %vm4271_vm12, %v4239_v61, 0  ;;  %v28157_v37 = vsub.f32 %v4318_v3, %v28126_v38  ;;  %v4587_v45 = vand.u32 4294901760, %v4586_v5  ;;  %v28164_v1 = vand.u32 4294901760, %v28135_v0 }
 0x4c2   : > { %22365 = vmatprep.subr.mxu1 %v7594_v58  ;;  %22292 = vmatprep.mubr.f32.mxu1 %v4537_v12  ;;  %34225 = vst [vmem:[#allocation40_spill] sm:$0xff] %v28145_v32  ;;  %34226 = vst [vmem:[#allocation41_spill] sm:$0xff] %v28148_v48  ;;  %v4241_v12 = vld [vmem:[%s33245_s22 + $0xa0] sm:$0xff]  ;;  %v28166_v61 = vand.u32 4294901760, %v4324_v24  ;;  %v4606_v3 = vsub.f32 %v28115_v57, %v28141_v40  ;;  %v28170_v18 = vand.u32 4294901760, %v4327_v59  ;;  %v4330_v35 = vsel %vm4271_vm12, %v4240_v14, 0 }
 0x4c3   : > { %22366 = vmatpush3.msra.mxu1 %v7594_v58  ;;  %21809 = vmatprep.mubr.f32.mxu0 %v4557_v9  ;;  %34227 = vst [vmem:[#allocation42_spill] sm:$0xff] %v28157_v37  ;;  %34228 = vst [vmem:[#allocation43_spill] sm:$0xff] %v28164_v1  ;;  %v4597_v58 = vand.u32 4294901760, %v4596_v51  ;;  %v28176_v5 = vand.u32 4294901760, %v28148_v48  ;;  %v28179_v42 = vsub.f32 %v4321_v36, %v28150_v53  ;;  %v4242_v51 = vld [vmem:[%s33245_s22 + $0xa8] sm:$0xff]  ;;  %v28186_v40 = vand.u32 4294901760, %v28157_v37 }
 0x4c4   : > { %22293 = vmatmul.mubr.f32.gmra.mrb[18].mxu1 %v4547_v60  ;;  %24545 = vmatprep.subr.bf16.mxu1 %v28001_v44  ;;  %v4616_v60 = vsub.f32 %v28119_v54, %v28145_v32  ;;  %v4243_v14 = vld [vmem:[%s33245_s22 + $0xb0] sm:$0xff]  ;;  %v4626_v32 = vsub.f32 %v28135_v0, %v28164_v1  ;;  %v28194_v36 = vsub.f32 %v4324_v24, %v28166_v61  ;;  %v28196_v28 = vand.u32 4294901760, %v4330_v35 }
 0x4c5   : > { %21810 = vmatmul.mubr.f32.gmra.mrb[24].mxu0 %v4567_v11  ;;  %22295 = vmatprep.mubr.f32.mxu1 %v4557_v9  ;;  %34229 = vst [vmem:[#allocation44_spill] sm:$0xff] %v28176_v5  ;;  %34230 = vst [vmem:[#allocation45_spill] sm:$0xff] %v28179_v42  ;;  %v4333_v9 = vsel %vm4271_vm12, %v4241_v12, 0  ;;  %v4607_v12 = vand.u32 4294901760, %v4606_v3  ;;  %v28199_v54 = vsub.f32 %v4327_v59, %v28170_v18  ;;  %v4336_v27 = vsel %vm4271_vm12, %v4242_v51, 0 }
 0x4c6   : > { %21812 = vmatprep.mubr.f32.mxu0 %v4577_v56  ;;  %34231 = vst [vmem:[#allocation46_spill] sm:$0xff] %v28186_v40  ;;  %34232 = vst [vmem:[#allocation47_spill] sm:$0xff] %v28194_v36  ;;  %v28201_v57 = vand.u32 4294901760, %v4333_v9  ;;  %v4636_v1 = vsub.f32 %v28148_v48, %v28176_v5  ;;  %v28207_v24 = vand.u32 4294901760, %v28179_v42  ;;  %v4339_v0 = vsel %vm4271_vm12, %v4243_v14, 0  ;;  %v4245_v14 = vld [vmem:[%s33245_s22 + $0xc0] sm:$0xff] }
 0x4c7   : > { %34233 = vst [vmem:[#allocation48_spill] sm:$0xff] %v28199_v54  ;;  %v4646_v59 = vsub.f32 %v28157_v37, %v28186_v40  ;;  %v4627_v3 = vand.u32 4294901760, %v4626_v32  ;;  %v28216_v51 = vand.u32 4294901760, %v28194_v36  ;;  %v28221_v5 = vand.u32 4294901760, %v4336_v27 }
 0x4c8   : > { %22296 = vmatmul.mubr.f32.gmra.mrb[20].mxu1 %v4567_v11  ;;  %v4617_v11 = vand.u32 4294901760, %v4616_v60  ;;  %34234 = vst [vmem:[#allocation49_spill] sm:$0xff] %v28207_v24  ;;  %v28219_v60 = vsub.f32 %v4330_v35, %v28196_v28  ;;  %v28227_v48 = vand.u32 4294901760, %v28199_v54  ;;  %v28232_v32 = vand.u32 4294901760, %v4339_v0 }
 0x4c9   : > { %21813 = vmatmul.mubr.f32.gmra.mrb[26].mxu0 %v4587_v45  ;;  %22298 = vmatprep.mubr.f32.mxu1 %v4577_v56  ;;  %v4244_v56 = vld [vmem:[%s33245_s22 + $0xb8] sm:$0xff]  ;;  %34235 = vst [vmem:[#allocation50_spill] sm:$0xff] %v28216_v51  ;;  %v4637_v35 = vand.u32 4294901760, %v4636_v1  ;;  %v4656_v37 = vsub.f32 %v28179_v42, %v28207_v24  ;;  %v4345_v22 = vsel %vm4271_vm12, %v4245_v14, 0  ;;  %v4247_v24 = vld [vmem:[%s33245_s22 + $0xd0] sm:$0xff] }
 0x4ca   : > { %21815 = vmatprep.mubr.f32.mxu0 %v4597_v58  ;;  %34236 = vst [vmem:[#allocation51_spill] sm:$0xff] %v28219_v60  ;;  %34237 = vst [vmem:[#allocation52_spill] sm:$0xff] %v28227_v48  ;;  %v4342_v40 = vsel %vm4271_vm12, %v4244_v56, 0  ;;  %v28244_v20 = vand.u32 4294901760, %v28219_v60  ;;  %v28247_v56 = vsub.f32 %v4336_v27, %v28221_v5  ;;  %v28260_v14 = vsub.f32 %v4339_v0, %v28232_v32 }
 0x4cb   : > { %v28249_v1 = vand.u32 4294901760, %v4342_v40  ;;  %v4348_v27 = vsel %vm4271_vm12, %v4246_v4, 0  ;;  %v4351_v42 = vsel %vm4271_vm12, %v4247_v24, 0 }
 0x4cc   : > { %22299 = vmatmul.mubr.f32.gmra.mrb[22].mxu1 %v4587_v45  ;;  %v28230_v45 = vsub.f32 %v4333_v9, %v28201_v57  ;;  %v4666_v9 = vsub.f32 %v28194_v36, %v28216_v51  ;;  %34239 = vst [vmem:[#allocation54_spill] sm:$0xff] %v28244_v20  ;;  %34240 = vst [vmem:[#allocation55_spill] sm:$0xff] %v28247_v56  ;;  %v4657_v51 = vand.u32 4294901760, %v4656_v37  ;;  %v28263_v36 = vand.u32 4294901760, %v4345_v22 }
 0x4cd   : > { %21816 = vmatmul.mubr.f32.gmra.mrb[28].mxu0 %v4607_v12  ;;  %22301 = vmatprep.mubr.f32.mxu1 %v4597_v58  ;;  %v4647_v58 = vand.u32 4294901760, %v4646_v59  ;;  %34242 = vst [vmem:[#allocation57_spill] sm:$0xff] %v28260_v14  ;;  %v28273_v0 = vand.u32 4294901760, %v28247_v56  ;;  %v28276_v4 = vsub.f32 %v4342_v40, %v28249_v1  ;;  %v28278_v37 = vand.u32 4294901760, %v4348_v27 }
 0x4ce   : > { %34238 = vst [vmem:[#allocation53_spill] sm:$0xff] %v28230_v45  ;;  %21818 = vmatprep.mubr.f32.mxu0 %v4617_v11  ;;  %v28257_v59 = vand.u32 4294901760, %v28230_v45  ;;  %v4686_v2 = vsub.f32 %v28219_v60, %v28244_v20  ;;  %v28290_v40 = vand.u32 4294901760, %v4351_v42 }
 0x4cf   : > { %34243 = vst [vmem:[#allocation58_spill] sm:$0xff] %v28273_v0  ;;  %34244 = vst [vmem:[#allocation59_spill] sm:$0xff] %v28276_v4  ;;  %v28300_v20 = vand.u32 4294901760, %v28276_v4 }
 0x4d0   : > { %22302 = vmatmul.mubr.f32.gmra.mrb[24].mxu1 %v4607_v12  ;;  %v4676_v12 = vsub.f32 %v28199_v54, %v28227_v48  ;;  %34241 = vst [vmem:[#allocation56_spill] sm:$0xff] %v28257_v59  ;;  %v4249_v48 = vld [vmem:[%s33245_s22 + $0xe0] sm:$0xff]  ;;  %v4667_v54 = vand.u32 4294901760, %v4666_v9  ;;  %v4696_v6 = vsub.f32 %v28230_v45, %v28257_v59  ;;  %v28288_v9 = vsub.f32 %v4345_v22, %v28263_v36 }
 0x4d1   : > { %21819 = vmatmul.mubr.f32.gmra.mrb[30].mxu0 %v4627_v3  ;;  %22304 = vmatprep.mubr.f32.mxu1 %v4617_v11  ;;  %v4248_v11 = vld [vmem:[%s33245_s22 + $0xd8] sm:$0xff]  ;;  %v4706_v59 = vsub.f32 %v28247_v56, %v28273_v0  ;;  %34247 = vst [vmem:[#allocation62_spill] sm:$0xff] %v28300_v20  ;;  %v28303_v22 = vsub.f32 %v4348_v27, %v28278_v37 }
 0x4d2   : > { %21821 = vmatprep.mubr.f32.mxu0 %v4637_v35  ;;  %v4677_v24 = vand.u32 4294901760, %v4676_v12  ;;  %34246 = vst [vmem:[#allocation61_spill] sm:$0xff] %v28288_v9  ;;  %v4354_v30 = vsel %vm4271_vm12, %v4248_v11, 0  ;;  %v4250_v12 = vld [vmem:[%s33245_s22 + $0xe8] sm:$0xff]  ;;  %v4251_v11 = vld [vmem:[%s33245_s22 + $0xf0] sm:$0xff]  ;;  %v4697_v0 = vand.u32 4294901760, %v4696_v6  ;;  %v28319_v21 = vsub.f32 %v4351_v42, %v28290_v40 }
 0x4d3   : > { %34248 = vst [vmem:[#allocation63_spill] sm:$0xff] %v28303_v22  ;;  %v28308_v45 = vand.u32 4294901760, %v4354_v30  ;;  %v28316_v27 = vand.u32 4294901760, %v28288_v9  ;;  %v4707_v6 = vand.u32 4294901760, %v4706_v59 }
 0x4d4   : > { %22305 = vmatmul.mubr.f32.gmra.mrb[26].mxu1 %v4627_v3  ;;  %v28285_v3 = vand.u32 4294901760, %v28260_v14  ;;  %34250 = vst [vmem:[#allocation65_spill] sm:$0xff] %v28319_v21 }
 0x4d5   : > { %21822 = vmatmul.mubr.f32.gmra.mrb[32].mxu0 %v4647_v58  ;;  %22307 = vmatprep.mubr.f32.mxu1 %v4637_v35  ;;  %v4357_v35 = vsel %vm4271_vm12, %v4249_v48, 0  ;;  %v4687_v48 = vand.u32 4294901760, %v4686_v2  ;;  %34249 = vst [vmem:[#allocation64_spill] sm:$0xff] %v28316_v27  ;;  %v4252_v2 = vld [vmem:[%s33245_s22 + $0xf8] sm:$0xff]  ;;  %v28336_v52 = vsub.f32 %v4354_v30, %v28308_v45  ;;  %v4254_v30 = vld [vmem:[%s33245_s22 + $0x108] sm:$0xff] }
 0x4d6   : > { %34245 = vst [vmem:[#allocation60_spill] sm:$0xff] %v28285_v3  ;;  %21824 = vmatprep.mubr.f32.mxu0 %v4657_v51  ;;  %v28310_v60 = vand.u32 4294901760, %v4357_v35  ;;  %v4716_v56 = vsub.f32 %v28260_v14, %v28285_v3  ;;  %v4726_v3 = vsub.f32 %v28276_v4, %v28300_v20  ;;  %v28331_v14 = vand.u32 4294901760, %v28303_v22 }
 0x4d7   : > { %34252 = vst [vmem:[#allocation67_spill] sm:$0xff] %v28336_v52  ;;  %v4736_v20 = vsub.f32 %v28288_v9, %v28316_v27  ;;  %v28346_v4 = vand.u32 4294901760, %v28319_v21  ;;  %v28366_v9 = vand.u32 4294901760, %v28336_v52 }
 0x4d8   : > { %22308 = vmatmul.mubr.f32.gmra.mrb[28].mxu1 %v4647_v58  ;;  %v4360_v58 = vsel %vm4271_vm12, %v4250_v12, 0  ;;  %v4363_v12 = vsel %vm4271_vm12, %v4251_v11, 0  ;;  %34251 = vst [vmem:[#allocation66_spill] sm:$0xff] %v28331_v14  ;;  %v28339_v41 = vsub.f32 %v4357_v35, %v28310_v60  ;;  %v4366_v11 = vsel %vm4271_vm12, %v4252_v2, 0 }
 0x4d9   : > { %21825 = vmatmul.mubr.f32.gmra.mrb[34].mxu0 %v4667_v54  ;;  %22310 = vmatprep.mubr.f32.mxu1 %v4657_v51  ;;  %v4253_v51 = vld [vmem:[%s33245_s22 + $0x100] sm:$0xff]  ;;  %v28333_v42 = vand.u32 4294901760, %v4360_v58  ;;  %v4717_v59 = vand.u32 4294901760, %v4716_v56  ;;  %34254 = vst [vmem:[#allocation69_spill] sm:$0xff] %v28346_v4  ;;  %v28348_v50 = vand.u32 4294901760, %v4363_v12  ;;  %v28356_v2 = vand.u32 4294901760, %v4366_v11 }
 0x4da   : > { %21827 = vmatprep.mubr.f32.mxu0 %v4677_v24  ;;  %34253 = vst [vmem:[#allocation68_spill] sm:$0xff] %v28339_v41  ;;  %v4746_v27 = vsub.f32 %v28303_v22, %v28331_v14  ;;  %34258 = vst [vmem:[#allocation73_spill] sm:$0xff] %v28366_v9  ;;  %v4756_v49 = vsub.f32 %v28319_v21, %v28346_v4  ;;  %v4256_v14 = vld [vmem:[%s33245_s22 + $0x118] sm:$0xff] }
 0x4db   : > { %v28354_v35 = vsub.f32 %v4360_v58, %v28333_v42  ;;  %34256 = vst [vmem:[#allocation71_spill] sm:$0xff] %v28356_v2  ;;  %v4737_v58 = vand.u32 4294901760, %v4736_v20  ;;  %v28375_v19 = vsub.f32 %v4363_v12, %v28348_v50  ;;  %v4257_v12 = vld [vmem:[%s33245_s22 + $0x120] sm:$0xff]  ;;  %v4378_v13 = vsel %vm4271_vm12, %v4256_v14, 0  ;;  %v4259_v14 = vld [vmem:[%s33245_s22 + $0x130] sm:$0xff] }
 0x4dc   : > { %22311 = vmatmul.mubr.f32.gmra.mrb[30].mxu1 %v4667_v54  ;;  %v4369_v54 = vsel %vm4271_vm12, %v4253_v51, 0  ;;  %v4255_v51 = vld [vmem:[%s33245_s22 + $0x110] sm:$0xff] }
 0x4dd   : > { %21828 = vmatmul.mubr.f32.gmra.mrb[36].mxu0 %v4687_v48  ;;  %22313 = vmatprep.mubr.f32.mxu1 %v4677_v24  ;;  %v4727_v24 = vand.u32 4294901760, %v4726_v3  ;;  %34255 = vst [vmem:[#allocation70_spill] sm:$0xff] %v28354_v35  ;;  %v28358_v56 = vand.u32 4294901760, %v4369_v54  ;;  %v28369_v3 = vand.u32 4294901760, %v28339_v41  ;;  %34260 = vst [vmem:[#allocation75_spill] sm:$0xff] %v28375_v19  ;;  %v28382_v22 = vand.u32 4294901760, %v28354_v35 }
 0x4de   : > { %21830 = vmatprep.mubr.f32.mxu0 %v4697_v0 }
 0x4df   : > { %34257 = vst [vmem:[#allocation72_spill] sm:$0xff] %v28358_v56  ;;  %34259 = vst [vmem:[#allocation74_spill] sm:$0xff] %v28369_v3  ;;  %v28388_v20 = vsub.f32 %v4369_v54, %v28358_v56  ;;  %v4776_v21 = vsub.f32 %v28339_v41, %v28369_v3  ;;  %v28400_v54 = vand.u32 4294901760, %v28375_v19  ;;  %v4381_v56 = vsel %vm4271_vm12, %v4257_v12, 0 }
 0x4e0   : > { %22314 = vmatmul.mubr.f32.gmra.mrb[32].mxu1 %v4687_v48  ;;  %v4372_v48 = vsel %vm4271_vm12, %v4254_v30, 0  ;;  %34261 = vst [vmem:[#allocation76_spill] sm:$0xff] %v28382_v22  ;;  %v28385_v30 = vsub.f32 %v4366_v11, %v28356_v2  ;;  %v4757_v11 = vand.u32 4294901760, %v4756_v49  ;;  %v28423_v41 = vand.u32 4294901760, %v4378_v13 }
 0x4e1   : > { %21831 = vmatmul.mubr.f32.gmra.mrb[38].mxu0 %v4707_v6  ;;  %22316 = vmatprep.mubr.f32.mxu1 %v4697_v0  ;;  %v4375_v0 = vsel %vm4271_vm12, %v4255_v51, 0  ;;  %34263 = vst [vmem:[#allocation78_spill] sm:$0xff] %v28388_v20  ;;  %v28390_v4 = vand.u32 4294901760, %v4372_v48  ;;  %v4747_v51 = vand.u32 4294901760, %v4746_v27  ;;  %34265 = vst [vmem:[#allocation80_spill] sm:$0xff] %v28400_v54  ;;  %v4258_v27 = vld [vmem:[%s33245_s22 + $0x128] sm:$0xff] }
 0x4e2   : > { %21833 = vmatprep.mubr.f32.mxu0 %v4717_v59  ;;  %34262 = vst [vmem:[#allocation77_spill] sm:$0xff] %v28385_v30  ;;  %v28402_v7 = vand.u32 4294901760, %v4375_v0  ;;  %v28412_v3 = vand.u32 4294901760, %v28385_v30  ;;  %v28415_v49 = vand.u32 4294901760, %v28388_v20  ;;  %34270 = vst [vmem:[#allocation85_spill] sm:$0xff] %v28423_v41 }
 0x4e3   : > { %34264 = vst [vmem:[#allocation79_spill] sm:$0xff] %v28390_v4 }
 0x4e4   : > { %22317 = vmatmul.mubr.f32.gmra.mrb[34].mxu1 %v4707_v6  ;;  %v4766_v6 = vsub.f32 %v28336_v52, %v28366_v9  ;;  %34266 = vst [vmem:[#allocation81_spill] sm:$0xff] %v28402_v7  ;;  %34267 = vst [vmem:[#allocation82_spill] sm:$0xff] %v28412_v3  ;;  %v28418_v9 = vsub.f32 %v4372_v48, %v28390_v4  ;;  %v28430_v52 = vand.u32 4294901760, %v4381_v56  ;;  %v4384_v48 = vsel %vm4271_vm12, %v4258_v27, 0  ;;  %v4260_v4 = vld [vmem:[%s33245_s22 + $0x138] sm:$0xff] }
 0x4e5   : > { %21834 = vmatmul.mubr.f32.gmra.mrb[40].mxu0 %v4727_v24  ;;  %22319 = vmatprep.mubr.f32.mxu1 %v4717_v59  ;;  %v4786_v59 = vsub.f32 %v28354_v35, %v28382_v22  ;;  %34268 = vst [vmem:[#allocation83_spill] sm:$0xff] %v28415_v49  ;;  %v4796_v22 = vsub.f32 %v28375_v19, %v28400_v54 }
 0x4e6   : > { %21836 = vmatprep.mubr.f32.mxu0 %v4737_v58  ;;  %34269 = vst [vmem:[#allocation84_spill] sm:$0xff] %v28418_v9  ;;  %v4767_v12 = vand.u32 4294901760, %v4766_v6  ;;  %v28428_v35 = vsub.f32 %v4375_v0, %v28402_v7  ;;  %34272 = vst [vmem:[#allocation87_spill] sm:$0xff] %v28430_v52  ;;  %v4806_v0 = vsub.f32 %v28385_v30, %v28412_v3  ;;  %v28445_v27 = vand.u32 4294901760, %v28418_v9 }
 0x4e7   : > { %v4787_v6 = vand.u32 4294901760, %v4786_v59  ;;  %v4816_v54 = vsub.f32 %v28388_v20, %v28415_v49  ;;  %v28448_v19 = vsub.f32 %v4378_v13, %v28423_v41  ;;  %v28450_v7 = vand.u32 4294901760, %v4384_v48  ;;  %v4262_v13 = vld [vmem:[%s33245_s22 + $0x148] sm:$0xff] }
 0x4e8   : > { %22320 = vmatmul.mubr.f32.gmra.mrb[36].mxu1 %v4727_v24  ;;  %v4777_v24 = vand.u32 4294901760, %v4776_v21  ;;  %34271 = vst [vmem:[#allocation86_spill] sm:$0xff] %v28428_v35  ;;  %v4261_v21 = vld [vmem:[%s33245_s22 + $0x140] sm:$0xff]  ;;  %34273 = vst [vmem:[#allocation88_spill] sm:$0xff] %v28445_v27  ;;  %v4797_v59 = vand.u32 4294901760, %v4796_v22  ;;  %v28455_v3 = vand.u32 4294901760, %v28428_v35  ;;  %v28458_v49 = vsub.f32 %v4381_v56, %v28430_v52 }
 0x4e9   : > { %21837 = vmatmul.mubr.f32.gmra.mrb[42].mxu0 %v4747_v51  ;;  %22322 = vmatprep.mubr.f32.mxu1 %v4737_v58  ;;  %v4387_v58 = vsel %vm4271_vm12, %v4259_v14, 0  ;;  %34274 = vst [vmem:[#allocation89_spill] sm:$0xff] %v28448_v19  ;;  %34275 = vst [vmem:[#allocation90_spill] sm:$0xff] %v28450_v7  ;;  %v4390_v14 = vsel %vm4271_vm12, %v4260_v4, 0  ;;  %v4263_v4 = vld [vmem:[%s33245_s22 + $0x150] sm:$0xff]  ;;  %v4826_v22 = vsub.f32 %v28418_v9, %v28445_v27  ;;  %v4817_v56 = vand.u32 4294901760, %v4816_v54 }
 0x4ea   : > { %21839 = vmatprep.mubr.f32.mxu0 %v4757_v11  ;;  %34276 = vst [vmem:[#allocation91_spill] sm:$0xff] %v28455_v3  ;;  %34277 = vst [vmem:[#allocation92_spill] sm:$0xff] %v28458_v49  ;;  %v28460_v20 = vand.u32 4294901760, %v4387_v58  ;;  %v28475_v52 = vand.u32 4294901760, %v28448_v19  ;;  %v28478_v41 = vsub.f32 %v4384_v48, %v28450_v7  ;;  %v4396_v2 = vsel %vm4271_vm12, %v4262_v13, 0 }
 0x4eb   : > { %v4399_v54 = vsel %vm4271_vm12, %v4263_v4, 0  ;;  %v4827_v4 = vand.u32 4294901760, %v4826_v22  ;;  %v4266_v22 = vld [vmem:[%s33245_s22 + $0x168] sm:$0xff] }
 0x4ec   : > { %22323 = vmatmul.mubr.f32.gmra.mrb[38].mxu1 %v4747_v51  ;;  %v4393_v51 = vsel %vm4271_vm12, %v4261_v21, 0  ;;  %34278 = vst [vmem:[#allocation93_spill] sm:$0xff] %v28460_v20  ;;  %v28470_v21 = vand.u32 4294901760, %v4390_v14  ;;  %34281 = vst [vmem:[#allocation96_spill] sm:$0xff] %v28475_v52  ;;  %v28487_v27 = vsub.f32 %v4387_v58, %v28460_v20  ;;  %v4265_v58 = vld [vmem:[%s33245_s22 + $0x160] sm:$0xff]  ;;  %v4408_v7 = vsel %vm4271_vm12, %v4266_v22, 0 }
 0x4ed   : > { %21840 = vmatmul.mubr.f32.gmra.mrb[44].mxu0 %v4767_v12  ;;  %22325 = vmatprep.mubr.f32.mxu1 %v4757_v11  ;;  %v4807_v11 = vand.u32 4294901760, %v4806_v0  ;;  %v28472_v30 = vand.u32 4294901760, %v4393_v51  ;;  %34282 = vst [vmem:[#allocation97_spill] sm:$0xff] %v28478_v41  ;;  %v28484_v0 = vand.u32 4294901760, %v28458_v49  ;;  %v4269_v22 = vld [vmem:[%s33245_s22 + $0x180] sm:$0xff] }
 0x4ee   : > { %21842 = vmatprep.mubr.f32.mxu0 %v4777_v24  ;;  %34279 = vst [vmem:[#allocation94_spill] sm:$0xff] %v28470_v21  ;;  %34284 = vst [vmem:[#allocation99_spill] sm:$0xff] %v28487_v27  ;;  %v28494_v48 = vsub.f32 %v4390_v14, %v28470_v21  ;;  %v28509_v14 = vand.u32 4294901760, %v4399_v54 }
 0x4ef   : > { %34280 = vst [vmem:[#allocation95_spill] sm:$0xff] %v28472_v30  ;;  %34283 = vst [vmem:[#allocation98_spill] sm:$0xff] %v28484_v0  ;;  %v28497_v13 = vsub.f32 %v4393_v51, %v28472_v30  ;;  %v4856_v9 = vsub.f32 %v28458_v49, %v28484_v0  ;;  %v28514_v30 = vand.u32 4294901760, %v28487_v27 }
 0x4f0   : > { %22326 = vmatmul.mubr.f32.gmra.mrb[40].mxu1 %v4767_v12  ;;  %v4836_v12 = vsub.f32 %v28428_v35, %v28455_v3  ;;  %34285 = vst [vmem:[#allocation100_spill] sm:$0xff] %v28494_v48  ;;  %v28499_v3 = vand.u32 4294901760, %v4396_v2  ;;  %v4846_v35 = vsub.f32 %v28448_v19, %v28475_v52  ;;  %34289 = vst [vmem:[#allocation104_spill] sm:$0xff] %v28509_v14  ;;  %v28522_v52 = vand.u32 4294901760, %v28494_v48 }
 0x4f1   : > { %21843 = vmatmul.mubr.f32.gmra.mrb[46].mxu0 %v4787_v6  ;;  %22328 = vmatprep.mubr.f32.mxu1 %v4777_v24  ;;  %v4264_v24 = vld [vmem:[%s33245_s22 + $0x158] sm:$0xff]  ;;  %34286 = vst [vmem:[#allocation101_spill] sm:$0xff] %v28497_v13  ;;  %34290 = vst [vmem:[#allocation105_spill] sm:$0xff] %v28514_v30  ;;  %v4857_v20 = vand.u32 4294901760, %v4856_v9 }
 0x4f2   : > { %21845 = vmatprep.mubr.f32.mxu0 %v4797_v59  ;;  %34287 = vst [vmem:[#allocation102_spill] sm:$0xff] %v28499_v3  ;;  %v4837_v51 = vand.u32 4294901760, %v4836_v12  ;;  %v4402_v21 = vsel %vm4271_vm12, %v4264_v24, 0  ;;  %34291 = vst [vmem:[#allocation106_spill] sm:$0xff] %v28522_v52  ;;  %v28525_v12 = vand.u32 4294901760, %v28497_v13  ;;  %v28528_v0 = vsub.f32 %v4396_v2, %v28499_v3  ;;  %v4267_v24 = vld [vmem:[%s33245_s22 + $0x170] sm:$0xff] }
 0x4f3   : > { %v28538_v19 = vand.u32 4294901760, %v4402_v21  ;;  %v4876_v2 = vsub.f32 %v28487_v27, %v28514_v30 }
 0x4f4   : > { %22329 = vmatmul.mubr.f32.gmra.mrb[42].mxu1 %v4787_v6  ;;  %v28507_v6 = vand.u32 4294901760, %v28478_v41  ;;  %34292 = vst [vmem:[#allocation107_spill] sm:$0xff] %v28525_v12  ;;  %34293 = vst [vmem:[#allocation108_spill] sm:$0xff] %v28528_v0  ;;  %v4896_v9 = vsub.f32 %v28497_v13, %v28525_v12 }
 0x4f5   : > { %21846 = vmatmul.mubr.f32.gmra.mrb[48].mxu0 %v4807_v11  ;;  %22331 = vmatprep.mubr.f32.mxu1 %v4797_v59  ;;  %v4405_v59 = vsel %vm4271_vm12, %v4265_v58, 0  ;;  %v4847_v58 = vand.u32 4294901760, %v4846_v35  ;;  %34295 = vst [vmem:[#allocation110_spill] sm:$0xff] %v28538_v19  ;;  %v4268_v35 = vld [vmem:[%s33245_s22 + $0x178] sm:$0xff]  ;;  %v4877_v12 = vand.u32 4294901760, %v4876_v2 }
 0x4f6   : > { %34288 = vst [vmem:[#allocation103_spill] sm:$0xff] %v28507_v6  ;;  %21848 = vmatprep.mubr.f32.mxu0 %v4817_v56  ;;  %v4866_v49 = vsub.f32 %v28478_v41, %v28507_v6  ;;  %v28542_v3 = vand.u32 4294901760, %v4405_v59  ;;  %v28554_v6 = vand.u32 4294901760, %v28528_v0  ;;  %v4414_v27 = vsel %vm4271_vm12, %v4268_v35, 0 }
 0x4f7   : > { %v4897_v41 = vand.u32 4294901760, %v4896_v9 }
 0x4f8   : > { %22332 = vmatmul.mubr.f32.gmra.mrb[44].mxu1 %v4807_v11  ;;  %v28536_v11 = vsub.f32 %v4399_v54, %v28509_v14  ;;  %34296 = vst [vmem:[#allocation111_spill] sm:$0xff] %v28542_v3  ;;  %v4886_v54 = vsub.f32 %v28494_v48, %v28522_v52  ;;  %34297 = vst [vmem:[#allocation112_spill] sm:$0xff] %v28554_v6  ;;  %v28565_v52 = vand.u32 4294901760, %v4408_v7 }
 0x4f9   : > { %21849 = vmatmul.mubr.f32.gmra.mrb[50].mxu0 %v4827_v4  ;;  %22334 = vmatprep.mubr.f32.mxu1 %v4817_v56  ;;  %v4411_v56 = vsel %vm4271_vm12, %v4267_v24, 0  ;;  %v4867_v24 = vand.u32 4294901760, %v4866_v49  ;;  %v28568_v13 = vsub.f32 %v4405_v59, %v28542_v3  ;;  %v4270_v49 = vld [vmem:[%s33245_s22 + $0x188] sm:$0xff] }
 0x4fa   : > { %34294 = vst [vmem:[#allocation109_spill] sm:$0xff] %v28536_v11  ;;  %21851 = vmatprep.mubr.f32.mxu0 %v4837_v51  ;;  %v28560_v30 = vand.u32 4294901760, %v28536_v11  ;;  %34299 = vst [vmem:[#allocation114_spill] sm:$0xff] %v28565_v52  ;;  %v28570_v48 = vand.u32 4294901760, %v4411_v56  ;;  %v28585_v35 = vsub.f32 %v4408_v7, %v28565_v52 }
 0x4fb   : > { %34300 = vst [vmem:[#allocation115_spill] sm:$0xff] %v28568_v13 }
 0x4fc   : > { %22335 = vmatmul.mubr.f32.gmra.mrb[46].mxu1 %v4827_v4  ;;  %34298 = vst [vmem:[#allocation113_spill] sm:$0xff] %v28560_v30  ;;  %v28563_v4 = vsub.f32 %v4402_v21, %v28538_v19  ;;  %34301 = vst [vmem:[#allocation116_spill] sm:$0xff] %v28570_v48  ;;  %v4887_v21 = vand.u32 4294901760, %v4886_v54  ;;  %v4906_v19 = vsub.f32 %v28528_v0, %v28554_v6  ;;  %v28601_v6 = vand.u32 4294901760, %v28585_v35 }
 0x4fd   : > { %21852 = vmatmul.mubr.f32.gmra.mrb[52].mxu0 %v4847_v58  ;;  %22337 = vmatprep.mubr.f32.mxu1 %v4837_v51  ;;  %v4417_v51 = vsel %vm4271_vm12, %v4269_v22, 0  ;;  %v4916_v59 = vsub.f32 %v28536_v11, %v28560_v30  ;;  %v28587_v22 = vand.u32 4294901760, %v4414_v27  ;;  %v28593_v54 = vsub.f32 %v4411_v56, %v28570_v48 }
 0x4fe   : > { %21854 = vmatprep.mubr.f32.mxu0 %v4857_v20  ;;  %v28582_v2 = vand.u32 4294901760, %v28563_v4  ;;  %v28595_v9 = vand.u32 4294901760, %v4417_v51  ;;  %v4907_v30 = vand.u32 4294901760, %v4906_v19 }
 0x4ff   : > { %34303 = vst [vmem:[#allocation118_spill] sm:$0xff] %v28587_v22  ;;  %v28604_v11 = vsub.f32 %v4414_v27, %v28587_v22  ;;  %v4917_v56 = vand.u32 4294901760, %v4916_v59  ;;  %v28611_v19 = vand.u32 4294901760, %v28593_v54  ;;  %v4946_v27 = vsub.f32 %v28585_v35, %v28601_v6 }
 0x500   : > { %22338 = vmatmul.mubr.f32.gmra.mrb[48].mxu1 %v4847_v58  ;;  %34302 = vst [vmem:[#allocation117_spill] sm:$0xff] %v28582_v2  ;;  %v28590_v58 = vand.u32 4294901760, %v28568_v13  ;;  %34305 = vst [vmem:[#allocation120_spill] sm:$0xff] %v28595_v9  ;;  %v4926_v7 = vsub.f32 %v28563_v4, %v28582_v2 }
 0x501   : > { %21855 = vmatmul.mubr.f32.gmra.mrb[54].mxu0 %v4867_v24  ;;  %22340 = vmatprep.mubr.f32.mxu1 %v4857_v20  ;;  %v4420_v20 = vsel %vm4271_vm12, %v4270_v49, 0  ;;  %34307 = vst [vmem:[#allocation122_spill] sm:$0xff] %v28611_v19  ;;  %v28619_v2 = vand.u32 4294901760, %v28604_v11 }
 0x502   : > { %21857 = vmatprep.mubr.f32.mxu0 %v4877_v12  ;;  %34304 = vst [vmem:[#allocation119_spill] sm:$0xff] %v28590_v58  ;;  %v28606_v0 = vand.u32 4294901760, %v4420_v20  ;;  %v4936_v49 = vsub.f32 %v28568_v13, %v28590_v58  ;;  %v4956_v13 = vsub.f32 %v28593_v54, %v28611_v19 }
 0x504   : > { %22341 = vmatmul.mubr.f32.gmra.mrb[50].mxu1 %v4867_v24  ;;  %34306 = vst [vmem:[#allocation121_spill] sm:$0xff] %v28606_v0  ;;  %v4927_v24 = vand.u32 4294901760, %v4926_v7  ;;  %v28622_v59 = vsub.f32 %v4420_v20, %v28606_v0  ;;  %v4937_v58 = vand.u32 4294901760, %v4936_v49  ;;  %v4957_v20 = vand.u32 4294901760, %v4956_v13  ;;  %v34308_v13 = vld [vmem:[#allocation18_spill] sm:$0xff] }
 0x505   : > { %21858 = vmatmul.mubr.f32.gmra.mrb[56].mxu0 %v4887_v21  ;;  %22343 = vmatprep.mubr.f32.mxu1 %v4877_v12  ;;  %v28614_v12 = vsub.f32 %v4417_v51, %v28595_v9 }
 0x506   : > { %21860 = vmatprep.mubr.f32.mxu0 %v4897_v41  ;;  %v28632_v7 = vand.u32 4294901760, %v28622_v59 }
 0x507   : > { %v28627_v51 = vand.u32 4294901760, %v28614_v12 }
 0x508   : > { %22344 = vmatmul.mubr.f32.gmra.mrb[52].mxu1 %v4887_v21  ;;  %v4966_v21 = vsub.f32 %v28604_v11, %v28619_v2 }
 0x509   : > { %21861 = vmatmul.mubr.f32.gmra.mrb[58].mxu0 %v4907_v30  ;;  %22346 = vmatprep.mubr.f32.mxu1 %v4897_v41  ;;  %v4947_v41 = vand.u32 4294901760, %v4946_v27  ;;  %v4976_v49 = vsub.f32 %v28614_v12, %v28627_v51 }
 0x50a   : > { %21863 = vmatprep.mubr.f32.mxu0 %v4917_v56  ;;  %v4967_v19 = vand.u32 4294901760, %v4966_v21  ;;  %v34317_v21 = vld [vmem:[#allocation94_spill] sm:$0xff] }
 0x50c   : > { %22347 = vmatmul.mubr.f32.gmra.mrb[54].mxu1 %v4907_v30  ;;  %v4986_v30 = vsub.f32 %v28622_v59, %v28632_v7 }
 0x50d   : > { %21864 = vmatmul.mubr.f32.gmra.mrb[60].mxu0 %v4927_v24  ;;  %22349 = vmatprep.mubr.f32.mxu1 %v4917_v56  ;;  %v4977_v56 = vand.u32 4294901760, %v4976_v49  ;;  %v34319_v49 = vld [vmem:[#allocation102_spill] sm:$0xff] }
 0x50e   : > { %21866 = vmatprep.mubr.f32.mxu0 %v4937_v58  ;;  %v4987_v27 = vand.u32 4294901760, %v4986_v30  ;;  %v34320_v30 = vld [vmem:[#allocation110_spill] sm:$0xff] }
 0x510   : > { %22350 = vmatmul.mubr.f32.gmra.mrb[56].mxu1 %v4927_v24  ;;  %v34315_v24 = vld [vmem:[#allocation90_spill] sm:$0xff] }
 0x511   : > { %21867 = vmatmul.mubr.f32.gmra.mrb[62].mxu0 %v4947_v41  ;;  %22352 = vmatprep.mubr.f32.mxu1 %v4937_v58  ;;  %v34313_v58 = vld [vmem:[#allocation85_spill] sm:$0xff] }
 0x512   : > { %21869 = vmatprep.mubr.f32.mxu0 %v4957_v20 }
 0x514   : > { %22353 = vmatmul.mubr.f32.gmra.mrb[58].mxu1 %v4947_v41  ;;  %v34316_v41 = vld [vmem:[#allocation93_spill] sm:$0xff] }
 0x515   : > { %21870 = vmatmul.mubr.f32.gmra.mrb[64].mxu0 %v4967_v19  ;;  %22355 = vmatprep.mubr.f32.mxu1 %v4957_v20  ;;  %v34318_v20 = vld [vmem:[#allocation95_spill] sm:$0xff] }
 0x516   : > { %21872 = vmatprep.mubr.f32.mxu0 %v4977_v56 }
 0x518   : > { %22356 = vmatmul.mubr.f32.gmra.mrb[60].mxu1 %v4967_v19  ;;  %v34314_v19 = vld [vmem:[#allocation87_spill] sm:$0xff] }
 0x519   : > { %21873 = vmatmul.mubr.f32.gmra.mrb[66].mxu0 %v4987_v27  ;;  %22358 = vmatprep.mubr.f32.mxu1 %v4977_v56  ;;  %v34321_v56 = vld [vmem:[#allocation2_spill] sm:$0xff] }
 0x51a   : > { %21881 = vmatprep.mubr.f32.mxu0 %v27862_v62 }
 0x51c   : > { %22359 = vmatmul.mubr.f32.gmra.mrb[62].mxu1 %v4987_v27  ;;  %v34322_v27 = vld [vmem:[#allocation22_spill] sm:$0xff] }
 0x51d   : > { %21882 = vmatmul.mubr.f32.vlgmr.msra.gmra.mrb[18].mxu0 %v27883_v16  ;;  %22367 = vmatprep.mubr.f32.mxu1 %v27862_v62 }
 0x51e   : > { %24523 = vmatpush3.bf16.msra.mxu0 %v34223_v31  ;;  %21884 = vmatprep.mubr.f32.mxu0 %v27885_v39  ;;  %v34312_v31 = vld [vmem:[#allocation81_spill] sm:$0xff] }
 0x51f   : > { %21960 = vmatprep.subr.mxu0 %v28048_v55 }
 0x520   : > { %22368 = vmatmul.mubr.f32.vlgmr.msra.gmra.mrb[14].mxu1 %v27883_v16 }
 0x521   : > { %24547 = vmatpush3.bf16.msra.mxu1 %v28001_v44  ;;  %21885 = vmatmul.mubr.f32.gmra.mrb[20].mxu0 %v27894_v17  ;;  %v34309_v44 = vld [vmem:[#allocation71_spill] sm:$0xff] }
 0x522   : > { %22446 = vmatprep.subr.mxu1 %v28072_v10  ;;  %21961 = vmatpush3.msra.mxu0 %v28048_v55  ;;  %v34310_v55 = vld [vmem:[#allocation72_spill] sm:$0xff] }
 0x523   : > { %24525 = vmatprep.subr.bf16.mxu0 %v34308_v13  ;;  %22370 = vmatprep.mubr.f32.mxu1 %v27885_v39 }
 0x524   : > { %22371 = vmatmul.mubr.f32.gmra.mrb[16].mxu1 %v27894_v17  ;;  %21887 = vmatprep.mubr.f32.mxu0 %v27914_v46 }
 0x525   : > { %22447 = vmatpush3.msra.mxu1 %v28072_v10  ;;  %21888 = vmatmul.mubr.f32.gmra.mrb[22].mxu0 %v27918_v15  ;;  %v34311_v10 = vld [vmem:[#allocation79_spill] sm:$0xff] }
 0x526   : > { %24549 = vmatprep.subr.bf16.mxu1 %v27978_v33  ;;  %22373 = vmatprep.mubr.f32.mxu1 %v27914_v46 }
 0x527   : > { %21890 = vmatprep.mubr.f32.mxu0 %v27967_v47 }
 0x528   : > { %22374 = vmatmul.mubr.f32.gmra.mrb[18].mxu1 %v27918_v15 }
 0x529   : > { %21891 = vmatmul.mubr.f32.gmra.mrb[24].mxu0 %v27970_v8  ;;  %22376 = vmatprep.mubr.f32.mxu1 %v27967_v47 }
 0x52a   : > { %21893 = vmatprep.mubr.f32.mxu0 %v27988_v63 }
 0x52c   : > { %22377 = vmatmul.mubr.f32.gmra.mrb[20].mxu1 %v27970_v8 }
 0x52d   : > { %21894 = vmatmul.mubr.f32.gmra.mrb[26].mxu0 %v28014_v23  ;;  %22379 = vmatprep.mubr.f32.mxu1 %v27988_v63 }
 0x52e   : > { %21896 = vmatprep.mubr.f32.mxu0 %v28022_v25 }
 0x530   : > { %22380 = vmatmul.mubr.f32.gmra.mrb[22].mxu1 %v28014_v23 }
 0x531   : > { %21897 = vmatmul.mubr.f32.gmra.mrb[28].mxu0 %v28061_v34  ;;  %22382 = vmatprep.mubr.f32.mxu1 %v28022_v25 }
 0x532   : > { %21899 = vmatprep.mubr.f32.mxu0 %v28085_v26 }
 0x534   : > { %22383 = vmatmul.mubr.f32.gmra.mrb[24].mxu1 %v28061_v34 }
 0x535   : > { %21900 = vmatmul.mubr.f32.gmra.mrb[30].mxu0 %v28103_v43  ;;  %22385 = vmatprep.mubr.f32.mxu1 %v28085_v26 }
 0x536   : > { %21902 = vmatprep.mubr.f32.mxu0 %v28121_v29 }
 0x538   : > { %22386 = vmatmul.mubr.f32.gmra.mrb[26].mxu1 %v28103_v43 }
 0x539   : > { %21903 = vmatmul.mubr.f32.gmra.mrb[32].mxu0 %v28126_v38  ;;  %22388 = vmatprep.mubr.f32.mxu1 %v28121_v29 }
 0x53a   : > { %21905 = vmatprep.mubr.f32.mxu0 %v28150_v53 }
 0x53c   : > { %22389 = vmatmul.mubr.f32.gmra.mrb[28].mxu1 %v28126_v38 }
 0x53d   : > { %21906 = vmatmul.mubr.f32.gmra.mrb[34].mxu0 %v28166_v61  ;;  %22391 = vmatprep.mubr.f32.mxu1 %v28150_v53 }
 0x53e   : > { %21908 = vmatprep.mubr.f32.mxu0 %v28170_v18 }
 0x540   : > { %22392 = vmatmul.mubr.f32.gmra.mrb[30].mxu1 %v28166_v61 }
 0x541   : > { %21909 = vmatmul.mubr.f32.gmra.mrb[36].mxu0 %v28196_v28  ;;  %22394 = vmatprep.mubr.f32.mxu1 %v28170_v18 }
 0x542   : > { %21911 = vmatprep.mubr.f32.mxu0 %v28201_v57 }
 0x544   : > { %22395 = vmatmul.mubr.f32.gmra.mrb[32].mxu1 %v28196_v28 }
 0x545   : > { %21912 = vmatmul.mubr.f32.gmra.mrb[38].mxu0 %v28221_v5  ;;  %22397 = vmatprep.mubr.f32.mxu1 %v28201_v57 }
 0x546   : > { %21914 = vmatprep.mubr.f32.mxu0 %v28232_v32 }
 0x548   : > { %22398 = vmatmul.mubr.f32.gmra.mrb[34].mxu1 %v28221_v5 }
 0x549   : > { %21915 = vmatmul.mubr.f32.gmra.mrb[40].mxu0 %v28249_v1  ;;  %22400 = vmatprep.mubr.f32.mxu1 %v28232_v32 }
 0x54a   : > { %21917 = vmatprep.mubr.f32.mxu0 %v28263_v36 }
 0x54c   : > { %22401 = vmatmul.mubr.f32.gmra.mrb[36].mxu1 %v28249_v1 }
 0x54d   : > { %21918 = vmatmul.mubr.f32.gmra.mrb[42].mxu0 %v28278_v37  ;;  %22403 = vmatprep.mubr.f32.mxu1 %v28263_v36 }
 0x54e   : > { %21920 = vmatprep.mubr.f32.mxu0 %v28290_v40 }
 0x550   : > { %22404 = vmatmul.mubr.f32.gmra.mrb[38].mxu1 %v28278_v37 }
 0x551   : > { %21921 = vmatmul.mubr.f32.gmra.mrb[44].mxu0 %v28308_v45  ;;  %22406 = vmatprep.mubr.f32.mxu1 %v28290_v40 }
 0x552   : > { %21923 = vmatprep.mubr.f32.mxu0 %v28310_v60 }
 0x554   : > { %22407 = vmatmul.mubr.f32.gmra.mrb[40].mxu1 %v28308_v45 }
 0x555   : > { %21924 = vmatmul.mubr.f32.gmra.mrb[46].mxu0 %v28333_v42  ;;  %22409 = vmatprep.mubr.f32.mxu1 %v28310_v60 }
 0x556   : > { %21926 = vmatprep.mubr.f32.mxu0 %v28348_v50 }
 0x558   : > { %22410 = vmatmul.mubr.f32.gmra.mrb[42].mxu1 %v28333_v42 }
 0x559   : > { %21927 = vmatmul.mubr.f32.gmra.mrb[48].mxu0 %v34309_v44  ;;  %22412 = vmatprep.mubr.f32.mxu1 %v28348_v50 }
 0x55a   : > { %21929 = vmatprep.mubr.f32.mxu0 %v34310_v55 }
 0x55c   : > { %22413 = vmatmul.mubr.f32.gmra.mrb[44].mxu1 %v34309_v44 }
 0x55d   : > { %21930 = vmatmul.mubr.f32.gmra.mrb[50].mxu0 %v34311_v10  ;;  %22415 = vmatprep.mubr.f32.mxu1 %v34310_v55 }
 0x55e   : > { %21932 = vmatprep.mubr.f32.mxu0 %v34312_v31 }
 0x560   : > { %22416 = vmatmul.mubr.f32.gmra.mrb[46].mxu1 %v34311_v10 }
 0x561   : > { %21933 = vmatmul.mubr.f32.gmra.mrb[52].mxu0 %v34313_v58  ;;  %22418 = vmatprep.mubr.f32.mxu1 %v34312_v31 }
 0x562   : > { %21935 = vmatprep.mubr.f32.mxu0 %v34314_v19 }
 0x564   : > { %22419 = vmatmul.mubr.f32.gmra.mrb[48].mxu1 %v34313_v58 }
 0x565   : > { %21936 = vmatmul.mubr.f32.gmra.mrb[54].mxu0 %v34315_v24  ;;  %22421 = vmatprep.mubr.f32.mxu1 %v34314_v19 }
 0x566   : > { %21938 = vmatprep.mubr.f32.mxu0 %v34316_v41 }
 0x568   : > { %22422 = vmatmul.mubr.f32.gmra.mrb[50].mxu1 %v34315_v24 }
 0x569   : > { %21939 = vmatmul.mubr.f32.gmra.mrb[56].mxu0 %v34317_v21  ;;  %22424 = vmatprep.mubr.f32.mxu1 %v34316_v41 }
 0x56a   : > { %21941 = vmatprep.mubr.f32.mxu0 %v34318_v20 }
 0x56c   : > { %22425 = vmatmul.mubr.f32.gmra.mrb[52].mxu1 %v34317_v21 }
 0x56d   : > { %21942 = vmatmul.mubr.f32.gmra.mrb[58].mxu0 %v34319_v49  ;;  %22427 = vmatprep.mubr.f32.mxu1 %v34318_v20 }
 0x56e   : > { %21944 = vmatprep.mubr.f32.mxu0 %v28509_v14 }
 0x570   : > { %22428 = vmatmul.mubr.f32.gmra.mrb[54].mxu1 %v34319_v49  ;;  %v34335_v49 = vld [vmem:[#allocation33_spill] sm:$0xff] }
 0x571   : > { %21945 = vmatmul.mubr.f32.gmra.mrb[60].mxu0 %v34320_v30  ;;  %22430 = vmatprep.mubr.f32.mxu1 %v28509_v14  ;;  %v34332_v14 = vld [vmem:[#allocation15_spill] sm:$0xff] }
 0x572   : > { %21947 = vmatprep.mubr.f32.mxu0 %v28542_v3 }
 0x574   : > { %22431 = vmatmul.mubr.f32.gmra.mrb[56].mxu1 %v34320_v30  ;;  %v34331_v30 = vld [vmem:[#allocation14_spill] sm:$0xff] }
 0x575   : > { %21948 = vmatmul.mubr.f32.gmra.mrb[62].mxu0 %v28565_v52  ;;  %22433 = vmatprep.mubr.f32.mxu1 %v28542_v3  ;;  %v34329_v3 = vld [vmem:[#allocation4_spill] sm:$0xff] }
 0x576   : > { %21950 = vmatprep.mubr.f32.mxu0 %v28570_v48 }
 0x578   : > { %22434 = vmatmul.mubr.f32.gmra.mrb[58].mxu1 %v28565_v52  ;;  %v34323_v52 = vld [vmem:[#allocation23_spill] sm:$0xff] }
 0x579   : > { %21951 = vmatmul.mubr.f32.gmra.mrb[64].mxu0 %v28587_v22  ;;  %22436 = vmatprep.mubr.f32.mxu1 %v28570_v48  ;;  %v34324_v48 = vld [vmem:[#allocation13_spill] sm:$0xff] }
 0x57a   : > { %21953 = vmatprep.mubr.f32.mxu0 %v28595_v9 }
 0x57c   : > { %22437 = vmatmul.mubr.f32.gmra.mrb[60].mxu1 %v28587_v22  ;;  %v34325_v22 = vld [vmem:[#allocation25_spill] sm:$0xff] }
 0x57d   : > { %21954 = vmatmul.mubr.f32.gmra.mrb[66].mxu0 %v28606_v0  ;;  %22439 = vmatprep.mubr.f32.mxu1 %v28595_v9  ;;  %v34326_v9 = vld [vmem:[#allocation29_spill] sm:$0xff] }
 0x57e   : > { %21962 = vmatprep.mubr.f32.mxu0 %v34321_v56 }
 0x580   : > { %22440 = vmatmul.mubr.f32.gmra.mrb[62].mxu1 %v28606_v0  ;;  %v34327_v0 = vld [vmem:[#allocation20_spill] sm:$0xff] }
 0x581   : > { %21963 = vmatmul.mubr.f32.vlgmr.msra.gmra.mrb[18].mxu0 %v34322_v27  ;;  %22448 = vmatprep.mubr.f32.mxu1 %v34321_v56  ;;  %v34328_v56 = vld [vmem:[#allocation12_spill] sm:$0xff] }
 0x582   : > { %24527 = vmatpush3.bf16.msra.mxu0 %v34308_v13  ;;  %21965 = vmatprep.mubr.f32.mxu0 %v34323_v52 }
 0x583   : > { %22041 = vmatprep.subr.mxu0 %v34324_v48 }
 0x584   : > { %22449 = vmatmul.mubr.f32.vlgmr.msra.gmra.mrb[14].mxu1 %v34322_v27  ;;  %v34330_v27 = vld [vmem:[#allocation16_spill] sm:$0xff] }
 0x585   : > { %24551 = vmatpush3.bf16.msra.mxu1 %v27978_v33  ;;  %21966 = vmatmul.mubr.f32.gmra.mrb[20].mxu0 %v34325_v22 }
 0x586   : > { %22527 = vmatprep.subr.mxu1 %v34326_v9  ;;  %22042 = vmatpush3.msra.mxu0 %v34324_v48 }
 0x587   : > { %24529 = vmatprep.subr.bf16.mxu0 %v34327_v0  ;;  %22451 = vmatprep.mubr.f32.mxu1 %v34323_v52  ;;  %v34333_v52 = vld [vmem:[#allocation17_spill] sm:$0xff] }
 0x588   : > { %22452 = vmatmul.mubr.f32.gmra.mrb[16].mxu1 %v34325_v22  ;;  %21968 = vmatprep.mubr.f32.mxu0 %v34328_v56  ;;  %v34334_v22 = vld [vmem:[#allocation31_spill] sm:$0xff] }
 0x589   : > { %22528 = vmatpush3.msra.mxu1 %v34326_v9  ;;  %21969 = vmatmul.mubr.f32.gmra.mrb[22].mxu0 %v34329_v3 }
 0x58a   : > { %24553 = vmatprep.subr.bf16.mxu1 %v34330_v27  ;;  %22454 = vmatprep.mubr.f32.mxu1 %v34328_v56  ;;  %v34336_v56 = vld [vmem:[#allocation37_spill] sm:$0xff] }
 0x58b   : > { %21971 = vmatprep.mubr.f32.mxu0 %v34331_v30 }
 0x58c   : > { %22455 = vmatmul.mubr.f32.gmra.mrb[18].mxu1 %v34329_v3  ;;  %v34337_v3 = vld [vmem:[#allocation38_spill] sm:$0xff] }
 0x58d   : > { %21972 = vmatmul.mubr.f32.gmra.mrb[24].mxu0 %v34332_v14  ;;  %22457 = vmatprep.mubr.f32.mxu1 %v34331_v30  ;;  %v34338_v30 = vld [vmem:[#allocation39_spill] sm:$0xff] }
 0x58e   : > { %21974 = vmatprep.mubr.f32.mxu0 %v34333_v52 }
 0x590   : > { %22458 = vmatmul.mubr.f32.gmra.mrb[20].mxu1 %v34332_v14  ;;  %v34339_v14 = vld [vmem:[#allocation41_spill] sm:$0xff] }
 0x591   : > { %21975 = vmatmul.mubr.f32.gmra.mrb[26].mxu0 %v34334_v22  ;;  %22460 = vmatprep.mubr.f32.mxu1 %v34333_v52  ;;  %v34340_v52 = vld [vmem:[#allocation42_spill] sm:$0xff] }
 0x592   : > { %21977 = vmatprep.mubr.f32.mxu0 %v34335_v49 }
 0x594   : > { %22461 = vmatmul.mubr.f32.gmra.mrb[22].mxu1 %v34334_v22  ;;  %v34341_v22 = vld [vmem:[#allocation45_spill] sm:$0xff] }
 0x595   : > { %21978 = vmatmul.mubr.f32.gmra.mrb[28].mxu0 %v34336_v56  ;;  %22463 = vmatprep.mubr.f32.mxu1 %v34335_v49  ;;  %v34342_v49 = vld [vmem:[#allocation47_spill] sm:$0xff] }
 0x596   : > { %21980 = vmatprep.mubr.f32.mxu0 %v34337_v3 }
 0x598   : > { %22464 = vmatmul.mubr.f32.gmra.mrb[24].mxu1 %v34336_v56  ;;  %v34343_v56 = vld [vmem:[#allocation48_spill] sm:$0xff] }
 0x599   : > { %21981 = vmatmul.mubr.f32.gmra.mrb[30].mxu0 %v34338_v30  ;;  %22466 = vmatprep.mubr.f32.mxu1 %v34337_v3  ;;  %v34344_v3 = vld [vmem:[#allocation51_spill] sm:$0xff] }
 0x59a   : > { %21983 = vmatprep.mubr.f32.mxu0 %v34339_v14 }
 0x59c   : > { %22467 = vmatmul.mubr.f32.gmra.mrb[26].mxu1 %v34338_v30  ;;  %v34345_v30 = vld [vmem:[#allocation53_spill] sm:$0xff] }
 0x59d   : > { %21984 = vmatmul.mubr.f32.gmra.mrb[32].mxu0 %v34340_v52  ;;  %22469 = vmatprep.mubr.f32.mxu1 %v34339_v14  ;;  %v34346_v14 = vld [vmem:[#allocation55_spill] sm:$0xff] }
 0x59e   : > { %21986 = vmatprep.mubr.f32.mxu0 %v34341_v22 }
 0x5a0   : > { %22470 = vmatmul.mubr.f32.gmra.mrb[28].mxu1 %v34340_v52  ;;  %v34347_v52 = vld [vmem:[#allocation57_spill] sm:$0xff] }
 0x5a1   : > { %21987 = vmatmul.mubr.f32.gmra.mrb[34].mxu0 %v34342_v49  ;;  %22472 = vmatprep.mubr.f32.mxu1 %v34341_v22  ;;  %v34348_v22 = vld [vmem:[#allocation59_spill] sm:$0xff] }
 0x5a2   : > { %21989 = vmatprep.mubr.f32.mxu0 %v34343_v56 }
 0x5a4   : > { %22473 = vmatmul.mubr.f32.gmra.mrb[30].mxu1 %v34342_v49  ;;  %v34349_v49 = vld [vmem:[#allocation61_spill] sm:$0xff] }
 0x5a5   : > { %21990 = vmatmul.mubr.f32.gmra.mrb[36].mxu0 %v34344_v3  ;;  %22475 = vmatprep.mubr.f32.mxu1 %v34343_v56  ;;  %v34350_v56 = vld [vmem:[#allocation63_spill] sm:$0xff] }
 0x5a6   : > { %21992 = vmatprep.mubr.f32.mxu0 %v34345_v30 }
 0x5a8   : > { %22476 = vmatmul.mubr.f32.gmra.mrb[32].mxu1 %v34344_v3  ;;  %v34351_v3 = vld [vmem:[#allocation65_spill] sm:$0xff] }
 0x5a9   : > { %21993 = vmatmul.mubr.f32.gmra.mrb[38].mxu0 %v34346_v14  ;;  %22478 = vmatprep.mubr.f32.mxu1 %v34345_v30  ;;  %v34352_v30 = vld [vmem:[#allocation67_spill] sm:$0xff] }
 0x5aa   : > { %21995 = vmatprep.mubr.f32.mxu0 %v34347_v52 }
 0x5ac   : > { %22479 = vmatmul.mubr.f32.gmra.mrb[34].mxu1 %v34346_v14  ;;  %v34353_v14 = vld [vmem:[#allocation68_spill] sm:$0xff] }
 0x5ad   : > { %21996 = vmatmul.mubr.f32.gmra.mrb[40].mxu0 %v34348_v22  ;;  %22481 = vmatprep.mubr.f32.mxu1 %v34347_v52  ;;  %v34354_v52 = vld [vmem:[#allocation70_spill] sm:$0xff] }
 0x5ae   : > { %21998 = vmatprep.mubr.f32.mxu0 %v34349_v49 }
 0x5b0   : > { %22482 = vmatmul.mubr.f32.gmra.mrb[36].mxu1 %v34348_v22  ;;  %v34355_v22 = vld [vmem:[#allocation75_spill] sm:$0xff] }
 0x5b1   : > { %21999 = vmatmul.mubr.f32.gmra.mrb[42].mxu0 %v34350_v56  ;;  %22484 = vmatprep.mubr.f32.mxu1 %v34349_v49  ;;  %v34356_v49 = vld [vmem:[#allocation77_spill] sm:$0xff] }
 0x5b2   : > { %22001 = vmatprep.mubr.f32.mxu0 %v34351_v3 }
 0x5b4   : > { %22485 = vmatmul.mubr.f32.gmra.mrb[38].mxu1 %v34350_v56  ;;  %v34357_v56 = vld [vmem:[#allocation78_spill] sm:$0xff] }
 0x5b5   : > { %22002 = vmatmul.mubr.f32.gmra.mrb[44].mxu0 %v34352_v30  ;;  %22487 = vmatprep.mubr.f32.mxu1 %v34351_v3  ;;  %v34358_v3 = vld [vmem:[#allocation84_spill] sm:$0xff] }
 0x5b6   : > { %22004 = vmatprep.mubr.f32.mxu0 %v34353_v14 }
 0x5b8   : > { %22488 = vmatmul.mubr.f32.gmra.mrb[40].mxu1 %v34352_v30  ;;  %v34359_v30 = vld [vmem:[#allocation86_spill] sm:$0xff] }
 0x5b9   : > { %22005 = vmatmul.mubr.f32.gmra.mrb[46].mxu0 %v34354_v52  ;;  %22490 = vmatprep.mubr.f32.mxu1 %v34353_v14  ;;  %v34360_v14 = vld [vmem:[#allocation89_spill] sm:$0xff] }
 0x5ba   : > { %22007 = vmatprep.mubr.f32.mxu0 %v34355_v22 }
 0x5bc   : > { %22491 = vmatmul.mubr.f32.gmra.mrb[42].mxu1 %v34354_v52  ;;  %v34361_v52 = vld [vmem:[#allocation92_spill] sm:$0xff] }
 0x5bd   : > { %22008 = vmatmul.mubr.f32.gmra.mrb[48].mxu0 %v34356_v49  ;;  %22493 = vmatprep.mubr.f32.mxu1 %v34355_v22  ;;  %v34362_v22 = vld [vmem:[#allocation97_spill] sm:$0xff] }
 0x5be   : > { %22010 = vmatprep.mubr.f32.mxu0 %v34357_v56 }
 0x5c0   : > { %22494 = vmatmul.mubr.f32.gmra.mrb[44].mxu1 %v34356_v49  ;;  %v34363_v49 = vld [vmem:[#allocation99_spill] sm:$0xff] }
 0x5c1   : > { %22011 = vmatmul.mubr.f32.gmra.mrb[50].mxu0 %v34358_v3  ;;  %22496 = vmatprep.mubr.f32.mxu1 %v34357_v56  ;;  %v34364_v56 = vld [vmem:[#allocation100_spill] sm:$0xff] }
 0x5c2   : > { %22013 = vmatprep.mubr.f32.mxu0 %v34359_v30 }
 0x5c4   : > { %22497 = vmatmul.mubr.f32.gmra.mrb[46].mxu1 %v34358_v3  ;;  %v34365_v3 = vld [vmem:[#allocation101_spill] sm:$0xff] }
 0x5c5   : > { %22014 = vmatmul.mubr.f32.gmra.mrb[52].mxu0 %v34360_v14  ;;  %22499 = vmatprep.mubr.f32.mxu1 %v34359_v30  ;;  %v34366_v30 = vld [vmem:[#allocation108_spill] sm:$0xff] }
 0x5c6   : > { %22016 = vmatprep.mubr.f32.mxu0 %v34361_v52 }
 0x5c8   : > { %22500 = vmatmul.mubr.f32.gmra.mrb[48].mxu1 %v34360_v14  ;;  %v34367_v14 = vld [vmem:[#allocation109_spill] sm:$0xff] }
 0x5c9   : > { %22017 = vmatmul.mubr.f32.gmra.mrb[54].mxu0 %v34362_v22  ;;  %22502 = vmatprep.mubr.f32.mxu1 %v34361_v52  ;;  %v34368_v52 = vld [vmem:[#allocation115_spill] sm:$0xff] }
 0x5ca   : > { %22019 = vmatprep.mubr.f32.mxu0 %v34363_v49 }
 0x5cc   : > { %22503 = vmatmul.mubr.f32.gmra.mrb[50].mxu1 %v34362_v22  ;;  %v34370_v22 = vld [vmem:[#allocation24_spill] sm:$0xff] }
 0x5cd   : > { %22020 = vmatmul.mubr.f32.gmra.mrb[56].mxu0 %v34364_v56  ;;  %22505 = vmatprep.mubr.f32.mxu1 %v34363_v49  ;;  %v34378_v49 = vld [vmem:[#allocation28_spill] sm:$0xff] }
 0x5ce   : > { %22022 = vmatprep.mubr.f32.mxu0 %v34365_v3 }
 0x5d0   : > { %22506 = vmatmul.mubr.f32.gmra.mrb[52].mxu1 %v34364_v56  ;;  %v34379_v56 = vld [vmem:[#allocation30_spill] sm:$0xff] }
 0x5d1   : > { %22023 = vmatmul.mubr.f32.gmra.mrb[58].mxu0 %v34366_v30  ;;  %22508 = vmatprep.mubr.f32.mxu1 %v34365_v3  ;;  %v34380_v3 = vld [vmem:[#allocation35_spill] sm:$0xff] }
 0x5d2   : > { %22025 = vmatprep.mubr.f32.mxu0 %v34367_v14 }
 0x5d4   : > { %22509 = vmatmul.mubr.f32.gmra.mrb[54].mxu1 %v34366_v30  ;;  %v34381_v30 = vld [vmem:[#allocation36_spill] sm:$0xff] }
 0x5d5   : > { %22026 = vmatmul.mubr.f32.gmra.mrb[60].mxu0 %v28563_v4  ;;  %22511 = vmatprep.mubr.f32.mxu1 %v34367_v14  ;;  %v34382_v14 = vld [vmem:[#allocation19_spill] sm:$0xff] }
 0x5d6   : > { %22028 = vmatprep.mubr.f32.mxu0 %v34368_v52 }
 0x5d8   : > { %22512 = vmatmul.mubr.f32.gmra.mrb[56].mxu1 %v28563_v4  ;;  %v34369_v4 = vld [vmem:[#allocation3_spill] sm:$0xff] }
 0x5d9   : > { %22029 = vmatmul.mubr.f32.gmra.mrb[62].mxu0 %v28585_v35  ;;  %22514 = vmatprep.mubr.f32.mxu1 %v34368_v52  ;;  %v34383_v52 = vld [vmem:[#allocation40_spill] sm:$0xff] }
 0x5da   : > { %22031 = vmatprep.mubr.f32.mxu0 %v28593_v54 }
 0x5dc   : > { %22515 = vmatmul.mubr.f32.gmra.mrb[58].mxu1 %v28585_v35  ;;  %v34371_v35 = vld [vmem:[#allocation10_spill] sm:$0xff] }
 0x5dd   : > { %22032 = vmatmul.mubr.f32.gmra.mrb[64].mxu0 %v28604_v11  ;;  %22517 = vmatprep.mubr.f32.mxu1 %v28593_v54  ;;  %v34372_v54 = vld [vmem:[#allocation32_spill] sm:$0xff] }
 0x5de   : > { %22034 = vmatprep.mubr.f32.mxu0 %v28614_v12 }
 0x5e0   : > { %22518 = vmatmul.mubr.f32.gmra.mrb[60].mxu1 %v28604_v11  ;;  %v34373_v11 = vld [vmem:[#allocation11_spill] sm:$0xff] }
 0x5e1   : > { %22035 = vmatmul.mubr.f32.gmra.mrb[66].mxu0 %v28622_v59  ;;  %22520 = vmatprep.mubr.f32.mxu1 %v28614_v12  ;;  %v34374_v12 = vld [vmem:[#allocation34_spill] sm:$0xff] }
 0x5e2   : > { %22043 = vmatprep.mubr.f32.mxu0 %v34369_v4 }
 0x5e4   : > { %22521 = vmatmul.mubr.f32.gmra.mrb[62].mxu1 %v28622_v59  ;;  %v34376_v59 = vld [vmem:[#allocation26_spill] sm:$0xff] }
 0x5e5   : > { %22044 = vmatmul.mubr.f32.vlgmr.msra.gmra.mrb[18].mxu0 %v34370_v22  ;;  %22529 = vmatprep.mubr.f32.mxu1 %v34369_v4  ;;  %v34384_v4 = vld [vmem:[#allocation43_spill] sm:$0xff] }
 0x5e6   : > { %24531 = vmatpush3.bf16.msra.mxu0 %v34327_v0  ;;  %22046 = vmatprep.mubr.f32.mxu0 %v34371_v35  ;;  %v34375_v0 = vld [vmem:[#allocation5_spill] sm:$0xff] }
 0x5e7   : > { %22122 = vmatprep.subr.mxu0 %v34372_v54 }
 0x5e8   : > { %22530 = vmatmul.mubr.f32.vlgmr.msra.gmra.mrb[14].mxu1 %v34370_v22  ;;  %v34385_v22 = vld [vmem:[#allocation44_spill] sm:$0xff] }
 0x5e9   : > { %24555 = vmatpush3.bf16.msra.mxu1 %v34330_v27  ;;  %22047 = vmatmul.mubr.f32.gmra.mrb[20].mxu0 %v34373_v11  ;;  %v34377_v27 = vld [vmem:[#allocation27_spill] sm:$0xff] }
 0x5ea   : > { %22608 = vmatprep.subr.mxu1 %v34374_v12  ;;  %22123 = vmatpush3.msra.mxu0 %v34372_v54  ;;  %v34387_v54 = vld [vmem:[#allocation49_spill] sm:$0xff] }
 0x5eb   : > { %24533 = vmatprep.subr.bf16.mxu0 %v34308_v13  ;;  %22532 = vmatprep.mubr.f32.mxu1 %v34371_v35  ;;  %v34386_v35 = vld [vmem:[#allocation46_spill] sm:$0xff] }
 0x5ec   : > { %22533 = vmatmul.mubr.f32.gmra.mrb[16].mxu1 %v34373_v11  ;;  %22049 = vmatprep.mubr.f32.mxu0 %v34375_v0  ;;  %v9586_v11 = vld [vmem:[%s33248_s25] sm:$0xff] }
 0x5ed   : > { %22609 = vmatpush3.msra.mxu1 %v34374_v12  ;;  %22050 = vmatmul.mubr.f32.gmra.mrb[22].mxu0 %v34376_v59  ;;  %v34388_v12 = vld [vmem:[#allocation50_spill] sm:$0xff] }
 0x5ee   : > { %24557 = vmatprep.subr.bf16.mxu1 %v27978_v33  ;;  %22535 = vmatprep.mubr.f32.mxu1 %v34375_v0  ;;  %v34389_v0 = vld [vmem:[#allocation52_spill] sm:$0xff] }
 0x5ef   : > { %22052 = vmatprep.mubr.f32.mxu0 %v34377_v27  ;;  %9638 = vperm.xlu1 %26517, %v9586_v11   ;;  %v9592_v11 = vld [vmem:[%s33248_s25 + $0x30] sm:$0xff] }
 0x5f0   : > { %22536 = vmatmul.mubr.f32.gmra.mrb[18].mxu1 %v34376_v59  ;;  %v9588_v59 = vld [vmem:[%s33248_s25 + $0x10] sm:$0xff] }
 0x5f1   : > { %22053 = vmatmul.mubr.f32.gmra.mrb[24].mxu0 %v34378_v49  ;;  %22538 = vmatprep.mubr.f32.mxu1 %v34377_v27  ;;  %v34390_v27 = vld [vmem:[#allocation54_spill] sm:$0xff] }
 0x5f2   : > { %22055 = vmatprep.mubr.f32.mxu0 %v34379_v56 }
 0x5f3   : > { %9648 = vperm.xlu1 %26517, %v9588_v59   ;;  %v9593_v59 = vld [vmem:[%s33248_s25 + $0x38] sm:$0xff] }
 0x5f4   : > { %22539 = vmatmul.mubr.f32.gmra.mrb[20].mxu1 %v34378_v49  ;;  %v34391_v49 = vld [vmem:[#allocation56_spill] sm:$0xff] }
 0x5f5   : > { %22056 = vmatmul.mubr.f32.gmra.mrb[26].mxu0 %v34380_v3  ;;  %22541 = vmatprep.mubr.f32.mxu1 %v34379_v56  ;;  %v9589_v56 = vld [vmem:[%s33248_s25 + $0x18] sm:$0xff] }
 0x5f6   : > { %22058 = vmatprep.mubr.f32.mxu0 %v34381_v30 }
 0x5f7   : > { %9653 = vperm.xlu1 %26517, %v9589_v56   ;;  %v9594_v56 = vld [vmem:[%s33248_s25 + $0x40] sm:$0xff] }
 0x5f8   : > { %22542 = vmatmul.mubr.f32.gmra.mrb[22].mxu1 %v34380_v3  ;;  %v34392_v3 = vld [vmem:[#allocation58_spill] sm:$0xff] }
 0x5f9   : > { %22059 = vmatmul.mubr.f32.gmra.mrb[28].mxu0 %v34382_v14  ;;  %22544 = vmatprep.mubr.f32.mxu1 %v34381_v30  ;;  %v34393_v30 = vld [vmem:[#allocation60_spill] sm:$0xff] }
 0x5fa   : > { %22061 = vmatprep.mubr.f32.mxu0 %v34383_v52 }
 0x5fc   : > { %22545 = vmatmul.mubr.f32.gmra.mrb[24].mxu1 %v34382_v14  ;;  %v9590_v14 = vld [vmem:[%s33248_s25 + $0x20] sm:$0xff] }
 0x5fd   : > { %22062 = vmatmul.mubr.f32.gmra.mrb[30].mxu0 %v34384_v4  ;;  %22547 = vmatprep.mubr.f32.mxu1 %v34383_v52  ;;  %v34394_v52 = vld [vmem:[#allocation62_spill] sm:$0xff] }
 0x5fe   : > { %22064 = vmatprep.mubr.f32.mxu0 %v34385_v22  ;;  %9658 = vperm.xlu1 %26517, %v9590_v14   ;;  %v9595_v14 = vld [vmem:[%s33248_s25 + $0x48] sm:$0xff] }
 0x600   : > { %22548 = vmatmul.mubr.f32.gmra.mrb[26].mxu1 %v34384_v4  ;;  %v34395_v4 = vld [vmem:[#allocation64_spill] sm:$0xff] }
 0x601   : > { %22065 = vmatmul.mubr.f32.gmra.mrb[32].mxu0 %v34386_v35  ;;  %22550 = vmatprep.mubr.f32.mxu1 %v34385_v22  ;;  %v9591_v22 = vld [vmem:[%s33248_s25 + $0x28] sm:$0xff] }
 0x602   : > { %22067 = vmatprep.mubr.f32.mxu0 %v34387_v54  ;;  %9663 = vperm.xlu1 %26517, %v9591_v22   ;;  %v9597_v22 = vld [vmem:[%s33248_s25 + $0x58] sm:$0xff] }
 0x604   : > { %22551 = vmatmul.mubr.f32.gmra.mrb[28].mxu1 %v34386_v35  ;;  %v34396_v35 = vld [vmem:[#allocation66_spill] sm:$0xff] }
 0x605   : > { %22068 = vmatmul.mubr.f32.gmra.mrb[34].mxu0 %v34388_v12  ;;  %22553 = vmatprep.mubr.f32.mxu1 %v34387_v54  ;;  %v34397_v54 = vld [vmem:[#allocation69_spill] sm:$0xff] }
 0x606   : > { %22070 = vmatprep.mubr.f32.mxu0 %v34389_v0  ;;  %9668 = vperm.xlu1 %26517, %v9592_v11   ;;  %v9599_v11 = vld [vmem:[%s33248_s25 + $0x68] sm:$0xff] }
 0x608   : > { %22554 = vmatmul.mubr.f32.gmra.mrb[30].mxu1 %v34388_v12  ;;  %v34398_v12 = vld [vmem:[#allocation73_spill] sm:$0xff] }
 0x609   : > { %22071 = vmatmul.mubr.f32.gmra.mrb[36].mxu0 %v34390_v27  ;;  %22556 = vmatprep.mubr.f32.mxu1 %v34389_v0  ;;  %v34399_v0 = vld [vmem:[#allocation74_spill] sm:$0xff] }
 0x60a   : > { %22073 = vmatprep.mubr.f32.mxu0 %v34391_v49  ;;  %9673 = vperm.xlu1 %26517, %v9593_v59   ;;  %v34410_v59 = vld [vmem:[#allocation106_spill] sm:$0xff] }
 0x60c   : > { %22557 = vmatmul.mubr.f32.gmra.mrb[32].mxu1 %v34390_v27  ;;  %v34400_v27 = vld [vmem:[#allocation76_spill] sm:$0xff] }
 0x60d   : > { %22074 = vmatmul.mubr.f32.gmra.mrb[38].mxu0 %v34392_v3  ;;  %22559 = vmatprep.mubr.f32.mxu1 %v34391_v49  ;;  %v34401_v49 = vld [vmem:[#allocation80_spill] sm:$0xff] }
 0x60e   : > { %22076 = vmatprep.mubr.f32.mxu0 %v34393_v30  ;;  %9678 = vperm.xlu1 %26517, %v9594_v56   ;;  %v34412_v56 = vld [vmem:[#allocation112_spill] sm:$0xff] }
 0x610   : > { %22560 = vmatmul.mubr.f32.gmra.mrb[34].mxu1 %v34392_v3  ;;  %v34402_v3 = vld [vmem:[#allocation82_spill] sm:$0xff] }
 0x611   : > { %22077 = vmatmul.mubr.f32.gmra.mrb[40].mxu0 %v34394_v52  ;;  %22562 = vmatprep.mubr.f32.mxu1 %v34393_v30  ;;  %v34403_v30 = vld [vmem:[#allocation83_spill] sm:$0xff] }
 0x612   : > { %22079 = vmatprep.mubr.f32.mxu0 %v34395_v4  ;;  %9683 = vperm.xlu1 %26517, %v9595_v14   ;;  %v34413_v14 = vld [vmem:[#allocation113_spill] sm:$0xff] }
 0x614   : > { %22563 = vmatmul.mubr.f32.gmra.mrb[36].mxu1 %v34394_v52  ;;  %v34404_v52 = vld [vmem:[#allocation88_spill] sm:$0xff] }
 0x615   : > { %22080 = vmatmul.mubr.f32.gmra.mrb[42].mxu0 %v34396_v35  ;;  %22565 = vmatprep.mubr.f32.mxu1 %v34395_v4  ;;  %v34405_v4 = vld [vmem:[#allocation91_spill] sm:$0xff] }
 0x616   : > { %22082 = vmatprep.mubr.f32.mxu0 %v34397_v54  ;;  %9693 = vperm.xlu1 %26517, %v9597_v22   ;;  %v34414_v22 = vld [vmem:[#allocation117_spill] sm:$0xff] }
 0x618   : > { %22566 = vmatmul.mubr.f32.gmra.mrb[38].mxu1 %v34396_v35  ;;  %v34406_v35 = vld [vmem:[#allocation96_spill] sm:$0xff] }
 0x619   : > { %22083 = vmatmul.mubr.f32.gmra.mrb[44].mxu0 %v34398_v12  ;;  %22568 = vmatprep.mubr.f32.mxu1 %v34397_v54  ;;  %v34407_v54 = vld [vmem:[#allocation98_spill] sm:$0xff] }
 0x61a   : > { %22085 = vmatprep.mubr.f32.mxu0 %v34399_v0  ;;  %9703 = vperm.xlu1 %26517, %v9599_v11   ;;  %v9598_v11 = vld [vmem:[%s33248_s25 + $0x60] sm:$0xff] }
 0x61c   : > { %22569 = vmatmul.mubr.f32.gmra.mrb[40].mxu1 %v34398_v12  ;;  %v34408_v12 = vld [vmem:[#allocation103_spill] sm:$0xff] }
 0x61d   : > { %22086 = vmatmul.mubr.f32.gmra.mrb[46].mxu0 %v34400_v27  ;;  %22571 = vmatprep.mubr.f32.mxu1 %v34399_v0  ;;  %v34409_v0 = vld [vmem:[#allocation105_spill] sm:$0xff] }
 0x61e   : > { %22088 = vmatprep.mubr.f32.mxu0 %v34401_v49 }
 0x620   : > { %22572 = vmatmul.mubr.f32.gmra.mrb[42].mxu1 %v34400_v27  ;;  %v9601_v27 = vld [vmem:[%s33248_s25 + $0x78] sm:$0xff] }
 0x621   : > { %22089 = vmatmul.mubr.f32.gmra.mrb[48].mxu0 %v34402_v3  ;;  %22574 = vmatprep.mubr.f32.mxu1 %v34401_v49  ;;  %v34411_v49 = vld [vmem:[#allocation107_spill] sm:$0xff] }
 0x622   : > { %22091 = vmatprep.mubr.f32.mxu0 %v34403_v30  ;;  %9713 = vperm.xlu1 %26517, %v9601_v27   ;;  %v9602_v27 = vld [vmem:[%s33248_s25 + $0x80] sm:$0xff] }
 0x624   : > { %22575 = vmatmul.mubr.f32.gmra.mrb[44].mxu1 %v34402_v3  ;;  %v9603_v3 = vld [vmem:[%s33248_s25 + $0x88] sm:$0xff] }
 0x625   : > { %22092 = vmatmul.mubr.f32.gmra.mrb[50].mxu0 %v34404_v52  ;;  %22577 = vmatprep.mubr.f32.mxu1 %v34403_v30  ;;  %v9587_v30 = vld [vmem:[%s33248_s25 + $0x8] sm:$0xff] }
 0x626   : > { %22094 = vmatprep.mubr.f32.mxu0 %v34405_v4  ;;  %9723 = vperm.xlu1 %26517, %v9603_v3   ;;  %v9621_v3 = vld [vmem:[%s33248_s25 + $0x118] sm:$0xff] }
 0x627   : > { %9643 = vperm.xlu0 %26518, %v9587_v30   ;;  %v9612_v30 = vld [vmem:[%s33248_s25 + $0xd0] sm:$0xff] }
 0x628   : > { %22578 = vmatmul.mubr.f32.gmra.mrb[46].mxu1 %v34404_v52  ;;  %v9605_v52 = vld [vmem:[%s33248_s25 + $0x98] sm:$0xff] }
 0x629   : > { %22095 = vmatmul.mubr.f32.gmra.mrb[52].mxu0 %v34406_v35  ;;  %22580 = vmatprep.mubr.f32.mxu1 %v34405_v4  ;;  %v9596_v4 = vld [vmem:[%s33248_s25 + $0x50] sm:$0xff] }
 0x62a   : > { %22097 = vmatprep.mubr.f32.mxu0 %v34407_v54  ;;  %9733 = vperm.xlu1 %26517, %v9605_v52   ;;  %v9614_v52 = vld [vmem:[%s33248_s25 + $0xe0] sm:$0xff] }
 0x62b   : > { %9688 = vperm.xlu0 %26518, %v9596_v4   ;;  %v9625_v4 = vld [vmem:[%s33248_s25 + $0x138] sm:$0xff] }
 0x62c   : > { %22581 = vmatmul.mubr.f32.gmra.mrb[48].mxu1 %v34406_v35  ;;  %v34415_v35 = vld [vmem:[#allocation119_spill] sm:$0xff] }
 0x62d   : > { %22098 = vmatmul.mubr.f32.gmra.mrb[54].mxu0 %v34408_v12  ;;  %22583 = vmatprep.mubr.f32.mxu1 %v34407_v54  ;;  %v9607_v54 = vld [vmem:[%s33248_s25 + $0xa8] sm:$0xff] }
 0x62e   : > { %22100 = vmatprep.mubr.f32.mxu0 %v34409_v0  ;;  %9743 = vperm.xlu1 %26517, %v9607_v54   ;;  %v9618_v54 = vld [vmem:[%s33248_s25 + $0x100] sm:$0xff] }
 0x62f   : > { %9698 = vperm.xlu0 %26518, %v9598_v11   ;;  %v9629_v11 = vld [vmem:[%s33248_s25 + $0x158] sm:$0xff] }
 0x630   : > { %22584 = vmatmul.mubr.f32.gmra.mrb[50].mxu1 %v34408_v12  ;;  %v34416_v12 = vld [vmem:[#allocation122_spill] sm:$0xff] }
 0x631   : > { %22101 = vmatmul.mubr.f32.gmra.mrb[56].mxu0 %v34410_v59  ;;  %22586 = vmatprep.mubr.f32.mxu1 %v34409_v0  ;;  %v9609_v0 = vld [vmem:[%s33248_s25 + $0xb8] sm:$0xff] }
 0x632   : > { %22103 = vmatprep.mubr.f32.mxu0 %v34411_v49  ;;  %9753 = vperm.xlu1 %26517, %v9609_v0   ;;  %v9631_v0 = vld [vmem:[%s33248_s25 + $0x168] sm:$0xff] }
 0x634   : > { %22587 = vmatmul.mubr.f32.gmra.mrb[52].mxu1 %v34410_v59  ;;  %v9600_v59 = vld [vmem:[%s33248_s25 + $0x70] sm:$0xff] }
 0x635   : > { %22104 = vmatmul.mubr.f32.gmra.mrb[58].mxu0 %v34412_v56  ;;  %22589 = vmatprep.mubr.f32.mxu1 %v34411_v49  ;;  %v9604_v49 = vld [vmem:[%s33248_s25 + $0x90] sm:$0xff] }
 0x636   : > { %22106 = vmatprep.mubr.f32.mxu0 %v34413_v14  ;;  %9708 = vperm.xlu0 %26518, %v9600_v59   ;;  %v9622_v59 = vld [vmem:[%s33248_s25 + $0x120] sm:$0xff] }
 0x638   : > { %22590 = vmatmul.mubr.f32.gmra.mrb[54].mxu1 %v34412_v56  ;;  %v9610_v56 = vld [vmem:[%s33248_s25 + $0xc0] sm:$0xff] }
 0x639   : > { %22107 = vmatmul.mubr.f32.gmra.mrb[60].mxu0 %v34414_v22  ;;  %22592 = vmatprep.mubr.f32.mxu1 %v34413_v14  ;;  %v9623_v14 = vld [vmem:[%s33248_s25 + $0x128] sm:$0xff] }
 0x63a   : > { %22109 = vmatprep.mubr.f32.mxu0 %v34415_v35  ;;  %9718 = vperm.xlu0 %26518, %v9602_v27   ;;  %v9624_v27 = vld [vmem:[%s33248_s25 + $0x130] sm:$0xff] }
 0x63c   : > { %22593 = vmatmul.mubr.f32.gmra.mrb[56].mxu1 %v34414_v22  ;;  %v9616_v22 = vld [vmem:[%s33248_s25 + $0xf0] sm:$0xff] }
 0x63d   : > { %22110 = vmatmul.mubr.f32.gmra.mrb[62].mxu0 %v28601_v6  ;;  %22595 = vmatprep.mubr.f32.mxu1 %v34415_v35  ;;  %v9627_v35 = vld [vmem:[%s33248_s25 + $0x148] sm:$0xff] }
 0x63e   : > { %22112 = vmatprep.mubr.f32.mxu0 %v34416_v12  ;;  %9728 = vperm.xlu0 %26518, %v9604_v49   ;;  %v9626_v49 = vld [vmem:[%s33248_s25 + $0x140] sm:$0xff] }
 0x640   : > { %22596 = vmatmul.mubr.f32.gmra.mrb[58].mxu1 %v28601_v6  ;;  %v9611_v6 = vld [vmem:[%s33248_s25 + $0xc8] sm:$0xff] }
 0x641   : > { %22113 = vmatmul.mubr.f32.gmra.mrb[64].mxu0 %v28619_v2  ;;  %22598 = vmatprep.mubr.f32.mxu1 %v34416_v12  ;;  %v9620_v12 = vld [vmem:[%s33248_s25 + $0x110] sm:$0xff] }
 0x642   : > { %22115 = vmatprep.mubr.f32.mxu0 %v28627_v51  ;;  %9763 = vperm.xlu1 %26517, %v9611_v6   ;;  %v9633_v6 = vld [vmem:[%s33248_s25 + $0x178] sm:$0xff] }
 0x644   : > { %22599 = vmatmul.mubr.f32.gmra.mrb[60].mxu1 %v28619_v2  ;;  %v9613_v2 = vld [vmem:[%s33248_s25 + $0xd8] sm:$0xff] }
 0x645   : > { %22116 = vmatmul.mubr.f32.gmra.mrb[66].mxu0 %v28632_v7  ;;  %22601 = vmatprep.mubr.f32.mxu1 %v28627_v51  ;;  %v9615_v51 = vld [vmem:[%s33248_s25 + $0xe8] sm:$0xff] }
 0x646   : > { %22124 = vmatprep.mubr.f32.mxu0 %v27862_v62  ;;  %9773 = vperm.xlu1 %26517, %v9613_v2   ;;  %v9635_v2 = vld [vmem:[%s33248_s25 + $0x188] sm:$0xff] }
 0x648   : > { %22602 = vmatmul.mubr.f32.gmra.mrb[62].mxu1 %v28632_v7  ;;  %v9617_v7 = vld [vmem:[%s33248_s25 + $0xf8] sm:$0xff] }
 0x649   : > { %22125 = vmatmul.mubr.f32.vlgmr.msra.gmra.mrb[18].mxu0 %v27883_v16  ;;  %22610 = vmatprep.mubr.f32.mxu1 %v27862_v62 }
 0x64a   : > { %24535 = vmatpush3.bf16.msra.mxu0 %v34308_v13  ;;  %22127 = vmatprep.mubr.f32.mxu0 %v27885_v39  ;;  %v9619_v13 = vld [vmem:[%s33248_s25 + $0x108] sm:$0xff] }
 0x64b   : > { %22203 = vmatprep.subr.mxu0 %v34324_v48  ;;  %9783 = vperm.xlu1 %26517, %v9615_v51   ;;  %v9628_v51 = vld [vmem:[%s33248_s25 + $0x150] sm:$0xff] }
 0x64c   : > { %22611 = vmatmul.mubr.f32.vlgmr.msra.gmra.mrb[14].mxu1 %v27883_v16 }
 0x64d   : > { %24559 = vmatpush3.bf16.msra.mxu1 %v27978_v33  ;;  %22128 = vmatmul.mubr.f32.gmra.mrb[20].mxu0 %v27894_v17  ;;  %v9606_v33 = vld [vmem:[%s33248_s25 + $0xa0] sm:$0xff] }
 0x64e   : > { %22689 = vmatprep.subr.mxu1 %v34326_v9  ;;  %22204 = vmatpush3.msra.mxu0 %v34324_v48  ;;  %v34417_v48 = vld [vmem:[#allocation7_spill] sm:$0xff] }
 0x64f   : > { %22613 = vmatprep.mubr.f32.mxu1 %v27885_v39  ;;  %22130 = vmatprep.mubr.f32.mxu0 %v27914_v46 }
 0x650   : > { %22614 = vmatmul.mubr.f32.gmra.mrb[16].mxu1 %v27894_v17  ;;  %9738 = vperm.xlu0 %26518, %v9606_v33   ;;  %v9630_v33 = vld [vmem:[%s33248_s25 + $0x160] sm:$0xff] }
 0x651   : > { %22690 = vmatpush3.msra.mxu1 %v34326_v9  ;;  %22131 = vmatmul.mubr.f32.gmra.mrb[22].mxu0 %v27918_v15  ;;  %v9608_v9 = vld [vmem:[%s33248_s25 + $0xb0] sm:$0xff] }
 0x652   : > { %24753 = vmatprep.subr.bf16.mxu1 %v34417_v48  ;;  %22616 = vmatprep.mubr.f32.mxu1 %v27914_v46 }
 0x653   : > { %22133 = vmatprep.mubr.f32.mxu0 %v27967_v47  ;;  %9793 = vperm.xlu1 %26517, %v9617_v7   ;;  %v9632_v7 = vld [vmem:[%s33248_s25 + $0x170] sm:$0xff] }
 0x654   : > { %22617 = vmatmul.mubr.f32.gmra.mrb[18].mxu1 %v27918_v15  ;;  %9748 = vperm.xlu0 %26518, %v9608_v9   ;;  %v9634_v9 = vld [vmem:[%s33248_s25 + $0x180] sm:$0xff] }
 0x655   : > { %22134 = vmatmul.mubr.f32.gmra.mrb[24].mxu0 %v27970_v8  ;;  %22619 = vmatprep.mubr.f32.mxu1 %v27967_v47 }
 0x656   : > { %22136 = vmatprep.mubr.f32.mxu0 %v27988_v63 }
 0x657   : > { %9803 = vperm.xlu1 %26517, %v9619_v13   ;;  %v34418_v13 = vld [vmem:[#allocation102_spill] sm:$0xff] }
 0x658   : > { %22620 = vmatmul.mubr.f32.gmra.mrb[20].mxu1 %v27970_v8  ;;  %9758 = vperm.xlu0 %26518, %v9610_v56   ;;  %v34419_v56 = vld [vmem:[#allocation104_spill] sm:$0xff] }
 0x659   : > { %22137 = vmatmul.mubr.f32.gmra.mrb[26].mxu0 %v28014_v23  ;;  %22622 = vmatprep.mubr.f32.mxu1 %v27988_v63 }
 0x65a   : > { %22139 = vmatprep.mubr.f32.mxu0 %v28022_v25 }
 0x65b   : > { %9813 = vperm.xlu1 %26517, %v9621_v3   ;;  %v34420_v3 = vld [vmem:[#allocation110_spill] sm:$0xff] }
 0x65c   : > { %22623 = vmatmul.mubr.f32.gmra.mrb[22].mxu1 %v28014_v23  ;;  %9768 = vperm.xlu0 %26518, %v9612_v30   ;;  %v34421_v30 = vld [vmem:[#allocation111_spill] sm:$0xff] }
 0x65d   : > { %22140 = vmatmul.mubr.f32.gmra.mrb[28].mxu0 %v28061_v34  ;;  %22625 = vmatprep.mubr.f32.mxu1 %v28022_v25 }
 0x65e   : > { %22142 = vmatprep.mubr.f32.mxu0 %v28085_v26 }
 0x65f   : > { %9823 = vperm.xlu1 %26517, %v9623_v14   ;;  %v34422_v14 = vld [vmem:[#allocation114_spill] sm:$0xff] }
 0x660   : > { %22626 = vmatmul.mubr.f32.gmra.mrb[24].mxu1 %v28061_v34  ;;  %9778 = vperm.xlu0 %26518, %v9614_v52   ;;  %v34423_v52 = vld [vmem:[#allocation116_spill] sm:$0xff] }
 0x661   : > { %22143 = vmatmul.mubr.f32.gmra.mrb[30].mxu0 %v28103_v43  ;;  %22628 = vmatprep.mubr.f32.mxu1 %v28085_v26 }
 0x662   : > { %22145 = vmatprep.mubr.f32.mxu0 %v28121_v29 }
 0x663   : > { %9833 = vperm.xlu1 %26517, %v9625_v4   ;;  %v34424_v4 = vld [vmem:[#allocation118_spill] sm:$0xff] }
 0x664   : > { %22629 = vmatmul.mubr.f32.gmra.mrb[26].mxu1 %v28103_v43  ;;  %9788 = vperm.xlu0 %26518, %v9616_v22   ;;  %v34425_v22 = vld [vmem:[#allocation120_spill] sm:$0xff] }
 0x665   : > { %22146 = vmatmul.mubr.f32.gmra.mrb[32].mxu0 %v28126_v38  ;;  %22631 = vmatprep.mubr.f32.mxu1 %v28121_v29 }
 0x666   : > { %22148 = vmatprep.mubr.f32.mxu0 %v28150_v53 }
 0x667   : > { %9843 = vperm.xlu1 %26517, %v9627_v35   ;;  %v34426_v35 = vld [vmem:[#allocation121_spill] sm:$0xff] }
 0x668   : > { %22632 = vmatmul.mubr.f32.gmra.mrb[28].mxu1 %v28126_v38  ;;  %9798 = vperm.xlu0 %26518, %v9618_v54   ;;  %v34427_v54 = vld [vmem:[#allocation6_spill] sm:$0xff] }
 0x669   : > { %22149 = vmatmul.mubr.f32.gmra.mrb[34].mxu0 %v28166_v61  ;;  %22634 = vmatprep.mubr.f32.mxu1 %v28150_v53 }
 0x66a   : > { %22151 = vmatprep.mubr.f32.mxu0 %v28170_v18 }
 0x66b   : > { %9853 = vperm.xlu1 %26517, %v9629_v11   ;;  %v34428_v11 = vand.u32 4294901760, %v34427_v54 }
 0x66c   : > { %22635 = vmatmul.mubr.f32.gmra.mrb[30].mxu1 %v28166_v61  ;;  %9808 = vperm.xlu0 %26518, %v9620_v12  }
 0x66d   : > { %22152 = vmatmul.mubr.f32.gmra.mrb[36].mxu0 %v28196_v28  ;;  %22637 = vmatprep.mubr.f32.mxu1 %v28170_v18  ;;  %v13525_v12 = vsub.f32 %v34427_v54, %v34428_v11 }
 0x66e   : > { %22154 = vmatprep.mubr.f32.mxu0 %v28201_v57 }
 0x66f   : > { %9863 = vperm.xlu1 %26517, %v9631_v0   ;;  %v34429_v0 = vld [vmem:[#allocation8_spill] sm:$0xff] }
 0x670   : > { %22638 = vmatmul.mubr.f32.gmra.mrb[32].mxu1 %v28196_v28  ;;  %9818 = vperm.xlu0 %26518, %v9622_v59   ;;  %v34430_v59 = vand.u32 4294901760, %v34429_v0 }
 0x671   : > { %22155 = vmatmul.mubr.f32.gmra.mrb[38].mxu0 %v28221_v5  ;;  %22640 = vmatprep.mubr.f32.mxu1 %v28201_v57 }
 0x672   : > { %22157 = vmatprep.mubr.f32.mxu0 %v28232_v32 }
 0x673   : > { %9873 = vperm.xlu1 %26517, %v9633_v6   ;;  %v13532_v6 = vsub.f32 %v34429_v0, %v34430_v59  ;;  %v12756_v59 = vld [vmem:[%s33246_s23 + $0x30] sm:$0xff] }
 0x674   : > { %22641 = vmatmul.mubr.f32.gmra.mrb[34].mxu1 %v28221_v5  ;;  %9828 = vperm.xlu0 %26518, %v9624_v27   ;;  %v34431_v27 = vld [vmem:[#allocation9_spill] sm:$0xff] }
 0x675   : > { %22158 = vmatmul.mubr.f32.gmra.mrb[40].mxu0 %v28249_v1  ;;  %22643 = vmatprep.mubr.f32.mxu1 %v28232_v32 }
 0x676   : > { %22160 = vmatprep.mubr.f32.mxu0 %v28263_v36 }
 0x677   : > { %9883 = vperm.xlu1 %26517, %v9635_v2   ;;  %v29228_v2 = vsel %vm2751_vm4, %v34431_v27, 0 }
 0x678   : > { %22644 = vmatmul.mubr.f32.gmra.mrb[36].mxu1 %v28249_v1  ;;  %9838 = vperm.xlu0 %26518, %v9626_v49   ;;  %v29234_v49 = vand.u32 4294901760, %v29228_v2 }
 0x679   : > { %22161 = vmatmul.mubr.f32.gmra.mrb[42].mxu0 %v28278_v37  ;;  %22646 = vmatprep.mubr.f32.mxu1 %v28263_v36 }
 0x67a   : > { %22163 = vmatprep.mubr.f32.mxu0 %v28290_v40  ;;  %34432 = vst [vmem:[#allocation18_spill] sm:$0xff] %v29234_v49 }
 0x67c   : > { %22647 = vmatmul.mubr.f32.gmra.mrb[38].mxu1 %v28278_v37  ;;  %9848 = vperm.xlu0 %26518, %v9628_v51   ;;  %v13526_v51 = vand.u32 4294901760, %v13525_v12 }
 0x67d   : > { %22164 = vmatmul.mubr.f32.gmra.mrb[44].mxu0 %v28308_v45  ;;  %22649 = vmatprep.mubr.f32.mxu1 %v28290_v40 }
 0x67e   : > { %22166 = vmatprep.mubr.f32.mxu0 %v28310_v60 }
 0x680   : > { %22650 = vmatmul.mubr.f32.gmra.mrb[40].mxu1 %v28308_v45  ;;  %9858 = vperm.xlu0 %26518, %v9630_v33   ;;  %v13533_v33 = vand.u32 4294901760, %v13532_v6 }
 0x681   : > { %22167 = vmatmul.mubr.f32.gmra.mrb[46].mxu0 %v28333_v42  ;;  %22652 = vmatprep.mubr.f32.mxu1 %v28310_v60 }
 0x682   : > { %22169 = vmatprep.mubr.f32.mxu0 %v28348_v50 }
 0x684   : > { %22653 = vmatmul.mubr.f32.gmra.mrb[42].mxu1 %v28333_v42  ;;  %9868 = vperm.xlu0 %26518, %v9632_v7   ;;  %v29458_v7 = vld [vmem:[%s33241_s18 + $0x50] sm:$0xff] }
 0x685   : > { %22170 = vmatmul.mubr.f32.gmra.mrb[48].mxu0 %v34309_v44  ;;  %22655 = vmatprep.mubr.f32.mxu1 %v28348_v50 }
 0x686   : > { %22172 = vmatprep.mubr.f32.mxu0 %v34310_v55 }
 0x688   : > { %22656 = vmatmul.mubr.f32.gmra.mrb[44].mxu1 %v34309_v44  ;;  %9878 = vperm.xlu0 %26518, %v9634_v9   ;;  %v29463_v9 = vld [vmem:[%s33241_s18 + $0x58] sm:$0xff] }
 0x689   : > { %22173 = vmatmul.mubr.f32.gmra.mrb[50].mxu0 %v34311_v10  ;;  %22658 = vmatprep.mubr.f32.mxu1 %v34310_v55 }
 0x68a   : > { %22175 = vmatprep.mubr.f32.mxu0 %v34312_v31 }
 0x68c   : > { %22659 = vmatmul.mubr.f32.gmra.mrb[46].mxu1 %v34311_v10 }
 0x68d   : > { %22176 = vmatmul.mubr.f32.gmra.mrb[52].mxu0 %v34313_v58  ;;  %22661 = vmatprep.mubr.f32.mxu1 %v34312_v31 }
 0x68e   : > { %22178 = vmatprep.mubr.f32.mxu0 %v34314_v19 }
 0x690   : > { %22662 = vmatmul.mubr.f32.gmra.mrb[48].mxu1 %v34313_v58 }
 0x691   : > { %22179 = vmatmul.mubr.f32.gmra.mrb[54].mxu0 %v34315_v24  ;;  %22664 = vmatprep.mubr.f32.mxu1 %v34314_v19 }
 0x692   : > { %22181 = vmatprep.mubr.f32.mxu0 %v34316_v41 }
 0x694   : > { %22665 = vmatmul.mubr.f32.gmra.mrb[50].mxu1 %v34315_v24 }
 0x695   : > { %22182 = vmatmul.mubr.f32.gmra.mrb[56].mxu0 %v34317_v21  ;;  %22667 = vmatprep.mubr.f32.mxu1 %v34316_v41 }
 0x696   : > { %22184 = vmatprep.mubr.f32.mxu0 %v34318_v20 }
 0x698   : > { %22668 = vmatmul.mubr.f32.gmra.mrb[52].mxu1 %v34317_v21 }
 0x699   : > { %22185 = vmatmul.mubr.f32.gmra.mrb[58].mxu0 %v34418_v13  ;;  %22670 = vmatprep.mubr.f32.mxu1 %v34318_v20 }
 0x69a   : > { %22187 = vmatprep.mubr.f32.mxu0 %v34419_v56 }
 0x69c   : > { %22671 = vmatmul.mubr.f32.gmra.mrb[54].mxu1 %v34418_v13 }
 0x69d   : > { %22188 = vmatmul.mubr.f32.gmra.mrb[60].mxu0 %v34420_v3  ;;  %22673 = vmatprep.mubr.f32.mxu1 %v34419_v56 }
 0x69e   : > { %22190 = vmatprep.mubr.f32.mxu0 %v34421_v30 }
 0x6a0   : > { %22674 = vmatmul.mubr.f32.gmra.mrb[56].mxu1 %v34420_v3 }
 0x6a1   : > { %22191 = vmatmul.mubr.f32.gmra.mrb[62].mxu0 %v34422_v14  ;;  %22676 = vmatprep.mubr.f32.mxu1 %v34421_v30 }
 0x6a2   : > { %22193 = vmatprep.mubr.f32.mxu0 %v34423_v52 }
 0x6a4   : > { %22677 = vmatmul.mubr.f32.gmra.mrb[58].mxu1 %v34422_v14 }
 0x6a5   : > { %22194 = vmatmul.mubr.f32.gmra.mrb[64].mxu0 %v34424_v4  ;;  %22679 = vmatprep.mubr.f32.mxu1 %v34423_v52 }
 0x6a6   : > { %22196 = vmatprep.mubr.f32.mxu0 %v34425_v22 }
 0x6a8   : > { %22680 = vmatmul.mubr.f32.gmra.mrb[60].mxu1 %v34424_v4 }
 0x6a9   : > { %22197 = vmatmul.mubr.f32.gmra.mrb[66].mxu0 %v34426_v35  ;;  %22682 = vmatprep.mubr.f32.mxu1 %v34425_v22 }
 0x6aa   : > { %22205 = vmatprep.mubr.f32.mxu0 %v27862_v62 }
 0x6ac   : > { %22683 = vmatmul.mubr.f32.gmra.mrb[62].mxu1 %v34426_v35 }
 0x6ad   : > { %22206 = vmatmul.mubr.f32.vlgmr.msra.gmra.mrb[18].mxu0 %v27883_v16  ;;  %22691 = vmatprep.mubr.f32.mxu1 %v27862_v62  ;;  %v29243_v62 = vpack.c.bf16 %v13533_v33, %v13526_v51 }
 0x6ae   : > { %22208 = vmatprep.mubr.f32.mxu0 %v27885_v39 }
 0x6b0   : > { %22692 = vmatmul.mubr.f32.vlgmr.msra.gmra.mrb[14].mxu1 %v27883_v16 }
 0x6b1   : > { %24755 = vmatpush3.bf16.msra.mxu1 %v34417_v48  ;;  %22209 = vmatmul.mubr.f32.gmra.mrb[20].mxu0 %v27894_v17 }
 0x6b2   : > { %23412 = vmatprep.subr.mxu1 %v29234_v49  ;;  %22694 = vmatprep.mubr.f32.mxu1 %v27885_v39 }
 0x6b3   : > { %22211 = vmatprep.mubr.f32.mxu0 %v27914_v46 }
 0x6b4   : > { %22695 = vmatmul.mubr.f32.gmra.mrb[16].mxu1 %v27894_v17 }
 0x6b5   : > { %23413 = vmatpush3.msra.mxu1 %v29234_v49  ;;  %22212 = vmatmul.mubr.f32.gmra.mrb[22].mxu0 %v27918_v15 }
 0x6b6   : > { %24757 = vmatprep.subr.bf16.mxu1 %v29243_v62  ;;  %22697 = vmatprep.mubr.f32.mxu1 %v27914_v46  ;;  %v29335_v46 = vld [vmem:[%s33241_s18 + $0x18] sm:$0xff] }
 0x6b7   : > { %22214 = vmatprep.mubr.f32.mxu0 %v27967_v47 }
 0x6b8   : > { %22698 = vmatmul.mubr.f32.gmra.mrb[18].mxu1 %v27918_v15 }
 0x6b9   : > { %22215 = vmatmul.mubr.f32.gmra.mrb[24].mxu0 %v27970_v8  ;;  %22700 = vmatprep.mubr.f32.mxu1 %v27967_v47 }
 0x6ba   : > { %22217 = vmatprep.mubr.f32.mxu0 %v27988_v63 }
 0x6bc   : > { %22701 = vmatmul.mubr.f32.gmra.mrb[20].mxu1 %v27970_v8  ;;  %v29354_v8 = vld [vmem:[%s33241_s18 + $0x20] sm:$0xff] }
 0x6bd   : > { %22218 = vmatmul.mubr.f32.gmra.mrb[26].mxu0 %v28014_v23  ;;  %22703 = vmatprep.mubr.f32.mxu1 %v27988_v63  ;;  %v29359_v63 = vld [vmem:[%s33241_s18 + $0x28] sm:$0xff] }
 0x6be   : > { %22220 = vmatprep.mubr.f32.mxu0 %v28022_v25 }
 0x6c0   : > { %22704 = vmatmul.mubr.f32.gmra.mrb[22].mxu1 %v28014_v23  ;;  %v33537_v23 = vand.u32 4294901760, %v29354_v8 }
 0x6c1   : > { %22221 = vmatmul.mubr.f32.gmra.mrb[28].mxu0 %v28061_v34  ;;  %22706 = vmatprep.mubr.f32.mxu1 %v28022_v25  ;;  %v33536_v25 = vand.u32 4294901760, %v29359_v63 }
 0x6c2   : > { %22223 = vmatprep.mubr.f32.mxu0 %v28085_v26 }
 0x6c4   : > { %22707 = vmatmul.mubr.f32.gmra.mrb[24].mxu1 %v28061_v34  ;;  %v12751_v34 = vld [vmem:[%s33246_s23 + $0x8] sm:$0xff] }
 0x6c5   : > { %22224 = vmatmul.mubr.f32.gmra.mrb[30].mxu0 %v28103_v43  ;;  %22709 = vmatprep.mubr.f32.mxu1 %v28085_v26  ;;  %v29389_v26 = vld [vmem:[%s33241_s18 + $0x38] sm:$0xff] }
 0x6c6   : > { %22226 = vmatprep.mubr.f32.mxu0 %v28121_v29 }
 0x6c8   : > { %22710 = vmatmul.mubr.f32.gmra.mrb[26].mxu1 %v28103_v43  ;;  %v29308_v43 = vld [vmem:[%s33241_s18] sm:$0xff] }
 0x6c9   : > { %22227 = vmatmul.mubr.f32.gmra.mrb[32].mxu0 %v28126_v38  ;;  %22712 = vmatprep.mubr.f32.mxu1 %v28121_v29  ;;  %v33542_v16 = vand.u32 4294901760, %v29308_v43  ;;  %v12750_v29 = vld [vmem:[%s33246_s23] sm:$0xff] }
 0x6ca   : > { %22229 = vmatprep.mubr.f32.mxu0 %v28150_v53 }
 0x6cc   : > { %22713 = vmatmul.mubr.f32.gmra.mrb[28].mxu1 %v28126_v38  ;;  %v33538_v38 = vand.u32 4294901760, %v29335_v46 }
 0x6cd   : > { %22230 = vmatmul.mubr.f32.gmra.mrb[34].mxu0 %v28166_v61  ;;  %22715 = vmatprep.mubr.f32.mxu1 %v28150_v53  ;;  %v12801_v53 = vsel %vm4271_vm12, %v12750_v29, 0 }
 0x6ce   : > { %22232 = vmatprep.mubr.f32.mxu0 %v28170_v18 }
 0x6d0   : > { %22716 = vmatmul.mubr.f32.gmra.mrb[30].mxu1 %v28166_v61 }
 0x6d1   : > { %22233 = vmatmul.mubr.f32.gmra.mrb[36].mxu0 %v28196_v28  ;;  %22718 = vmatprep.mubr.f32.mxu1 %v28170_v18  ;;  %v29384_v18 = vld [vmem:[%s33241_s18 + $0x30] sm:$0xff] }
 0x6d2   : > { %22235 = vmatprep.mubr.f32.mxu0 %v28201_v57  ;;  %v33535_v61 = vand.u32 4294901760, %v29384_v18 }
 0x6d4   : > { %22719 = vmatmul.mubr.f32.gmra.mrb[32].mxu1 %v28196_v28  ;;  %v29313_v28 = vld [vmem:[%s33241_s18 + $0x8] sm:$0xff] }
 0x6d5   : > { %22236 = vmatmul.mubr.f32.gmra.mrb[38].mxu0 %v28221_v5  ;;  %22721 = vmatprep.mubr.f32.mxu1 %v28201_v57  ;;  %v33541_v39 = vand.u32 4294901760, %v29313_v28  ;;  %v29374_v57 = vpack.c.bf16 %v33536_v25, %v33537_v23  ;;  %v12760_v23 = vld [vmem:[%s33246_s23 + $0x50] sm:$0xff] }
 0x6d6   : > { %22238 = vmatprep.mubr.f32.mxu0 %v28232_v32 }
 0x6d7   : > { %v29323_v17 = vpack.c.bf16 %v33541_v39, %v33542_v16  ;;  %34435 = vst [vmem:[#allocation79_spill] sm:$0xff] %v29374_v57 }
 0x6d8   : > { %22722 = vmatmul.mubr.f32.gmra.mrb[34].mxu1 %v28221_v5  ;;  %v33534_v5 = vand.u32 4294901760, %v29389_v26 }
 0x6d9   : > { %22239 = vmatmul.mubr.f32.gmra.mrb[40].mxu0 %v28249_v1  ;;  %22724 = vmatprep.mubr.f32.mxu1 %v28232_v32  ;;  %34433 = vst [vmem:[#allocation71_spill] sm:$0xff] %v29323_v17  ;;  %v29410_v32 = vand.u32 4294901760, %v12801_v53 }
 0x6da   : > { %22241 = vmatprep.mubr.f32.mxu0 %v28263_v36  ;;  %24561 = vmatprep.subr.bf16.mxu0 %v29323_v17 }
 0x6db   : > { %24563 = vmatpush3.bf16.msra.mxu0 %v29323_v17  ;;  %34437 = vst [vmem:[#allocation85_spill] sm:$0xff] %v29410_v32 }
 0x6dc   : > { %22725 = vmatmul.mubr.f32.gmra.mrb[36].mxu1 %v28249_v1  ;;  %v12753_v1 = vld [vmem:[%s33246_s23 + $0x18] sm:$0xff] }
 0x6dd   : > { %22242 = vmatmul.mubr.f32.gmra.mrb[42].mxu0 %v28278_v37  ;;  %22727 = vmatprep.mubr.f32.mxu1 %v28263_v36  ;;  %v12752_v36 = vld [vmem:[%s33246_s23 + $0x10] sm:$0xff] }
 0x6de   : > { %22244 = vmatprep.mubr.f32.mxu0 %v28290_v40 }
 0x6e0   : > { %22728 = vmatmul.mubr.f32.gmra.mrb[38].mxu1 %v28278_v37  ;;  %v29418_v37 = vld [vmem:[%s33241_s18 + $0x40] sm:$0xff] }
 0x6e1   : > { %22245 = vmatmul.mubr.f32.gmra.mrb[44].mxu0 %v28308_v45  ;;  %22730 = vmatprep.mubr.f32.mxu1 %v28290_v40  ;;  %v29423_v40 = vld [vmem:[%s33241_s18 + $0x48] sm:$0xff] }
 0x6e2   : > { %22247 = vmatprep.mubr.f32.mxu0 %v28310_v60 }
 0x6e4   : > { %22731 = vmatmul.mubr.f32.gmra.mrb[40].mxu1 %v28308_v45  ;;  %v29406_v45 = vpack.c.bf16 %v33534_v5, %v33535_v61 }
 0x6e5   : > { %22248 = vmatmul.mubr.f32.gmra.mrb[46].mxu0 %v28333_v42  ;;  %22733 = vmatprep.mubr.f32.mxu1 %v28310_v60  ;;  %v12804_v60 = vsel %vm4271_vm12, %v12751_v34, 0  ;;  %v29500_v34 = vld [vmem:[%s33241_s18 + $0x60] sm:$0xff] }
 0x6e6   : > { %22250 = vmatprep.mubr.f32.mxu0 %v28348_v50  ;;  %34436 = vst [vmem:[#allocation81_spill] sm:$0xff] %v29406_v45 }
 0x6e8   : > { %22734 = vmatmul.mubr.f32.gmra.mrb[42].mxu1 %v28333_v42  ;;  %v12807_v42 = vsel %vm4271_vm12, %v12752_v36, 0  ;;  %v12819_v36 = vsel %vm4271_vm12, %v12756_v59, 0 }
 0x6e9   : > { %22251 = vmatmul.mubr.f32.gmra.mrb[48].mxu0 %v34309_v44  ;;  %22736 = vmatprep.mubr.f32.mxu1 %v28348_v50  ;;  %v29330_v50 = vld [vmem:[%s33241_s18 + $0x10] sm:$0xff] }
 0x6ea   : > { %22253 = vmatprep.mubr.f32.mxu0 %v34310_v55  ;;  %v33539_v15 = vand.u32 4294901760, %v29330_v50 }
 0x6ec   : > { %22737 = vmatmul.mubr.f32.gmra.mrb[44].mxu1 %v34309_v44  ;;  %v29347_v47 = vpack.c.bf16 %v33538_v38, %v33539_v15  ;;  %v12754_v44 = vld [vmem:[%s33246_s23 + $0x20] sm:$0xff]  ;;  %v12761_v38 = vld [vmem:[%s33246_s23 + $0x58] sm:$0xff] }
 0x6ed   : > { %22254 = vmatmul.mubr.f32.gmra.mrb[50].mxu0 %v34311_v10  ;;  %22739 = vmatprep.mubr.f32.mxu1 %v34310_v55  ;;  %v33533_v55 = vand.u32 4294901760, %v29418_v37 }
 0x6ee   : > { %22256 = vmatprep.mubr.f32.mxu0 %v34312_v31  ;;  %34434 = vst [vmem:[#allocation72_spill] sm:$0xff] %v29347_v47  ;;  %24565 = vmatprep.subr.bf16.mxu0 %v29347_v47 }
 0x6ef   : > { %24567 = vmatpush3.bf16.msra.mxu0 %v29347_v47 }
 0x6f0   : > { %22740 = vmatmul.mubr.f32.gmra.mrb[46].mxu1 %v34311_v10  ;;  %24569 = vmatprep.subr.bf16.mxu0 %v29374_v57  ;;  %v33529_v10 = vand.u32 4294901760, %v29423_v40 }
 0x6f1   : > { %22257 = vmatmul.mubr.f32.gmra.mrb[52].mxu0 %v34313_v58  ;;  %22742 = vmatprep.mubr.f32.mxu1 %v34312_v31  ;;  %v29433_v31 = vand.u32 4294901760, %v12804_v60 }
 0x6f2   : > { %22259 = vmatprep.mubr.f32.mxu0 %v34314_v19 }
 0x6f3   : > { %24571 = vmatpush3.bf16.msra.mxu0 %v29374_v57  ;;  %34438 = vst [vmem:[#allocation87_spill] sm:$0xff] %v29433_v31  ;;  %v29470_v11 = vsub.f32 %v12804_v60, %v29433_v31  ;;  %v12758_v60 = vld [vmem:[%s33246_s23 + $0x40] sm:$0xff] }
 0x6f4   : > { %22743 = vmatmul.mubr.f32.gmra.mrb[48].mxu1 %v34313_v58  ;;  %24573 = vmatprep.subr.bf16.mxu0 %v29406_v45  ;;  %v12810_v58 = vsel %vm4271_vm12, %v12753_v1, 0  ;;  %v33532_v1 = vand.u32 4294901760, %v29500_v34 }
 0x6f5   : > { %22260 = vmatmul.mubr.f32.gmra.mrb[54].mxu0 %v34315_v24  ;;  %22745 = vmatprep.mubr.f32.mxu1 %v34314_v19  ;;  %v29442_v19 = vpack.c.bf16 %v33529_v10, %v33533_v55  ;;  %34442 = vst [vmem:[#allocation95_spill] sm:$0xff] %v29470_v11  ;;  %v29472_v12 = vand.u32 4294901760, %v12810_v58  ;;  %v29549_v10 = vld [vmem:[%s33241_s18 + $0x70] sm:$0xff] }
 0x6f6   : > { %22262 = vmatprep.mubr.f32.mxu0 %v34316_v41 }
 0x6f7   : > { %24575 = vmatpush3.bf16.msra.mxu0 %v29406_v45  ;;  %34439 = vst [vmem:[#allocation90_spill] sm:$0xff] %v29442_v19  ;;  %34443 = vst [vmem:[#allocation2_spill] sm:$0xff] %v29472_v12 }
 0x6f8   : > { %22746 = vmatmul.mubr.f32.gmra.mrb[50].mxu1 %v34315_v24  ;;  %v29447_v24 = vsub.f32 %v12801_v53, %v29410_v32  ;;  %24577 = vmatprep.subr.bf16.mxu0 %v29442_v19  ;;  %v29505_v53 = vld [vmem:[%s33241_s18 + $0x68] sm:$0xff] }
 0x6f9   : > { %22263 = vmatmul.mubr.f32.gmra.mrb[56].mxu0 %v34317_v21  ;;  %22748 = vmatprep.mubr.f32.mxu1 %v34316_v41  ;;  %v29449_v41 = vand.u32 4294901760, %v12807_v42 }
 0x6fa   : > { %22265 = vmatprep.mubr.f32.mxu0 %v34318_v20  ;;  %34440 = vst [vmem:[#allocation93_spill] sm:$0xff] %v29447_v24  ;;  %v33531_v33 = vand.u32 4294901760, %v29447_v24 }
 0x6fb   : > { %34441 = vst [vmem:[#allocation94_spill] sm:$0xff] %v29449_v41  ;;  %24579 = vmatpush3.bf16.msra.mxu0 %v29442_v19  ;;  %v29492_v29 = vsub.f32 %v12807_v42, %v29449_v41  ;;  %v33530_v42 = vand.u32 4294901760, %v29505_v53 }
 0x6fc   : > { %22749 = vmatmul.mubr.f32.gmra.mrb[52].mxu1 %v34317_v21  ;;  %v12813_v21 = vsel %vm4271_vm12, %v12754_v44, 0  ;;  %v33540_v44 = vand.u32 4294901760, %v29470_v11 }
 0x6fd   : > { %22266 = vmatmul.mubr.f32.gmra.mrb[58].mxu0 %v34418_v13  ;;  %22751 = vmatprep.mubr.f32.mxu1 %v34318_v20  ;;  %v12755_v20 = vld [vmem:[%s33246_s23 + $0x28] sm:$0xff]  ;;  %v29479_v6 = vand.u32 4294901760, %v12813_v21  ;;  %34446 = vst [vmem:[#allocation13_spill] sm:$0xff] %v29492_v29 }
 0x6fe   : > { %22268 = vmatprep.mubr.f32.mxu0 %v34419_v56  ;;  %v12816_v27 = vsel %vm4271_vm12, %v12755_v20, 0  ;;  %v29521_v20 = vsub.f32 %v12810_v58, %v29472_v12  ;;  %v13024_v58 = vsub.f32 %v29447_v24, %v33531_v33  ;;  %v12759_v33 = vld [vmem:[%s33246_s23 + $0x48] sm:$0xff]  ;;  %v13034_v55 = vsub.f32 %v29470_v11, %v33540_v44 }
 0x6ff   : > { %34444 = vst [vmem:[#allocation22_spill] sm:$0xff] %v29479_v6  ;;  %v29528_v59 = vsub.f32 %v12813_v21, %v29479_v6  ;;  %v29543_v21 = vand.u32 4294901760, %v12819_v36  ;;  %v12828_v16 = vsel %vm4271_vm12, %v12759_v33, 0 }
 0x700   : > { %22752 = vmatmul.mubr.f32.gmra.mrb[54].mxu1 %v34418_v13  ;;  %v33528_v13 = vand.u32 4294901760, %v29458_v7  ;;  %34447 = vst [vmem:[#allocation25_spill] sm:$0xff] %v29521_v20  ;;  %v33548_v5 = vand.u32 4294901760, %v29521_v20  ;;  %v13025_v44 = vand.u32 4294901760, %v13024_v58 }
 0x701   : > { %22269 = vmatmul.mubr.f32.gmra.mrb[60].mxu0 %v34420_v3  ;;  %22754 = vmatprep.mubr.f32.mxu1 %v34419_v56  ;;  %v33527_v56 = vand.u32 4294901760, %v29463_v9  ;;  %34449 = vst [vmem:[#allocation20_spill] sm:$0xff] %v29528_v59  ;;  %34451 = vst [vmem:[#allocation4_spill] sm:$0xff] %v29543_v21 }
 0x702   : > { %22271 = vmatprep.mubr.f32.mxu0 %v34421_v30  ;;  %v13054_v58 = vsub.f32 %v29521_v20, %v33548_v5  ;;  %v29623_v5 = vand.u32 4294901760, %v12828_v16 }
 0x703   : > { %v29486_v51 = vpack.c.bf16 %v33527_v56, %v33528_v13  ;;  %v29535_v13 = vpack.c.bf16 %v33530_v42, %v33532_v1  ;;  %v29554_v42 = vld [vmem:[%s33241_s18 + $0x78] sm:$0xff] }
 0x704   : > { %22755 = vmatmul.mubr.f32.gmra.mrb[56].mxu1 %v34420_v3  ;;  %v12757_v3 = vld [vmem:[%s33246_s23 + $0x38] sm:$0xff]  ;;  %v33543_v1 = vand.u32 4294901760, %v29554_v42  ;;  %34461 = vst [vmem:[#allocation39_spill] sm:$0xff] %v29623_v5  ;;  %v13055_v45 = vand.u32 4294901760, %v13054_v58 }
 0x705   : > { %34445 = vst [vmem:[#allocation23_spill] sm:$0xff] %v29486_v51  ;;  %22272 = vmatmul.mubr.f32.gmra.mrb[62].mxu0 %v34422_v14  ;;  %22757 = vmatprep.mubr.f32.mxu1 %v34421_v30  ;;  %v29509_v30 = vsub.f32 %v29228_v2, %v29234_v49  ;;  %v29523_v2 = vand.u32 4294901760, %v12816_v27  ;;  %v12822_v56 = vsel %vm4271_vm12, %v12757_v3, 0  ;;  %34450 = vst [vmem:[#allocation12_spill] sm:$0xff] %v29535_v13  ;;  %v12825_v3 = vsel %vm4271_vm12, %v12758_v60, 0 }
 0x706   : > { %22274 = vmatprep.mubr.f32.mxu0 %v34423_v52  ;;  %24581 = vmatprep.subr.bf16.mxu0 %v29486_v51  ;;  %v33544_v60 = vand.u32 4294901760, %v29549_v10  ;;  %v29573_v25 = vand.u32 4294901760, %v12822_v56  ;;  %v29581_v15 = vand.u32 4294901760, %v12825_v3 }
 0x707   : > { %34448 = vst [vmem:[#allocation29_spill] sm:$0xff] %v29523_v2  ;;  %24583 = vmatpush3.bf16.msra.mxu0 %v29486_v51  ;;  %v29571_v61 = vsub.f32 %v12816_v27, %v29523_v2 }
 0x708   : > { %22758 = vmatmul.mubr.f32.gmra.mrb[58].mxu1 %v34422_v14  ;;  %v33545_v14 = vand.u32 4294901760, %v29492_v29  ;;  %24585 = vmatprep.subr.bf16.mxu0 %v29535_v13  ;;  %34454 = vst [vmem:[#allocation15_spill] sm:$0xff] %v29573_v25  ;;  %34455 = vst [vmem:[#allocation17_spill] sm:$0xff] %v29581_v15  ;;  %v29587_v27 = vpack.c.bf16 %v33543_v1, %v33544_v60  ;;  %v12831_v60 = vsel %vm4271_vm12, %v12760_v23, 0  ;;  %v34459_v23 = vand.u32 4294901760, %v29528_v59 }
 0x709   : > { %22275 = vmatmul.mubr.f32.gmra.mrb[64].mxu0 %v34424_v4  ;;  %22760 = vmatprep.mubr.f32.mxu1 %v34423_v52  ;;  %v29558_v52 = vand.u32 4294901760, %v29509_v30  ;;  %34453 = vst [vmem:[#allocation14_spill] sm:$0xff] %v29571_v61  ;;  %v29610_v33 = vsub.f32 %v12822_v56, %v29573_v25  ;;  %v12834_v56 = vsel %vm4271_vm12, %v12761_v38, 0  ;;  %v29627_v19 = vand.u32 4294901760, %v12831_v60 }
 0x70a   : > { %22277 = vmatprep.mubr.f32.mxu0 %v34425_v22  ;;  %34456 = vst [vmem:[#allocation31_spill] sm:$0xff] %v29587_v27  ;;  %v13044_v39 = vsub.f32 %v29492_v29, %v33545_v14  ;;  %v12762_v14 = vld [vmem:[%s33246_s23 + $0x60] sm:$0xff]  ;;  %v34463_v38 = vand.u32 4294901760, %v29571_v61  ;;  %v29640_v51 = vand.u32 4294901760, %v12834_v56 }
 0x70b   : > { %34452 = vst [vmem:[#allocation16_spill] sm:$0xff] %v29558_v52  ;;  %24587 = vmatpush3.bf16.msra.mxu0 %v29535_v13  ;;  %v13539_v1 = vsub.f32 %v29509_v30, %v29558_v52  ;;  %34458 = vst [vmem:[#allocation37_spill] sm:$0xff] %v29610_v33  ;;  %v29621_v13 = vsub.f32 %v12825_v3, %v29581_v15  ;;  %v12764_v3 = vld [vmem:[%s33246_s23 + $0x70] sm:$0xff] }
 0x70c   : > { %22761 = vmatmul.mubr.f32.gmra.mrb[60].mxu1 %v34424_v4  ;;  %v29595_v4 = vsub.f32 %v12819_v36, %v29543_v21  ;;  %24589 = vmatprep.subr.bf16.mxu0 %v29587_v27  ;;  %v13045_v36 = vand.u32 4294901760, %v13044_v39  ;;  %34462 = vst [vmem:[#allocation41_spill] sm:$0xff] %v29627_v19  ;;  %v13074_v39 = vsub.f32 %v29571_v61, %v34463_v38  ;;  %34464 = vst [vmem:[#allocation42_spill] sm:$0xff] %v29640_v51 }
 0x70d   : > { %22278 = vmatmul.mubr.f32.gmra.mrb[66].mxu0 %v34426_v35  ;;  %22763 = vmatprep.mubr.f32.mxu1 %v34425_v22  ;;  %v13035_v22 = vand.u32 4294901760, %v13034_v55  ;;  %v13064_v55 = vsub.f32 %v29528_v59, %v34459_v23  ;;  %34460 = vst [vmem:[#allocation38_spill] sm:$0xff] %v29621_v13  ;;  %v12837_v23 = vsel %vm4271_vm12, %v12762_v14, 0  ;;  %v33567_v47 = vand.u32 4294901760, %v29621_v13 }
 0x70e   : > { %34457 = vst [vmem:[#allocation33_spill] sm:$0xff] %v29595_v4  ;;  %v34466_v58 = vand.u32 4294901760, %v29595_v4  ;;  %v29654_v52 = vand.u32 4294901760, %v12837_v23 }
 0x70f   : > { %24591 = vmatpush3.bf16.msra.mxu0 %v29587_v27  ;;  %v13540_v27 = vand.u32 4294901760, %v13539_v1  ;;  %v13065_v57 = vand.u32 4294901760, %v13064_v55  ;;  %v29644_v1 = vsub.f32 %v12828_v16, %v29623_v5  ;;  %v12765_v16 = vld [vmem:[%s33246_s23 + $0x78] sm:$0xff]  ;;  %v34469_v55 = vand.u32 4294901760, %v29610_v33 }
 0x710   : > { %22764 = vmatmul.mubr.f32.gmra.mrb[62].mxu1 %v34426_v35  ;;  %v12763_v35 = vld [vmem:[%s33246_s23 + $0x68] sm:$0xff]  ;;  %v13084_v38 = vsub.f32 %v29595_v4, %v34466_v58  ;;  %34468 = vst [vmem:[#allocation48_spill] sm:$0xff] %v29654_v52 }
 0x711   : > { %23414 = vmatprep.mubr.f32.mxu1 %v13025_v44  ;;  %34465 = vst [vmem:[#allocation45_spill] sm:$0xff] %v29644_v1  ;;  %v12840_v14 = vsel %vm4271_vm12, %v12763_v35, 0  ;;  %v29652_v44 = vsub.f32 %v12831_v60, %v29627_v19  ;;  %v13094_v35 = vsub.f32 %v29610_v33, %v34469_v55  ;;  %v29668_v60 = vsub.f32 %v12834_v56, %v29640_v51 }
 0x712   : > { %v29670_v58 = vand.u32 4294901760, %v12840_v14  ;;  %v12846_v55 = vsel %vm4271_vm12, %v12765_v16, 0  ;;  %v13085_v56 = vand.u32 4294901760, %v13084_v38  ;;  %v29684_v33 = vsub.f32 %v12837_v23, %v29654_v52  ;;  %v12768_v16 = vld [vmem:[%s33246_s23 + $0x90] sm:$0xff] }
 0x713   : > { %34467 = vst [vmem:[#allocation47_spill] sm:$0xff] %v29652_v44  ;;  %34470 = vst [vmem:[#allocation51_spill] sm:$0xff] %v29668_v60  ;;  %v29698_v23 = vand.u32 4294901760, %v12846_v55 }
 0x714   : > { %23415 = vmatmul.mubr.f32.vlgmr.msra.gmra.mrb[64].mxu1 %v13035_v22  ;;  %v12843_v22 = vsel %vm4271_vm12, %v12764_v3, 0  ;;  %34471 = vst [vmem:[#allocation53_spill] sm:$0xff] %v29670_v58  ;;  %v12766_v3 = vld [vmem:[%s33246_s23 + $0x80] sm:$0xff]  ;;  %34473 = vst [vmem:[#allocation57_spill] sm:$0xff] %v29684_v33  ;;  %v29696_v38 = vsub.f32 %v12840_v14, %v29670_v58 }
 0x715   : > { %24759 = vmatpush3.bf16.msra.mxu1 %v29243_v62  ;;  %23417 = vmatprep.mubr.f32.mxu1 %v13045_v36  ;;  %v29662_v62 = vpack.c.bf16 %v34429_v0, %v34427_v54  ;;  %v13075_v36 = vand.u32 4294901760, %v13074_v39  ;;  %v13104_v54 = vsub.f32 %v29621_v13, %v33567_v47  ;;  %v33574_v0 = vand.u32 4294901760, %v29644_v1  ;;  %34475 = vst [vmem:[#allocation61_spill] sm:$0xff] %v29698_v23  ;;  %v12770_v14 = vld [vmem:[%s33246_s23 + $0xa0] sm:$0xff] }
 0x716   : > { %23493 = vmatprep.subr.mxu1 %v13540_v27  ;;  %v29679_v39 = vand.u32 4294901760, %v12843_v22  ;;  %v12849_v47 = vsel %vm4271_vm12, %v12766_v3, 0  ;;  %34474 = vst [vmem:[#allocation59_spill] sm:$0xff] %v29696_v38  ;;  %v34485_v20 = vand.u32 4294901760, %v29696_v38 }
 0x717   : > { %v13105_v17 = vand.u32 4294901760, %v13104_v54  ;;  %v13114_v13 = vsub.f32 %v29644_v1, %v33574_v0  ;;  %v29711_v61 = vand.u32 4294901760, %v12849_v47  ;;  %v12769_v54 = vld [vmem:[%s33246_s23 + $0x98] sm:$0xff] }
 0x718   : > { %23418 = vmatmul.mubr.f32.gmra.mrb[66].mxu1 %v13055_v45  ;;  %34472 = vst [vmem:[#allocation55_spill] sm:$0xff] %v29679_v39  ;;  %v12767_v45 = vld [vmem:[%s33246_s23 + $0x88] sm:$0xff]  ;;  %v29704_v3 = vsub.f32 %v12843_v22, %v29679_v39  ;;  %v34479_v22 = vand.u32 4294901760, %v29668_v60 }
 0x719   : > { %23494 = vmatpush3.msra.mxu1 %v13540_v27  ;;  %23420 = vmatprep.mubr.f32.mxu1 %v13065_v57  ;;  %v13095_v27 = vand.u32 4294901760, %v13094_v35  ;;  %v12852_v4 = vsel %vm4271_vm12, %v12767_v45, 0  ;;  %v34477_v35 = vand.u32 4294901760, %v29652_v44  ;;  %34478 = vst [vmem:[#allocation65_spill] sm:$0xff] %v29711_v61  ;;  %v29722_v45 = vsub.f32 %v12846_v55, %v29698_v23 }
 0x71a   : > { %24761 = vmatprep.subr.bf16.mxu1 %v29662_v62  ;;  %34476 = vst [vmem:[#allocation63_spill] sm:$0xff] %v29704_v3  ;;  %v13134_v0 = vsub.f32 %v29668_v60, %v34479_v22  ;;  %v34483_v22 = vand.u32 4294901760, %v29684_v33  ;;  %v29736_v55 = vsub.f32 %v12849_v47, %v29711_v61  ;;  %v12858_v60 = vsel %vm4271_vm12, %v12769_v54, 0  ;;  %v12772_v47 = vld [vmem:[%s33246_s23 + $0xb0] sm:$0xff] }
 0x71b   : > { %v13124_v57 = vsub.f32 %v29652_v44, %v34477_v35  ;;  %34480 = vst [vmem:[#allocation67_spill] sm:$0xff] %v29722_v45  ;;  %v29724_v35 = vand.u32 4294901760, %v12852_v4  ;;  %v34487_v54 = vand.u32 4294901760, %v29704_v3  ;;  %v12867_v49 = vsel %vm4271_vm12, %v12772_v47, 0 }
 0x71c   : > { %23421 = vmatmul.mubr.f32.gmra.mrb[68].mxu1 %v13075_v36  ;;  %v12855_v36 = vsel %vm4271_vm12, %v12768_v16, 0  ;;  %v13115_v16 = vand.u32 4294901760, %v13114_v13  ;;  %34484 = vst [vmem:[#allocation75_spill] sm:$0xff] %v29736_v55  ;;  %v12861_v13 = vsel %vm4271_vm12, %v12770_v14, 0  ;;  %v13135_v44 = vand.u32 4294901760, %v13134_v0 }
 0x71d   : > { %23423 = vmatprep.mubr.f32.mxu1 %v13085_v56  ;;  %34481 = vst [vmem:[#allocation68_spill] sm:$0xff] %v29724_v35  ;;  %v29730_v1 = vand.u32 4294901760, %v12855_v36  ;;  %v13125_v59 = vand.u32 4294901760, %v13124_v57  ;;  %v13144_v56 = vsub.f32 %v29684_v33, %v34483_v22  ;;  %v29748_v22 = vsub.f32 %v12852_v4, %v29724_v35 }
 0x71e   : > { %v13164_v33 = vsub.f32 %v29704_v3, %v34487_v54  ;;  %v29759_v14 = vand.u32 4294901760, %v12858_v60  ;;  %v34491_v3 = vand.u32 4294901760, %v29722_v45 }
 0x71f   : > { %34482 = vst [vmem:[#allocation70_spill] sm:$0xff] %v29730_v1  ;;  %34486 = vst [vmem:[#allocation77_spill] sm:$0xff] %v29748_v22  ;;  %v29757_v0 = vsub.f32 %v12855_v36, %v29730_v1  ;;  %v13145_v57 = vand.u32 4294901760, %v13144_v56  ;;  %v12774_v36 = vld [vmem:[%s33246_s23 + $0xc0] sm:$0xff]  ;;  %v29789_v56 = vand.u32 4294901760, %v12867_v49  ;;  %v34497_v29 = vand.u32 4294901760, %v29748_v22 }
 0x720   : > { %23424 = vmatmul.mubr.f32.gmra.mrb[70].mxu1 %v13095_v27  ;;  %v12771_v27 = vld [vmem:[%s33246_s23 + $0xa8] sm:$0xff]  ;;  %34489 = vst [vmem:[#allocation84_spill] sm:$0xff] %v29759_v14  ;;  %v13165_v4 = vand.u32 4294901760, %v13164_v33  ;;  %v29780_v11 = vsub.f32 %v12858_v60, %v29759_v14 }
 0x721   : > { %23426 = vmatprep.mubr.f32.mxu1 %v13105_v17  ;;  %v13154_v17 = vsub.f32 %v29696_v38, %v34485_v20  ;;  %34488 = vst [vmem:[#allocation78_spill] sm:$0xff] %v29757_v0  ;;  %v12864_v20 = vsel %vm4271_vm12, %v12771_v27, 0  ;;  %v29763_v38 = vand.u32 4294901760, %v12861_v13  ;;  %34496 = vst [vmem:[#allocation99_spill] sm:$0xff] %v29789_v56  ;;  %v12775_v33 = vld [vmem:[%s33246_s23 + $0xc8] sm:$0xff] }
 0x722   : > { %v29776_v27 = vand.u32 4294901760, %v12864_v20  ;;  %34493 = vst [vmem:[#allocation92_spill] sm:$0xff] %v29780_v11 }
 0x723   : > { %34490 = vst [vmem:[#allocation86_spill] sm:$0xff] %v29763_v38  ;;  %v13155_v54 = vand.u32 4294901760, %v13154_v17  ;;  %v34494_v17 = vand.u32 4294901760, %v29736_v55 }
 0x724   : > { %23427 = vmatmul.mubr.f32.gmra.mrb[72].mxu1 %v13115_v16  ;;  %v12773_v16 = vld [vmem:[%s33246_s23 + $0xb8] sm:$0xff]  ;;  %34492 = vst [vmem:[#allocation89_spill] sm:$0xff] %v29776_v27 }
 0x725   : > { %23429 = vmatprep.mubr.f32.mxu1 %v13125_v59  ;;  %v13174_v59 = vsub.f32 %v29722_v45, %v34491_v3  ;;  %v12870_v47 = vsel %vm4271_vm12, %v12773_v16, 0  ;;  %v13184_v24 = vsub.f32 %v29736_v55, %v34494_v17  ;;  %v29787_v3 = vsub.f32 %v12861_v13, %v29763_v38  ;;  %v12776_v13 = vld [vmem:[%s33246_s23 + $0xd0] sm:$0xff] }
 0x726   : > { %v29799_v16 = vsub.f32 %v12864_v20, %v29776_v27  ;;  %v29801_v17 = vand.u32 4294901760, %v12870_v47  ;;  %v29815_v27 = vsub.f32 %v12867_v49, %v29789_v56  ;;  %v12879_v38 = vsel %vm4271_vm12, %v12776_v13, 0 }
 0x727   : > { %34495 = vst [vmem:[#allocation97_spill] sm:$0xff] %v29787_v3  ;;  %v13175_v60 = vand.u32 4294901760, %v13174_v59  ;;  %v13185_v20 = vand.u32 4294901760, %v13184_v24  ;;  %v12778_v24 = vld [vmem:[%s33246_s23 + $0xe0] sm:$0xff]  ;;  %v29840_v56 = vand.u32 4294901760, %v12879_v38 }
 0x728   : > { %23430 = vmatmul.mubr.f32.gmra.mrb[74].mxu1 %v13135_v44  ;;  %v12873_v44 = vsel %vm4271_vm12, %v12774_v36, 0  ;;  %34498 = vst [vmem:[#allocation100_spill] sm:$0xff] %v29799_v16  ;;  %34499 = vst [vmem:[#allocation101_spill] sm:$0xff] %v29801_v17  ;;  %v34500_v36 = vand.u32 4294901760, %v29757_v0  ;;  %v29823_v59 = vsub.f32 %v12870_v47, %v29801_v17  ;;  %v34507_v47 = vand.u32 4294901760, %v29787_v3  ;;  %v12780_v17 = vld [vmem:[%s33246_s23 + $0xf0] sm:$0xff] }
 0x729   : > { %23432 = vmatprep.mubr.f32.mxu1 %v13145_v57  ;;  %v13194_v57 = vsub.f32 %v29748_v22, %v34497_v29  ;;  %v29810_v45 = vand.u32 4294901760, %v12873_v44  ;;  %v12876_v29 = vsel %vm4271_vm12, %v12775_v33, 0  ;;  %34502 = vst [vmem:[#allocation109_spill] sm:$0xff] %v29815_v27  ;;  %v34505_v33 = vand.u32 4294901760, %v29780_v11  ;;  %34508 = vst [vmem:[#allocation10_spill] sm:$0xff] %v29840_v56 }
 0x72a   : > { %v13204_v55 = vsub.f32 %v29757_v0, %v34500_v36  ;;  %34503 = vst [vmem:[#allocation115_spill] sm:$0xff] %v29823_v59  ;;  %v29825_v0 = vand.u32 4294901760, %v12876_v29  ;;  %v13224_v36 = vsub.f32 %v29787_v3, %v34507_v47 }
 0x72b   : > { %34501 = vst [vmem:[#allocation108_spill] sm:$0xff] %v29810_v45  ;;  %v13195_v49 = vand.u32 4294901760, %v13194_v57  ;;  %v13214_v13 = vsub.f32 %v29780_v11, %v34505_v33  ;;  %v29834_v22 = vsub.f32 %v12873_v44, %v29810_v45  ;;  %v12885_v57 = vsel %vm4271_vm12, %v12778_v24, 0 }
 0x72c   : > { %23433 = vmatmul.mubr.f32.gmra.mrb[76].mxu1 %v13155_v54  ;;  %v12777_v54 = vld [vmem:[%s33246_s23 + $0xd8] sm:$0xff]  ;;  %34504 = vst [vmem:[#allocation3_spill] sm:$0xff] %v29825_v0  ;;  %v34509_v44 = vand.u32 4294901760, %v29799_v16  ;;  %v29852_v47 = vsub.f32 %v12876_v29, %v29825_v0  ;;  %v13225_v45 = vand.u32 4294901760, %v13224_v36  ;;  %v29865_v29 = vsub.f32 %v12879_v38, %v29840_v56  ;;  %v29876_v36 = vpop.permute.xlu1 %9638 }
 0x72d   : > { %23435 = vmatprep.mubr.f32.mxu1 %v13165_v4  ;;  %v13205_v4 = vand.u32 4294901760, %v13204_v55  ;;  %34506 = vst [vmem:[#allocation24_spill] sm:$0xff] %v29834_v22  ;;  %v12779_v55 = vld [vmem:[%s33246_s23 + $0xe8] sm:$0xff]  ;;  %v34517_v56 = vand.u32 4294901760, %v29834_v22 }
 0x72e   : > { %34510 = vst [vmem:[#allocation32_spill] sm:$0xff] %v29852_v47  ;;  %v12888_v24 = vsel %vm4271_vm12, %v12779_v55, 0  ;;  %34513 = vst [vmem:[#allocation34_spill] sm:$0xff] %v29865_v29 }
 0x72f   : > { %v13264_v0 = vsub.f32 %v29834_v22, %v34517_v56  ;;  %v12784_v56 = vld [vmem:[%s33246_s23 + $0x110] sm:$0xff] }
 0x730   : > { %23436 = vmatmul.mubr.f32.gmra.mrb[78].mxu1 %v13175_v60  ;;  %v12882_v60 = vsel %vm4271_vm12, %v12777_v54, 0  ;;  %v13215_v54 = vand.u32 4294901760, %v13214_v13  ;;  %v12782_v13 = vld [vmem:[%s33246_s23 + $0x100] sm:$0xff] }
 0x731   : > { %23438 = vmatprep.mubr.f32.mxu1 %v13185_v20  ;;  %v13234_v20 = vsub.f32 %v29799_v16, %v34509_v44  ;;  %v29858_v11 = vand.u32 4294901760, %v12882_v60  ;;  %v34512_v44 = vand.u32 4294901760, %v29815_v27  ;;  %v29867_v16 = vand.u32 4294901760, %v12885_v57 }
 0x733   : > { %34511 = vst [vmem:[#allocation11_spill] sm:$0xff] %v29858_v11  ;;  %v13244_v33 = vsub.f32 %v29815_v27, %v34512_v44  ;;  %34514 = vst [vmem:[#allocation5_spill] sm:$0xff] %v29867_v16  ;;  %v13235_v55 = vand.u32 4294901760, %v13234_v20  ;;  %v34515_v44 = vand.u32 4294901760, %v29823_v59  ;;  %v29882_v27 = vand.u32 4294901760, %v12888_v24 }
 0x734   : > { %23439 = vmatmul.mubr.f32.gmra.mrb[80].mxu1 %v13195_v49  ;;  %v12781_v49 = vld [vmem:[%s33246_s23 + $0xf8] sm:$0xff]  ;;  %v29888_v14 = vsub.f32 %v12882_v60, %v29858_v11  ;;  %v12897_v20 = vsel %vm4271_vm12, %v12782_v13, 0  ;;  %v34525_v11 = vand.u32 4294901760, %v29865_v29 }
 0x735   : > { %23441 = vmatprep.mubr.f32.mxu1 %v13205_v4  ;;  %v12891_v4 = vsel %vm4271_vm12, %v12780_v17, 0  ;;  %v13254_v38 = vsub.f32 %v29823_v59, %v34515_v44  ;;  %34516 = vst [vmem:[#allocation26_spill] sm:$0xff] %v29882_v27  ;;  %v12894_v17 = vsel %vm4271_vm12, %v12781_v49, 0  ;;  %v12783_v44 = vld [vmem:[%s33246_s23 + $0x108] sm:$0xff]  ;;  %v13245_v3 = vand.u32 4294901760, %v13244_v33 }
 0x736   : > { %34518 = vst [vmem:[#allocation27_spill] sm:$0xff] %v29888_v14  ;;  %v29899_v1 = vand.u32 4294901760, %v12891_v4  ;;  %v29905_v60 = vsub.f32 %v12888_v24, %v29882_v27  ;;  %v29907_v49 = vand.u32 4294901760, %v12894_v17  ;;  %v29909_v13 = vand.u32 4294901760, %v12897_v20  ;;  %v12785_v24 = vld [vmem:[%s33246_s23 + $0x118] sm:$0xff]  ;;  %v29919_v27 = vpop.permute.xlu1 %9648 }
 0x737   : > { %v13255_v33 = vand.u32 4294901760, %v13254_v38  ;;  %v13265_v59 = vand.u32 4294901760, %v13264_v0  ;;  %v12903_v38 = vsel %vm4271_vm12, %v12784_v56, 0  ;;  %v34530_v56 = vand.u32 4294901760, %v29888_v14 }
 0x738   : > { %23442 = vmatmul.mubr.f32.gmra.mrb[82].mxu1 %v13215_v54  ;;  %v29897_v54 = vsub.f32 %v12885_v57, %v29867_v16  ;;  %34520 = vst [vmem:[#allocation30_spill] sm:$0xff] %v29899_v1  ;;  %34521 = vst [vmem:[#allocation35_spill] sm:$0xff] %v29905_v60  ;;  %v34524_v57 = vand.u32 4294901760, %v29852_v47  ;;  %v29926_v0 = vsub.f32 %v12891_v4, %v29899_v1  ;;  %v12786_v16 = vld [vmem:[%s33246_s23 + $0x120] sm:$0xff]  ;;  %v29945_v1 = vand.u32 4294901760, %v12903_v38 }
 0x739   : > { %23444 = vmatprep.mubr.f32.mxu1 %v13225_v45  ;;  %34522 = vst [vmem:[#allocation36_spill] sm:$0xff] %v29907_v49  ;;  %34523 = vst [vmem:[#allocation19_spill] sm:$0xff] %v29909_v13  ;;  %v12900_v45 = vsel %vm4271_vm12, %v12783_v44, 0  ;;  %v13284_v44 = vsub.f32 %v29865_v29, %v34525_v11  ;;  %v29939_v11 = vsub.f32 %v12897_v20, %v29909_v13  ;;  %v12909_v20 = vsel %vm4271_vm12, %v12786_v16, 0  ;;  %v12788_v16 = vld [vmem:[%s33246_s23 + $0x130] sm:$0xff] }
 0x73a   : > { %34519 = vst [vmem:[#allocation28_spill] sm:$0xff] %v29897_v54  ;;  %v13274_v22 = vsub.f32 %v29852_v47, %v34524_v57  ;;  %34526 = vst [vmem:[#allocation40_spill] sm:$0xff] %v29926_v0  ;;  %v29929_v57 = vand.u32 4294901760, %v12900_v45  ;;  %v13294_v29 = vsub.f32 %v29888_v14, %v34530_v56  ;;  %v34532_v47 = vand.u32 4294901760, %v29897_v54  ;;  %v29960_v56 = vpop.permute.xlu1 %9653 }
 0x73b   : > { %34529 = vst [vmem:[#allocation46_spill] sm:$0xff] %v29939_v11  ;;  %34531 = vst [vmem:[#allocation49_spill] sm:$0xff] %v29945_v1  ;;  %v13285_v35 = vand.u32 4294901760, %v13284_v44  ;;  %v29973_v14 = vand.u32 4294901760, %v12909_v20 }
 0x73c   : > { %23445 = vmatmul.mubr.f32.gmra.mrb[84].mxu1 %v13235_v55  ;;  %34527 = vst [vmem:[#allocation43_spill] sm:$0xff] %v29929_v57  ;;  %v12906_v55 = vsel %vm4271_vm12, %v12785_v24, 0  ;;  %v13275_v4 = vand.u32 4294901760, %v13274_v22  ;;  %v29953_v24 = vsub.f32 %v12900_v45, %v29929_v57  ;;  %v13295_v45 = vand.u32 4294901760, %v13294_v29  ;;  %v12789_v57 = vld [vmem:[%s33246_s23 + $0x138] sm:$0xff]  ;;  %v12790_v29 = vld [vmem:[%s33246_s23 + $0x140] sm:$0xff] }
 0x73d   : > { %23447 = vmatprep.mubr.f32.mxu1 %v13245_v3  ;;  %v29936_v3 = vsub.f32 %v12894_v17, %v29907_v49  ;;  %v13304_v17 = vsub.f32 %v29897_v54, %v34532_v47  ;;  %v29955_v22 = vand.u32 4294901760, %v12906_v55  ;;  %v29971_v54 = vsub.f32 %v12903_v38, %v29945_v1  ;;  %34537 = vst [vmem:[#allocation56_spill] sm:$0xff] %v29973_v14 }
 0x73e   : > { %34533 = vst [vmem:[#allocation50_spill] sm:$0xff] %v29953_v24  ;;  %v34538_v47 = vand.u32 4294901760, %v29926_v0  ;;  %v12915_v1 = vsel %vm4271_vm12, %v12788_v16, 0  ;;  %v29999_v38 = vsub.f32 %v12909_v20, %v29973_v14  ;;  %v30004_v16 = vpop.permute.xlu1 %9658 }
 0x73f   : > { %34528 = vst [vmem:[#allocation44_spill] sm:$0xff] %v29936_v3  ;;  %34534 = vst [vmem:[#allocation52_spill] sm:$0xff] %v29955_v22  ;;  %v34548_v14 = vand.u32 4294901760, %v29971_v54 }
 0x740   : > { %23448 = vmatmul.mubr.f32.gmra.mrb[86].mxu1 %v13255_v33  ;;  %v12787_v33 = vld [vmem:[%s33246_s23 + $0x128] sm:$0xff]  ;;  %34536 = vst [vmem:[#allocation54_spill] sm:$0xff] %v29971_v54  ;;  %v13324_v49 = vsub.f32 %v29926_v0, %v34538_v47  ;;  %v34541_v47 = vand.u32 4294901760, %v29939_v11  ;;  %v12918_v0 = vsel %vm4271_vm12, %v12789_v57, 0  ;;  %34542 = vst [vmem:[#allocation60_spill] sm:$0xff] %v29999_v38 }
 0x741   : > { %23450 = vmatprep.mubr.f32.mxu1 %v13265_v59  ;;  %v34535_v59 = vand.u32 4294901760, %v29905_v60  ;;  %v12791_v57 = vld [vmem:[%s33246_s23 + $0x148] sm:$0xff]  ;;  %v30015_v61 = vand.u32 4294901760, %v12918_v0 }
 0x742   : > { %v12924_v20 = vsel %vm4271_vm12, %v12791_v57, 0  ;;  %v12793_v57 = vld [vmem:[%s33246_s23 + $0x158] sm:$0xff] }
 0x743   : > { %v13314_v44 = vsub.f32 %v29905_v60, %v34535_v59  ;;  %v13305_v59 = vand.u32 4294901760, %v13304_v17  ;;  %v12912_v60 = vsel %vm4271_vm12, %v12787_v33, 0  ;;  %v13344_v33 = vsub.f32 %v29939_v11, %v34541_v47  ;;  %34546 = vst [vmem:[#allocation66_spill] sm:$0xff] %v30015_v61 }
 0x744   : > { %23451 = vmatmul.mubr.f32.gmra.mrb[88].mxu1 %v13275_v4  ;;  %v29987_v4 = vsub.f32 %v12906_v55, %v29955_v22  ;;  %v30001_v55 = vand.u32 4294901760, %v12912_v60  ;;  %v13364_v22 = vsub.f32 %v29971_v54, %v34548_v14  ;;  %v34553_v14 = vand.u32 4294901760, %v29313_v28 }
 0x745   : > { %23453 = vmatprep.mubr.f32.mxu1 %v13285_v35  ;;  %v13315_v13 = vand.u32 4294901760, %v13314_v44  ;;  %v34540_v35 = vand.u32 4294901760, %v29936_v3  ;;  %v12921_v44 = vsel %vm4271_vm12, %v12790_v29, 0  ;;  %v12792_v29 = vld [vmem:[%s33246_s23 + $0x150] sm:$0xff] }
 0x746   : > { %34539 = vst [vmem:[#allocation58_spill] sm:$0xff] %v29987_v4  ;;  %34543 = vst [vmem:[#allocation62_spill] sm:$0xff] %v30001_v55  ;;  %v30020_v11 = vand.u32 4294901760, %v12921_v44  ;;  %v30042_v23 = vsub.f32 %v29313_v28, %v34553_v14  ;;  %v34555_v54 = vand.u32 4294901760, %v29987_v4  ;;  %v12794_v28 = vld [vmem:[%s33246_s23 + $0x160] sm:$0xff]  ;;  %v34559_v14 = vand.u32 4294901760, %v29999_v38 }
 0x747   : > { %v13334_v17 = vsub.f32 %v29936_v3, %v34540_v35  ;;  %v13325_v35 = vand.u32 4294901760, %v13324_v49  ;;  %v30006_v3 = vand.u32 4294901760, %v12915_v1  ;;  %v13345_v49 = vand.u32 4294901760, %v13344_v33 }
 0x748   : > { %23454 = vmatmul.mubr.f32.gmra.mrb[90].mxu1 %v13295_v45  ;;  %v34545_v45 = vand.u32 4294901760, %v29953_v24  ;;  %34547 = vst [vmem:[#allocation69_spill] sm:$0xff] %v30020_v11  ;;  %v34551_v33 = vand.u32 4294901760, %v29308_v43  ;;  %34554 = vst [vmem:[#allocation80_spill] sm:$0xff] %v30042_v23 }
 0x749   : > { %23456 = vmatprep.mubr.f32.mxu1 %v13305_v59  ;;  %34544 = vst [vmem:[#allocation64_spill] sm:$0xff] %v30006_v3  ;;  %v13335_v59 = vand.u32 4294901760, %v13334_v17  ;;  %v12927_v17 = vsel %vm4271_vm12, %v12792_v29, 0  ;;  %v30053_v29 = vpop.permute.xlu1 %9663 }
 0x74a   : > { %v13354_v47 = vsub.f32 %v29953_v24, %v34545_v45  ;;  %v30027_v45 = vsub.f32 %v12912_v60, %v30001_v55  ;;  %v30031_v24 = vsub.f32 %v12915_v1, %v30006_v3  ;;  %v30048_v1 = vsub.f32 %v12918_v0, %v30015_v61 }
 0x74b   : > { %v33696_v0 = vand.u32 4294901760, %v30042_v23  ;;  %v12930_v3 = vsel %vm4271_vm12, %v12793_v57, 0  ;;  %v12933_v61 = vsel %vm4271_vm12, %v12794_v28, 0 }
 0x74c   : > { %23457 = vmatmul.mubr.f32.gmra.mrb[92].mxu1 %v13315_v13  ;;  %34549 = vst [vmem:[#allocation73_spill] sm:$0xff] %v30027_v45  ;;  %34550 = vst [vmem:[#allocation74_spill] sm:$0xff] %v30031_v24  ;;  %v30037_v13 = vsub.f32 %v29308_v43, %v34551_v33  ;;  %v13355_v60 = vand.u32 4294901760, %v13354_v47  ;;  %v30056_v43 = vsub.f32 %v12921_v44, %v30020_v11  ;;  %v30058_v33 = vand.u32 4294901760, %v12924_v20 }
 0x74d   : > { %23459 = vmatprep.mubr.f32.mxu1 %v13325_v35  ;;  %v13374_v35 = vsub.f32 %v29987_v4, %v34555_v54  ;;  %34556 = vst [vmem:[#allocation82_spill] sm:$0xff] %v30048_v1  ;;  %v13365_v47 = vand.u32 4294901760, %v13364_v22  ;;  %v13384_v4 = vsub.f32 %v29999_v38, %v34559_v14  ;;  %v30069_v44 = vand.u32 4294901760, %v12927_v17  ;;  %v30099_v11 = vpop.permute.xlu1 %9668 }
 0x74e   : > { %34552 = vst [vmem:[#allocation76_spill] sm:$0xff] %v30037_v13  ;;  %34557 = vst [vmem:[#allocation83_spill] sm:$0xff] %v30056_v43  ;;  %v33693_v54 = vand.u32 4294901760, %v30037_v13  ;;  %v10594_v22 = vsub.f32 %v30042_v23, %v33696_v0  ;;  %v30086_v57 = vsub.f32 %v12924_v20, %v30058_v33  ;;  %v34562_v14 = vand.u32 4294901760, %v30027_v45 }
 0x74f   : > { %34558 = vst [vmem:[#allocation88_spill] sm:$0xff] %v30058_v33  ;;  %34560 = vst [vmem:[#allocation91_spill] sm:$0xff] %v30069_v44  ;;  %v30095_v23 = vsub.f32 %v12927_v17, %v30069_v44  ;;  %v34565_v20 = vand.u32 4294901760, %v30031_v24  ;;  %v12797_v17 = vld [vmem:[%s33246_s23 + $0x178] sm:$0xff] }
 0x750   : > { %23460 = vmatmul.mubr.f32.gmra.mrb[94].mxu1 %v13335_v59  ;;  %v10587_v55 = vsub.f32 %v30037_v13, %v33693_v54  ;;  %v13375_v59 = vand.u32 4294901760, %v13374_v35  ;;  %34561 = vst [vmem:[#allocation96_spill] sm:$0xff] %v30086_v57  ;;  %v12796_v54 = vld [vmem:[%s33246_s23 + $0x170] sm:$0xff]  ;;  %v10595_v0 = vand.u32 4294901760, %v10594_v22  ;;  %v13385_v35 = vand.u32 4294901760, %v13384_v4 }
 0x751   : > { %23462 = vmatprep.mubr.f32.mxu1 %v13345_v49  ;;  %v12795_v49 = vld [vmem:[%s33246_s23 + $0x168] sm:$0xff]  ;;  %v13394_v28 = vsub.f32 %v30027_v45, %v34562_v14  ;;  %34563 = vst [vmem:[#allocation98_spill] sm:$0xff] %v30095_v23  ;;  %v30097_v13 = vand.u32 4294901760, %v12930_v3  ;;  %v13404_v33 = vsub.f32 %v30031_v24, %v34565_v20  ;;  %v12939_v22 = vsel %vm4271_vm12, %v12796_v54, 0 }
 0x752   : > { %v10588_v38 = vand.u32 4294901760, %v10587_v55  ;;  %v30104_v55 = vand.u32 4294901760, %v12933_v61  ;;  %v12936_v4 = vsel %vm4271_vm12, %v12795_v49, 0  ;;  %v34568_v14 = vand.u32 4294901760, %v30048_v1 }
 0x753   : > { %34564 = vst [vmem:[#allocation103_spill] sm:$0xff] %v30097_v13  ;;  %v34569_v45 = vand.u32 4294901760, %v30056_v43  ;;  %v13395_v54 = vand.u32 4294901760, %v13394_v28  ;;  %v30126_v49 = vsub.f32 %v12930_v3, %v30097_v13  ;;  %v30133_v24 = vand.u32 4294901760, %v12939_v22  ;;  %v30140_v28 = vpop.permute.xlu1 %9673 }
 0x754   : > { %23463 = vmatmul.mubr.f32.gmra.mrb[96].mxu1 %v13355_v60  ;;  %34566 = vst [vmem:[#allocation105_spill] sm:$0xff] %v30104_v55  ;;  %v30107_v60 = vpack.c.bf16 %v10595_v0, %v10588_v38  ;;  %v12798_v38 = vld [vmem:[%s33246_s23 + $0x180] sm:$0xff] }
 0x755   : > { %23465 = vmatprep.mubr.f32.mxu1 %v13365_v47  ;;  %v13414_v47 = vsub.f32 %v30048_v1, %v34568_v14  ;;  %v13424_v20 = vsub.f32 %v30056_v43, %v34569_v45  ;;  %34570 = vst [vmem:[#allocation107_spill] sm:$0xff] %v30126_v49  ;;  %v30128_v14 = vand.u32 4294901760, %v12936_v4  ;;  %v13405_v1 = vand.u32 4294901760, %v13404_v33  ;;  %34573 = vst [vmem:[#allocation117_spill] sm:$0xff] %v30133_v24 }
 0x756   : > { %34567 = vst [vmem:[#allocation106_spill] sm:$0xff] %v30107_v60  ;;  %24593 = vmatprep.subr.bf16.mxu0 %v30107_v60  ;;  %v30131_v45 = vsub.f32 %v12933_v61, %v30104_v55  ;;  %v12942_v43 = vsel %vm4271_vm12, %v12797_v17, 0  ;;  %v12945_v44 = vsel %vm4271_vm12, %v12798_v38, 0  ;;  %v34575_v61 = vand.u32 4294901760, %v30095_v23 }
 0x757   : > { %34571 = vst [vmem:[#allocation112_spill] sm:$0xff] %v30128_v14  ;;  %v13415_v3 = vand.u32 4294901760, %v13414_v47  ;;  %v13425_v0 = vand.u32 4294901760, %v13424_v20  ;;  %v33722_v17 = vand.u32 4294901760, %v30126_v49  ;;  %v30150_v38 = vsub.f32 %v12936_v4, %v30128_v14  ;;  %v30170_v47 = vpop.permute.xlu1 %9678 }
 0x758   : > { %23466 = vmatmul.mubr.f32.gmra.mrb[98].mxu1 %v13375_v59  ;;  %34572 = vst [vmem:[#allocation113_spill] sm:$0xff] %v30131_v45  ;;  %v12799_v59 = vld [vmem:[%s33246_s23 + $0x188] sm:$0xff]  ;;  %v13444_v55 = vsub.f32 %v30095_v23, %v34575_v61  ;;  %v30152_v13 = vand.u32 4294901760, %v12942_v43  ;;  %v30156_v20 = vsub.f32 %v12939_v22, %v30133_v24  ;;  %v30158_v60 = vand.u32 4294901760, %v12945_v44 }
 0x759   : > { %23468 = vmatprep.mubr.f32.mxu1 %v13385_v35  ;;  %v34574_v35 = vand.u32 4294901760, %v30086_v57  ;;  %34576 = vst [vmem:[#allocation119_spill] sm:$0xff] %v30150_v38  ;;  %v13454_v61 = vsub.f32 %v30126_v49, %v33722_v17  ;;  %v33727_v4 = vand.u32 4294901760, %v30150_v38 }
 0x75a   : > { %34577 = vst [vmem:[#allocation122_spill] sm:$0xff] %v30152_v13  ;;  %34578 = vst [vmem:[#allocation102_spill] sm:$0xff] %v30156_v20  ;;  %v30166_v23 = vsub.f32 %v12942_v43, %v30152_v13  ;;  %v13445_v22 = vand.u32 4294901760, %v13444_v55 }
 0x75b   : > { %v13434_v33 = vsub.f32 %v30086_v57, %v34574_v35  ;;  %34579 = vst [vmem:[#allocation104_spill] sm:$0xff] %v30158_v60  ;;  %v34582_v57 = vand.u32 4294901760, %v30131_v45  ;;  %v13455_v17 = vand.u32 4294901760, %v13454_v61  ;;  %v13474_v43 = vsub.f32 %v30150_v38, %v33727_v4 }
 0x75c   : > { %23469 = vmatmul.mubr.f32.gmra.mrb[100].mxu1 %v13395_v54  ;;  %v12948_v54 = vsel %vm4271_vm12, %v12799_v59, 0  ;;  %34580 = vst [vmem:[#allocation110_spill] sm:$0xff] %v30166_v23  ;;  %v33729_v49 = vand.u32 4294901760, %v30166_v23 }
 0x75d   : > { %23471 = vmatprep.mubr.f32.mxu1 %v13405_v1  ;;  %v13435_v35 = vand.u32 4294901760, %v13434_v33  ;;  %v30168_v1 = vand.u32 4294901760, %v12948_v54  ;;  %v13464_v59 = vsub.f32 %v30131_v45, %v34582_v57  ;;  %v30177_v33 = vsub.f32 %v12945_v44, %v30158_v60  ;;  %v30190_v45 = vpop.permute.xlu1 %9683 }
 0x75e   : > { %v13494_v61 = vsub.f32 %v30166_v23, %v33729_v49 }
 0x75f   : > { %34581 = vst [vmem:[#allocation111_spill] sm:$0xff] %v30168_v1  ;;  %34583 = vst [vmem:[#allocation114_spill] sm:$0xff] %v30177_v33  ;;  %v13465_v55 = vand.u32 4294901760, %v13464_v59  ;;  %v33735_v44 = vand.u32 4294901760, %v30177_v33 }
 0x760   : > { %23472 = vmatmul.mubr.f32.gmra.mrb[102].mxu1 %v13415_v3  ;;  %v33728_v3 = vand.u32 4294901760, %v30156_v20 }
 0x761   : > { %23474 = vmatprep.mubr.f32.mxu1 %v13425_v0  ;;  %v30184_v0 = vsub.f32 %v12948_v54, %v30168_v1  ;;  %v30196_v54 = vpop.permute.xlu0 %9643  ;;  %v13504_v59 = vsub.f32 %v30177_v33, %v33735_v44 }
 0x762   : > { %v13484_v57 = vsub.f32 %v30156_v20, %v33728_v3  ;;  %v13495_v3 = vand.u32 4294901760, %v13494_v61  ;;  %v34585_v61 = vand.u32 4294901760, %v29330_v50  ;;  %v34593_v50 = vand.u32 4294901760, %v29384_v18 }
 0x763   : > { %34584 = vst [vmem:[#allocation116_spill] sm:$0xff] %v30184_v0  ;;  %v33734_v4 = vand.u32 4294901760, %v30184_v0  ;;  %v13505_v49 = vand.u32 4294901760, %v13504_v59 }
 0x764   : > { %23475 = vmatmul.mubr.f32.gmra.mrb[104].mxu1 %v13435_v35  ;;  %v13475_v35 = vand.u32 4294901760, %v13474_v43  ;;  %v30204_v43 = vpop.permute.xlu1 %9693 }
 0x765   : > { %23477 = vmatprep.mubr.f32.mxu1 %v13445_v22  ;;  %v13485_v22 = vand.u32 4294901760, %v13484_v57  ;;  %v30206_v23 = vpop.permute.xlu0 %9688 }
 0x768   : > { %23478 = vmatmul.mubr.f32.gmra.mrb[106].mxu1 %v13455_v17  ;;  %v13514_v17 = vsub.f32 %v30184_v0, %v33734_v4  ;;  %v34591_v4 = vand.u32 4294901760, %v29359_v63 }
 0x769   : > { %23480 = vmatprep.mubr.f32.mxu1 %v13465_v55  ;;  %v30208_v55 = vpop.permute.xlu1 %9703  ;;  %v30210_v57 = vpop.permute.xlu0 %9698 }
 0x76a   : > { %v13515_v20 = vand.u32 4294901760, %v13514_v17  ;;  %v30235_v44 = vsub.f32 %v29359_v63, %v34591_v4  ;;  %v34599_v63 = vand.u32 4294901760, %v29423_v40 }
 0x76c   : > { %23481 = vmatmul.mubr.f32.gmra.mrb[108].mxu1 %v13475_v35  ;;  %v26549_v35 = vld [vmem:[%s33241_s18 + $0x10] sm:$0xff]  ;;  %34592 = vst [vmem:[#allocation6_spill] sm:$0xff] %v30235_v44  ;;  %v30256_v4 = vsub.f32 %v29423_v40, %v34599_v63 }
 0x76d   : > { %23483 = vmatprep.mubr.f32.mxu1 %v13485_v22  ;;  %v30218_v22 = vsub.f32 %v26549_v35, %v34585_v61  ;;  %v30240_v35 = vsub.f32 %v29384_v18, %v34593_v50  ;;  %v30267_v50 = vpop.permute.xlu0 %9708 }
 0x76e   : > { %34600 = vst [vmem:[#allocation124_spill] sm:$0xff] %v30256_v4 }
 0x76f   : > { %34586 = vst [vmem:[#allocation118_spill] sm:$0xff] %v30218_v22  ;;  %34594 = vst [vmem:[#allocation8_spill] sm:$0xff] %v30240_v35  ;;  %v33736_v18 = vand.u32 4294901760, %v30218_v22 }
 0x770   : > { %23484 = vmatmul.mubr.f32.gmra.mrb[110].mxu1 %v13495_v3  ;;  %v26550_v3 = vld [vmem:[%s33241_s18 + $0x18] sm:$0xff] }
 0x771   : > { %23486 = vmatprep.mubr.f32.mxu1 %v13505_v49  ;;  %v34587_v49 = vand.u32 4294901760, %v29335_v46  ;;  %v34595_v46 = vand.u32 4294901760, %v29389_v26  ;;  %v10601_v63 = vsub.f32 %v30218_v22, %v33736_v18  ;;  %v30314_v0 = vpop.permute.xlu0 %9718 }
 0x773   : > { %v30225_v59 = vsub.f32 %v26550_v3, %v34587_v49  ;;  %v30246_v61 = vsub.f32 %v29389_v26, %v34595_v46  ;;  %v30258_v49 = vpop.permute.xlu1 %9713 }
 0x774   : > { %23487 = vmatmul.mubr.f32.gmra.mrb[112].mxu1 %v13515_v20  ;;  %v34589_v20 = vand.u32 4294901760, %v29354_v8 }
 0x775   : > { %23495 = vmatprep.mubr.f32.mxu1 %v29410_v32  ;;  %34588 = vst [vmem:[#allocation120_spill] sm:$0xff] %v30225_v59  ;;  %34596 = vst [vmem:[#allocation9_spill] sm:$0xff] %v30246_v61  ;;  %v33739_v26 = vand.u32 4294901760, %v30225_v59  ;;  %v34608_v32 = vand.u32 4294901760, %v30256_v4 }
 0x776   : > { %v30230_v17 = vsub.f32 %v29354_v8, %v34589_v20  ;;  %v34597_v8 = vand.u32 4294901760, %v29418_v37  ;;  %v33745_v20 = vand.u32 4294901760, %v30235_v44 }
 0x777   : > { %v10608_v40 = vsub.f32 %v30225_v59, %v33739_v26  ;;  %v30294_v18 = vpop.permute.xlu1 %9723 }
 0x778   : > { %34590 = vst [vmem:[#allocation121_spill] sm:$0xff] %v30230_v17  ;;  %23496 = vmatmul.mubr.f32.vlgmr.msra.gmra.mrb[64].mxu1 %v29433_v31  ;;  %v30251_v3 = vsub.f32 %v29418_v37, %v34597_v8  ;;  %v33744_v37 = vand.u32 4294901760, %v30230_v17  ;;  %v34601_v8 = vand.u32 4294901760, %v29458_v7 }
 0x779   : > { %24763 = vmatpush3.bf16.msra.mxu1 %v29662_v62  ;;  %23498 = vmatprep.mubr.f32.mxu1 %v29449_v41 }
 0x77a   : > { %34598 = vst [vmem:[#allocation123_spill] sm:$0xff] %v30251_v3  ;;  %23574 = vmatprep.subr.mxu1 %v29509_v30  ;;  %v10615_v46 = vsub.f32 %v30230_v17, %v33744_v37  ;;  %v30292_v62 = vsub.f32 %v29458_v7, %v34601_v8  ;;  %v34607_v7 = vand.u32 4294901760, %v30251_v3 }
 0x77c   : > { %23499 = vmatmul.mubr.f32.gmra.mrb[66].mxu1 %v29472_v12  ;;  %34602 = vst [vmem:[#allocation125_spill] sm:$0xff] %v30292_v62  ;;  %v34604_v12 = vand.u32 4294901760, %v29463_v9  ;;  %v10643_v8 = vsub.f32 %v30251_v3, %v34607_v7 }
 0x77d   : > { %23575 = vmatpush3.msra.mxu1 %v29509_v30  ;;  %23501 = vmatprep.mubr.f32.mxu1 %v29479_v6  ;;  %v10622_v30 = vsub.f32 %v30235_v44, %v33745_v20  ;;  %v34603_v6 = vand.u32 4294901760, %v30240_v35  ;;  %v34606_v20 = vand.u32 4294901760, %v30246_v61 }
 0x77e   : > { %24765 = vmatprep.subr.bf16.mxu1 %v34417_v48  ;;  %v30302_v41 = vsub.f32 %v29463_v9, %v34604_v12  ;;  %v10602_v12 = vand.u32 4294901760, %v10601_v63  ;;  %v10644_v38 = vand.u32 4294901760, %v10643_v8  ;;  %v34615_v8 = vand.u32 4294901760, %v30292_v62 }
 0x77f   : > { %v10629_v26 = vsub.f32 %v30240_v35, %v34603_v6  ;;  %v10636_v31 = vsub.f32 %v30246_v61, %v34606_v20  ;;  %v10650_v6 = vsub.f32 %v30256_v4, %v34608_v32  ;;  %v10616_v20 = vand.u32 4294901760, %v10615_v46 }
 0x780   : > { %34605 = vst [vmem:[#allocation126_spill] sm:$0xff] %v30302_v41  ;;  %23502 = vmatmul.mubr.f32.gmra.mrb[68].mxu1 %v29523_v2  ;;  %v22207_v37 = vpop.f32.mrb[18].mxu0  ;;  %v10609_v2 = vand.u32 4294901760, %v10608_v40  ;;  %v10623_v33 = vand.u32 4294901760, %v10622_v30  ;;  %v34609_v32 = vand.u32 4294901760, %v29500_v34 }
 0x781   : > { %vm9887_vm4 = vcmp.eq.f32.partialorder %v22207_v37, %v30196_v54  ;;  %v6706_v9 = vpop.f32.mrb[19].mxu0  ;;  %23504 = vmatprep.mubr.f32.mxu1 %v29543_v21  ;;  %v10630_v3 = vand.u32 4294901760, %v10629_v26  ;;  %v34611_v54 = vand.u32 4294901760, %v29505_v53  ;;  %v10637_v30 = vand.u32 4294901760, %v10636_v31  ;;  %v30332_v21 = vpop.permute.xlu1 %9733 }
 0x782   : > { %vm9886_vm6 = vcmp.eq.f32.partialorder %v6706_v9, %v29876_v36  ;;  %v30324_v4 = vsub.f32 %v29500_v34, %v34609_v32  ;;  %v10651_v26 = vand.u32 4294901760, %v10650_v6  ;;  %v30345_v31 = vpack.c.bf16 %v10623_v33, %v10616_v20  ;;  %v30352_v36 = vpop.permute.xlu0 %9728 }
 0x783   : > { %v22693_v7 = vpop.f32.mrb[14].mxu1  ;;  %v30329_v37 = vsub.f32 %v29505_v53, %v34611_v54  ;;  %v30340_v53 = vpack.c.bf16 %v10609_v2, %v10602_v12  ;;  %v30350_v6 = vsub.f32 %v30292_v62, %v34615_v8  ;;  %v34617_v2 = vand.u32 4294901760, %v30302_v41 }
 0x784   : > { %34610 = vst [vmem:[#allocation127_spill] sm:$0xff] %v30324_v4  ;;  %v9937_v40 = vsel %vm9887_vm4, %v22693_v7, 0.0  ;;  %v9288_v63 = vpop.f32.mrb[15].mxu1  ;;  %23505 = vmatmul.mubr.f32.gmra.mrb[70].mxu1 %v29573_v25  ;;  %v22210_v46 = vpop.f32.mrb[20].mxu0 }
 0x785   : > { %34612 = vst [vmem:[#allocation128_spill] sm:$0xff] %v30329_v37  ;;  %v30334_v61 = vand.u32 4294901760, %v9937_v40  ;;  %v9936_v34 = vsel %vm9886_vm6, %v9288_v63, 0.0  ;;  %vm9889_vm7 = vcmp.eq.f32.partialorder %v22210_v46, %v29960_v56  ;;  %v6718_v32 = vpop.f32.mrb[21].mxu0  ;;  %23507 = vmatprep.mubr.f32.mxu1 %v29581_v15  ;;  %v30360_v12 = vsub.f32 %v30302_v41, %v34617_v2 }
 0x786   : > { %v30342_v7 = vand.u32 4294901760, %v9936_v34  ;;  %vm9888_vm10 = vcmp.eq.f32.partialorder %v6718_v32, %v29919_v27  ;;  %v30370_v15 = vpack.c.bf16 %v10651_v26, %v10644_v38  ;;  %v10658_v38 = vand.u32 4294901760, %v30350_v6 }
 0x787   : > { %34613 = vst [vmem:[#allocation129_spill] sm:$0xff] %v30334_v61  ;;  %v30355_v56 = vsub.f32 %v9937_v40, %v30334_v61  ;;  %v22696_v9 = vpop.f32.mrb[16].mxu1  ;;  %v30368_v40 = vpack.c.bf16 %v10637_v30, %v10630_v3  ;;  %v30384_v3 = vpop.permute.xlu1 %9743  ;;  %v10665_v26 = vand.u32 4294901760, %v30360_v12 }
 0x788   : > { %34614 = vst [vmem:[#allocation130_spill] sm:$0xff] %v30342_v7  ;;  %v30365_v20 = vsub.f32 %v9936_v34, %v30342_v7  ;;  %v9939_v63 = vsel %vm9889_vm7, %v22696_v9, 0.0  ;;  %v9300_v46 = vpop.f32.mrb[17].mxu1  ;;  %23508 = vmatmul.mubr.f32.gmra.mrb[72].mxu1 %v29623_v5  ;;  %v22213_v8 = vpop.f32.mrb[22].mxu0 }
 0x789   : > { %34616 = vst [vmem:[#allocation131_spill] sm:$0xff] %v30355_v56  ;;  %v33778_v25 = vand.u32 4294901760, %v30355_v56  ;;  %v30373_v2 = vand.u32 4294901760, %v9939_v63  ;;  %v9938_v54 = vsel %vm9888_vm10, %v9300_v46, 0.0  ;;  %vm9891_vm11 = vcmp.eq.f32.partialorder %v22213_v8, %v30053_v29  ;;  %v6730_v34 = vpop.f32.mrb[23].mxu0  ;;  %23510 = vmatprep.mubr.f32.mxu1 %v29627_v19 }
 0x78a   : > { %34618 = vst [vmem:[#allocation132_spill] sm:$0xff] %v30365_v20  ;;  %v30380_v33 = vand.u32 4294901760, %v9938_v54  ;;  %vm9890_vm12 = vcmp.eq.f32.partialorder %v6730_v34, %v30004_v16  ;;  %v34622_v29 = vand.u32 4294901760, %v30324_v4  ;;  %v34623_v46 = vand.u32 4294901760, %v30329_v37 }
 0x78b   : > { %34619 = vst [vmem:[#allocation133_spill] sm:$0xff] %v30373_v2  ;;  %v30387_v30 = vsub.f32 %v9939_v63, %v30373_v2  ;;  %v22699_v27 = vpop.f32.mrb[18].mxu1  ;;  %v10096_v6 = vsub.f32 %v30355_v56, %v33778_v25 }
 0x78c   : > { %34620 = vst [vmem:[#allocation134_spill] sm:$0xff] %v30380_v33  ;;  %v30393_v32 = vsub.f32 %v30324_v4, %v34622_v29  ;;  %v30398_v8 = vsub.f32 %v30329_v37, %v34623_v46  ;;  %v30404_v63 = vsub.f32 %v9938_v54, %v30380_v33  ;;  %v9941_v9 = vsel %vm9891_vm11, %v22699_v27, 0.0  ;;  %v9312_v19 = vpop.f32.mrb[19].mxu1  ;;  %23511 = vmatmul.mubr.f32.gmra.mrb[74].mxu1 %v29640_v51  ;;  %v22216_v12 = vpop.f32.mrb[24].mxu0  ;;  %v26551_v27 = vld [vmem:[%s33241_s18 + $0x70] sm:$0xff] }
 0x78d   : > { %34621 = vst [vmem:[#allocation135_spill] sm:$0xff] %v30387_v30  ;;  %v34625_v29 = vand.u32 4294901760, %v30365_v20  ;;  %v30410_v4 = vpop.permute.xlu0 %9738  ;;  %v33789_v46 = vand.u32 4294901760, %v30387_v30  ;;  %v30413_v37 = vand.u32 4294901760, %v9941_v9  ;;  %v9940_v25 = vsel %vm9890_vm12, %v9312_v19, 0.0  ;;  %v6742_v54 = vpop.f32.mrb[25].mxu0  ;;  %23513 = vmatprep.mubr.f32.mxu1 %v29654_v52 }
 0x78e   : > { %34624 = vst [vmem:[#allocation136_spill] sm:$0xff] %v30404_v63  ;;  %v34627_v51 = vand.u32 4294901760, %v29549_v10  ;;  %vm9893_vm13 = vcmp.eq.f32.partialorder %v22216_v12, %v30140_v28  ;;  %vm9892_vm14 = vcmp.eq.f32.partialorder %v6742_v54, %v30099_v11  ;;  %v26552_v10 = vld [vmem:[%s33241_s18 + $0x78] sm:$0xff]  ;;  %v10097_v28 = vand.u32 4294901760, %v10096_v6 }
 0x78f   : > { %v10086_v5 = vsub.f32 %v30365_v20, %v34625_v29  ;;  %34626 = vst [vmem:[#allocation137_spill] sm:$0xff] %v30413_v37  ;;  %v30426_v20 = vand.u32 4294901760, %v9940_v25  ;;  %v30431_v19 = vsub.f32 %v9941_v9, %v30413_v37  ;;  %v22702_v16 = vpop.f32.mrb[20].mxu1  ;;  %v10116_v52 = vsub.f32 %v30387_v30, %v33789_v46  ;;  %v30450_v30 = vpop.permute.xlu1 %9753 }
 0x790   : > { %v30423_v56 = vsub.f32 %v26551_v27, %v34627_v51  ;;  %v34631_v51 = vand.u32 4294901760, %v29554_v42  ;;  %v9943_v9 = vsel %vm9893_vm13, %v22702_v16, 0.0  ;;  %v9324_v29 = vpop.f32.mrb[21].mxu1  ;;  %23514 = vmatmul.mubr.f32.gmra.mrb[76].mxu1 %v29670_v58  ;;  %v34634_v41 = vand.u32 4294901760, %v30404_v63  ;;  %v34640_v58 = vld [vmem:[#allocation61_spill] sm:$0xff] }
 0x791   : > { %34629 = vst [vmem:[#allocation139_spill] sm:$0xff] %v30426_v20  ;;  %34630 = vst [vmem:[#allocation140_spill] sm:$0xff] %v30431_v19  ;;  %v10087_v34 = vand.u32 4294901760, %v10086_v5  ;;  %v30444_v12 = vsub.f32 %v9940_v25, %v30426_v20  ;;  %v22219_v5 = vpop.f32.mrb[26].mxu0  ;;  %v30453_v42 = vand.u32 4294901760, %v9943_v9  ;;  %v9942_v6 = vsel %vm9892_vm14, %v9324_v29, 0.0  ;;  %23516 = vmatprep.mubr.f32.mxu1 %v29679_v39 }
 0x792   : > { %34628 = vst [vmem:[#allocation138_spill] sm:$0xff] %v30423_v56  ;;  %v30441_v27 = vsub.f32 %v26552_v10, %v34631_v51  ;;  %v10106_v46 = vsub.f32 %v30404_v63, %v34634_v41  ;;  %vm9895_vm15 = vcmp.eq.f32.partialorder %v22219_v5, %v30190_v45  ;;  %v6754_v25 = vpop.f32.mrb[27].mxu0  ;;  %v30460_v10 = vand.u32 4294901760, %v9942_v6  ;;  %v30463_v51 = vpop.permute.xlu0 %9748  ;;  %v34638_v29 = vld [vmem:[#allocation106_spill] sm:$0xff] }
 0x793   : > { %34633 = vst [vmem:[#allocation142_spill] sm:$0xff] %v30444_v12  ;;  %34635 = vst [vmem:[#allocation143_spill] sm:$0xff] %v30453_v42  ;;  %22798 = vmatprep.mubr.f32.mxu0 %v10087_v34  ;;  %vm9894_vm3 = vcmp.eq.f32.partialorder %v6754_v25, %v30170_v47  ;;  %v30466_v62 = vsub.f32 %v9943_v9, %v30453_v42  ;;  %v22705_v11 = vpop.f32.mrb[22].mxu1  ;;  %v10117_v54 = vand.u32 4294901760, %v10116_v52  ;;  %v10672_v39 = vand.u32 4294901760, %v30393_v32 }
 0x794   : > { %34632 = vst [vmem:[#allocation141_spill] sm:$0xff] %v30441_v27  ;;  %34636 = vst [vmem:[#allocation144_spill] sm:$0xff] %v30460_v10  ;;  %22799 = vmatmul.mubr.f32.vlgmr.msra.gmra.mrb[68].mxu0 %v10097_v28  ;;  %v10107_v41 = vand.u32 4294901760, %v10106_v46  ;;  %v30469_v34 = vpack.c.bf16 %v10665_v26, %v10658_v38  ;;  %v30473_v16 = vsub.f32 %v9942_v6, %v30460_v10  ;;  %v9945_v28 = vsel %vm9895_vm15, %v22705_v11, 0.0  ;;  %v9336_v46 = vpop.f32.mrb[23].mxu1  ;;  %v22222_v9 = vpop.f32.mrb[28].mxu0 }
 0x795   : > { %34637 = vst [vmem:[#allocation145_spill] sm:$0xff] %v30466_v62  ;;  %24595 = vmatpush3.bf16.msra.mxu0 %v34638_v29  ;;  %23517 = vmatmul.mubr.f32.gmra.mrb[78].mxu1 %v34640_v58  ;;  %v34641_v63 = vand.u32 4294901760, %v30444_v12  ;;  %v34642_v38 = vand.u32 4294901760, %v30431_v19  ;;  %v33804_v32 = vand.u32 4294901760, %v30466_v62  ;;  %v30485_v6 = vand.u32 4294901760, %v9945_v28  ;;  %v6766_v5 = vpop.f32.mrb[29].mxu0 }
 0x796   : > { %34639 = vst [vmem:[#allocation106_spill] sm:$0xff] %v30473_v16  ;;  %22801 = vmatprep.mubr.f32.mxu0 %v10107_v41  ;;  %v9944_v45 = vsel %vm9894_vm3, %v9336_v46, 0.0  ;;  %vm9897_vm5 = vcmp.eq.f32.partialorder %v22222_v9, %v30204_v43  ;;  %v34644_v41 = vld [vmem:[#allocation65_spill] sm:$0xff]  ;;  %24597 = vmatprep.subr.bf16.mxu0 %v30340_v53  ;;  %vm9896_vm8 = vcmp.eq.f32.partialorder %v6766_v5, %v30206_v23 }
 0x797   : > { %v10126_v52 = vsub.f32 %v30444_v12, %v34641_v63  ;;  %v10136_v26 = vsub.f32 %v30431_v19, %v34642_v38  ;;  %34643 = vst [vmem:[#allocation146_spill] sm:$0xff] %v30485_v6  ;;  %23519 = vmatprep.mubr.f32.mxu1 %v34644_v41  ;;  %v30493_v11 = vand.u32 4294901760, %v9944_v45  ;;  %v30496_v38 = vpop.permute.xlu1 %9763  ;;  %v30499_v47 = vsub.f32 %v9945_v28, %v30485_v6  ;;  %v22708_v25 = vpop.f32.mrb[24].mxu1  ;;  %v34648_v28 = vld [vmem:[#allocation68_spill] sm:$0xff] }
 0x798   : > { %22802 = vmatmul.mubr.f32.gmra.mrb[70].mxu0 %v10117_v54  ;;  %v10156_v46 = vsub.f32 %v30466_v62, %v33804_v32  ;;  %v10679_v63 = vand.u32 4294901760, %v30398_v8  ;;  %v9348_v58 = vpop.f32.mrb[25].mxu1  ;;  %v22225_v19 = vpop.f32.mrb[30].mxu0  ;;  %v34649_v32 = vand.u32 4294901760, %v30473_v16 }
 0x799   : > { %34645 = vst [vmem:[#allocation147_spill] sm:$0xff] %v30493_v11  ;;  %v10127_v29 = vand.u32 4294901760, %v10126_v52  ;;  %34646 = vst [vmem:[#allocation148_spill] sm:$0xff] %v30499_v47  ;;  %24599 = vmatpush3.bf16.msra.mxu0 %v30340_v53  ;;  %v30508_v54 = vsub.f32 %v9944_v45, %v30493_v11  ;;  %v9947_v52 = vsel %vm9897_vm5, %v22708_v25, 0.0  ;;  %23520 = vmatmul.mubr.f32.gmra.mrb[80].mxu1 %v34648_v28  ;;  %v10137_v12 = vand.u32 4294901760, %v10136_v26  ;;  %v30516_v62 = vpop.permute.xlu0 %9758  ;;  %v6778_v9 = vpop.f32.mrb[31].mxu0 }
 0x79a   : > { %v10146_v53 = vsub.f32 %v30473_v16, %v34649_v32  ;;  %v30519_v41 = vand.u32 4294901760, %v9947_v52  ;;  %v9946_v43 = vsel %vm9896_vm8, %v9348_v58, 0.0  ;;  %vm9899_vm9 = vcmp.eq.f32.partialorder %v22225_v19, %v30208_v55  ;;  %v34651_v45 = vld [vmem:[#allocation70_spill] sm:$0xff]  ;;  %24601 = vmatprep.subr.bf16.mxu0 %v30345_v31  ;;  %v34666_v16 = vld [vmem:[#allocation89_spill] sm:$0xff] }
 0x79b   : > { %34647 = vst [vmem:[#allocation149_spill] sm:$0xff] %v30508_v54  ;;  %22804 = vmatprep.mubr.f32.mxu0 %v10127_v29  ;;  %23522 = vmatprep.mubr.f32.mxu1 %v34651_v45  ;;  %v30527_v29 = vand.u32 4294901760, %v9946_v43  ;;  %vm9898_vm4 = vcmp.eq.f32.partialorder %v6778_v9, %v30210_v57  ;;  %v22711_v23 = vpop.f32.mrb[26].mxu1  ;;  %v10157_v58 = vand.u32 4294901760, %v10156_v46  ;;  %v30534_v5 = vpack.c.bf16 %v10679_v63, %v10672_v39  ;;  %v30549_v63 = vpop.permute.xlu1 %9773 }
 0x79c   : > { %34650 = vst [vmem:[#allocation150_spill] sm:$0xff] %v30519_v41  ;;  %22805 = vmatmul.mubr.f32.gmra.mrb[72].mxu0 %v10137_v12  ;;  %v10147_v32 = vand.u32 4294901760, %v10146_v53  ;;  %v30531_v25 = vsub.f32 %v9947_v52, %v30519_v41  ;;  %v9949_v12 = vsel %vm9899_vm9, %v22711_v23, 0.0  ;;  %v9360_v26 = vpop.f32.mrb[27].mxu1  ;;  %v34655_v53 = vld [vmem:[#allocation84_spill] sm:$0xff]  ;;  %v22228_v52 = vpop.f32.mrb[32].mxu0 }
 0x79d   : > { %34652 = vst [vmem:[#allocation151_spill] sm:$0xff] %v30527_v29  ;;  %24603 = vmatpush3.bf16.msra.mxu0 %v30345_v31  ;;  %v30538_v45 = vsub.f32 %v9946_v43, %v30527_v29  ;;  %23523 = vmatmul.mubr.f32.gmra.mrb[82].mxu1 %v34655_v53  ;;  %v34656_v28 = vand.u32 4294901760, %v30508_v54  ;;  %v34657_v39 = vand.u32 4294901760, %v30499_v47  ;;  %v30552_v8 = vand.u32 4294901760, %v9949_v12  ;;  %v6790_v19 = vpop.f32.mrb[33].mxu0  ;;  %v30563_v43 = vpop.permute.xlu0 %9768 }
 0x79e   : > { %34653 = vst [vmem:[#allocation152_spill] sm:$0xff] %v30531_v25  ;;  %22807 = vmatprep.mubr.f32.mxu0 %v10147_v32  ;;  %v9948_v55 = vsel %vm9898_vm4, %v9360_v26, 0.0  ;;  %vm9901_vm6 = vcmp.eq.f32.partialorder %v22228_v52, %v30258_v49  ;;  %v34659_v32 = vld [vmem:[#allocation86_spill] sm:$0xff]  ;;  %24605 = vmatprep.subr.bf16.mxu0 %v30368_v40  ;;  %vm9900_vm7 = vcmp.eq.f32.partialorder %v6790_v19, %v30267_v50  ;;  %v34662_v26 = vand.u32 4294901760, %v30531_v25  ;;  %v34669_v52 = vld [vmem:[#allocation99_spill] sm:$0xff] }
 0x79f   : > { %34654 = vst [vmem:[#allocation153_spill] sm:$0xff] %v30538_v45  ;;  %v10166_v46 = vsub.f32 %v30508_v54, %v34656_v28  ;;  %v10176_v31 = vsub.f32 %v30499_v47, %v34657_v39  ;;  %34658 = vst [vmem:[#allocation154_spill] sm:$0xff] %v30552_v8  ;;  %23525 = vmatprep.mubr.f32.mxu1 %v34659_v32  ;;  %v30560_v23 = vand.u32 4294901760, %v9948_v55  ;;  %v22714_v9 = vpop.f32.mrb[28].mxu1  ;;  %v34663_v28 = vand.u32 4294901760, %v30423_v56 }
 0x7a0   : > { %22808 = vmatmul.mubr.f32.gmra.mrb[74].mxu0 %v10157_v58  ;;  %v30566_v57 = vsub.f32 %v9949_v12, %v30552_v8  ;;  %v10196_v32 = vsub.f32 %v30531_v25, %v34662_v26  ;;  %v34664_v58 = vand.u32 4294901760, %v30441_v27  ;;  %v9951_v12 = vsel %vm9901_vm6, %v22714_v9, 0.0  ;;  %v9372_v54 = vpop.f32.mrb[29].mxu1  ;;  %v22231_v26 = vpop.f32.mrb[34].mxu0 }
 0x7a1   : > { %34660 = vst [vmem:[#allocation155_spill] sm:$0xff] %v30560_v23  ;;  %v10167_v39 = vand.u32 4294901760, %v10166_v46  ;;  %24607 = vmatpush3.bf16.msra.mxu0 %v30368_v40  ;;  %v10685_v53 = vsub.f32 %v30423_v56, %v34663_v28  ;;  %v30579_v47 = vsub.f32 %v9948_v55, %v30560_v23  ;;  %23526 = vmatmul.mubr.f32.gmra.mrb[84].mxu1 %v34666_v16  ;;  %v10177_v40 = vand.u32 4294901760, %v10176_v31  ;;  %v6802_v49 = vpop.f32.mrb[35].mxu0  ;;  %v30599_v9 = vpop.permute.xlu1 %9783 }
 0x7a2   : > { %34661 = vst [vmem:[#allocation156_spill] sm:$0xff] %v30566_v57  ;;  %v10692_v46 = vsub.f32 %v30441_v27, %v34664_v58  ;;  %v34667_v25 = vand.u32 4294901760, %v30538_v45  ;;  %v30588_v56 = vand.u32 4294901760, %v9951_v12  ;;  %v9950_v55 = vsel %vm9900_vm7, %v9372_v54, 0.0  ;;  %23528 = vmatprep.mubr.f32.mxu1 %v34669_v52  ;;  %24609 = vmatprep.subr.bf16.mxu0 %v30370_v15 }
 0x7a3   : > { %34665 = vst [vmem:[#allocation157_spill] sm:$0xff] %v30579_v47  ;;  %22810 = vmatprep.mubr.f32.mxu0 %v10167_v39  ;;  %vm9903_vm10 = vcmp.eq.f32.partialorder %v22231_v26, %v30294_v18  ;;  %v30596_v39 = vand.u32 4294901760, %v9950_v55  ;;  %vm9902_vm11 = vcmp.eq.f32.partialorder %v6802_v49, %v30314_v0  ;;  %v22717_v54 = vpop.f32.mrb[30].mxu1  ;;  %v10197_v19 = vand.u32 4294901760, %v10196_v32 }
 0x7a4   : > { %v10186_v28 = vsub.f32 %v30538_v45, %v34667_v25  ;;  %34668 = vst [vmem:[#allocation158_spill] sm:$0xff] %v30588_v56  ;;  %22811 = vmatmul.mubr.f32.gmra.mrb[76].mxu0 %v10177_v40  ;;  %v30602_v50 = vsub.f32 %v9951_v12, %v30588_v56  ;;  %v10686_v58 = vand.u32 4294901760, %v10685_v53  ;;  %v10693_v8 = vand.u32 4294901760, %v10692_v46  ;;  %v9384_v31 = vpop.f32.mrb[31].mxu1  ;;  %v22234_v16 = vpop.f32.mrb[36].mxu0 }
 0x7a5   : > { %34670 = vst [vmem:[#allocation159_spill] sm:$0xff] %v30596_v39  ;;  %24611 = vmatpush3.bf16.msra.mxu0 %v30370_v15  ;;  %v30606_v52 = vsub.f32 %v9950_v55, %v30596_v39  ;;  %v9953_v40 = vsel %vm9903_vm10, %v22717_v54, 0.0  ;;  %v34674_v12 = vand.u32 4294901760, %v30579_v47  ;;  %v34675_v32 = vand.u32 4294901760, %v30566_v57  ;;  %v30617_v53 = vpop.permute.xlu0 %9778  ;;  %v6814_v26 = vpop.f32.mrb[37].mxu0 }
 0x7a6   : > { %v10187_v25 = vand.u32 4294901760, %v10186_v28  ;;  %34671 = vst [vmem:[#allocation160_spill] sm:$0xff] %v30602_v50  ;;  %v34673_v28 = vld [vmem:[#allocation101_spill] sm:$0xff]  ;;  %v30620_v55 = vand.u32 4294901760, %v9953_v40  ;;  %v9952_v18 = vsel %vm9902_vm11, %v9384_v31, 0.0  ;;  %vm9905_vm12 = vcmp.eq.f32.partialorder %v22234_v16, %v30332_v21  ;;  %24613 = vmatprep.subr.bf16.mxu0 %v30469_v34 }
 0x7a7   : > { %34672 = vst [vmem:[#allocation161_spill] sm:$0xff] %v30606_v52  ;;  %23529 = vmatmul.mubr.f32.gmra.mrb[86].mxu1 %v34673_v28  ;;  %v10206_v45 = vsub.f32 %v30579_v47, %v34674_v12  ;;  %v10216_v15 = vsub.f32 %v30566_v57, %v34675_v32  ;;  %v30628_v12 = vand.u32 4294901760, %v9952_v18  ;;  %vm9904_vm13 = vcmp.eq.f32.partialorder %v6814_v26, %v30352_v36  ;;  %v22720_v0 = vpop.f32.mrb[32].mxu1  ;;  %v30645_v47 = vpop.permute.xlu1 %9793 }
 0x7a8   : > { %22813 = vmatprep.mubr.f32.mxu0 %v10187_v25  ;;  %34676 = vst [vmem:[#allocation162_spill] sm:$0xff] %v30620_v55  ;;  %v34677_v25 = vld [vmem:[#allocation108_spill] sm:$0xff]  ;;  %v30632_v46 = vsub.f32 %v9953_v40, %v30620_v55  ;;  %v34680_v49 = vand.u32 4294901760, %v30602_v50  ;;  %v24620_v16 = vpack.c.bf16 %v10693_v8, %v10686_v58  ;;  %v9955_v54 = vsel %vm9905_vm12, %v22720_v0, 0.0 }
 0x7a9   : > { %23531 = vmatprep.mubr.f32.mxu1 %v34677_v25  ;;  %34678 = vst [vmem:[#allocation163_spill] sm:$0xff] %v30628_v12  ;;  %22814 = vmatmul.mubr.f32.gmra.mrb[78].mxu0 %v10197_v19  ;;  %v10207_v32 = vand.u32 4294901760, %v10206_v45  ;;  %v30639_v31 = vsub.f32 %v9952_v18, %v30628_v12  ;;  %v9396_v25 = vpop.f32.mrb[33].mxu1  ;;  %v34682_v19 = vld [vmem:[#allocation3_spill] sm:$0xff]  ;;  %v22237_v45 = vpop.f32.mrb[38].mxu0  ;;  %v10217_v28 = vand.u32 4294901760, %v10216_v15 }
 0x7aa   : > { %34679 = vst [vmem:[#allocation164_spill] sm:$0xff] %v30632_v46  ;;  %v10236_v21 = vsub.f32 %v30602_v50, %v34680_v49  ;;  %24615 = vmatpush3.bf16.msra.mxu0 %v30469_v34  ;;  %v34683_v40 = vand.u32 4294901760, %v30606_v52  ;;  %v30648_v34 = vand.u32 4294901760, %v9955_v54  ;;  %v9954_v8 = vsel %vm9904_vm13, %v9396_v25, 0.0  ;;  %v6826_v58 = vpop.f32.mrb[39].mxu0  ;;  %v34685_v18 = vld [vmem:[#allocation10_spill] sm:$0xff] }
 0x7ab   : > { %34681 = vst [vmem:[#allocation165_spill] sm:$0xff] %v30639_v31  ;;  %22816 = vmatprep.mubr.f32.mxu0 %v10207_v32  ;;  %23532 = vmatmul.mubr.f32.gmra.mrb[88].mxu1 %v34682_v19  ;;  %vm9907_vm14 = vcmp.eq.f32.partialorder %v22237_v45, %v30384_v3  ;;  %v30656_v32 = vand.u32 4294901760, %v9954_v8  ;;  %vm9906_vm15 = vcmp.eq.f32.partialorder %v6826_v58, %v30410_v4  ;;  %v22723_v26 = vpop.f32.mrb[34].mxu1  ;;  %v34689_v15 = vld [vmem:[#allocation11_spill] sm:$0xff] }
 0x7ac   : > { %v10226_v57 = vsub.f32 %v30606_v52, %v34683_v40  ;;  %34684 = vst [vmem:[#allocation166_spill] sm:$0xff] %v30648_v34  ;;  %23534 = vmatprep.mubr.f32.mxu1 %v34685_v18  ;;  %24617 = vmatprep.subr.bf16.mxu0 %v30534_v5  ;;  %v30659_v40 = vpop.permute.xlu0 %9788  ;;  %v30662_v36 = vsub.f32 %v9955_v54, %v30648_v34  ;;  %v10237_v3 = vand.u32 4294901760, %v10236_v21  ;;  %v9957_v45 = vsel %vm9907_vm14, %v22723_v26, 0.0  ;;  %v9408_v49 = vpop.f32.mrb[35].mxu1  ;;  %v34693_v26 = vld [vmem:[#allocation5_spill] sm:$0xff] }
 0x7ad   : > { %34686 = vst [vmem:[#allocation167_spill] sm:$0xff] %v30656_v32  ;;  %22817 = vmatmul.mubr.f32.gmra.mrb[80].mxu0 %v10217_v28  ;;  %v30666_v25 = vsub.f32 %v9954_v8, %v30656_v32  ;;  %v22240_v28 = vpop.f32.mrb[40].mxu0  ;;  %v34691_v54 = vand.u32 4294901760, %v30632_v46  ;;  %v9956_v8 = vsel %vm9906_vm15, %v9408_v49, 0.0  ;;  %v30686_v21 = vpop.permute.xlu1 %9803 }
 0x7ae   : > { %v10227_v0 = vand.u32 4294901760, %v10226_v57  ;;  %34687 = vst [vmem:[#allocation168_spill] sm:$0xff] %v30662_v36  ;;  %24619 = vmatpush3.bf16.msra.mxu0 %v30534_v5  ;;  %v34690_v57 = vand.u32 4294901760, %v30639_v31  ;;  %v30676_v5 = vand.u32 4294901760, %v9957_v45  ;;  %vm9909_vm3 = vcmp.eq.f32.partialorder %v22240_v28, %v30450_v30 }
 0x7af   : > { %34688 = vst [vmem:[#allocation169_spill] sm:$0xff] %v30666_v25  ;;  %23535 = vmatmul.mubr.f32.gmra.mrb[90].mxu1 %v34689_v15  ;;  %v10256_v19 = vsub.f32 %v30632_v46, %v34691_v54  ;;  %24621 = vmatprep.subr.bf16.mxu0 %v24620_v16  ;;  %v22726_v4 = vpop.f32.mrb[36].mxu1  ;;  %v34696_v30 = vand.u32 4294901760, %v30662_v36 }
 0x7b0   : > { %22819 = vmatprep.mubr.f32.mxu0 %v10227_v0  ;;  %v10246_v18 = vsub.f32 %v30639_v31, %v34690_v57  ;;  %34692 = vst [vmem:[#allocation170_spill] sm:$0xff] %v30676_v5  ;;  %v6838_v0 = vpop.f32.mrb[41].mxu0  ;;  %23537 = vmatprep.mubr.f32.mxu1 %v34693_v26  ;;  %v30683_v57 = vand.u32 4294901760, %v9956_v8  ;;  %v30689_v46 = vsub.f32 %v9957_v45, %v30676_v5  ;;  %v9959_v28 = vsel %vm9909_vm3, %v22726_v4, 0.0  ;;  %v9420_v15 = vpop.f32.mrb[37].mxu1 }
 0x7b1   : > { %22820 = vmatmul.mubr.f32.gmra.mrb[82].mxu0 %v10237_v3  ;;  %vm9908_vm5 = vcmp.eq.f32.partialorder %v6838_v0, %v30463_v51  ;;  %v10276_v49 = vsub.f32 %v30662_v36, %v34696_v30  ;;  %v34698_v3 = vld [vmem:[#allocation26_spill] sm:$0xff]  ;;  %v10257_v26 = vand.u32 4294901760, %v10256_v19  ;;  %v34699_v31 = vand.u32 4294901760, %v30666_v25  ;;  %v30701_v50 = vpop.permute.xlu0 %9798  ;;  %v34705_v0 = vld [vmem:[#allocation36_spill] sm:$0xff] }
 0x7b2   : > { %34694 = vst [vmem:[#allocation171_spill] sm:$0xff] %v30683_v57  ;;  %v10247_v54 = vand.u32 4294901760, %v10246_v18  ;;  %34695 = vst [vmem:[#allocation172_spill] sm:$0xff] %v30689_v46  ;;  %24623 = vmatpush3.bf16.msra.mxu0 %v24620_v16  ;;  %v30695_v58 = vsub.f32 %v9956_v8, %v30683_v57  ;;  %v22243_v18 = vpop.f32.mrb[42].mxu0  ;;  %v30704_v30 = vand.u32 4294901760, %v9959_v28  ;;  %v9958_v16 = vsel %vm9908_vm5, %v9420_v15, 0.0 }
 0x7b3   : > { %23538 = vmatmul.mubr.f32.gmra.mrb[92].mxu1 %v34698_v3  ;;  %v10266_v45 = vsub.f32 %v30666_v25, %v34699_v31  ;;  %vm9911_vm8 = vcmp.eq.f32.partialorder %v22243_v18, %v30496_v38  ;;  %v6850_v8 = vpop.f32.mrb[43].mxu0  ;;  %v30711_v4 = vand.u32 4294901760, %v9958_v16  ;;  %v22729_v3 = vpop.f32.mrb[38].mxu1  ;;  %v10277_v36 = vand.u32 4294901760, %v10276_v49 }
 0x7b4   : > { %34697 = vst [vmem:[#allocation173_spill] sm:$0xff] %v30695_v58  ;;  %22822 = vmatprep.mubr.f32.mxu0 %v10247_v54  ;;  %34700 = vst [vmem:[#allocation174_spill] sm:$0xff] %v30704_v30  ;;  %v34701_v54 = vld [vmem:[#allocation30_spill] sm:$0xff]  ;;  %v33835_v19 = vand.u32 4294901760, %v30695_v58  ;;  %vm9910_vm9 = vcmp.eq.f32.partialorder %v6850_v8, %v30516_v62  ;;  %v30715_v52 = vsub.f32 %v9959_v28, %v30704_v30  ;;  %v9961_v38 = vsel %vm9911_vm8, %v22729_v3, 0.0  ;;  %v9432_v15 = vpop.f32.mrb[39].mxu1 }
 0x7b5   : > { %23540 = vmatprep.mubr.f32.mxu1 %v34701_v54  ;;  %34702 = vst [vmem:[#allocation175_spill] sm:$0xff] %v30711_v4  ;;  %22823 = vmatmul.mubr.f32.gmra.mrb[84].mxu0 %v10257_v26  ;;  %v10267_v31 = vand.u32 4294901760, %v10266_v45  ;;  %v30718_v51 = vsub.f32 %v9958_v16, %v30711_v4  ;;  %v22246_v18 = vpop.f32.mrb[44].mxu0  ;;  %v34706_v45 = vand.u32 4294901760, %v30689_v46  ;;  %v30727_v54 = vpop.permute.xlu1 %9813  ;;  %v30730_v16 = vand.u32 4294901760, %v9961_v38 }
 0x7b6   : > { %34703 = vst [vmem:[#allocation176_spill] sm:$0xff] %v30715_v52  ;;  %v10286_v26 = vsub.f32 %v30695_v58, %v33835_v19  ;;  %v9960_v3 = vsel %vm9910_vm9, %v9432_v15, 0.0  ;;  %vm9913_vm4 = vcmp.eq.f32.partialorder %v22246_v18, %v30549_v63  ;;  %v34711_v8 = vand.u32 4294901760, %v30715_v52  ;;  %v34712_v15 = vld [vmem:[#allocation76_spill] sm:$0xff] }
 0x7b7   : > { %34704 = vst [vmem:[#allocation177_spill] sm:$0xff] %v30718_v51  ;;  %22825 = vmatprep.mubr.f32.mxu0 %v10267_v31  ;;  %23541 = vmatmul.mubr.f32.gmra.mrb[94].mxu1 %v34705_v0  ;;  %v10296_v28 = vsub.f32 %v30689_v46, %v34706_v45  ;;  %34707 = vst [vmem:[#allocation178_spill] sm:$0xff] %v30730_v16  ;;  %v6862_v31 = vpop.f32.mrb[45].mxu0  ;;  %v34708_v0 = vld [vmem:[#allocation19_spill] sm:$0xff]  ;;  %v30737_v58 = vand.u32 4294901760, %v9960_v3  ;;  %v30740_v46 = vpop.permute.xlu0 %9808  ;;  %v30743_v49 = vsub.f32 %v9961_v38, %v30730_v16  ;;  %v34713_v18 = vld [vmem:[#allocation80_spill] sm:$0xff] }
 0x7b8   : > { %23543 = vmatprep.mubr.f32.mxu1 %v34708_v0  ;;  %vm9912_vm6 = vcmp.eq.f32.partialorder %v6862_v31, %v30563_v43  ;;  %v10287_v45 = vand.u32 4294901760, %v10286_v26  ;;  %v22732_v62 = vpop.f32.mrb[40].mxu1  ;;  %v10316_v63 = vsub.f32 %v30715_v52, %v34711_v8  ;;  %v30750_v0 = vpack.c.bf16 %v34713_v18, %v34712_v15  ;;  %v34715_v26 = vld [vmem:[#allocation43_spill] sm:$0xff]  ;;  %v22249_v30 = vpop.f32.mrb[46].mxu0 }
 0x7b9   : > { %34709 = vst [vmem:[#allocation179_spill] sm:$0xff] %v30737_v58  ;;  %22826 = vmatmul.mubr.f32.gmra.mrb[86].mxu0 %v10277_v36  ;;  %34710 = vst [vmem:[#allocation180_spill] sm:$0xff] %v30743_v49  ;;  %v30753_v19 = vsub.f32 %v9960_v3, %v30737_v58  ;;  %v9963_v36 = vsel %vm9913_vm4, %v22732_v62, 0.0  ;;  %v9444_v25 = vpop.f32.mrb[41].mxu1  ;;  %v10297_v38 = vand.u32 4294901760, %v10296_v28  ;;  %v34716_v16 = vand.u32 4294901760, %v30718_v51  ;;  %v30771_v8 = vpop.permute.xlu1 %9823 }
 0x7ba   : > { %22828 = vmatprep.mubr.f32.mxu0 %v10287_v45  ;;  %v30760_v52 = vand.u32 4294901760, %v9963_v36  ;;  %v9962_v18 = vsel %vm9912_vm6, %v9444_v25, 0.0  ;;  %vm9915_vm7 = vcmp.eq.f32.partialorder %v22249_v30, %v30599_v9  ;;  %v6874_v3 = vpop.f32.mrb[47].mxu0  ;;  %v34718_v62 = vld [vmem:[#allocation49_spill] sm:$0xff]  ;;  %24625 = vmatprep.subr.bf16.mxu0 %v30750_v0  ;;  %v10317_v9 = vand.u32 4294901760, %v10316_v63  ;;  %v34722_v28 = vld [vmem:[#allocation52_spill] sm:$0xff] }
 0x7bb   : > { %34714 = vst [vmem:[#allocation181_spill] sm:$0xff] %v30753_v19  ;;  %23544 = vmatmul.mubr.f32.gmra.mrb[96].mxu1 %v34715_v26  ;;  %v10306_v4 = vsub.f32 %v30718_v51, %v34716_v16  ;;  %v30768_v45 = vand.u32 4294901760, %v9962_v18  ;;  %vm9914_vm10 = vcmp.eq.f32.partialorder %v6874_v3, %v30617_v53  ;;  %v22735_v25 = vpop.f32.mrb[42].mxu1  ;;  %v34724_v51 = vand.u32 4294901760, %v30743_v49  ;;  %v30786_v15 = vpop.permute.xlu0 %9818 }
 0x7bc   : > { %34717 = vst [vmem:[#allocation182_spill] sm:$0xff] %v30760_v52  ;;  %23546 = vmatprep.mubr.f32.mxu1 %v34718_v62  ;;  %v30774_v43 = vsub.f32 %v9963_v36, %v30760_v52  ;;  %v9965_v31 = vsel %vm9915_vm7, %v22735_v25, 0.0  ;;  %v9456_v62 = vpop.f32.mrb[43].mxu1  ;;  %v22252_v26 = vpop.f32.mrb[48].mxu0 }
 0x7bd   : > { %34719 = vst [vmem:[#allocation183_spill] sm:$0xff] %v30768_v45  ;;  %22829 = vmatmul.mubr.f32.gmra.mrb[88].mxu0 %v10297_v38  ;;  %v10307_v16 = vand.u32 4294901760, %v10306_v4  ;;  %v30777_v30 = vsub.f32 %v9962_v18, %v30768_v45  ;;  %v34723_v38 = vand.u32 4294901760, %v30753_v19  ;;  %v10336_v36 = vsub.f32 %v30743_v49, %v34724_v51  ;;  %v6886_v25 = vpop.f32.mrb[49].mxu0 }
 0x7be   : > { %34720 = vst [vmem:[#allocation184_spill] sm:$0xff] %v30774_v43  ;;  %v30789_v18 = vand.u32 4294901760, %v9965_v31  ;;  %vm9917_vm11 = vcmp.eq.f32.partialorder %v22252_v26, %v30645_v47  ;;  %vm9916_vm12 = vcmp.eq.f32.partialorder %v6886_v25, %v30659_v40  ;;  %v34729_v53 = vand.u32 4294901760, %v30774_v43 }
 0x7bf   : > { %34721 = vst [vmem:[#allocation185_spill] sm:$0xff] %v30777_v30  ;;  %22831 = vmatprep.mubr.f32.mxu0 %v10307_v16  ;;  %23547 = vmatmul.mubr.f32.gmra.mrb[98].mxu1 %v34722_v28  ;;  %v10326_v4 = vsub.f32 %v30753_v19, %v34723_v38  ;;  %v9964_v16 = vsel %vm9914_vm10, %v9456_v62, 0.0  ;;  %v34726_v28 = vld [vmem:[#allocation56_spill] sm:$0xff]  ;;  %v22738_v49 = vpop.f32.mrb[44].mxu1  ;;  %v34731_v38 = vld [vmem:[#allocation62_spill] sm:$0xff] }
 0x7c0   : > { %34725 = vst [vmem:[#allocation186_spill] sm:$0xff] %v30789_v18  ;;  %23549 = vmatprep.mubr.f32.mxu1 %v34726_v28  ;;  %v30796_v19 = vand.u32 4294901760, %v9964_v16  ;;  %v30800_v63 = vsub.f32 %v9965_v31, %v30789_v18  ;;  %v10356_v3 = vsub.f32 %v30774_v43, %v34729_v53  ;;  %v9967_v26 = vsel %vm9917_vm11, %v22738_v49, 0.0  ;;  %v9468_v62 = vpop.f32.mrb[45].mxu1  ;;  %v30812_v18 = vpop.permute.xlu1 %9833 }
 0x7c1   : > { %22832 = vmatmul.mubr.f32.gmra.mrb[90].mxu0 %v10317_v9  ;;  %v10327_v51 = vand.u32 4294901760, %v10326_v4  ;;  %v22255_v9 = vpop.f32.mrb[50].mxu0  ;;  %v10337_v28 = vand.u32 4294901760, %v10336_v36  ;;  %v34732_v4 = vand.u32 4294901760, %v30777_v30  ;;  %v30815_v45 = vand.u32 4294901760, %v9967_v26  ;;  %v34738_v36 = vld [vmem:[#allocation66_spill] sm:$0xff] }
 0x7c2   : > { %34727 = vst [vmem:[#allocation187_spill] sm:$0xff] %v30796_v19  ;;  %34728 = vst [vmem:[#allocation188_spill] sm:$0xff] %v30800_v63  ;;  %v30806_v47 = vsub.f32 %v9964_v16, %v30796_v19  ;;  %v9966_v16 = vsel %vm9916_vm12, %v9468_v62, 0.0  ;;  %vm9919_vm13 = vcmp.eq.f32.partialorder %v22255_v9, %v30686_v21  ;;  %v6898_v49 = vpop.f32.mrb[51].mxu0  ;;  %v10357_v25 = vand.u32 4294901760, %v10356_v3 }
 0x7c3   : > { %22834 = vmatprep.mubr.f32.mxu0 %v10327_v51  ;;  %23550 = vmatmul.mubr.f32.gmra.mrb[100].mxu1 %v34731_v38  ;;  %v10346_v31 = vsub.f32 %v30777_v30, %v34732_v4  ;;  %34733 = vst [vmem:[#allocation190_spill] sm:$0xff] %v30815_v45  ;;  %v34734_v51 = vld [vmem:[#allocation64_spill] sm:$0xff]  ;;  %v30822_v53 = vand.u32 4294901760, %v9966_v16  ;;  %vm9918_vm14 = vcmp.eq.f32.partialorder %v6898_v49, %v30701_v50  ;;  %v30825_v38 = vpop.permute.xlu0 %9828  ;;  %v22741_v40 = vpop.f32.mrb[46].mxu1  ;;  %v34740_v43 = vand.u32 4294901760, %v30800_v63 }
 0x7c4   : > { %34730 = vst [vmem:[#allocation189_spill] sm:$0xff] %v30806_v47  ;;  %23552 = vmatprep.mubr.f32.mxu1 %v34734_v51  ;;  %v30828_v52 = vsub.f32 %v9967_v26, %v30815_v45  ;;  %v9969_v62 = vsel %vm9919_vm13, %v22741_v40, 0.0  ;;  %v9480_v9 = vpop.f32.mrb[47].mxu1  ;;  %v22258_v51 = vpop.f32.mrb[52].mxu0  ;;  %v34742_v40 = vld [vmem:[#allocation69_spill] sm:$0xff] }
 0x7c5   : > { %34735 = vst [vmem:[#allocation191_spill] sm:$0xff] %v30822_v53  ;;  %22835 = vmatmul.mubr.f32.gmra.mrb[92].mxu0 %v10337_v28  ;;  %v10347_v4 = vand.u32 4294901760, %v10346_v31  ;;  %v30831_v21 = vsub.f32 %v9966_v16, %v30822_v53  ;;  %v34739_v28 = vand.u32 4294901760, %v30806_v47  ;;  %v10376_v26 = vsub.f32 %v30800_v63, %v34740_v43 }
 0x7c6   : > { %34736 = vst [vmem:[#allocation192_spill] sm:$0xff] %v30828_v52  ;;  %v30841_v3 = vand.u32 4294901760, %v9969_v62  ;;  %v9968_v16 = vsel %vm9918_vm14, %v9480_v9, 0.0  ;;  %vm9921_vm15 = vcmp.eq.f32.partialorder %v22258_v51, %v30727_v54  ;;  %v34745_v49 = vand.u32 4294901760, %v30828_v52 }
 0x7c7   : > { %34737 = vst [vmem:[#allocation193_spill] sm:$0xff] %v30831_v21  ;;  %22837 = vmatprep.mubr.f32.mxu0 %v10347_v4  ;;  %23553 = vmatmul.mubr.f32.gmra.mrb[102].mxu1 %v34738_v36  ;;  %v10366_v31 = vsub.f32 %v30806_v47, %v34739_v28  ;;  %v6910_v4 = vpop.f32.mrb[53].mxu0  ;;  %v30848_v45 = vand.u32 4294901760, %v9968_v16  ;;  %v30851_v28 = vpop.permute.xlu1 %9843  ;;  %v34748_v63 = vand.u32 4294901760, %v30831_v21 }
 0x7c8   : > { %34741 = vst [vmem:[#allocation194_spill] sm:$0xff] %v30841_v3  ;;  %23555 = vmatprep.mubr.f32.mxu1 %v34742_v40  ;;  %vm9920_vm3 = vcmp.eq.f32.partialorder %v6910_v4, %v30740_v46  ;;  %v30854_v30 = vsub.f32 %v9969_v62, %v30841_v3  ;;  %v22744_v50 = vpop.f32.mrb[48].mxu1  ;;  %v10396_v54 = vsub.f32 %v30828_v52, %v34745_v49  ;;  %v22261_v40 = vpop.f32.mrb[54].mxu0  ;;  %v34754_v4 = vld [vmem:[#allocation103_spill] sm:$0xff] }
 0x7c9   : > { %34743 = vst [vmem:[#allocation195_spill] sm:$0xff] %v30848_v45  ;;  %22838 = vmatmul.mubr.f32.gmra.mrb[94].mxu0 %v10357_v25  ;;  %v10367_v43 = vand.u32 4294901760, %v10366_v31  ;;  %v30860_v51 = vsub.f32 %v9968_v16, %v30848_v45  ;;  %v9971_v9 = vsel %vm9921_vm15, %v22744_v50, 0.0  ;;  %v9492_v36 = vpop.f32.mrb[49].mxu1  ;;  %v34747_v25 = vld [vmem:[#allocation88_spill] sm:$0xff]  ;;  %v10377_v31 = vand.u32 4294901760, %v10376_v26  ;;  %v30866_v47 = vpop.permute.xlu0 %9838 }
 0x7ca   : > { %34744 = vst [vmem:[#allocation196_spill] sm:$0xff] %v30854_v30  ;;  %v10386_v62 = vsub.f32 %v30831_v21, %v34748_v63  ;;  %v30869_v53 = vand.u32 4294901760, %v9971_v9  ;;  %v9970_v16 = vsel %vm9920_vm3, %v9492_v36, 0.0  ;;  %vm9923_vm5 = vcmp.eq.f32.partialorder %v22261_v40, %v30771_v8  ;;  %v34750_v50 = vld [vmem:[#allocation91_spill] sm:$0xff] }
 0x7cb   : > { %34746 = vst [vmem:[#allocation197_spill] sm:$0xff] %v30860_v51  ;;  %22840 = vmatprep.mubr.f32.mxu0 %v10367_v43  ;;  %23556 = vmatmul.mubr.f32.gmra.mrb[104].mxu1 %v34747_v25  ;;  %v6922_v43 = vpop.f32.mrb[55].mxu0  ;;  %v33878_v26 = vand.u32 4294901760, %v30860_v51  ;;  %v30876_v49 = vand.u32 4294901760, %v9970_v16  ;;  %v22747_v25 = vpop.f32.mrb[50].mxu1  ;;  %v10397_v52 = vand.u32 4294901760, %v10396_v54 }
 0x7cc   : > { %34749 = vst [vmem:[#allocation198_spill] sm:$0xff] %v30869_v53  ;;  %23558 = vmatprep.mubr.f32.mxu1 %v34750_v50  ;;  %vm9922_vm8 = vcmp.eq.f32.partialorder %v6922_v43, %v30786_v15  ;;  %v10387_v63 = vand.u32 4294901760, %v10386_v62  ;;  %v30880_v3 = vsub.f32 %v9971_v9, %v30869_v53  ;;  %v9973_v8 = vsel %vm9923_vm5, %v22747_v25, 0.0  ;;  %v9504_v36 = vpop.f32.mrb[51].mxu1  ;;  %v22264_v40 = vpop.f32.mrb[56].mxu0 }
 0x7cd   : > { %34751 = vst [vmem:[#allocation199_spill] sm:$0xff] %v30876_v49  ;;  %22841 = vmatmul.mubr.f32.gmra.mrb[96].mxu0 %v10377_v31  ;;  %v30883_v46 = vsub.f32 %v9970_v16, %v30876_v49  ;;  %v10406_v31 = vsub.f32 %v30860_v51, %v33878_v26  ;;  %v34755_v62 = vand.u32 4294901760, %v30854_v30  ;;  %v30892_v50 = vpop.permute.xlu1 %9853  ;;  %v30895_v16 = vand.u32 4294901760, %v9973_v8 }
 0x7ce   : > { %34752 = vst [vmem:[#allocation200_spill] sm:$0xff] %v30880_v3  ;;  %22843 = vmatprep.mubr.f32.mxu0 %v10387_v63  ;;  %v9972_v25 = vsel %vm9922_vm8, %v9504_v36, 0.0  ;;  %vm9925_vm9 = vcmp.eq.f32.partialorder %v22264_v40, %v30812_v18  ;;  %v6934_v63 = vpop.f32.mrb[57].mxu0  ;;  %v34760_v15 = vand.u32 4294901760, %v30880_v3  ;;  %vm15594_vm8 = vcmask 130048  }
 0x7cf   : > { %34753 = vst [vmem:[#allocation201_spill] sm:$0xff] %v30883_v46  ;;  %23559 = vmatmul.mubr.f32.gmra.mrb[106].mxu1 %v34754_v4  ;;  %v10416_v9 = vsub.f32 %v30854_v30, %v34755_v62  ;;  %34756 = vst [vmem:[#allocation202_spill] sm:$0xff] %v30895_v16  ;;  %v34757_v4 = vld [vmem:[#allocation105_spill] sm:$0xff]  ;;  %v30902_v51 = vand.u32 4294901760, %v9972_v25  ;;  %vm9924_vm4 = vcmp.eq.f32.partialorder %v6934_v63, %v30825_v38  ;;  %v10407_v62 = vand.u32 4294901760, %v10406_v31  ;;  %v9849_v30 = vpop.permute.xlu0 %9848  ;;  %v22750_v21 = vpop.f32.mrb[52].mxu1 }
 0x7d0   : > { %23561 = vmatprep.mubr.f32.mxu1 %v34757_v4  ;;  %v30906_v54 = vsub.f32 %v9973_v8, %v30895_v16  ;;  %v10436_v18 = vsub.f32 %v30880_v3, %v34760_v15  ;;  %v9975_v36 = vsel %vm9925_vm9, %v22750_v21, 0.0  ;;  %v9516_v40 = vpop.f32.mrb[53].mxu1  ;;  %v34762_v31 = vand.u32 4294901760, %v30883_v46 }
 0x7d1   : > { %34758 = vst [vmem:[#allocation203_spill] sm:$0xff] %v30902_v51  ;;  %22844 = vmatmul.mubr.f32.gmra.mrb[98].mxu0 %v10397_v52  ;;  %v30912_v43 = vsub.f32 %v9972_v25, %v30902_v51  ;;  %v22267_v52 = vpop.f32.mrb[58].mxu0  ;;  %v10417_v26 = vand.u32 4294901760, %v10416_v9  ;;  %v30919_v16 = vand.u32 4294901760, %v9975_v36  ;;  %v9974_v15 = vsel %vm9924_vm4, %v9516_v40, 0.0 }
 0x7d2   : > { %34759 = vst [vmem:[#allocation204_spill] sm:$0xff] %v30906_v54  ;;  %22846 = vmatprep.mubr.f32.mxu0 %v10407_v62  ;;  %v10426_v8 = vsub.f32 %v30883_v46, %v34762_v31  ;;  %vm9927_vm6 = vcmp.eq.f32.partialorder %v22267_v52, %v30851_v28  ;;  %v6946_v21 = vpop.f32.mrb[59].mxu0  ;;  %v30926_v62 = vand.u32 4294901760, %v9974_v15  ;;  %v9864_v31 = vpop.permute.xlu1 %9863  ;;  %v10437_v38 = vand.u32 4294901760, %v10436_v18 }
 0x7d3   : > { %34761 = vst [vmem:[#allocation205_spill] sm:$0xff] %v30912_v43  ;;  %23562 = vmatmul.mubr.f32.gmra.mrb[108].mxu1 %v30128_v14  ;;  %34763 = vst [vmem:[#allocation206_spill] sm:$0xff] %v30919_v16  ;;  %v33893_v25 = vand.u32 4294901760, %v30912_v43  ;;  %vm9926_vm7 = vcmp.eq.f32.partialorder %v6946_v21, %v30866_v47  ;;  %v30930_v4 = vsub.f32 %v9975_v36, %v30919_v16  ;;  %v22753_v14 = vpop.f32.mrb[54].mxu1  ;;  %vm18656_vm9 = vcmask 523264  }
 0x7d4   : > { %23564 = vmatprep.mubr.f32.mxu1 %v30133_v24  ;;  %34764 = vst [vmem:[#allocation207_spill] sm:$0xff] %v30926_v62  ;;  %v10427_v9 = vand.u32 4294901760, %v10426_v8  ;;  %v30933_v63 = vsub.f32 %v9974_v15, %v30926_v62  ;;  %v9977_v28 = vsel %vm9927_vm6, %v22753_v14, 0.0  ;;  %v9528_v40 = vpop.f32.mrb[55].mxu1  ;;  %v22270_v52 = vpop.f32.mrb[60].mxu0  ;;  %v34767_v8 = vand.u32 4294901760, %v30906_v54 }
 0x7d5   : > { %22847 = vmatmul.mubr.f32.gmra.mrb[100].mxu0 %v10417_v26  ;;  %34765 = vst [vmem:[#allocation208_spill] sm:$0xff] %v30930_v4  ;;  %v10446_v26 = vsub.f32 %v30912_v43, %v33893_v25  ;;  %v9859_v24 = vpop.permute.xlu0 %9858  ;;  %v30943_v3 = vand.u32 4294901760, %v9977_v28  ;;  %v9976_v14 = vsel %vm9926_vm7, %v9528_v40, 0.0  ;;  %vm9929_vm10 = vcmp.eq.f32.partialorder %v22270_v52, %v30892_v50  ;;  %v6958_v15 = vpop.f32.mrb[61].mxu0 }
 0x7d6   : > { %34766 = vst [vmem:[#allocation209_spill] sm:$0xff] %v30933_v63  ;;  %22849 = vmatprep.mubr.f32.mxu0 %v10427_v9  ;;  %v10456_v36 = vsub.f32 %v30906_v54, %v34767_v8  ;;  %v33906_v9 = vand.u32 4294901760, %v30933_v63  ;;  %v30950_v25 = vand.u32 4294901760, %v9976_v14  ;;  %vm9928_vm11 = vcmp.eq.f32.partialorder %v6958_v15, %v9849_v30 }
 0x7d7   : > { %23565 = vmatmul.mubr.f32.gmra.mrb[110].mxu1 %v30152_v13  ;;  %34768 = vst [vmem:[#allocation210_spill] sm:$0xff] %v30943_v3  ;;  %v10447_v8 = vand.u32 4294901760, %v10446_v26  ;;  %v30953_v13 = vsub.f32 %v9977_v28, %v30943_v3  ;;  %v22756_v18 = vpop.f32.mrb[56].mxu1  ;;  %v34771_v54 = vand.u32 4294901760, %v30930_v4  ;;  %v9874_v26 = vpop.permute.xlu1 %9873 }
 0x7d8   : > { %23567 = vmatprep.mubr.f32.mxu1 %v30158_v60  ;;  %34769 = vst [vmem:[#allocation211_spill] sm:$0xff] %v30950_v25  ;;  %v30959_v50 = vsub.f32 %v9976_v14, %v30950_v25  ;;  %v9979_v21 = vsel %vm9929_vm10, %v22756_v18, 0.0  ;;  %v9540_v40 = vpop.f32.mrb[57].mxu1  ;;  %v22273_v52 = vpop.f32.mrb[62].mxu0  ;;  %v10466_v28 = vsub.f32 %v30933_v63, %v33906_v9  ;;  %v34774_v18 = vld [vmem:[#allocation93_spill] sm:$0xff] }
 0x7d9   : > { %22850 = vmatmul.mubr.f32.gmra.mrb[102].mxu0 %v10437_v38  ;;  %34770 = vst [vmem:[#allocation212_spill] sm:$0xff] %v30953_v13  ;;  %v10476_v47 = vsub.f32 %v30930_v4, %v34771_v54  ;;  %v10457_v38 = vand.u32 4294901760, %v10456_v36  ;;  %v30966_v43 = vand.u32 4294901760, %v9979_v21  ;;  %v9978_v54 = vsel %vm9928_vm11, %v9540_v40, 0.0  ;;  %v6970_v14 = vpop.f32.mrb[63].mxu0  ;;  %v9869_v4 = vpop.permute.xlu0 %9868  ;;  %v34778_v40 = vld [vmem:[#allocation95_spill] sm:$0xff] }
 0x7da   : > { %34772 = vst [vmem:[#allocation213_spill] sm:$0xff] %v30959_v50  ;;  %22852 = vmatprep.mubr.f32.mxu0 %v10447_v8  ;;  %vm9931_vm12 = vcmp.eq.f32.partialorder %v22273_v52, %v9864_v31  ;;  %v33915_v8 = vand.u32 4294901760, %v30959_v50  ;;  %vm9930_vm13 = vcmp.eq.f32.partialorder %v6970_v14, %v9859_v24  ;;  %v10467_v36 = vand.u32 4294901760, %v10466_v28 }
 0x7db   : > { %23568 = vmatmul.mubr.f32.gmra.mrb[112].mxu1 %v30168_v1  ;;  %34773 = vst [vmem:[#allocation214_spill] sm:$0xff] %v30966_v43  ;;  %v30971_v1 = vand.u32 4294901760, %v9978_v54  ;;  %v30974_v9 = vsub.f32 %v9979_v21, %v30966_v43  ;;  %v22759_v60 = vpop.f32.mrb[58].mxu1  ;;  %v10477_v63 = vand.u32 4294901760, %v10476_v47  ;;  %v34779_v28 = vand.u32 4294901760, %v30953_v13  ;;  %v9884_v46 = vpop.permute.xlu1 %9883 }
 0x7dc   : > { %23576 = vmatprep.mubr.f32.mxu1 %v34774_v18  ;;  %v9981_v31 = vsel %vm9931_vm12, %v22759_v60, 0.0  ;;  %v9552_v15 = vpop.f32.mrb[59].mxu1  ;;  %v22276_v52 = vpop.f32.mrb[64].mxu0 }
 0x7dd   : > { %34775 = vst [vmem:[#allocation93_spill] sm:$0xff] %v30971_v1  ;;  %22853 = vmatmul.mubr.f32.gmra.mrb[104].mxu0 %v10457_v38  ;;  %34776 = vst [vmem:[#allocation215_spill] sm:$0xff] %v30974_v9  ;;  %v30977_v30 = vsub.f32 %v9978_v54, %v30971_v1  ;;  %v10486_v38 = vsub.f32 %v30959_v50, %v33915_v8  ;;  %v10496_v21 = vsub.f32 %v30953_v13, %v34779_v28  ;;  %v6982_v60 = vpop.f32.mrb[65].mxu0  ;;  %v34783_v8 = vld [vmem:[#allocation18_spill] sm:$0xff] }
 0x7de   : > { %22855 = vmatprep.mubr.f32.mxu0 %v10467_v36  ;;  %v30987_v47 = vand.u32 4294901760, %v9981_v31  ;;  %v9980_v54 = vsel %vm9930_vm13, %v9552_v15, 0.0  ;;  %vm9933_vm14 = vcmp.eq.f32.partialorder %v22276_v52, %v9874_v26  ;;  %v34781_v36 = vld [vmem:[#allocation13_spill] sm:$0xff]  ;;  %vm9932_vm15 = vcmp.eq.f32.partialorder %v6982_v60, %v9869_v4 }
 0x7df   : > { %34777 = vst [vmem:[#allocation216_spill] sm:$0xff] %v30977_v30  ;;  %23577 = vmatmul.mubr.f32.vlgmr.msra.gmra.mrb[64].mxu1 %v34778_v40  ;;  %v30993_v1 = vand.u32 4294901760, %v9980_v54  ;;  %v10487_v28 = vand.u32 4294901760, %v10486_v38  ;;  %v22762_v24 = vpop.f32.mrb[60].mxu1  ;;  %v34785_v14 = vand.u32 4294901760, %v30974_v9  ;;  %v34788_v38 = vand.u32 4294901760, %v30977_v30 }
 0x7e0   : > { %34780 = vst [vmem:[#allocation95_spill] sm:$0xff] %v30987_v47  ;;  %24767 = vmatpush3.bf16.msra.mxu1 %v34417_v48  ;;  %23579 = vmatprep.mubr.f32.mxu1 %v34781_v36  ;;  %v30997_v13 = vsub.f32 %v9981_v31, %v30987_v47  ;;  %v9983_v52 = vsel %vm9933_vm14, %v22762_v24, 0.0  ;;  %v9564_v43 = vpop.f32.mrb[61].mxu1  ;;  %v22279_v50 = vpop.f32.mrb[66].mxu0  ;;  %v10497_v48 = vand.u32 4294901760, %v10496_v21 }
 0x7e1   : > { %34782 = vst [vmem:[#allocation13_spill] sm:$0xff] %v30993_v1  ;;  %22856 = vmatmul.mubr.f32.gmra.mrb[106].mxu0 %v10477_v63  ;;  %23655 = vmatprep.subr.mxu1 %v34783_v8  ;;  %v10516_v26 = vsub.f32 %v30974_v9, %v34785_v14  ;;  %v31003_v15 = vsub.f32 %v9980_v54, %v30993_v1  ;;  %v34787_v63 = vld [vmem:[#allocation25_spill] sm:$0xff]  ;;  %v9879_v47 = vpop.permute.xlu0 %9878  ;;  %v31010_v25 = vand.u32 4294901760, %v9983_v52  ;;  %v9982_v14 = vsel %vm9932_vm15, %v9564_v43, 0.0  ;;  %v6994_v54 = vpop.f32.mrb[67].mxu0 }
 0x7e2   : > { %34784 = vst [vmem:[#allocation217_spill] sm:$0xff] %v30997_v13  ;;  %22858 = vmatprep.mubr.f32.mxu0 %v10487_v28  ;;  %v10506_v31 = vsub.f32 %v30977_v30, %v34788_v38  ;;  %vm9935_vm3 = vcmp.eq.f32.partialorder %v22279_v50, %v9884_v46  ;;  %v34790_v28 = vld [vmem:[#allocation20_spill] sm:$0xff]  ;;  %v31016_v21 = vand.u32 4294901760, %v9982_v14  ;;  %v34792_v9 = vld [vmem:[#allocation21_spill] sm:$0xff]  ;;  %vm9934_vm5 = vcmp.eq.f32.partialorder %v6994_v54, %v9879_v47  ;;  %v34795_v30 = vld [vmem:[#allocation14_spill] sm:$0xff] }
 0x7e3   : > { %34786 = vst [vmem:[#allocation218_spill] sm:$0xff] %v31003_v15  ;;  %23580 = vmatmul.mubr.f32.gmra.mrb[66].mxu1 %v34787_v63  ;;  %34789 = vst [vmem:[#allocation25_spill] sm:$0xff] %v31010_v25  ;;  %v33934_v24 = vand.u32 4294901760, %v31003_v15  ;;  %v31020_v3 = vsub.f32 %v9983_v52, %v31010_v25  ;;  %v22765_v4 = vpop.f32.mrb[62].mxu1  ;;  %v10517_v43 = vand.u32 4294901760, %v10516_v26  ;;  %v34796_v47 = vand.u32 4294901760, %v30997_v13 }
 0x7e4   : > { %23656 = vmatpush3.msra.mxu1 %v34783_v8  ;;  %23582 = vmatprep.mubr.f32.mxu1 %v34790_v28  ;;  %34791 = vst [vmem:[#allocation20_spill] sm:$0xff] %v31016_v21  ;;  %v10507_v38 = vand.u32 4294901760, %v10506_v31  ;;  %v31023_v60 = vsub.f32 %v9982_v14, %v31016_v21  ;;  %v9985_v46 = vsel %vm9935_vm3, %v22765_v4, 0.0  ;;  %v9576_v50 = vpop.f32.mrb[63].mxu1  ;;  %v34798_v14 = vld [vmem:[#allocation33_spill] sm:$0xff] }
 0x7e5   : > { %22859 = vmatmul.mubr.f32.gmra.mrb[108].mxu0 %v10497_v48  ;;  %24769 = vmatprep.subr.bf16.mxu1 %v34792_v9  ;;  %34793 = vst [vmem:[#allocation21_spill] sm:$0xff] %v31020_v3  ;;  %v10526_v48 = vsub.f32 %v31003_v15, %v33934_v24  ;;  %v10536_v31 = vsub.f32 %v30997_v13, %v34796_v47  ;;  %v31033_v54 = vand.u32 4294901760, %v9985_v46  ;;  %v9984_v26 = vsel %vm9934_vm5, %v9576_v50, 0.0  ;;  %v34802_v47 = vld [vmem:[#allocation37_spill] sm:$0xff] }
 0x7e6   : > { %34794 = vst [vmem:[#allocation219_spill] sm:$0xff] %v31023_v60  ;;  %22861 = vmatprep.mubr.f32.mxu0 %v10507_v38  ;;  %v33939_v4 = vand.u32 4294901760, %v31023_v60  ;;  %v31037_v38 = vand.u32 4294901760, %v9984_v26  ;;  %v34803_v13 = vand.u32 4294901760, %v31020_v3 }
 0x7e7   : > { %23583 = vmatmul.mubr.f32.gmra.mrb[68].mxu1 %v34795_v30  ;;  %34797 = vst [vmem:[#allocation14_spill] sm:$0xff] %v31033_v54  ;;  %v10527_v8 = vand.u32 4294901760, %v10526_v48  ;;  %v31040_v25 = vsub.f32 %v9985_v46, %v31033_v54  ;;  %v10537_v52 = vand.u32 4294901760, %v10536_v31  ;;  %v34804_v48 = vld [vmem:[#allocation38_spill] sm:$0xff]  ;;  %v34807_v54 = vld [vmem:[#allocation51_spill] sm:$0xff] }
 0x7e8   : > { %23585 = vmatprep.mubr.f32.mxu1 %v34798_v14  ;;  %34799 = vst [vmem:[#allocation33_spill] sm:$0xff] %v31037_v38  ;;  %v31043_v24 = vsub.f32 %v9984_v26, %v31037_v38  ;;  %v10546_v50 = vsub.f32 %v31023_v60, %v33939_v4  ;;  %v10556_v15 = vsub.f32 %v31020_v3, %v34803_v13  ;;  %v34806_v3 = vld [vmem:[#allocation47_spill] sm:$0xff] }
 0x7e9   : > { %22862 = vmatmul.mubr.f32.gmra.mrb[110].mxu0 %v10517_v43  ;;  %34800 = vst [vmem:[#allocation220_spill] sm:$0xff] %v31040_v25  ;;  %v33947_v43 = vand.u32 4294901760, %v31040_v25 }
 0x7ea   : > { %34801 = vst [vmem:[#allocation221_spill] sm:$0xff] %v31043_v24  ;;  %22864 = vmatprep.mubr.f32.mxu0 %v10527_v8  ;;  %v33946_v46 = vand.u32 4294901760, %v31043_v24  ;;  %v10547_v26 = vand.u32 4294901760, %v10546_v50  ;;  %v34805_v8 = vld [vmem:[#allocation45_spill] sm:$0xff]  ;;  %v10557_v31 = vand.u32 4294901760, %v10556_v15  ;;  %v34809_v15 = vld [vmem:[#allocation59_spill] sm:$0xff] }
 0x7eb   : > { %23586 = vmatmul.mubr.f32.gmra.mrb[70].mxu1 %v34802_v47  ;;  %v10576_v13 = vsub.f32 %v31040_v25, %v33947_v43  ;;  %v34808_v50 = vld [vmem:[#allocation57_spill] sm:$0xff]  ;;  %v34862_v25 = vld [vmem:[#allocation110_spill] sm:$0xff] }
 0x7ec   : > { %23588 = vmatprep.mubr.f32.mxu1 %v34804_v48  ;;  %v10566_v4 = vsub.f32 %v31043_v24, %v33946_v46  ;;  %v34810_v46 = vld [vmem:[#allocation63_spill] sm:$0xff] }
 0x7ed   : > { %22865 = vmatmul.mubr.f32.gmra.mrb[112].mxu0 %v10537_v52  ;;  %v10577_v52 = vand.u32 4294901760, %v10576_v13  ;;  %v34813_v13 = vld [vmem:[#allocation77_spill] sm:$0xff] }
 0x7ee   : > { %22867 = vmatprep.mubr.f32.mxu0 %v10547_v26  ;;  %v10567_v60 = vand.u32 4294901760, %v10566_v4  ;;  %v24628_v26 = vpack.c.bf16 %v30225_v59, %v30218_v22  ;;  %v24632_v4 = vpack.c.bf16 %v30235_v44, %v30230_v17  ;;  %v34852_v44 = vld [vmem:[#allocation96_spill] sm:$0xff]  ;;  %v34855_v17 = vld [vmem:[#allocation191_spill] sm:$0xff] }
 0x7ef   : > { %23589 = vmatmul.mubr.f32.gmra.mrb[72].mxu1 %v34805_v8  ;;  %v34856_v59 = vld [vmem:[#allocation107_spill] sm:$0xff] }
 0x7f0   : > { %23591 = vmatprep.mubr.f32.mxu1 %v34806_v3  ;;  %v34859_v22 = vld [vmem:[#allocation119_spill] sm:$0xff] }
 0x7f1   : > { %22868 = vmatmul.mubr.f32.gmra.mrb[114].mxu0 %v10557_v31  ;;  %v34812_v31 = vld [vmem:[#allocation75_spill] sm:$0xff] }
 0x7f2   : > { %22870 = vmatprep.mubr.f32.mxu0 %v10567_v60  ;;  %v34811_v60 = vld [vmem:[#allocation67_spill] sm:$0xff] }
 0x7f3   : > { %23592 = vmatmul.mubr.f32.gmra.mrb[74].mxu1 %v34807_v54 }
 0x7f4   : > { %23594 = vmatprep.mubr.f32.mxu1 %v34808_v50 }
 0x7f5   : > { %22871 = vmatmul.mubr.f32.gmra.mrb[116].mxu0 %v10577_v52  ;;  %v34814_v52 = vld [vmem:[#allocation9_spill] sm:$0xff] }
 0x7f6   : > { %22905 = vmatprep.mubr.f32.mxu0 %v30342_v7  ;;  %v24636_v43 = vpack.c.bf16 %v34814_v52, %v30240_v35  ;;  %v34820_v7 = vld [vmem:[#allocation100_spill] sm:$0xff]  ;;  %v34822_v52 = vld [vmem:[#allocation126_spill] sm:$0xff] }
 0x7f7   : > { %23595 = vmatmul.mubr.f32.gmra.mrb[76].mxu1 %v34809_v15  ;;  %v34849_v35 = vld [vmem:[#allocation82_spill] sm:$0xff] }
 0x7f8   : > { %23597 = vmatprep.mubr.f32.mxu1 %v34810_v46 }
 0x7f9   : > { %22906 = vmatmul.mubr.f32.vlgmr.msra.gmra.mrb[68].mxu0 %v30334_v61  ;;  %v34818_v61 = vld [vmem:[#allocation124_spill] sm:$0xff] }
 0x7fa   : > { %22908 = vmatprep.mubr.f32.mxu0 %v30380_v33  ;;  %24627 = vmatpush3.bf16.msra.mxu0 %v30750_v0  ;;  %v34815_v0 = vld [vmem:[#allocation78_spill] sm:$0xff]  ;;  %v34816_v33 = vld [vmem:[#allocation92_spill] sm:$0xff] }
 0x7fb   : > { %23598 = vmatmul.mubr.f32.gmra.mrb[78].mxu1 %v34811_v60  ;;  %24629 = vmatprep.subr.bf16.mxu0 %v24628_v26 }
 0x7fc   : > { %23600 = vmatprep.mubr.f32.mxu1 %v34812_v31 }
 0x7fd   : > { %22909 = vmatmul.mubr.f32.gmra.mrb[70].mxu0 %v30373_v2  ;;  %v34817_v2 = vld [vmem:[#allocation123_spill] sm:$0xff] }
 0x7fe   : > { %22911 = vmatprep.mubr.f32.mxu0 %v30426_v20  ;;  %24631 = vmatpush3.bf16.msra.mxu0 %v24628_v26  ;;  %v24640_v20 = vpack.c.bf16 %v34818_v61, %v34817_v2  ;;  %v34819_v26 = vld [vmem:[#allocation97_spill] sm:$0xff]  ;;  %v34824_v61 = vld [vmem:[#allocation115_spill] sm:$0xff]  ;;  %v34826_v2 = vld [vmem:[#allocation128_spill] sm:$0xff] }
 0x7ff   : > { %23601 = vmatmul.mubr.f32.gmra.mrb[80].mxu1 %v34813_v13  ;;  %24633 = vmatprep.subr.bf16.mxu0 %v24632_v4 }
 0x800   : > { %23603 = vmatprep.mubr.f32.mxu1 %v34815_v0 }
 0x801   : > { %22912 = vmatmul.mubr.f32.gmra.mrb[72].mxu0 %v30413_v37  ;;  %v34821_v37 = vld [vmem:[#allocation125_spill] sm:$0xff] }
 0x802   : > { %22914 = vmatprep.mubr.f32.mxu0 %v30460_v10  ;;  %24635 = vmatpush3.bf16.msra.mxu0 %v24632_v4  ;;  %v24644_v10 = vpack.c.bf16 %v34822_v52, %v34821_v37  ;;  %v34823_v4 = vld [vmem:[#allocation109_spill] sm:$0xff]  ;;  %v34828_v52 = vld [vmem:[#allocation32_spill] sm:$0xff]  ;;  %v34831_v37 = vld [vmem:[#allocation154_spill] sm:$0xff] }
 0x803   : > { %23604 = vmatmul.mubr.f32.gmra.mrb[82].mxu1 %v34816_v33  ;;  %24637 = vmatprep.subr.bf16.mxu0 %v24636_v43 }
 0x804   : > { %23606 = vmatprep.mubr.f32.mxu1 %v34819_v26 }
 0x805   : > { %22915 = vmatmul.mubr.f32.gmra.mrb[74].mxu0 %v30453_v42  ;;  %v34825_v42 = vld [vmem:[#allocation127_spill] sm:$0xff] }
 0x806   : > { %22917 = vmatprep.mubr.f32.mxu0 %v30493_v11  ;;  %24639 = vmatpush3.bf16.msra.mxu0 %v24636_v43  ;;  %v24648_v11 = vpack.c.bf16 %v34826_v2, %v34825_v42  ;;  %v34827_v43 = vld [vmem:[#allocation24_spill] sm:$0xff]  ;;  %v34832_v2 = vld [vmem:[#allocation27_spill] sm:$0xff] }
 0x807   : > { %23607 = vmatmul.mubr.f32.gmra.mrb[84].mxu1 %v34820_v7  ;;  %24641 = vmatprep.subr.bf16.mxu0 %v24640_v20  ;;  %v34848_v42 = vld [vmem:[#allocation183_spill] sm:$0xff] }
 0x808   : > { %23609 = vmatprep.mubr.f32.mxu1 %v34823_v4 }
 0x809   : > { %22918 = vmatmul.mubr.f32.gmra.mrb[76].mxu0 %v30485_v6  ;;  %v34829_v6 = vld [vmem:[#allocation138_spill] sm:$0xff] }
 0x80a   : > { %22920 = vmatprep.mubr.f32.mxu0 %v30527_v29  ;;  %24643 = vmatpush3.bf16.msra.mxu0 %v24640_v20  ;;  %v24652_v29 = vpack.c.bf16 %v30441_v27, %v34829_v6  ;;  %v34830_v20 = vld [vmem:[#allocation34_spill] sm:$0xff]  ;;  %v34836_v27 = vld [vmem:[#allocation40_spill] sm:$0xff]  ;;  %v34845_v6 = vld [vmem:[#allocation73_spill] sm:$0xff] }
 0x80b   : > { %23610 = vmatmul.mubr.f32.gmra.mrb[86].mxu1 %v34824_v61  ;;  %24645 = vmatprep.subr.bf16.mxu0 %v24644_v10 }
 0x80c   : > { %23612 = vmatprep.mubr.f32.mxu1 %v34827_v43 }
 0x80d   : > { %22921 = vmatmul.mubr.f32.gmra.mrb[78].mxu0 %v30519_v41  ;;  %v34833_v41 = vld [vmem:[#allocation28_spill] sm:$0xff] }
 0x80e   : > { %22923 = vmatprep.mubr.f32.mxu0 %v30560_v23  ;;  %24647 = vmatpush3.bf16.msra.mxu0 %v24644_v10  ;;  %v34834_v10 = vld [vmem:[#allocation35_spill] sm:$0xff] }
 0x80f   : > { %23613 = vmatmul.mubr.f32.gmra.mrb[88].mxu1 %v34828_v52  ;;  %24649 = vmatprep.subr.bf16.mxu0 %v24648_v11  ;;  %v34835_v23 = vld [vmem:[#allocation71_spill] sm:$0xff] }
 0x810   : > { %23615 = vmatprep.mubr.f32.mxu1 %v34830_v20 }
 0x811   : > { %22924 = vmatmul.mubr.f32.gmra.mrb[80].mxu0 %v34831_v37  ;;  %v34842_v37 = vld [vmem:[#allocation58_spill] sm:$0xff] }
 0x812   : > { %22926 = vmatprep.mubr.f32.mxu0 %v30596_v39  ;;  %24651 = vmatpush3.bf16.msra.mxu0 %v24648_v11  ;;  %v34837_v11 = vld [vmem:[#allocation44_spill] sm:$0xff]  ;;  %v34838_v39 = vld [vmem:[#allocation46_spill] sm:$0xff] }
 0x813   : > { %23616 = vmatmul.mubr.f32.gmra.mrb[90].mxu1 %v34832_v2  ;;  %24653 = vmatprep.subr.bf16.mxu0 %v24652_v29 }
 0x814   : > { %23618 = vmatprep.mubr.f32.mxu1 %v34833_v41 }
 0x815   : > { %22927 = vmatmul.mubr.f32.gmra.mrb[82].mxu0 %v30588_v56  ;;  %v34841_v56 = vld [vmem:[#allocation175_spill] sm:$0xff] }
 0x816   : > { %22929 = vmatprep.mubr.f32.mxu0 %v30628_v12  ;;  %24655 = vmatpush3.bf16.msra.mxu0 %v24652_v29  ;;  %v34839_v12 = vld [vmem:[#allocation50_spill] sm:$0xff] }
 0x817   : > { %23619 = vmatmul.mubr.f32.gmra.mrb[92].mxu1 %v34834_v10  ;;  %24657 = vmatprep.subr.bf16.mxu0 %v34835_v23  ;;  %v34840_v29 = vld [vmem:[#allocation54_spill] sm:$0xff] }
 0x818   : > { %23621 = vmatprep.mubr.f32.mxu1 %v34836_v27 }
 0x819   : > { %22930 = vmatmul.mubr.f32.gmra.mrb[84].mxu0 %v30620_v55  ;;  %v34843_v55 = vld [vmem:[#allocation60_spill] sm:$0xff] }
 0x81a   : > { %22932 = vmatprep.mubr.f32.mxu0 %v30656_v32  ;;  %v34844_v32 = vld [vmem:[#allocation174_spill] sm:$0xff] }
 0x81b   : > { %23622 = vmatmul.mubr.f32.gmra.mrb[94].mxu1 %v34837_v11 }
 0x81c   : > { %23624 = vmatprep.mubr.f32.mxu1 %v34838_v39 }
 0x81d   : > { %22933 = vmatmul.mubr.f32.gmra.mrb[86].mxu0 %v30648_v34  ;;  %v34846_v34 = vld [vmem:[#allocation74_spill] sm:$0xff] }
 0x81e   : > { %22935 = vmatprep.mubr.f32.mxu0 %v30683_v57  ;;  %v34847_v57 = vld [vmem:[#allocation178_spill] sm:$0xff] }
 0x81f   : > { %23625 = vmatmul.mubr.f32.gmra.mrb[96].mxu1 %v34839_v12 }
 0x820   : > { %23627 = vmatprep.mubr.f32.mxu1 %v34840_v29 }
 0x821   : > { %22936 = vmatmul.mubr.f32.gmra.mrb[88].mxu0 %v30676_v5  ;;  %v34850_v5 = vld [vmem:[#allocation83_spill] sm:$0xff] }
 0x822   : > { %22938 = vmatprep.mubr.f32.mxu0 %v34841_v56  ;;  %v34851_v56 = vld [vmem:[#allocation182_spill] sm:$0xff] }
 0x823   : > { %23628 = vmatmul.mubr.f32.gmra.mrb[98].mxu1 %v34842_v37 }
 0x824   : > { %23630 = vmatprep.mubr.f32.mxu1 %v34843_v55 }
 0x825   : > { %22939 = vmatmul.mubr.f32.gmra.mrb[90].mxu0 %v34844_v32  ;;  %v34853_v32 = vld [vmem:[#allocation98_spill] sm:$0xff] }
 0x826   : > { %22941 = vmatprep.mubr.f32.mxu0 %v30737_v58  ;;  %v34854_v58 = vld [vmem:[#allocation186_spill] sm:$0xff] }
 0x827   : > { %23631 = vmatmul.mubr.f32.gmra.mrb[100].mxu1 %v34845_v6 }
 0x828   : > { %23633 = vmatprep.mubr.f32.mxu1 %v34846_v34 }
 0x829   : > { %22942 = vmatmul.mubr.f32.gmra.mrb[92].mxu0 %v34847_v57  ;;  %v34857_v57 = vld [vmem:[#allocation113_spill] sm:$0xff] }
 0x82a   : > { %22944 = vmatprep.mubr.f32.mxu0 %v34848_v42  ;;  %v34858_v42 = vld [vmem:[#allocation190_spill] sm:$0xff] }
 0x82b   : > { %23634 = vmatmul.mubr.f32.gmra.mrb[102].mxu1 %v34849_v35 }
 0x82c   : > { %23636 = vmatprep.mubr.f32.mxu1 %v34850_v5 }
 0x82d   : > { %22945 = vmatmul.mubr.f32.gmra.mrb[94].mxu0 %v34851_v56  ;;  %v34860_v56 = vld [vmem:[#allocation102_spill] sm:$0xff] }
 0x82e   : > { %22947 = vmatprep.mubr.f32.mxu0 %v30796_v19  ;;  %v34861_v19 = vld [vmem:[#allocation194_spill] sm:$0xff] }
 0x82f   : > { %23637 = vmatmul.mubr.f32.gmra.mrb[104].mxu1 %v34852_v44 }
 0x830   : > { %23639 = vmatprep.mubr.f32.mxu1 %v34853_v32 }
 0x831   : > { %22948 = vmatmul.mubr.f32.gmra.mrb[96].mxu0 %v34854_v58  ;;  %v34863_v58 = vld [vmem:[#allocation114_spill] sm:$0xff] }
 0x832   : > { %22950 = vmatprep.mubr.f32.mxu0 %v34855_v17  ;;  %v34864_v17 = vld [vmem:[#allocation116_spill] sm:$0xff] }
 0x833   : > { %23640 = vmatmul.mubr.f32.gmra.mrb[106].mxu1 %v34856_v59 }
 0x834   : > { %23642 = vmatprep.mubr.f32.mxu1 %v34857_v57 }
 0x835   : > { %22951 = vmatmul.mubr.f32.gmra.mrb[98].mxu0 %v34858_v42  ;;  %v34866_v42 = vld [vmem:[#allocation202_spill] sm:$0xff] }
 0x836   : > { %22953 = vmatprep.mubr.f32.mxu0 %v30848_v45  ;;  %v34865_v45 = vand.u32 4294901760, %v34774_v18  ;;  %v34872_v18 = vand.u32 4294901760, %v34790_v28  ;;  %v34881_v28 = vld [vmem:[#allocation95_spill] sm:$0xff] }
 0x837   : > { %23643 = vmatmul.mubr.f32.gmra.mrb[108].mxu1 %v34859_v22 }
 0x838   : > { %23645 = vmatprep.mubr.f32.mxu1 %v34860_v56 }
 0x839   : > { %22954 = vmatmul.mubr.f32.gmra.mrb[100].mxu0 %v34861_v19  ;;  %v34867_v19 = vand.u32 4294901760, %v34778_v40  ;;  %v34875_v40 = vld [vmem:[#allocation93_spill] sm:$0xff] }
 0x83a   : > { %22956 = vmatprep.mubr.f32.mxu0 %v30876_v49  ;;  %v34868_v49 = vand.u32 4294901760, %v34781_v36  ;;  %v34877_v36 = vand.u32 4294901760, %v34798_v14  ;;  %v34883_v14 = vand.u32 4294901760, %v34806_v3  ;;  %v34890_v3 = vand.u32 4294901760, %v34810_v46 }
 0x83b   : > { %23646 = vmatmul.mubr.f32.gmra.mrb[110].mxu1 %v34862_v25  ;;  %v34898_v46 = vand.u32 4294901760, %v34813_v13  ;;  %v34906_v13 = vld [vmem:[#allocation145_spill] sm:$0xff] }
 0x83c   : > { %23648 = vmatprep.mubr.f32.mxu1 %v34863_v58 }
 0x83d   : > { %22957 = vmatmul.mubr.f32.gmra.mrb[102].mxu0 %v30869_v53  ;;  %v34870_v53 = vld [vmem:[#allocation211_spill] sm:$0xff] }
 0x83e   : > { %22959 = vmatprep.mubr.f32.mxu0 %v30902_v51  ;;  %v34869_v51 = vld [vmem:[#allocation16_spill] sm:$0xff] }
 0x83f   : > { %23649 = vmatmul.mubr.f32.gmra.mrb[112].mxu1 %v34864_v17 }
 0x840   : > { %23657 = vmatprep.mubr.f32.mxu1 %v34865_v45  ;;  %v34871_v45 = vand.u32 4294901760, %v34787_v63  ;;  %v34880_v63 = vand.u32 4294901760, %v34804_v48  ;;  %v34886_v48 = vand.u32 4294901760, %v34808_v50  ;;  %v34894_v50 = vld [vmem:[#allocation72_spill] sm:$0xff] }
 0x841   : > { %22960 = vmatmul.mubr.f32.gmra.mrb[104].mxu0 %v34866_v42  ;;  %v34989_v42 = vld [vmem:[#allocation15_spill] sm:$0xff] }
 0x842   : > { %22962 = vmatprep.mubr.f32.mxu0 %v30926_v62  ;;  %v34988_v62 = vld [vmem:[#allocation218_spill] sm:$0xff] }
 0x843   : > { %23658 = vmatmul.mubr.f32.vlgmr.msra.gmra.mrb[64].mxu1 %v34867_v19  ;;  %v34873_v19 = vld [vmem:[#allocation210_spill] sm:$0xff] }
 0x844   : > { %24771 = vmatpush3.bf16.msra.mxu1 %v34792_v9  ;;  %23660 = vmatprep.mubr.f32.mxu1 %v34868_v49  ;;  %v34874_v9 = vld [vmem:[#allocation7_spill] sm:$0xff]  ;;  %v34876_v49 = vand.u32 4294901760, %v34795_v30  ;;  %v34882_v30 = vand.u32 4294901760, %v34805_v8  ;;  %v34889_v8 = vand.u32 4294901760, %v34809_v15  ;;  %v34897_v15 = vld [vmem:[#allocation142_spill] sm:$0xff] }
 0x845   : > { %22963 = vmatmul.mubr.f32.gmra.mrb[106].mxu0 %v30919_v16  ;;  %23736 = vmatprep.subr.mxu1 %v34869_v51  ;;  %v34987_v16 = vld [vmem:[#allocation215_spill] sm:$0xff] }
 0x846   : > { %22965 = vmatprep.mubr.f32.mxu0 %v34870_v53  ;;  %v34878_v53 = vld [vmem:[#allocation214_spill] sm:$0xff] }
 0x847   : > { %23661 = vmatmul.mubr.f32.gmra.mrb[66].mxu1 %v34871_v45  ;;  %v34884_v45 = vld [vmem:[#allocation25_spill] sm:$0xff] }
 0x848   : > { %23737 = vmatpush3.msra.mxu1 %v34869_v51  ;;  %23663 = vmatprep.mubr.f32.mxu1 %v34872_v18  ;;  %v34879_v51 = vand.u32 4294901760, %v34802_v47  ;;  %v34885_v47 = vand.u32 4294901760, %v34807_v54  ;;  %v34887_v18 = vld [vmem:[#allocation14_spill] sm:$0xff]  ;;  %v34893_v54 = vand.u32 4294901760, %v34811_v60  ;;  %v34901_v60 = vld [vmem:[#allocation140_spill] sm:$0xff] }
 0x849   : > { %22966 = vmatmul.mubr.f32.gmra.mrb[108].mxu0 %v34873_v19  ;;  %24773 = vmatprep.subr.bf16.mxu1 %v34874_v9  ;;  %v34985_v19 = vld [vmem:[#allocation29_spill] sm:$0xff] }
 0x84a   : > { %22968 = vmatprep.mubr.f32.mxu0 %v34875_v40  ;;  %v34984_v40 = vld [vmem:[#allocation216_spill] sm:$0xff] }
 0x84b   : > { %23664 = vmatmul.mubr.f32.gmra.mrb[68].mxu1 %v34876_v49  ;;  %v34888_v49 = vld [vmem:[#allocation132_spill] sm:$0xff] }
 0x84c   : > { %23666 = vmatprep.mubr.f32.mxu1 %v34877_v36  ;;  %v34891_v36 = vld [vmem:[#allocation131_spill] sm:$0xff] }
 0x84d   : > { %22969 = vmatmul.mubr.f32.gmra.mrb[110].mxu0 %v34878_v53  ;;  %v34941_v53 = vand.u32 4294901760, %v34840_v29  ;;  %v34950_v29 = vld [vmem:[#allocation180_spill] sm:$0xff] }
 0x84e   : > { %22971 = vmatprep.mubr.f32.mxu0 %v30993_v1 }
 0x84f   : > { %23667 = vmatmul.mubr.f32.gmra.mrb[70].mxu1 %v34879_v51  ;;  %v34892_v51 = vld [vmem:[#allocation136_spill] sm:$0xff] }
 0x850   : > { %23669 = vmatprep.mubr.f32.mxu1 %v34880_v63  ;;  %v34895_v63 = vand.u32 4294901760, %v34812_v31  ;;  %v34903_v31 = vand.u32 4294901760, %v34816_v33  ;;  %v34911_v33 = vld [vmem:[#allocation148_spill] sm:$0xff] }
 0x851   : > { %22972 = vmatmul.mubr.f32.gmra.mrb[112].mxu0 %v34881_v28  ;;  %v34936_v28 = vld [vmem:[#allocation76_spill] sm:$0xff] }
 0x852   : > { %22974 = vmatprep.mubr.f32.mxu0 %v31016_v21  ;;  %v34935_v21 = vld [vmem:[#allocation173_spill] sm:$0xff] }
 0x853   : > { %23670 = vmatmul.mubr.f32.gmra.mrb[72].mxu1 %v34882_v30  ;;  %v34896_v30 = vld [vmem:[#allocation135_spill] sm:$0xff] }
 0x854   : > { %23672 = vmatprep.mubr.f32.mxu1 %v34883_v14  ;;  %v34899_v14 = vld [vmem:[#allocation79_spill] sm:$0xff] }
 0x855   : > { %22975 = vmatmul.mubr.f32.gmra.mrb[114].mxu0 %v34884_v45  ;;  %v34930_v45 = vld [vmem:[#allocation164_spill] sm:$0xff] }
 0x856   : > { %22977 = vmatprep.mubr.f32.mxu0 %v31037_v38  ;;  %v34925_v38 = vand.u32 4294901760, %v34833_v41  ;;  %v34933_v41 = vand.u32 4294901760, %v34838_v39  ;;  %v34942_v39 = vld [vmem:[#allocation172_spill] sm:$0xff] }
 0x857   : > { %23673 = vmatmul.mubr.f32.gmra.mrb[74].mxu1 %v34885_v47  ;;  %v34900_v47 = vand.u32 4294901760, %v34815_v0  ;;  %v34908_v0 = vand.u32 4294901760, %v34820_v7  ;;  %v34916_v7 = vld [vmem:[#allocation152_spill] sm:$0xff] }
 0x858   : > { %23675 = vmatprep.mubr.f32.mxu1 %v34886_v48  ;;  %v34902_v48 = vld [vmem:[#allocation106_spill] sm:$0xff] }
 0x859   : > { %22978 = vmatmul.mubr.f32.gmra.mrb[116].mxu0 %v34887_v18  ;;  %v34920_v18 = vand.u32 4294901760, %v34830_v20  ;;  %v34928_v20 = vand.u32 4294901760, %v34834_v10  ;;  %v34937_v10 = vand.u32 4294901760, %v34936_v28  ;;  %v34945_v28 = vand.u32 4294901760, %v34843_v55 }
 0x85a   : > { %23012 = vmatprep.mubr.f32.mxu0 %v34888_v49  ;;  %v34953_v55 = vand.u32 4294901760, %v34850_v5  ;;  %v34961_v5 = vand.u32 4294901760, %v34857_v57  ;;  %v34969_v57 = vand.u32 4294901760, %v34863_v58  ;;  %v34978_v58 = vld [vmem:[#allocation208_spill] sm:$0xff] }
 0x85b   : > { %23676 = vmatmul.mubr.f32.gmra.mrb[76].mxu1 %v34889_v8  ;;  %v34904_v8 = vld [vmem:[#allocation81_spill] sm:$0xff] }
 0x85c   : > { %23678 = vmatprep.mubr.f32.mxu1 %v34890_v3  ;;  %v34905_v3 = vand.u32 4294901760, %v34819_v26  ;;  %v34913_v26 = vand.u32 4294901760, %v34824_v61  ;;  %v34921_v61 = vld [vmem:[#allocation156_spill] sm:$0xff] }
 0x85d   : > { %23013 = vmatmul.mubr.f32.vlgmr.msra.gmra.mrb[68].mxu0 %v34891_v36 }
 0x85e   : > { %23015 = vmatprep.mubr.f32.mxu0 %v34892_v51  ;;  %24659 = vmatpush3.bf16.msra.mxu0 %v34835_v23 }
 0x85f   : > { %23679 = vmatmul.mubr.f32.gmra.mrb[78].mxu1 %v34893_v54  ;;  %24661 = vmatprep.subr.bf16.mxu0 %v34894_v50  ;;  %v34907_v54 = vld [vmem:[#allocation149_spill] sm:$0xff] }
 0x860   : > { %23681 = vmatprep.mubr.f32.mxu1 %v34895_v63  ;;  %v34909_v63 = vld [vmem:[#allocation90_spill] sm:$0xff] }
 0x861   : > { %23016 = vmatmul.mubr.f32.gmra.mrb[70].mxu0 %v34896_v30 }
 0x862   : > { %23018 = vmatprep.mubr.f32.mxu0 %v34897_v15  ;;  %24663 = vmatpush3.bf16.msra.mxu0 %v34894_v50  ;;  %v34997_v50 = vld [vmem:[#allocation48_spill] sm:$0xff] }
 0x863   : > { %23682 = vmatmul.mubr.f32.gmra.mrb[80].mxu1 %v34898_v46  ;;  %24665 = vmatprep.subr.bf16.mxu0 %v34899_v14  ;;  %v34910_v46 = vand.u32 4294901760, %v34823_v4  ;;  %v34918_v4 = vand.u32 4294901760, %v34828_v52  ;;  %v34926_v52 = vld [vmem:[#allocation160_spill] sm:$0xff] }
 0x864   : > { %23684 = vmatprep.mubr.f32.mxu1 %v34900_v47  ;;  %v34912_v47 = vld [vmem:[#allocation153_spill] sm:$0xff] }
 0x865   : > { %23019 = vmatmul.mubr.f32.gmra.mrb[72].mxu0 %v34901_v60 }
 0x866   : > { %23021 = vmatprep.mubr.f32.mxu0 %v34902_v48  ;;  %24667 = vmatpush3.bf16.msra.mxu0 %v34899_v14  ;;  %v34996_v14 = vld [vmem:[#allocation42_spill] sm:$0xff] }
 0x867   : > { %23685 = vmatmul.mubr.f32.gmra.mrb[82].mxu1 %v34903_v31  ;;  %24669 = vmatprep.subr.bf16.mxu0 %v34904_v8  ;;  %v34914_v31 = vld [vmem:[#allocation23_spill] sm:$0xff] }
 0x868   : > { %23687 = vmatprep.mubr.f32.mxu1 %v34905_v3  ;;  %v34915_v3 = vand.u32 4294901760, %v34827_v43  ;;  %v34923_v43 = vand.u32 4294901760, %v34832_v2  ;;  %v34931_v2 = vld [vmem:[#allocation169_spill] sm:$0xff] }
 0x869   : > { %23022 = vmatmul.mubr.f32.gmra.mrb[74].mxu0 %v34906_v13 }
 0x86a   : > { %23024 = vmatprep.mubr.f32.mxu0 %v34907_v54  ;;  %24671 = vmatpush3.bf16.msra.mxu0 %v34904_v8  ;;  %v34995_v8 = vld [vmem:[#allocation21_spill] sm:$0xff] }
 0x86b   : > { %23688 = vmatmul.mubr.f32.gmra.mrb[84].mxu1 %v34908_v0  ;;  %24673 = vmatprep.subr.bf16.mxu0 %v34909_v63  ;;  %v34917_v0 = vld [vmem:[#allocation157_spill] sm:$0xff] }
 0x86c   : > { %23690 = vmatprep.mubr.f32.mxu1 %v34910_v46  ;;  %v34919_v46 = vld [vmem:[#allocation12_spill] sm:$0xff] }
 0x86d   : > { %23025 = vmatmul.mubr.f32.gmra.mrb[76].mxu0 %v34911_v33 }
 0x86e   : > { %23027 = vmatprep.mubr.f32.mxu0 %v34912_v47  ;;  %24675 = vmatpush3.bf16.msra.mxu0 %v34909_v63  ;;  %v34994_v63 = vld [vmem:[#allocation41_spill] sm:$0xff] }
 0x86f   : > { %23691 = vmatmul.mubr.f32.gmra.mrb[86].mxu1 %v34913_v26  ;;  %24677 = vmatprep.subr.bf16.mxu0 %v34914_v31  ;;  %v34922_v26 = vld [vmem:[#allocation161_spill] sm:$0xff] }
 0x870   : > { %23693 = vmatprep.mubr.f32.mxu1 %v34915_v3  ;;  %v34924_v3 = vld [vmem:[#allocation31_spill] sm:$0xff] }
 0x871   : > { %23028 = vmatmul.mubr.f32.gmra.mrb[78].mxu0 %v34916_v7 }
 0x872   : > { %23030 = vmatprep.mubr.f32.mxu0 %v34917_v0  ;;  %24679 = vmatpush3.bf16.msra.mxu0 %v34914_v31  ;;  %v34993_v31 = vld [vmem:[#allocation39_spill] sm:$0xff] }
 0x873   : > { %23694 = vmatmul.mubr.f32.gmra.mrb[88].mxu1 %v34918_v4  ;;  %24681 = vmatprep.subr.bf16.mxu0 %v34919_v46  ;;  %v34927_v4 = vld [vmem:[#allocation165_spill] sm:$0xff] }
 0x874   : > { %23696 = vmatprep.mubr.f32.mxu1 %v34920_v18  ;;  %v34929_v18 = vand.u32 4294901760, %v34836_v27 }
 0x875   : > { %23031 = vmatmul.mubr.f32.gmra.mrb[80].mxu0 %v34921_v61 }
 0x876   : > { %23033 = vmatprep.mubr.f32.mxu0 %v34922_v26  ;;  %24683 = vmatpush3.bf16.msra.mxu0 %v34919_v46  ;;  %v34991_v46 = vld [vmem:[#allocation217_spill] sm:$0xff] }
 0x877   : > { %23697 = vmatmul.mubr.f32.gmra.mrb[90].mxu1 %v34923_v43  ;;  %24685 = vmatprep.subr.bf16.mxu0 %v34924_v3  ;;  %v34932_v43 = vand.u32 4294901760, %v34837_v11  ;;  %v34943_v11 = vld [vmem:[#allocation177_spill] sm:$0xff] }
 0x878   : > { %23699 = vmatprep.mubr.f32.mxu1 %v34925_v38  ;;  %v34934_v38 = vld [vmem:[#allocation168_spill] sm:$0xff] }
 0x879   : > { %23034 = vmatmul.mubr.f32.gmra.mrb[82].mxu0 %v34926_v52 }
 0x87a   : > { %23036 = vmatprep.mubr.f32.mxu0 %v34927_v4  ;;  %24687 = vmatpush3.bf16.msra.mxu0 %v34924_v3  ;;  %v34990_v3 = vld [vmem:[#allocation17_spill] sm:$0xff] }
 0x87b   : > { %23700 = vmatmul.mubr.f32.gmra.mrb[92].mxu1 %v34928_v20  ;;  %v34938_v20 = vld [vmem:[#allocation80_spill] sm:$0xff] }
 0x87c   : > { %23702 = vmatprep.mubr.f32.mxu1 %v34929_v18  ;;  %v34939_v1 = vand.u32 4294901760, %v34938_v20  ;;  %v34940_v18 = vand.u32 4294901760, %v34839_v12  ;;  %v34948_v12 = vand.u32 4294901760, %v34845_v6  ;;  %v34954_v20 = vld [vmem:[#allocation184_spill] sm:$0xff]  ;;  %v34956_v6 = vand.u32 4294901760, %v34852_v44 }
 0x87d   : > { %23037 = vmatmul.mubr.f32.gmra.mrb[84].mxu0 %v34930_v45  ;;  %v34964_v44 = vand.u32 4294901760, %v34859_v22  ;;  %v34972_v22 = vand.u32 4294901760, %v34864_v17  ;;  %v34981_v17 = vld [vmem:[#allocation2_spill] sm:$0xff] }
 0x87e   : > { %23039 = vmatprep.mubr.f32.mxu0 %v34931_v2  ;;  %v31278_v27 = vpack.c.bf16 %v34939_v1, %v34937_v10  ;;  %v34946_v1 = vld [vmem:[#allocation176_spill] sm:$0xff]  ;;  %v34951_v10 = vld [vmem:[#allocation185_spill] sm:$0xff] }
 0x87f   : > { %23703 = vmatmul.mubr.f32.gmra.mrb[94].mxu1 %v34932_v43  ;;  %v34944_v43 = vand.u32 4294901760, %v34842_v37  ;;  %v34952_v37 = vand.u32 4294901760, %v34849_v35  ;;  %v34960_v35 = vand.u32 4294901760, %v34856_v59  ;;  %v34968_v59 = vand.u32 4294901760, %v34862_v25  ;;  %v34977_v25 = vld [vmem:[#allocation94_spill] sm:$0xff] }
 0x880   : > { %23705 = vmatprep.mubr.f32.mxu1 %v34933_v41  ;;  %24689 = vmatprep.subr.bf16.mxu0 %v31278_v27  ;;  %v34947_v41 = vld [vmem:[#allocation181_spill] sm:$0xff] }
 0x881   : > { %23040 = vmatmul.mubr.f32.gmra.mrb[86].mxu0 %v34934_v38 }
 0x882   : > { %23042 = vmatprep.mubr.f32.mxu0 %v34935_v21 }
 0x883   : > { %23706 = vmatmul.mubr.f32.gmra.mrb[96].mxu1 %v34940_v18  ;;  %v34955_v18 = vld [vmem:[#allocation189_spill] sm:$0xff] }
 0x884   : > { %23708 = vmatprep.mubr.f32.mxu1 %v34941_v53  ;;  %v34949_v53 = vand.u32 4294901760, %v34846_v34  ;;  %v34957_v34 = vand.u32 4294901760, %v34853_v32  ;;  %v34965_v32 = vand.u32 4294901760, %v34860_v56  ;;  %v34974_v56 = vld [vmem:[#allocation204_spill] sm:$0xff] }
 0x885   : > { %23043 = vmatmul.mubr.f32.gmra.mrb[88].mxu0 %v34942_v39 }
 0x886   : > { %23045 = vmatprep.mubr.f32.mxu0 %v34943_v11 }
 0x887   : > { %23709 = vmatmul.mubr.f32.gmra.mrb[98].mxu1 %v34944_v43  ;;  %v34958_v43 = vld [vmem:[#allocation188_spill] sm:$0xff] }
 0x888   : > { %23711 = vmatprep.mubr.f32.mxu1 %v34945_v28  ;;  %v34959_v28 = vld [vmem:[#allocation193_spill] sm:$0xff] }
 0x889   : > { %23046 = vmatmul.mubr.f32.gmra.mrb[90].mxu0 %v34946_v1 }
 0x88a   : > { %23048 = vmatprep.mubr.f32.mxu0 %v34947_v41 }
 0x88b   : > { %23712 = vmatmul.mubr.f32.gmra.mrb[100].mxu1 %v34948_v12  ;;  %v34962_v12 = vld [vmem:[#allocation192_spill] sm:$0xff] }
 0x88c   : > { %23714 = vmatprep.mubr.f32.mxu1 %v34949_v53  ;;  %v34963_v53 = vld [vmem:[#allocation197_spill] sm:$0xff] }
 0x88d   : > { %23049 = vmatmul.mubr.f32.gmra.mrb[92].mxu0 %v34950_v29 }
 0x88e   : > { %23051 = vmatprep.mubr.f32.mxu0 %v34951_v10 }
 0x88f   : > { %23715 = vmatmul.mubr.f32.gmra.mrb[102].mxu1 %v34952_v37  ;;  %v34966_v37 = vld [vmem:[#allocation196_spill] sm:$0xff] }
 0x890   : > { %23717 = vmatprep.mubr.f32.mxu1 %v34953_v55  ;;  %v34967_v55 = vld [vmem:[#allocation201_spill] sm:$0xff] }
 0x891   : > { %23052 = vmatmul.mubr.f32.gmra.mrb[94].mxu0 %v34954_v20 }
 0x892   : > { %23054 = vmatprep.mubr.f32.mxu0 %v34955_v18 }
 0x893   : > { %23718 = vmatmul.mubr.f32.gmra.mrb[104].mxu1 %v34956_v6  ;;  %v34970_v6 = vld [vmem:[#allocation200_spill] sm:$0xff] }
 0x894   : > { %23720 = vmatprep.mubr.f32.mxu1 %v34957_v34  ;;  %v34971_v34 = vld [vmem:[#allocation205_spill] sm:$0xff] }
 0x895   : > { %23055 = vmatmul.mubr.f32.gmra.mrb[96].mxu0 %v34958_v43 }
 0x896   : > { %23057 = vmatprep.mubr.f32.mxu0 %v34959_v28 }
 0x897   : > { %23721 = vmatmul.mubr.f32.gmra.mrb[106].mxu1 %v34960_v35  ;;  %v34973_v35 = vld [vmem:[#allocation85_spill] sm:$0xff] }
 0x898   : > { %23723 = vmatprep.mubr.f32.mxu1 %v34961_v5  ;;  %v34975_v5 = vld [vmem:[#allocation209_spill] sm:$0xff] }
 0x899   : > { %23058 = vmatmul.mubr.f32.gmra.mrb[98].mxu0 %v34962_v12 }
 0x89a   : > { %23060 = vmatprep.mubr.f32.mxu0 %v34963_v53 }
 0x89b   : > { %23724 = vmatmul.mubr.f32.gmra.mrb[108].mxu1 %v34964_v44  ;;  %v34976_v44 = vld [vmem:[#allocation87_spill] sm:$0xff] }
 0x89c   : > { %23726 = vmatprep.mubr.f32.mxu1 %v34965_v32  ;;  %v34979_v32 = vld [vmem:[#allocation18_spill] sm:$0xff] }
 0x89d   : > { %23061 = vmatmul.mubr.f32.gmra.mrb[100].mxu0 %v34966_v37 }
 0x89e   : > { %23063 = vmatprep.mubr.f32.mxu0 %v34967_v55 }
 0x89f   : > { %23727 = vmatmul.mubr.f32.gmra.mrb[110].mxu1 %v34968_v59  ;;  %v34980_v59 = vld [vmem:[#allocation213_spill] sm:$0xff] }
 0x8a0   : > { %23729 = vmatprep.mubr.f32.mxu1 %v34969_v57  ;;  %v34982_v57 = vld [vmem:[#allocation22_spill] sm:$0xff] }
 0x8a1   : > { %23064 = vmatmul.mubr.f32.gmra.mrb[102].mxu0 %v34970_v6 }
 0x8a2   : > { %23066 = vmatprep.mubr.f32.mxu0 %v34971_v34 }
 0x8a3   : > { %23730 = vmatmul.mubr.f32.gmra.mrb[112].mxu1 %v34972_v22  ;;  %v34983_v22 = vld [vmem:[#allocation212_spill] sm:$0xff] }
 0x8a4   : > { %23738 = vmatprep.mubr.f32.mxu1 %v34973_v35 }
 0x8a5   : > { %23067 = vmatmul.mubr.f32.gmra.mrb[104].mxu0 %v34974_v56 }
 0x8a6   : > { %23069 = vmatprep.mubr.f32.mxu0 %v34975_v5 }
 0x8a7   : > { %23739 = vmatmul.mubr.f32.vlgmr.msra.gmra.mrb[64].mxu1 %v34976_v44 }
 0x8a8   : > { %24775 = vmatpush3.bf16.msra.mxu1 %v34874_v9  ;;  %23741 = vmatprep.mubr.f32.mxu1 %v34977_v25  ;;  %v34986_v9 = vld [vmem:[#allocation4_spill] sm:$0xff] }
 0x8a9   : > { %23070 = vmatmul.mubr.f32.gmra.mrb[106].mxu0 %v34978_v58  ;;  %23817 = vmatprep.subr.mxu1 %v34979_v32 }
 0x8aa   : > { %23072 = vmatprep.mubr.f32.mxu0 %v34980_v59 }
 0x8ab   : > { %23742 = vmatmul.mubr.f32.gmra.mrb[66].mxu1 %v34981_v17 }
 0x8ac   : > { %23818 = vmatpush3.msra.mxu1 %v34979_v32  ;;  %23744 = vmatprep.mubr.f32.mxu1 %v34982_v57  ;;  %v34992_v32 = vld [vmem:[#allocation219_spill] sm:$0xff] }
 0x8ad   : > { %23073 = vmatmul.mubr.f32.gmra.mrb[108].mxu0 %v34983_v22 }
 0x8ae   : > { %23075 = vmatprep.mubr.f32.mxu0 %v34984_v40 }
 0x8af   : > { %23745 = vmatmul.mubr.f32.gmra.mrb[68].mxu1 %v34985_v19 }
 0x8b0   : > { %23747 = vmatprep.mubr.f32.mxu1 %v34986_v9  ;;  %v35005_v9 = vld [vmem:[#allocation55_spill] sm:$0xff] }
 0x8b1   : > { %23076 = vmatmul.mubr.f32.gmra.mrb[110].mxu0 %v34987_v16 }
 0x8b2   : > { %23078 = vmatprep.mubr.f32.mxu0 %v34988_v62  ;;  %v34998_v62 = vld [vmem:[#allocation220_spill] sm:$0xff] }
 0x8b3   : > { %23748 = vmatmul.mubr.f32.gmra.mrb[70].mxu1 %v34989_v42 }
 0x8b4   : > { %23750 = vmatprep.mubr.f32.mxu1 %v34990_v3  ;;  %v34999_v3 = vand.u32 4294901760, %v34888_v49  ;;  %v35009_v49 = vld [vmem:[#allocation121_spill] sm:$0xff] }
 0x8b5   : > { %23079 = vmatmul.mubr.f32.gmra.mrb[112].mxu0 %v34991_v46  ;;  %v35000_v46 = vld [vmem:[#allocation53_spill] sm:$0xff] }
 0x8b6   : > { %23081 = vmatprep.mubr.f32.mxu0 %v34992_v32  ;;  %v35001_v32 = vld [vmem:[#allocation118_spill] sm:$0xff] }
 0x8b7   : > { %23751 = vmatmul.mubr.f32.gmra.mrb[72].mxu1 %v34993_v31  ;;  %v35002_v42 = vand.u32 4294901760, %v35001_v32  ;;  %v35003_v31 = vld [vmem:[#allocation120_spill] sm:$0xff] }
 0x8b8   : > { %23753 = vmatprep.mubr.f32.mxu1 %v34994_v63  ;;  %v35004_v16 = vand.u32 4294901760, %v35003_v31  ;;  %v35013_v31 = vld [vmem:[#allocation65_spill] sm:$0xff] }
 0x8b9   : > { %23082 = vmatmul.mubr.f32.gmra.mrb[114].mxu0 %v34995_v8 }
 0x8ba   : > { %23084 = vmatprep.mubr.f32.mxu0 %v31043_v24  ;;  %v24692_v63 = vpack.c.bf16 %v35004_v16, %v35002_v42  ;;  %v35006_v24 = vand.u32 4294901760, %v34891_v36  ;;  %v35014_v42 = vand.u32 4294901760, %v34896_v30  ;;  %v35015_v16 = vand.u32 4294901760, %v34897_v15  ;;  %v35017_v36 = vld [vmem:[#allocation8_spill] sm:$0xff] }
 0x8bb   : > { %23754 = vmatmul.mubr.f32.gmra.mrb[74].mxu1 %v34996_v14  ;;  %v35007_v14 = vand.u32 4294901760, %v34892_v51  ;;  %v35018_v51 = vand.u32 4294901760, %v35017_v36  ;;  %v35023_v30 = vand.u32 4294901760, %v34902_v48  ;;  %v35024_v15 = vld [vmem:[#allocation84_spill] sm:$0xff]  ;;  %v35029_v36 = vld [vmem:[#allocation86_spill] sm:$0xff]  ;;  %v35032_v48 = vld [vmem:[#allocation89_spill] sm:$0xff] }
 0x8bc   : > { %23756 = vmatprep.mubr.f32.mxu1 %v34997_v50 }
 0x8bd   : > { %23085 = vmatmul.mubr.f32.gmra.mrb[116].mxu0 %v34998_v62  ;;  %v35008_v62 = vld [vmem:[#allocation61_spill] sm:$0xff] }
 0x8be   : > { %23119 = vmatprep.mubr.f32.mxu0 %v34999_v3  ;;  %v35010_v3 = vand.u32 4294901760, %v35009_v49 }
 0x8bf   : > { %23757 = vmatmul.mubr.f32.gmra.mrb[76].mxu1 %v35000_v46  ;;  %v35011_v46 = vld [vmem:[#allocation6_spill] sm:$0xff] }
 0x8c0   : > { %23759 = vmatprep.mubr.f32.mxu1 %v35005_v9  ;;  %v35012_v32 = vand.u32 4294901760, %v35011_v46  ;;  %v35022_v46 = vand.u32 4294901760, %v34901_v60  ;;  %v35031_v60 = vand.u32 4294901760, %v34907_v54  ;;  %v35040_v54 = vld [vmem:[#allocation101_spill] sm:$0xff] }
 0x8c1   : > { %23120 = vmatmul.mubr.f32.vlgmr.msra.gmra.mrb[68].mxu0 %v35006_v24  ;;  %v35016_v24 = vld [vmem:[#allocation68_spill] sm:$0xff] }
 0x8c2   : > { %23122 = vmatprep.mubr.f32.mxu0 %v35007_v14  ;;  %24691 = vmatpush3.bf16.msra.mxu0 %v31278_v27  ;;  %v24696_v50 = vpack.c.bf16 %v35012_v32, %v35010_v3  ;;  %v35019_v14 = vld [vmem:[#allocation9_spill] sm:$0xff]  ;;  %v35027_v32 = vld [vmem:[#allocation124_spill] sm:$0xff] }
 0x8c3   : > { %23760 = vmatmul.mubr.f32.gmra.mrb[78].mxu1 %v35008_v62  ;;  %24693 = vmatprep.subr.bf16.mxu0 %v24692_v63  ;;  %v35020_v27 = vand.u32 4294901760, %v35019_v14  ;;  %v35021_v62 = vld [vmem:[#allocation70_spill] sm:$0xff] }
 0x8c4   : > { %23762 = vmatprep.mubr.f32.mxu1 %v35013_v31 }
 0x8c5   : > { %23123 = vmatmul.mubr.f32.gmra.mrb[70].mxu0 %v35014_v42  ;;  %v24700_v49 = vpack.c.bf16 %v35020_v27, %v35018_v51  ;;  %v35028_v42 = vand.u32 4294901760, %v35027_v32  ;;  %v35030_v51 = vand.u32 4294901760, %v34906_v13  ;;  %v35035_v27 = vld [vmem:[#allocation126_spill] sm:$0xff]  ;;  %v35039_v13 = vand.u32 4294901760, %v34912_v47  ;;  %v35048_v47 = vld [vmem:[#allocation3_spill] sm:$0xff] }
 0x8c6   : > { %23125 = vmatprep.mubr.f32.mxu0 %v35015_v16  ;;  %24695 = vmatpush3.bf16.msra.mxu0 %v24692_v63  ;;  %v35025_v63 = vld [vmem:[#allocation123_spill] sm:$0xff] }
 0x8c7   : > { %23763 = vmatmul.mubr.f32.gmra.mrb[80].mxu1 %v35016_v24  ;;  %24697 = vmatprep.subr.bf16.mxu0 %v24696_v50  ;;  %v35026_v3 = vand.u32 4294901760, %v35025_v63  ;;  %v35037_v63 = vld [vmem:[#allocation99_spill] sm:$0xff] }
 0x8c8   : > { %23765 = vmatprep.mubr.f32.mxu1 %v35021_v62 }
 0x8c9   : > { %23126 = vmatmul.mubr.f32.gmra.mrb[72].mxu0 %v35022_v46  ;;  %v24704_v16 = vpack.c.bf16 %v35028_v42, %v35026_v3  ;;  %v35036_v46 = vand.u32 4294901760, %v35035_v27  ;;  %v35038_v3 = vand.u32 4294901760, %v34911_v33  ;;  %v35043_v42 = vld [vmem:[#allocation128_spill] sm:$0xff]  ;;  %v35047_v33 = vand.u32 4294901760, %v34917_v0  ;;  %v35056_v0 = vld [vmem:[#allocation11_spill] sm:$0xff] }
 0x8ca   : > { %23128 = vmatprep.mubr.f32.mxu0 %v35023_v30  ;;  %24699 = vmatpush3.bf16.msra.mxu0 %v24696_v50  ;;  %v35033_v50 = vld [vmem:[#allocation125_spill] sm:$0xff] }
 0x8cb   : > { %23766 = vmatmul.mubr.f32.gmra.mrb[82].mxu1 %v35024_v15  ;;  %24701 = vmatprep.subr.bf16.mxu0 %v24700_v49  ;;  %v35034_v14 = vand.u32 4294901760, %v35033_v50  ;;  %v35045_v50 = vld [vmem:[#allocation108_spill] sm:$0xff] }
 0x8cc   : > { %23768 = vmatprep.mubr.f32.mxu1 %v35029_v36 }
 0x8cd   : > { %23129 = vmatmul.mubr.f32.gmra.mrb[74].mxu0 %v35030_v51  ;;  %v24708_v30 = vpack.c.bf16 %v35036_v46, %v35034_v14  ;;  %v35044_v51 = vand.u32 4294901760, %v35043_v42  ;;  %v35046_v14 = vand.u32 4294901760, %v34916_v7  ;;  %v35051_v46 = vld [vmem:[#allocation141_spill] sm:$0xff]  ;;  %v35055_v7 = vand.u32 4294901760, %v34922_v26 }
 0x8ce   : > { %23131 = vmatprep.mubr.f32.mxu0 %v35031_v60  ;;  %24703 = vmatpush3.bf16.msra.mxu0 %v24700_v49  ;;  %v35041_v49 = vld [vmem:[#allocation127_spill] sm:$0xff]  ;;  %v35058_v42 = vand.u32 4294901760, %v34926_v52  ;;  %v35062_v26 = vand.u32 4294901760, %v34930_v45  ;;  %v35070_v45 = vand.u32 4294901760, %v34942_v39  ;;  %v35078_v39 = vand.u32 4294901760, %v34950_v29 }
 0x8cf   : > { %23769 = vmatmul.mubr.f32.gmra.mrb[84].mxu1 %v35032_v48  ;;  %24705 = vmatprep.subr.bf16.mxu0 %v24704_v16  ;;  %v35042_v32 = vand.u32 4294901760, %v35041_v49  ;;  %v35053_v49 = vld [vmem:[#allocation10_spill] sm:$0xff]  ;;  %v35065_v52 = vld [vmem:[#allocation19_spill] sm:$0xff]  ;;  %v35086_v29 = vand.u32 4294901760, %v34958_v43  ;;  %v35094_v43 = vand.u32 4294901760, %v34966_v37  ;;  %v35101_v37 = vand.u32 4294901760, %v34974_v56 }
 0x8d0   : > { %23771 = vmatprep.mubr.f32.mxu1 %v35037_v63  ;;  %v35106_v56 = vand.u32 4294901760, %v34984_v40 }
 0x8d1   : > { %23132 = vmatmul.mubr.f32.gmra.mrb[76].mxu0 %v35038_v3  ;;  %v24712_v60 = vpack.c.bf16 %v35044_v51, %v35042_v32  ;;  %v35052_v3 = vand.u32 4294901760, %v35051_v46  ;;  %v35054_v32 = vand.u32 4294901760, %v34921_v61  ;;  %v35059_v51 = vand.u32 4294901760, %v34927_v4  ;;  %v35061_v61 = vld [vmem:[#allocation30_spill] sm:$0xff]  ;;  %v35069_v46 = vld [vmem:[#allocation49_spill] sm:$0xff] }
 0x8d2   : > { %23134 = vmatprep.mubr.f32.mxu0 %v35039_v13  ;;  %24707 = vmatpush3.bf16.msra.mxu0 %v24704_v16  ;;  %v35049_v16 = vld [vmem:[#allocation138_spill] sm:$0xff]  ;;  %v35066_v4 = vand.u32 4294901760, %v34934_v38  ;;  %v35074_v38 = vand.u32 4294901760, %v34946_v1  ;;  %v35082_v1 = vand.u32 4294901760, %v34954_v20  ;;  %v35090_v20 = vand.u32 4294901760, %v34962_v12 }
 0x8d3   : > { %23772 = vmatmul.mubr.f32.gmra.mrb[86].mxu1 %v35040_v54  ;;  %24709 = vmatprep.subr.bf16.mxu0 %v24708_v30  ;;  %v35050_v27 = vand.u32 4294901760, %v35049_v16  ;;  %v35067_v16 = vand.u32 4294901760, %v34935_v21  ;;  %v35075_v21 = vand.u32 4294901760, %v34947_v41  ;;  %v35083_v41 = vand.u32 4294901760, %v34955_v18 }
 0x8d4   : > { %23774 = vmatprep.mubr.f32.mxu1 %v35045_v50  ;;  %v35091_v18 = vand.u32 4294901760, %v34963_v53  ;;  %v35098_v12 = vand.u32 4294901760, %v34970_v6  ;;  %v35099_v53 = vand.u32 4294901760, %v34971_v34  ;;  %v35103_v6 = vand.u32 4294901760, %v34978_v58  ;;  %v35110_v58 = vld [vmem:[#allocation218_spill] sm:$0xff] }
 0x8d5   : > { %23135 = vmatmul.mubr.f32.gmra.mrb[78].mxu0 %v35046_v14  ;;  %v24716_v13 = vpack.c.bf16 %v35052_v3, %v35050_v27  ;;  %v35060_v14 = vld [vmem:[#allocation26_spill] sm:$0xff]  ;;  %v35068_v27 = vld [vmem:[#allocation43_spill] sm:$0xff]  ;;  %v35072_v3 = vld [vmem:[#allocation52_spill] sm:$0xff]  ;;  %v35104_v34 = vand.u32 4294901760, %v34980_v59  ;;  %v35111_v59 = vand.u32 4294901760, %v35110_v58 }
 0x8d6   : > { %23137 = vmatprep.mubr.f32.mxu0 %v35047_v33  ;;  %24711 = vmatpush3.bf16.msra.mxu0 %v24708_v30  ;;  %v35057_v30 = vld [vmem:[#allocation5_spill] sm:$0xff]  ;;  %v35064_v33 = vld [vmem:[#allocation36_spill] sm:$0xff]  ;;  %v35143_v58 = vld [vmem:[#allocation151_spill] sm:$0xff] }
 0x8d7   : > { %23775 = vmatmul.mubr.f32.gmra.mrb[88].mxu1 %v35048_v47  ;;  %24713 = vmatprep.subr.bf16.mxu0 %v24712_v60 }
 0x8d8   : > { %23777 = vmatprep.mubr.f32.mxu1 %v35053_v49 }
 0x8d9   : > { %23138 = vmatmul.mubr.f32.gmra.mrb[80].mxu0 %v35054_v32  ;;  %v35076_v32 = vld [vmem:[#allocation62_spill] sm:$0xff] }
 0x8da   : > { %23140 = vmatprep.mubr.f32.mxu0 %v35055_v7  ;;  %24715 = vmatpush3.bf16.msra.mxu0 %v24712_v60  ;;  %v35063_v60 = vand.u32 4294901760, %v34931_v2  ;;  %v35071_v2 = vand.u32 4294901760, %v34943_v11  ;;  %v35077_v7 = vld [vmem:[#allocation64_spill] sm:$0xff]  ;;  %v35079_v11 = vand.u32 4294901760, %v34951_v10  ;;  %v35087_v10 = vand.u32 4294901760, %v34959_v28 }
 0x8db   : > { %23778 = vmatmul.mubr.f32.gmra.mrb[90].mxu1 %v35056_v0  ;;  %24717 = vmatprep.subr.bf16.mxu0 %v24716_v13  ;;  %v35095_v28 = vand.u32 4294901760, %v34967_v55  ;;  %v35102_v55 = vand.u32 4294901760, %v34975_v5  ;;  %v35107_v5 = vld [vmem:[#allocation4_spill] sm:$0xff] }
 0x8dc   : > { %23780 = vmatprep.mubr.f32.mxu1 %v35057_v30 }
 0x8dd   : > { %23141 = vmatmul.mubr.f32.gmra.mrb[82].mxu0 %v35058_v42  ;;  %v35080_v42 = vld [vmem:[#allocation66_spill] sm:$0xff] }
 0x8de   : > { %23143 = vmatprep.mubr.f32.mxu0 %v35059_v51  ;;  %24719 = vmatpush3.bf16.msra.mxu0 %v24716_v13  ;;  %v35073_v13 = vld [vmem:[#allocation56_spill] sm:$0xff]  ;;  %v35081_v51 = vld [vmem:[#allocation69_spill] sm:$0xff] }
 0x8df   : > { %23781 = vmatmul.mubr.f32.gmra.mrb[92].mxu1 %v35060_v14  ;;  %24721 = vmatprep.subr.bf16.mxu0 %v34835_v23 }
 0x8e0   : > { %23783 = vmatprep.mubr.f32.mxu1 %v35061_v61 }
 0x8e1   : > { %23144 = vmatmul.mubr.f32.gmra.mrb[84].mxu0 %v35062_v26  ;;  %v35084_v26 = vld [vmem:[#allocation88_spill] sm:$0xff] }
 0x8e2   : > { %23146 = vmatprep.mubr.f32.mxu0 %v35063_v60  ;;  %v35085_v60 = vld [vmem:[#allocation91_spill] sm:$0xff] }
 0x8e3   : > { %23784 = vmatmul.mubr.f32.gmra.mrb[94].mxu1 %v35064_v33 }
 0x8e4   : > { %23786 = vmatprep.mubr.f32.mxu1 %v35065_v52 }
 0x8e5   : > { %23147 = vmatmul.mubr.f32.gmra.mrb[86].mxu0 %v35066_v4  ;;  %v35088_v4 = vld [vmem:[#allocation103_spill] sm:$0xff] }
 0x8e6   : > { %23149 = vmatprep.mubr.f32.mxu0 %v35067_v16  ;;  %v35089_v16 = vld [vmem:[#allocation105_spill] sm:$0xff] }
 0x8e7   : > { %23787 = vmatmul.mubr.f32.gmra.mrb[96].mxu1 %v35068_v27 }
 0x8e8   : > { %23789 = vmatprep.mubr.f32.mxu1 %v35069_v46 }
 0x8e9   : > { %23150 = vmatmul.mubr.f32.gmra.mrb[88].mxu0 %v35070_v45  ;;  %v35092_v45 = vld [vmem:[#allocation112_spill] sm:$0xff] }
 0x8ea   : > { %23152 = vmatprep.mubr.f32.mxu0 %v35071_v2  ;;  %v35093_v2 = vld [vmem:[#allocation117_spill] sm:$0xff] }
 0x8eb   : > { %23790 = vmatmul.mubr.f32.gmra.mrb[98].mxu1 %v35072_v3 }
 0x8ec   : > { %23792 = vmatprep.mubr.f32.mxu1 %v35073_v13 }
 0x8ed   : > { %23153 = vmatmul.mubr.f32.gmra.mrb[90].mxu0 %v35074_v38  ;;  %v35096_v38 = vld [vmem:[#allocation122_spill] sm:$0xff] }
 0x8ee   : > { %23155 = vmatprep.mubr.f32.mxu0 %v35075_v21  ;;  %v35097_v21 = vld [vmem:[#allocation104_spill] sm:$0xff] }
 0x8ef   : > { %23793 = vmatmul.mubr.f32.gmra.mrb[100].mxu1 %v35076_v32 }
 0x8f0   : > { %23795 = vmatprep.mubr.f32.mxu1 %v35077_v7 }
 0x8f1   : > { %23156 = vmatmul.mubr.f32.gmra.mrb[92].mxu0 %v35078_v39  ;;  %v35100_v39 = vld [vmem:[#allocation111_spill] sm:$0xff] }
 0x8f2   : > { %23158 = vmatprep.mubr.f32.mxu0 %v35079_v11  ;;  %v35112_v11 = vld [vmem:[#allocation15_spill] sm:$0xff] }
 0x8f3   : > { %23796 = vmatmul.mubr.f32.gmra.mrb[102].mxu1 %v35080_v42 }
 0x8f4   : > { %23798 = vmatprep.mubr.f32.mxu1 %v35081_v51 }
 0x8f5   : > { %23159 = vmatmul.mubr.f32.gmra.mrb[94].mxu0 %v35082_v1  ;;  %v35116_v1 = vld [vmem:[#allocation219_spill] sm:$0xff] }
 0x8f6   : > { %23161 = vmatprep.mubr.f32.mxu0 %v35083_v41  ;;  %v35117_v40 = vand.u32 4294901760, %v35116_v1  ;;  %v35118_v41 = vld [vmem:[#allocation39_spill] sm:$0xff]  ;;  %v35177_v1 = vld [vmem:[#allocation210_spill] sm:$0xff] }
 0x8f7   : > { %23799 = vmatmul.mubr.f32.gmra.mrb[104].mxu1 %v35084_v26 }
 0x8f8   : > { %23801 = vmatprep.mubr.f32.mxu1 %v35085_v60 }
 0x8f9   : > { %23162 = vmatmul.mubr.f32.gmra.mrb[96].mxu0 %v35086_v29  ;;  %v35120_v29 = vand.u32 4294901760, %v34995_v8  ;;  %v35130_v8 = vld [vmem:[#allocation134_spill] sm:$0xff] }
 0x8fa   : > { %23164 = vmatprep.mubr.f32.mxu0 %v35087_v10  ;;  %v35121_v10 = vld [vmem:[#allocation221_spill] sm:$0xff] }
 0x8fb   : > { %23802 = vmatmul.mubr.f32.gmra.mrb[106].mxu1 %v35088_v4 }
 0x8fc   : > { %23804 = vmatprep.mubr.f32.mxu1 %v35089_v16 }
 0x8fd   : > { %23165 = vmatmul.mubr.f32.gmra.mrb[98].mxu0 %v35090_v20  ;;  %v35122_v20 = vand.u32 4294901760, %v35121_v10  ;;  %v35185_v10 = vld [vmem:[#allocation14_spill] sm:$0xff] }
 0x8fe   : > { %23167 = vmatprep.mubr.f32.mxu0 %v35091_v18  ;;  %v35123_v18 = vld [vmem:[#allocation42_spill] sm:$0xff] }
 0x8ff   : > { %23805 = vmatmul.mubr.f32.gmra.mrb[108].mxu1 %v35092_v45 }
 0x900   : > { %23807 = vmatprep.mubr.f32.mxu1 %v35093_v2 }
 0x901   : > { %23168 = vmatmul.mubr.f32.gmra.mrb[100].mxu0 %v35094_v43  ;;  %v35124_v43 = vld [vmem:[#allocation48_spill] sm:$0xff] }
 0x902   : > { %23170 = vmatprep.mubr.f32.mxu0 %v35095_v28  ;;  %v35125_v28 = vld [vmem:[#allocation220_spill] sm:$0xff] }
 0x903   : > { %23808 = vmatmul.mubr.f32.gmra.mrb[110].mxu1 %v35096_v38 }
 0x904   : > { %23810 = vmatprep.mubr.f32.mxu1 %v35097_v21 }
 0x905   : > { %23171 = vmatmul.mubr.f32.gmra.mrb[102].mxu0 %v35098_v12  ;;  %v35126_v12 = vand.u32 4294901760, %v35125_v28 }
 0x906   : > { %23173 = vmatprep.mubr.f32.mxu0 %v35099_v53  ;;  %v35127_v53 = vld [vmem:[#allocation130_spill] sm:$0xff] }
 0x907   : > { %23811 = vmatmul.mubr.f32.gmra.mrb[112].mxu1 %v35100_v39 }
 0x908   : > { %23819 = vmatprep.mubr.f32.mxu1 %v34973_v35  ;;  %v35105_v35 = vand.u32 4294901760, %v34983_v22 }
 0x909   : > { %23174 = vmatmul.mubr.f32.gmra.mrb[104].mxu0 %v35101_v37  ;;  %v35128_v37 = vld [vmem:[#allocation53_spill] sm:$0xff] }
 0x90a   : > { %23176 = vmatprep.mubr.f32.mxu0 %v35102_v55  ;;  %v35129_v55 = vld [vmem:[#allocation129_spill] sm:$0xff] }
 0x90b   : > { %23820 = vmatmul.mubr.f32.vlgmr.msra.gmra.mrb[64].mxu1 %v34976_v44  ;;  %v35108_v44 = vld [vmem:[#allocation215_spill] sm:$0xff] }
 0x90c   : > { %23822 = vmatprep.mubr.f32.mxu1 %v34977_v25  ;;  %v35109_v25 = vand.u32 4294901760, %v35108_v44  ;;  %v35139_v44 = vld [vmem:[#allocation143_spill] sm:$0xff] }
 0x90d   : > { %23177 = vmatmul.mubr.f32.gmra.mrb[106].mxu0 %v35103_v6  ;;  %v35131_v6 = vld [vmem:[#allocation61_spill] sm:$0xff] }
 0x90e   : > { %23179 = vmatprep.mubr.f32.mxu0 %v35104_v34  ;;  %v35132_v34 = vld [vmem:[#allocation72_spill] sm:$0xff] }
 0x90f   : > { %23823 = vmatmul.mubr.f32.gmra.mrb[66].mxu1 %v34981_v17  ;;  %v35113_v17 = vld [vmem:[#allocation17_spill] sm:$0xff] }
 0x910   : > { %23825 = vmatprep.mubr.f32.mxu1 %v34982_v57  ;;  %v35114_v57 = vld [vmem:[#allocation217_spill] sm:$0xff] }
 0x911   : > { %23180 = vmatmul.mubr.f32.gmra.mrb[108].mxu0 %v35105_v35  ;;  %v35115_v22 = vand.u32 4294901760, %v35114_v57  ;;  %v35133_v35 = vld [vmem:[#allocation133_spill] sm:$0xff]  ;;  %v35157_v57 = vld [vmem:[#allocation170_spill] sm:$0xff] }
 0x912   : > { %23182 = vmatprep.mubr.f32.mxu0 %v35106_v56  ;;  %v35134_v56 = vld [vmem:[#allocation139_spill] sm:$0xff] }
 0x913   : > { %23826 = vmatmul.mubr.f32.gmra.mrb[68].mxu1 %v34985_v19  ;;  %v35119_v19 = vld [vmem:[#allocation41_spill] sm:$0xff] }
 0x914   : > { %23828 = vmatprep.mubr.f32.mxu1 %v35107_v5  ;;  %v35136_v5 = vld [vmem:[#allocation137_spill] sm:$0xff] }
 0x915   : > { %23183 = vmatmul.mubr.f32.gmra.mrb[110].mxu0 %v35109_v25  ;;  %v35140_v25 = vld [vmem:[#allocation147_spill] sm:$0xff] }
 0x916   : > { %23185 = vmatprep.mubr.f32.mxu0 %v35111_v59  ;;  %v35146_v59 = vld [vmem:[#allocation155_spill] sm:$0xff] }
 0x917   : > { %23829 = vmatmul.mubr.f32.gmra.mrb[70].mxu1 %v35112_v11  ;;  %v35149_v11 = vld [vmem:[#allocation159_spill] sm:$0xff] }
 0x918   : > { %23831 = vmatprep.mubr.f32.mxu1 %v35113_v17  ;;  %v35152_v17 = vld [vmem:[#allocation163_spill] sm:$0xff] }
 0x919   : > { %23186 = vmatmul.mubr.f32.gmra.mrb[112].mxu0 %v35115_v22  ;;  %v35174_v22 = vld [vmem:[#allocation207_spill] sm:$0xff] }
 0x91a   : > { %23188 = vmatprep.mubr.f32.mxu0 %v35117_v40  ;;  %v35178_v40 = vld [vmem:[#allocation93_spill] sm:$0xff] }
 0x91b   : > { %23832 = vmatmul.mubr.f32.gmra.mrb[72].mxu1 %v35118_v41  ;;  %v35181_v41 = vld [vmem:[#allocation95_spill] sm:$0xff] }
 0x91c   : > { %23834 = vmatprep.mubr.f32.mxu1 %v35119_v19  ;;  %v35182_v19 = vld [vmem:[#allocation20_spill] sm:$0xff] }
 0x91d   : > { %23189 = vmatmul.mubr.f32.gmra.mrb[114].mxu0 %v35120_v29  ;;  %v35184_v29 = vld [vmem:[#allocation33_spill] sm:$0xff] }
 0x91e   : > { %23191 = vmatprep.mubr.f32.mxu0 %v35122_v20 }
 0x91f   : > { %23835 = vmatmul.mubr.f32.gmra.mrb[74].mxu1 %v35123_v18 }
 0x920   : > { %23837 = vmatprep.mubr.f32.mxu1 %v35124_v43 }
 0x921   : > { %23192 = vmatmul.mubr.f32.gmra.mrb[116].mxu0 %v35126_v12 }
 0x922   : > { %23226 = vmatprep.mubr.f32.mxu0 %v35127_v53 }
 0x923   : > { %23838 = vmatmul.mubr.f32.gmra.mrb[76].mxu1 %v35128_v37 }
 0x924   : > { %23840 = vmatprep.mubr.f32.mxu1 %v35005_v9  ;;  %v35135_v9 = vld [vmem:[#allocation79_spill] sm:$0xff] }
 0x925   : > { %23227 = vmatmul.mubr.f32.vlgmr.msra.gmra.mrb[68].mxu0 %v35129_v55 }
 0x926   : > { %23229 = vmatprep.mubr.f32.mxu0 %v35130_v8  ;;  %24723 = vmatpush3.bf16.msra.mxu0 %v34835_v23  ;;  %v35137_v23 = vld [vmem:[#allocation144_spill] sm:$0xff] }
 0x927   : > { %23841 = vmatmul.mubr.f32.gmra.mrb[78].mxu1 %v35131_v6  ;;  %24725 = vmatprep.subr.bf16.mxu0 %v35132_v34 }
 0x928   : > { %23843 = vmatprep.mubr.f32.mxu1 %v35013_v31  ;;  %v35138_v31 = vld [vmem:[#allocation81_spill] sm:$0xff] }
 0x929   : > { %23230 = vmatmul.mubr.f32.gmra.mrb[70].mxu0 %v35133_v35 }
 0x92a   : > { %23232 = vmatprep.mubr.f32.mxu0 %v35134_v56  ;;  %24727 = vmatpush3.bf16.msra.mxu0 %v35132_v34 }
 0x92b   : > { %23844 = vmatmul.mubr.f32.gmra.mrb[80].mxu1 %v35016_v24  ;;  %24729 = vmatprep.subr.bf16.mxu0 %v35135_v9  ;;  %v35142_v24 = vld [vmem:[#allocation146_spill] sm:$0xff] }
 0x92c   : > { %23846 = vmatprep.mubr.f32.mxu1 %v35021_v62  ;;  %v35141_v62 = vld [vmem:[#allocation90_spill] sm:$0xff] }
 0x92d   : > { %23233 = vmatmul.mubr.f32.gmra.mrb[72].mxu0 %v35136_v5 }
 0x92e   : > { %23235 = vmatprep.mubr.f32.mxu0 %v35137_v23  ;;  %24731 = vmatpush3.bf16.msra.mxu0 %v35135_v9 }
 0x92f   : > { %23847 = vmatmul.mubr.f32.gmra.mrb[82].mxu1 %v35024_v15  ;;  %24733 = vmatprep.subr.bf16.mxu0 %v35138_v31  ;;  %v35144_v15 = vld [vmem:[#allocation23_spill] sm:$0xff] }
 0x930   : > { %23849 = vmatprep.mubr.f32.mxu1 %v35029_v36  ;;  %v35145_v36 = vld [vmem:[#allocation150_spill] sm:$0xff] }
 0x931   : > { %23236 = vmatmul.mubr.f32.gmra.mrb[74].mxu0 %v35139_v44 }
 0x932   : > { %23238 = vmatprep.mubr.f32.mxu0 %v35140_v25  ;;  %24735 = vmatpush3.bf16.msra.mxu0 %v35138_v31 }
 0x933   : > { %23850 = vmatmul.mubr.f32.gmra.mrb[84].mxu1 %v35032_v48  ;;  %24737 = vmatprep.subr.bf16.mxu0 %v35141_v62  ;;  %v35147_v48 = vld [vmem:[#allocation12_spill] sm:$0xff] }
 0x934   : > { %23852 = vmatprep.mubr.f32.mxu1 %v35037_v63  ;;  %v35148_v63 = vld [vmem:[#allocation154_spill] sm:$0xff] }
 0x935   : > { %23239 = vmatmul.mubr.f32.gmra.mrb[76].mxu0 %v35142_v24 }
 0x936   : > { %23241 = vmatprep.mubr.f32.mxu0 %v35143_v58  ;;  %24739 = vmatpush3.bf16.msra.mxu0 %v35141_v62 }
 0x937   : > { %23853 = vmatmul.mubr.f32.gmra.mrb[86].mxu1 %v35040_v54  ;;  %24741 = vmatprep.subr.bf16.mxu0 %v35144_v15  ;;  %v35150_v54 = vld [vmem:[#allocation31_spill] sm:$0xff] }
 0x938   : > { %23855 = vmatprep.mubr.f32.mxu1 %v35045_v50  ;;  %v35151_v50 = vld [vmem:[#allocation158_spill] sm:$0xff] }
 0x939   : > { %23242 = vmatmul.mubr.f32.gmra.mrb[78].mxu0 %v35145_v36 }
 0x93a   : > { %23244 = vmatprep.mubr.f32.mxu0 %v35146_v59  ;;  %24743 = vmatpush3.bf16.msra.mxu0 %v35144_v15 }
 0x93b   : > { %23856 = vmatmul.mubr.f32.gmra.mrb[88].mxu1 %v35048_v47  ;;  %24745 = vmatprep.subr.bf16.mxu0 %v35147_v48  ;;  %v35153_v47 = vld [vmem:[#allocation162_spill] sm:$0xff] }
 0x93c   : > { %23858 = vmatprep.mubr.f32.mxu1 %v35053_v49  ;;  %v35154_v49 = vld [vmem:[#allocation167_spill] sm:$0xff] }
 0x93d   : > { %23245 = vmatmul.mubr.f32.gmra.mrb[80].mxu0 %v35148_v63 }
 0x93e   : > { %23247 = vmatprep.mubr.f32.mxu0 %v35149_v11  ;;  %24747 = vmatpush3.bf16.msra.mxu0 %v35147_v48 }
 0x93f   : > { %23859 = vmatmul.mubr.f32.gmra.mrb[90].mxu1 %v35056_v0  ;;  %24749 = vmatprep.subr.bf16.mxu0 %v35150_v54  ;;  %v35155_v0 = vld [vmem:[#allocation166_spill] sm:$0xff] }
 0x940   : > { %23861 = vmatprep.mubr.f32.mxu1 %v35057_v30  ;;  %v35156_v30 = vld [vmem:[#allocation171_spill] sm:$0xff] }
 0x941   : > { %23248 = vmatmul.mubr.f32.gmra.mrb[82].mxu0 %v35151_v50 }
 0x942   : > { %23250 = vmatprep.mubr.f32.mxu0 %v35152_v17  ;;  %24751 = vmatpush3.bf16.msra.mxu0 %v35150_v54 }
 0x943   : > { %23862 = vmatmul.mubr.f32.gmra.mrb[92].mxu1 %v35060_v14  ;;  %v35158_v14 = vld [vmem:[#allocation175_spill] sm:$0xff] }
 0x944   : > { %23864 = vmatprep.mubr.f32.mxu1 %v35061_v61  ;;  %v35159_v61 = vld [vmem:[#allocation174_spill] sm:$0xff] }
 0x945   : > { %23251 = vmatmul.mubr.f32.gmra.mrb[84].mxu0 %v35153_v47 }
 0x946   : > { %23253 = vmatprep.mubr.f32.mxu0 %v35154_v49 }
 0x947   : > { %23865 = vmatmul.mubr.f32.gmra.mrb[94].mxu1 %v35064_v33  ;;  %v35160_v33 = vld [vmem:[#allocation179_spill] sm:$0xff] }
 0x948   : > { %23867 = vmatprep.mubr.f32.mxu1 %v35065_v52  ;;  %v35161_v52 = vld [vmem:[#allocation178_spill] sm:$0xff] }
 0x949   : > { %23254 = vmatmul.mubr.f32.gmra.mrb[86].mxu0 %v35155_v0 }
 0x94a   : > { %23256 = vmatprep.mubr.f32.mxu0 %v35156_v30 }
 0x94b   : > { %23868 = vmatmul.mubr.f32.gmra.mrb[96].mxu1 %v35068_v27  ;;  %v35162_v27 = vld [vmem:[#allocation183_spill] sm:$0xff] }
 0x94c   : > { %23870 = vmatprep.mubr.f32.mxu1 %v35069_v46  ;;  %v35163_v46 = vld [vmem:[#allocation182_spill] sm:$0xff] }
 0x94d   : > { %23257 = vmatmul.mubr.f32.gmra.mrb[88].mxu0 %v35157_v57 }
 0x94e   : > { %23259 = vmatprep.mubr.f32.mxu0 %v35158_v14 }
 0x94f   : > { %23871 = vmatmul.mubr.f32.gmra.mrb[98].mxu1 %v35072_v3  ;;  %v35164_v3 = vld [vmem:[#allocation187_spill] sm:$0xff] }
 0x950   : > { %23873 = vmatprep.mubr.f32.mxu1 %v35073_v13  ;;  %v35165_v13 = vld [vmem:[#allocation186_spill] sm:$0xff] }
 0x951   : > { %23260 = vmatmul.mubr.f32.gmra.mrb[90].mxu0 %v35159_v61 }
 0x952   : > { %23262 = vmatprep.mubr.f32.mxu0 %v35160_v33 }
 0x953   : > { %23874 = vmatmul.mubr.f32.gmra.mrb[100].mxu1 %v35076_v32  ;;  %v35166_v32 = vld [vmem:[#allocation191_spill] sm:$0xff] }
 0x954   : > { %23876 = vmatprep.mubr.f32.mxu1 %v35077_v7  ;;  %v35167_v7 = vld [vmem:[#allocation190_spill] sm:$0xff] }
 0x955   : > { %23263 = vmatmul.mubr.f32.gmra.mrb[92].mxu0 %v35161_v52 }
 0x956   : > { %23265 = vmatprep.mubr.f32.mxu0 %v35162_v27 }
 0x957   : > { %23877 = vmatmul.mubr.f32.gmra.mrb[102].mxu1 %v35080_v42  ;;  %v35168_v42 = vld [vmem:[#allocation195_spill] sm:$0xff] }
 0x958   : > { %23879 = vmatprep.mubr.f32.mxu1 %v35081_v51  ;;  %v35169_v51 = vld [vmem:[#allocation194_spill] sm:$0xff] }
 0x959   : > { %23266 = vmatmul.mubr.f32.gmra.mrb[94].mxu0 %v35163_v46 }
 0x95a   : > { %23268 = vmatprep.mubr.f32.mxu0 %v35164_v3 }
 0x95b   : > { %23880 = vmatmul.mubr.f32.gmra.mrb[104].mxu1 %v35084_v26  ;;  %v35170_v26 = vld [vmem:[#allocation199_spill] sm:$0xff] }
 0x95c   : > { %23882 = vmatprep.mubr.f32.mxu1 %v35085_v60  ;;  %v35171_v60 = vld [vmem:[#allocation198_spill] sm:$0xff] }
 0x95d   : > { %23269 = vmatmul.mubr.f32.gmra.mrb[96].mxu0 %v35165_v13 }
 0x95e   : > { %23271 = vmatprep.mubr.f32.mxu0 %v35166_v32 }
 0x95f   : > { %23883 = vmatmul.mubr.f32.gmra.mrb[106].mxu1 %v35088_v4  ;;  %v35172_v4 = vld [vmem:[#allocation203_spill] sm:$0xff] }
 0x960   : > { %23885 = vmatprep.mubr.f32.mxu1 %v35089_v16  ;;  %v35173_v16 = vld [vmem:[#allocation202_spill] sm:$0xff] }
 0x961   : > { %23272 = vmatmul.mubr.f32.gmra.mrb[98].mxu0 %v35167_v7 }
 0x962   : > { %23274 = vmatprep.mubr.f32.mxu0 %v35168_v42 }
 0x963   : > { %23886 = vmatmul.mubr.f32.gmra.mrb[108].mxu1 %v35092_v45  ;;  %v35175_v45 = vld [vmem:[#allocation206_spill] sm:$0xff] }
 0x964   : > { %23888 = vmatprep.mubr.f32.mxu1 %v35093_v2  ;;  %v35176_v2 = vld [vmem:[#allocation211_spill] sm:$0xff] }
 0x965   : > { %23275 = vmatmul.mubr.f32.gmra.mrb[100].mxu0 %v35169_v51 }
 0x966   : > { %23277 = vmatprep.mubr.f32.mxu0 %v35170_v26 }
 0x967   : > { %23889 = vmatmul.mubr.f32.gmra.mrb[110].mxu1 %v35096_v38  ;;  %v35179_v38 = vld [vmem:[#allocation214_spill] sm:$0xff] }
 0x968   : > { %23891 = vmatprep.mubr.f32.mxu1 %v35097_v21  ;;  %v35180_v21 = vld [vmem:[#allocation13_spill] sm:$0xff] }
 0x969   : > { %23278 = vmatmul.mubr.f32.gmra.mrb[102].mxu0 %v35171_v60 }
 0x96a   : > { %23280 = vmatprep.mubr.f32.mxu0 %v35172_v4 }
 0x96b   : > { %23892 = vmatmul.mubr.f32.gmra.mrb[112].mxu1 %v35100_v39  ;;  %v35183_v39 = vld [vmem:[#allocation25_spill] sm:$0xff] }
 0x96d   : > { %23281 = vmatmul.mubr.f32.gmra.mrb[104].mxu0 %v35173_v16 }
 0x96e   : > { %23283 = vmatprep.mubr.f32.mxu0 %v35174_v22 }
 0x971   : > { %23284 = vmatmul.mubr.f32.gmra.mrb[106].mxu0 %v35175_v45 }
 0x972   : > { %23286 = vmatprep.mubr.f32.mxu0 %v35176_v2 }
 0x975   : > { %23287 = vmatmul.mubr.f32.gmra.mrb[108].mxu0 %v35177_v1 }
 0x976   : > { %23289 = vmatprep.mubr.f32.mxu0 %v35178_v40 }
 0x979   : > { %23290 = vmatmul.mubr.f32.gmra.mrb[110].mxu0 %v35179_v38 }
 0x97a   : > { %23292 = vmatprep.mubr.f32.mxu0 %v35180_v21 }
 0x97d   : > { %23293 = vmatmul.mubr.f32.gmra.mrb[112].mxu0 %v35181_v41 }
 0x97e   : > { %23295 = vmatprep.mubr.f32.mxu0 %v35182_v19 }
 0x981   : > { %23296 = vmatmul.mubr.f32.gmra.mrb[114].mxu0 %v35183_v39 }
 0x982   : > { %23298 = vmatprep.mubr.f32.mxu0 %v35184_v29 }
 0x985   : > { %23299 = vmatmul.mubr.f32.gmra.mrb[116].mxu0 %v35185_v10 }
 0x986   : > { %23333 = vmatprep.mubr.f32.mxu0 %v35127_v53 }
 0x989   : > { %23334 = vmatmul.mubr.f32.vlgmr.msra.gmra.mrb[68].mxu0 %v35129_v55 }
 0x98a   : > { %23336 = vmatprep.mubr.f32.mxu0 %v35130_v8 }
 0x98d   : > { %23337 = vmatmul.mubr.f32.gmra.mrb[70].mxu0 %v35133_v35 }
 0x98e   : > { %23339 = vmatprep.mubr.f32.mxu0 %v35134_v56 }
 0x991   : > { %23340 = vmatmul.mubr.f32.gmra.mrb[72].mxu0 %v35136_v5 }
 0x992   : > { %23342 = vmatprep.mubr.f32.mxu0 %v35137_v23 }
 0x995   : > { %23343 = vmatmul.mubr.f32.gmra.mrb[74].mxu0 %v35139_v44 }
 0x996   : > { %23345 = vmatprep.mubr.f32.mxu0 %v35140_v25 }
 0x999   : > { %23346 = vmatmul.mubr.f32.gmra.mrb[76].mxu0 %v35142_v24 }
 0x99a   : > { %23348 = vmatprep.mubr.f32.mxu0 %v35143_v58 }
 0x99d   : > { %23349 = vmatmul.mubr.f32.gmra.mrb[78].mxu0 %v35145_v36 }
 0x99e   : > { %23351 = vmatprep.mubr.f32.mxu0 %v35146_v59 }
 0x9a1   : > { %23352 = vmatmul.mubr.f32.gmra.mrb[80].mxu0 %v35148_v63 }
 0x9a2   : > { %23354 = vmatprep.mubr.f32.mxu0 %v35149_v11 }
 0x9a5   : > { %23355 = vmatmul.mubr.f32.gmra.mrb[82].mxu0 %v35151_v50 }
 0x9a6   : > { %23357 = vmatprep.mubr.f32.mxu0 %v35152_v17 }
 0x9a9   : > { %23358 = vmatmul.mubr.f32.gmra.mrb[84].mxu0 %v35153_v47  ;;  %v15533_v47 = vld [vmem:[%s33247_s24 + $0x8] sm:$0xff] }
 0x9aa   : > { %23360 = vmatprep.mubr.f32.mxu0 %v35154_v49 }
 0x9ad   : > { %23361 = vmatmul.mubr.f32.gmra.mrb[86].mxu0 %v35155_v0  ;;  %v31759_v0 = vand.u32 4294901760, %v15533_v47 }
 0x9ae   : > { %23363 = vmatprep.mubr.f32.mxu0 %v35156_v30 }
 0x9af   : > { %35186 = vst [vmem:[#allocation37_spill] sm:$0xff] %v31759_v0  ;;  %v31762_v30 = vsub.f32 %v15533_v47, %v31759_v0  ;;  %v15541_v47 = vld [vmem:[%s33247_s24 + $0x48] sm:$0xf] }
 0x9b1   : > { %23364 = vmatmul.mubr.f32.gmra.mrb[88].mxu0 %v35157_v57  ;;  %35187 = vst [vmem:[#allocation38_spill] sm:$0xff] %v31762_v30  ;;  %16122 = vmatprep.mubr.f32.mxu1 %v31762_v30 }
 0x9b2   : > { %23366 = vmatprep.mubr.f32.mxu0 %v35158_v14 }
 0x9b5   : > { %23367 = vmatmul.mubr.f32.gmra.mrb[90].mxu0 %v35159_v61  ;;  %v34028_v61 = vand.u32 4294901760, %v31762_v30 }
 0x9b6   : > { %23369 = vmatprep.mubr.f32.mxu0 %v35160_v33 }
 0x9b7   : > { %v15703_v33 = vsub.f32 %v31762_v30, %v34028_v61 }
 0x9b9   : > { %23370 = vmatmul.mubr.f32.gmra.mrb[92].mxu0 %v35161_v52 }
 0x9ba   : > { %23372 = vmatprep.mubr.f32.mxu0 %v35162_v27 }
 0x9bd   : > { %23373 = vmatmul.mubr.f32.gmra.mrb[94].mxu0 %v35163_v46  ;;  %v15704_v46 = vand.u32 4294901760, %v15703_v33 }
 0x9be   : > { %23375 = vmatprep.mubr.f32.mxu0 %v35164_v3 }
 0x9c1   : > { %23376 = vmatmul.mubr.f32.gmra.mrb[96].mxu0 %v35165_v13 }
 0x9c2   : > { %23378 = vmatprep.mubr.f32.mxu0 %v35166_v32 }
 0x9c5   : > { %23379 = vmatmul.mubr.f32.gmra.mrb[98].mxu0 %v35167_v7 }
 0x9c6   : > { %23381 = vmatprep.mubr.f32.mxu0 %v35168_v42 }
 0x9c9   : > { %23382 = vmatmul.mubr.f32.gmra.mrb[100].mxu0 %v35169_v51 }
 0x9ca   : > { %23384 = vmatprep.mubr.f32.mxu0 %v35170_v26 }
 0x9cd   : > { %23385 = vmatmul.mubr.f32.gmra.mrb[102].mxu0 %v35171_v60 }
 0x9ce   : > { %23387 = vmatprep.mubr.f32.mxu0 %v35172_v4 }
 0x9d1   : > { %23388 = vmatmul.mubr.f32.gmra.mrb[104].mxu0 %v35173_v16 }
 0x9d2   : > { %23390 = vmatprep.mubr.f32.mxu0 %v35174_v22 }
 0x9d5   : > { %23391 = vmatmul.mubr.f32.gmra.mrb[106].mxu0 %v35175_v45 }
 0x9d6   : > { %23393 = vmatprep.mubr.f32.mxu0 %v35176_v2 }
 0x9d9   : > { %23394 = vmatmul.mubr.f32.gmra.mrb[108].mxu0 %v35177_v1 }
 0x9da   : > { %23396 = vmatprep.mubr.f32.mxu0 %v35178_v40  ;;  %v15532_v40 = vld [vmem:[%s33247_s24] sm:$0xff] }
 0x9dd   : > { %23397 = vmatmul.mubr.f32.gmra.mrb[110].mxu0 %v35179_v38  ;;  %v15537_v38 = vld [vmem:[%s33247_s24 + $0x28] sm:$0xff] }
 0x9de   : > { %23399 = vmatprep.mubr.f32.mxu0 %v35180_v21  ;;  %v31687_v20 = vpop.f32.mrb[64].mxu1  ;;  %v31811_v21 = vand.u32 4294901760, %v15532_v40 }
 0x9df   : > { %v31689_v18 = vpop.f32.mrb[65].mxu1 }
 0x9e0   : > { %35204 = vst [vmem:[#allocation32_spill] sm:$0xff] %v31811_v21 }
 0x9e1   : > { %23400 = vmatmul.mubr.f32.gmra.mrb[112].mxu0 %v35181_v41  ;;  %v31813_v41 = vand.u32 4294901760, %v15537_v38 }
 0x9e2   : > { %23402 = vmatprep.mubr.f32.mxu0 %v35182_v19  ;;  %v31693_v43 = vpop.f32.mrb[66].mxu1  ;;  %v15536_v19 = vld [vmem:[%s33247_s24 + $0x20] sm:$0xff] }
 0x9e3   : > { %v31695_v28 = vpop.f32.mrb[67].mxu1  ;;  %35205 = vst [vmem:[#allocation34_spill] sm:$0xff] %v31813_v41 }
 0x9e5   : > { %23403 = vmatmul.mubr.f32.gmra.mrb[114].mxu0 %v35183_v39  ;;  %v31819_v39 = vsub.f32 %v15532_v40, %v31811_v21 }
 0x9e6   : > { %23405 = vmatprep.mubr.f32.mxu0 %v35184_v29  ;;  %v31699_v12 = vpop.f32.mrb[68].mxu1  ;;  %v31822_v29 = vsub.f32 %v15537_v38, %v31813_v41 }
 0x9e7   : > { %v31701_v53 = vpop.f32.mrb[69].mxu1  ;;  %35206 = vst [vmem:[#allocation27_spill] sm:$0xff] %v31819_v39  ;;  %v34036_v33 = vand.u32 4294901760, %v31819_v39 }
 0x9e8   : > { %35207 = vst [vmem:[#allocation28_spill] sm:$0xff] %v31822_v29 }
 0x9e9   : > { %23406 = vmatmul.mubr.f32.gmra.mrb[116].mxu0 %v35185_v10  ;;  %v31824_v10 = vand.u32 4294901760, %v15536_v19  ;;  %v31841_v21 = vsub.f32 %v31819_v39, %v34036_v33 }
 0x9ea   : > { %v31704_v37 = vpop.f32.mrb[70].mxu1  ;;  %15705 = vmatprep.mubr.f32.mxu0 %v15704_v46  ;;  %v15540_v46 = vld [vmem:[%s33247_s24 + $0x40] sm:$0xf] }
 0x9eb   : > { %v31706_v55 = vpop.f32.mrb[71].mxu1  ;;  %35208 = vst [vmem:[#allocation35_spill] sm:$0xff] %v31824_v10  ;;  %v31832_v61 = vsub.f32 %v15536_v19, %v31824_v10  ;;  %35211 = vst [vmem:[#allocation44_spill] sm:$0xff] %v31841_v21  ;;  %v35212_v19 = vand.u32 4294901760, %v31822_v29 }
 0x9ed   : > { %35209 = vst [vmem:[#allocation71_spill] sm:$0xff] %v31832_v61  ;;  %v31849_v10 = vsub.f32 %v31822_v29, %v35212_v19 }
 0x9ee   : > { %v31708_v8 = vpop.f32.mrb[72].mxu1 }
 0x9ef   : > { %v31710_v6 = vpop.f32.mrb[73].mxu1  ;;  %35213 = vst [vmem:[#allocation46_spill] sm:$0xff] %v31849_v10 }
 0x9f2   : > { %v31712_v34 = vpop.f32.mrb[74].mxu1 }
 0x9f3   : > { %v31714_v35 = vpop.f32.mrb[75].mxu1 }
 0x9f6   : > { %v31716_v56 = vpop.f32.mrb[76].mxu1 }
 0x9f7   : > { %v31718_v9 = vpop.f32.mrb[77].mxu1 }
 0x9fa   : > { %v31720_v5 = vpop.f32.mrb[78].mxu1 }
 0x9fb   : > { %v31722_v23 = vpop.f32.mrb[79].mxu1 }
 0x9fe   : > { %v31724_v31 = vpop.f32.mrb[80].mxu1 }
 0x9ff   : > { %v31726_v44 = vpop.f32.mrb[81].mxu1 }
 0xa02   : > { %v31728_v25 = vpop.f32.mrb[82].mxu1 }
 0xa03   : > { %v31730_v62 = vpop.f32.mrb[83].mxu1 }
 0xa06   : > { %v31732_v24 = vpop.f32.mrb[84].mxu1 }
 0xa07   : > { %v31734_v58 = vpop.f32.mrb[85].mxu1 }
 0xa0a   : > { %v31736_v15 = vpop.f32.mrb[86].mxu1 }
 0xa0b   : > { %v31738_v36 = vpop.f32.mrb[87].mxu1 }
 0xa0e   : > { %v31740_v59 = vpop.f32.mrb[88].mxu1 }
 0xa0f   : > { %v31742_v48 = vpop.f32.mrb[89].mxu1 }
 0xa12   : > { %v31744_v63 = vpop.f32.mrb[90].mxu1 }
 0xa13   : > { %v31746_v11 = vpop.f32.mrb[91].mxu1 }
 0xa16   : > { %v31748_v54 = vpop.f32.mrb[92].mxu1 }
 0xa17   : > { %v31750_v50 = vpop.f32.mrb[93].mxu1 }
 0xa1a   : > { %v31752_v17 = vpop.f32.mrb[94].mxu1 }
 0xa1b   : > { %v31757_v49 = vpop.f32.mrb[95].mxu1 }
 0xa1e   : > { %v31764_v57 = vpop.f32.mrb[96].mxu1 }
 0xa1f   : > { %v31766_v14 = vpop.f32.mrb[97].mxu1 }
 0xa22   : > { %v31773_v52 = vpop.f32.mrb[98].mxu1 }
 0xa23   : > { %35188 = vst [vmem:[#allocation45_spill] sm:$0xff] %v31773_v52  ;;  %v31775_v27 = vpop.f32.mrb[99].mxu1 }
 0xa24   : > { %35189 = vst [vmem:[#allocation47_spill] sm:$0xff] %v31775_v27 }
 0xa26   : > { %v31777_v3 = vpop.f32.mrb[100].mxu1 }
 0xa27   : > { %35190 = vst [vmem:[#allocation51_spill] sm:$0xff] %v31777_v3  ;;  %v31779_v13 = vpop.f32.mrb[101].mxu1 }
 0xa28   : > { %35191 = vst [vmem:[#allocation57_spill] sm:$0xff] %v31779_v13 }
 0xa2a   : > { %v31781_v32 = vpop.f32.mrb[102].mxu1 }
 0xa2b   : > { %35192 = vst [vmem:[#allocation59_spill] sm:$0xff] %v31781_v32  ;;  %v31783_v7 = vpop.f32.mrb[103].mxu1 }
 0xa2c   : > { %35193 = vst [vmem:[#allocation63_spill] sm:$0xff] %v31783_v7 }
 0xa2e   : > { %v31785_v42 = vpop.f32.mrb[104].mxu1 }
 0xa2f   : > { %35194 = vst [vmem:[#allocation67_spill] sm:$0xff] %v31785_v42  ;;  %v31787_v51 = vpop.f32.mrb[105].mxu1 }
 0xa30   : > { %35195 = vst [vmem:[#allocation75_spill] sm:$0xff] %v31787_v51 }
 0xa32   : > { %v31789_v26 = vpop.f32.mrb[106].mxu1 }
 0xa33   : > { %35196 = vst [vmem:[#allocation77_spill] sm:$0xff] %v31789_v26  ;;  %v31791_v60 = vpop.f32.mrb[107].mxu1 }
 0xa34   : > { %35197 = vst [vmem:[#allocation78_spill] sm:$0xff] %v31791_v60 }
 0xa36   : > { %v31793_v4 = vpop.f32.mrb[108].mxu1 }
 0xa37   : > { %35198 = vst [vmem:[#allocation92_spill] sm:$0xff] %v31793_v4  ;;  %v31795_v16 = vpop.f32.mrb[109].mxu1 }
 0xa38   : > { %35199 = vst [vmem:[#allocation97_spill] sm:$0xff] %v31795_v16  ;;  %v31858_v16 = vand.u32 4294901760, %v15540_v46 }
 0xa3a   : > { %v31797_v22 = vpop.f32.mrb[110].mxu1  ;;  %35215 = vst [vmem:[#allocation54_spill] sm:$0xff] %v31858_v16  ;;  %v31882_v51 = vsub.f32 %v15540_v46, %v31858_v16 }
 0xa3b   : > { %35200 = vst [vmem:[#allocation100_spill] sm:$0xff] %v31797_v22  ;;  %v31799_v45 = vpop.f32.mrb[111].mxu1 }
 0xa3c   : > { %35201 = vst [vmem:[#allocation109_spill] sm:$0xff] %v31799_v45  ;;  %35218 = vst [vmem:[#allocation60_spill] sm:$0xff] %v31882_v51 }
 0xa3e   : > { %v31801_v2 = vpop.f32.mrb[112].mxu1 }
 0xa3f   : > { %35202 = vst [vmem:[#allocation115_spill] sm:$0xff] %v31801_v2  ;;  %v31803_v1 = vpop.f32.mrb[113].mxu1 }
 0xa40   : > { %35203 = vst [vmem:[#allocation24_spill] sm:$0xff] %v31803_v1  ;;  %v31834_v1 = vand.u32 4294901760, %v15541_v47 }
 0xa42   : > { %35210 = vst [vmem:[#allocation40_spill] sm:$0xff] %v31834_v1 }
 0xa5c   : > { %v23335_v30 = vpop.f32.mrb[68].mxu0 }
 0xa5d   : > { %v15545_v40 = vmul.f32 %v31687_v20, %v23335_v30  ;;  %v12452_v38 = vpop.f32.mrb[69].mxu0 }
 0xa5e   : > { %v15544_v41 = vmul.f32 %v31689_v18, %v12452_v38  ;;  %v31853_v18 = vsub.f32 %v15541_v47, %v31834_v1 }
 0xa5f   : > { %v15608_v2 = vand.u32 4294901760, %v15545_v40 }
 0xa60   : > { %v15605_v30 = vand.u32 4294901760, %v15544_v41  ;;  %v23338_v45 = vpop.f32.mrb[70].mxu0  ;;  %35214 = vst [vmem:[#allocation50_spill] sm:$0xff] %v31853_v18 }
 0xa61   : > { %v31855_v38 = vsub.f32 %v15545_v40, %v15608_v2  ;;  %v15547_v33 = vmul.f32 %v31693_v43, %v23338_v45  ;;  %v12464_v22 = vpop.f32.mrb[71].mxu0  ;;  %v35216_v40 = vand.u32 4294901760, %v31832_v61 }
 0xa62   : > { %v31860_v4 = vpack.c.bf16 %v15608_v2, %v15605_v30  ;;  %v31862_v60 = vsub.f32 %v15544_v41, %v15605_v30  ;;  %v15546_v19 = vmul.f32 %v31695_v28, %v12464_v22 }
 0xa63   : > { %v15756_v26 = vand.u32 4294901760, %v31855_v38  ;;  %v15614_v0 = vand.u32 4294901760, %v15547_v33  ;;  %v31871_v43 = vsub.f32 %v31832_v61, %v35216_v40 }
 0xa64   : > { %v15749_v45 = vand.u32 4294901760, %v31862_v60  ;;  %v15611_v41 = vand.u32 4294901760, %v15546_v19  ;;  %v23341_v30 = vpop.f32.mrb[72].mxu0 }
 0xa65   : > { %35217 = vst [vmem:[#allocation58_spill] sm:$0xff] %v31871_v43  ;;  %v15757_v22 = vsub.f32 %v31855_v38, %v15756_v26  ;;  %v31878_v20 = vsub.f32 %v15547_v33, %v15614_v0  ;;  %v15549_v47 = vmul.f32 %v31699_v12, %v23341_v30  ;;  %v12476_v1 = vpop.f32.mrb[73].mxu0 }
 0xa66   : > { %v15750_v40 = vsub.f32 %v31862_v60, %v15749_v45  ;;  %v31885_v61 = vpack.c.bf16 %v15614_v0, %v15611_v41  ;;  %v31887_v42 = vsub.f32 %v15546_v19, %v15611_v41  ;;  %v15548_v2 = vmul.f32 %v31701_v53, %v12476_v1 }
 0xa67   : > { %v15758_v29 = vand.u32 4294901760, %v15757_v22  ;;  %v15770_v28 = vand.u32 4294901760, %v31878_v20  ;;  %v15620_v7 = vand.u32 4294901760, %v15549_v47  ;;  %v31891_v33 = vpack.c.bf16 %v15756_v26, %v15749_v45 }
 0xa68   : > { %v15751_v32 = vand.u32 4294901760, %v15750_v40  ;;  %v15763_v12 = vand.u32 4294901760, %v31887_v42  ;;  %v15617_v30 = vand.u32 4294901760, %v15548_v2  ;;  %v23344_v16 = vpop.f32.mrb[74].mxu0 }
 0xa69   : > { %35219 = vst [vmem:[#allocation73_spill] sm:$0xff] %v31891_v33  ;;  %v15771_v0 = vsub.f32 %v31878_v20, %v15770_v28  ;;  %v31897_v19 = vsub.f32 %v15549_v47, %v15620_v7  ;;  %v15551_v53 = vmul.f32 %v31704_v37, %v23344_v16  ;;  %v12488_v1 = vpop.f32.mrb[75].mxu0 }
 0xa6a   : > { %v15764_v26 = vsub.f32 %v31887_v42, %v15763_v12  ;;  %v31902_v45 = vpack.c.bf16 %v15620_v7, %v15617_v30  ;;  %v31904_v22 = vsub.f32 %v15548_v2, %v15617_v30  ;;  %v15550_v40 = vmul.f32 %v31706_v55, %v12488_v1 }
 0xa6b   : > { %v15772_v46 = vand.u32 4294901760, %v15771_v0  ;;  %v15784_v33 = vand.u32 4294901760, %v31897_v19  ;;  %v15626_v39 = vand.u32 4294901760, %v15551_v53  ;;  %v31908_v13 = vpack.c.bf16 %v15758_v29, %v15751_v32 }
 0xa6c   : > { %v15765_v47 = vand.u32 4294901760, %v15764_v26  ;;  %v15777_v37 = vand.u32 4294901760, %v31904_v22  ;;  %v15623_v41 = vand.u32 4294901760, %v15550_v40  ;;  %v23347_v10 = vpop.f32.mrb[76].mxu0  ;;  %v31917_v0 = vpack.c.bf16 %v15770_v28, %v15763_v12 }
 0xa6d   : > { %35220 = vst [vmem:[#allocation74_spill] sm:$0xff] %v31908_v13  ;;  %v15785_v7 = vsub.f32 %v31897_v19, %v15784_v33  ;;  %v31914_v2 = vsub.f32 %v15551_v53, %v15626_v39  ;;  %v15553_v55 = vmul.f32 %v31708_v8, %v23347_v10  ;;  %v12500_v30 = vpop.f32.mrb[77].mxu0 }
 0xa6e   : > { %35221 = vst [vmem:[#allocation82_spill] sm:$0xff] %v31917_v0  ;;  %v15778_v32 = vsub.f32 %v31904_v22, %v15777_v37  ;;  %v31920_v29 = vpack.c.bf16 %v15626_v39, %v15623_v41  ;;  %v31922_v1 = vsub.f32 %v15550_v40, %v15623_v41  ;;  %v15552_v26 = vmul.f32 %v31710_v6, %v12500_v30 }
 0xa6f   : > { %v15786_v16 = vand.u32 4294901760, %v15785_v7  ;;  %v15798_v13 = vand.u32 4294901760, %v31914_v2  ;;  %v15632_v3 = vand.u32 4294901760, %v15553_v55  ;;  %v31926_v51 = vpack.c.bf16 %v15772_v46, %v15765_v47 }
 0xa70   : > { %v15779_v53 = vand.u32 4294901760, %v15778_v32  ;;  %v15791_v8 = vand.u32 4294901760, %v31922_v1  ;;  %v15629_v28 = vand.u32 4294901760, %v15552_v26  ;;  %v23350_v12 = vpop.f32.mrb[78].mxu0  ;;  %v31935_v7 = vpack.c.bf16 %v15784_v33, %v15777_v37 }
 0xa71   : > { %35222 = vst [vmem:[#allocation83_spill] sm:$0xff] %v31926_v51  ;;  %v15799_v39 = vsub.f32 %v31914_v2, %v15798_v13  ;;  %v31932_v41 = vsub.f32 %v15553_v55, %v15632_v3  ;;  %v15555_v6 = vmul.f32 %v31712_v34, %v23350_v12  ;;  %v12512_v40 = vpop.f32.mrb[79].mxu0 }
 0xa72   : > { %35223 = vst [vmem:[#allocation96_spill] sm:$0xff] %v31935_v7  ;;  %v15792_v46 = vsub.f32 %v31922_v1, %v15791_v8  ;;  %v31938_v47 = vpack.c.bf16 %v15632_v3, %v15629_v28  ;;  %v31940_v30 = vsub.f32 %v15552_v26, %v15629_v28  ;;  %v15554_v32 = vmul.f32 %v31714_v35, %v12512_v40 }
 0xa73   : > { %v15800_v10 = vand.u32 4294901760, %v15799_v39  ;;  %v15812_v0 = vand.u32 4294901760, %v31932_v41  ;;  %v15638_v51 = vand.u32 4294901760, %v15555_v6  ;;  %v31944_v21 = vpack.c.bf16 %v15786_v16, %v15779_v53 }
 0xa74   : > { %35224 = vst [vmem:[#allocation98_spill] sm:$0xff] %v31938_v47  ;;  %v15793_v55 = vand.u32 4294901760, %v15792_v46  ;;  %v15805_v34 = vand.u32 4294901760, %v31940_v30  ;;  %v15635_v37 = vand.u32 4294901760, %v15554_v32  ;;  %v23353_v12 = vpop.f32.mrb[80].mxu0  ;;  %v31953_v39 = vpack.c.bf16 %v15798_v13, %v15791_v8 }
 0xa75   : > { %35225 = vst [vmem:[#allocation107_spill] sm:$0xff] %v31944_v21  ;;  %v15813_v3 = vsub.f32 %v31932_v41, %v15812_v0  ;;  %v31950_v26 = vsub.f32 %v15555_v6, %v15638_v51  ;;  %v15557_v35 = vmul.f32 %v31716_v56, %v23353_v12  ;;  %v12524_v28 = vpop.f32.mrb[81].mxu0 }
 0xa76   : > { %35226 = vst [vmem:[#allocation113_spill] sm:$0xff] %v31953_v39  ;;  %v15806_v16 = vsub.f32 %v31940_v30, %v15805_v34  ;;  %v31956_v53 = vpack.c.bf16 %v15638_v51, %v15635_v37  ;;  %v31958_v40 = vsub.f32 %v15554_v32, %v15635_v37  ;;  %v15556_v46 = vmul.f32 %v31718_v9, %v12524_v28 }
 0xa77   : > { %v15814_v33 = vand.u32 4294901760, %v15813_v3  ;;  %v15826_v7 = vand.u32 4294901760, %v31950_v26  ;;  %v15644_v21 = vand.u32 4294901760, %v15557_v35  ;;  %v31962_v18 = vpack.c.bf16 %v15800_v10, %v15793_v55 }
 0xa78   : > { %35227 = vst [vmem:[#allocation119_spill] sm:$0xff] %v31956_v53  ;;  %v15807_v6 = vand.u32 4294901760, %v15806_v16  ;;  %v15819_v56 = vand.u32 4294901760, %v31958_v40  ;;  %v15641_v8 = vand.u32 4294901760, %v15556_v46  ;;  %v23356_v12 = vpop.f32.mrb[82].mxu0  ;;  %v31971_v3 = vpack.c.bf16 %v15812_v0, %v15805_v34 }
 0xa79   : > { %35228 = vst [vmem:[#allocation102_spill] sm:$0xff] %v31962_v18  ;;  %v15827_v51 = vsub.f32 %v31950_v26, %v15826_v7  ;;  %v31968_v32 = vsub.f32 %v15557_v35, %v15644_v21  ;;  %v15559_v9 = vmul.f32 %v31720_v5, %v23356_v12  ;;  %v12536_v37 = vpop.f32.mrb[83].mxu0 }
 0xa7a   : > { %35229 = vst [vmem:[#allocation110_spill] sm:$0xff] %v31971_v3  ;;  %v15820_v10 = vsub.f32 %v31958_v40, %v15819_v56  ;;  %v31974_v55 = vpack.c.bf16 %v15644_v21, %v15641_v8  ;;  %v31976_v28 = vsub.f32 %v15556_v46, %v15641_v8  ;;  %v15558_v16 = vmul.f32 %v31722_v23, %v12536_v37 }
 0xa7b   : > { %v15828_v13 = vand.u32 4294901760, %v15827_v51  ;;  %v15840_v39 = vand.u32 4294901760, %v31968_v32  ;;  %v15650_v18 = vand.u32 4294901760, %v15559_v9  ;;  %v31980_v43 = vpack.c.bf16 %v15814_v33, %v15807_v6 }
 0xa7c   : > { %35230 = vst [vmem:[#allocation114_spill] sm:$0xff] %v31974_v55  ;;  %35231 = vst [vmem:[#allocation116_spill] sm:$0xff] %v31976_v28  ;;  %v15821_v35 = vand.u32 4294901760, %v15820_v10  ;;  %v15833_v5 = vand.u32 4294901760, %v31976_v28  ;;  %v15647_v34 = vand.u32 4294901760, %v15558_v16  ;;  %v23359_v12 = vpop.f32.mrb[84].mxu0  ;;  %v31989_v51 = vpack.c.bf16 %v15826_v7, %v15819_v56 }
 0xa7d   : > { %35232 = vst [vmem:[#allocation16_spill] sm:$0xff] %v31980_v43  ;;  %v15841_v21 = vsub.f32 %v31968_v32, %v15840_v39  ;;  %v31986_v46 = vsub.f32 %v15559_v9, %v15650_v18  ;;  %v15561_v23 = vmul.f32 %v31724_v31, %v23359_v12  ;;  %v12548_v8 = vpop.f32.mrb[85].mxu0 }
 0xa7e   : > { %35234 = vst [vmem:[#allocation132_spill] sm:$0xff] %v31989_v51  ;;  %v15834_v33 = vsub.f32 %v31976_v28, %v15833_v5  ;;  %v31992_v6 = vpack.c.bf16 %v15650_v18, %v15647_v34  ;;  %v31994_v37 = vsub.f32 %v15558_v16, %v15647_v34  ;;  %v15560_v10 = vmul.f32 %v31726_v44, %v12548_v8 }
 0xa7f   : > { %35233 = vst [vmem:[#allocation7_spill] sm:$0xff] %v31986_v46  ;;  %v15842_v0 = vand.u32 4294901760, %v15841_v21  ;;  %v15854_v3 = vand.u32 4294901760, %v31986_v46  ;;  %v15656_v43 = vand.u32 4294901760, %v15561_v23  ;;  %v31998_v27 = vpack.c.bf16 %v15828_v13, %v15821_v35 }
 0xa80   : > { %35235 = vst [vmem:[#allocation131_spill] sm:$0xff] %v31992_v6  ;;  %v15835_v9 = vand.u32 4294901760, %v15834_v33  ;;  %v15847_v31 = vand.u32 4294901760, %v31994_v37  ;;  %v15653_v56 = vand.u32 4294901760, %v15560_v10  ;;  %v23362_v12 = vpop.f32.mrb[86].mxu0  ;;  %v32005_v21 = vpack.c.bf16 %v15840_v39, %v15833_v5 }
 0xa81   : > { %35236 = vst [vmem:[#allocation136_spill] sm:$0xff] %v31998_v27  ;;  %v15855_v18 = vsub.f32 %v31986_v46, %v15854_v3  ;;  %v15867_v16 = vsub.f32 %v15561_v23, %v15656_v43  ;;  %v15563_v34 = vmul.f32 %v31728_v25, %v23362_v12  ;;  %v12560_v44 = vpop.f32.mrb[87].mxu0 }
 0xa82   : > { %v15848_v8 = vsub.f32 %v31994_v37, %v15847_v31  ;;  %v15860_v13 = vsub.f32 %v15560_v10, %v15653_v56  ;;  %v15562_v35 = vmul.f32 %v31730_v62, %v12560_v44  ;;  %v32009_v33 = vpack.c.bf16 %v15656_v43, %v15653_v56 }
 0xa83   : > { %v15856_v51 = vand.u32 4294901760, %v15855_v18  ;;  %v15868_v27 = vand.u32 4294901760, %v15867_v16  ;;  %v15662_v7 = vand.u32 4294901760, %v15563_v34  ;;  %v32011_v6 = vpack.c.bf16 %v15842_v0, %v15835_v9 }
 0xa84   : > { %v15849_v52 = vand.u32 4294901760, %v15848_v8  ;;  %v15861_v46 = vand.u32 4294901760, %v15860_v13  ;;  %v15659_v23 = vand.u32 4294901760, %v15562_v35  ;;  %v23365_v28 = vpop.f32.mrb[88].mxu0  ;;  %24777 = vmatprep.subr.bf16.mxu0 %v32009_v33  ;;  %v24840_v25 = vpack.c.bf16 %v15867_v16, %v15860_v13 }
 0xa85   : > { %v15881_v39 = vsub.f32 %v15563_v34, %v15662_v7  ;;  %v15565_v5 = vmul.f32 %v31732_v24, %v23365_v28  ;;  %v12572_v10 = vpop.f32.mrb[89].mxu0  ;;  %24779 = vmatpush3.bf16.msra.mxu0 %v31860_v4  ;;  %v15869_v62 = vsub.f32 %v15867_v16, %v15868_v27  ;;  %v32016_v43 = vpack.c.bf16 %v15854_v3, %v15847_v31 }
 0xa86   : > { %v15874_v56 = vsub.f32 %v15562_v35, %v15659_v23  ;;  %v15564_v0 = vmul.f32 %v31734_v58, %v12572_v10  ;;  %24841 = vmatprep.subr.bf16.mxu1 %v24840_v25  ;;  %v32019_v9 = vpack.c.bf16 %v15662_v7, %v15659_v23  ;;  %v15862_v12 = vsub.f32 %v15860_v13, %v15861_v46 }
 0xa87   : > { %v15882_v18 = vand.u32 4294901760, %v15881_v39  ;;  %v15668_v44 = vand.u32 4294901760, %v15565_v5  ;;  %v35237_v34 = vpack.c.bf16 %v31855_v38, %v31862_v60  ;;  %v15870_v24 = vand.u32 4294901760, %v15869_v62 }
 0xa88   : > { %v32024_v28 = vpack.c.bf16 %v15868_v27, %v15861_v46  ;;  %v15875_v8 = vand.u32 4294901760, %v15874_v56  ;;  %v15665_v16 = vand.u32 4294901760, %v15564_v0  ;;  %v23368_v3 = vpop.f32.mrb[90].mxu0  ;;  %24781 = vmatprep.subr.bf16.mxu0 %v32019_v9  ;;  %v24844_v31 = vpack.c.bf16 %v15881_v39, %v15874_v56 }
 0xa89   : > { %24843 = vmatpush3.bf16.msra.mxu1 %v35237_v34  ;;  %v15863_v58 = vand.u32 4294901760, %v15862_v12  ;;  %v15895_v35 = vsub.f32 %v15565_v5, %v15668_v44  ;;  %v15567_v7 = vmul.f32 %v31736_v15, %v23368_v3  ;;  %v12584_v13 = vpop.f32.mrb[91].mxu0  ;;  %24783 = vmatpush3.bf16.msra.mxu0 %v31885_v61  ;;  %v15883_v23 = vsub.f32 %v15881_v39, %v15882_v18 }
 0xa8a   : > { %v32029_v25 = vpack.c.bf16 %v15856_v51, %v15849_v52  ;;  %v15888_v60 = vsub.f32 %v15564_v0, %v15665_v16  ;;  %v15566_v27 = vmul.f32 %v31738_v36, %v12584_v13  ;;  %24845 = vmatprep.subr.bf16.mxu1 %v24844_v31  ;;  %v32032_v38 = vpack.c.bf16 %v15668_v44, %v15665_v16 }
 0xa8b   : > { %v32034_v46 = vpack.c.bf16 %v15870_v24, %v15863_v58  ;;  %v15896_v10 = vand.u32 4294901760, %v15895_v35  ;;  %v15674_v62 = vand.u32 4294901760, %v15567_v7  ;;  %v35238_v5 = vpack.c.bf16 %v31878_v20, %v31887_v42 }
 0xa8c   : > { %v15876_v15 = vsub.f32 %v15874_v56, %v15875_v8  ;;  %v15884_v12 = vand.u32 4294901760, %v15883_v23  ;;  %v15889_v34 = vand.u32 4294901760, %v15888_v60  ;;  %v15671_v39 = vand.u32 4294901760, %v15566_v27  ;;  %v23371_v52 = vpop.f32.mrb[92].mxu0  ;;  %24785 = vmatprep.subr.bf16.mxu0 %v32032_v38 }
 0xa8d   : > { %24847 = vmatpush3.bf16.msra.mxu1 %v35238_v5  ;;  %v24848_v51 = vpack.c.bf16 %v15895_v35, %v15888_v60  ;;  %v32040_v36 = vpack.c.bf16 %v15882_v18, %v15875_v8  ;;  %v15909_v0 = vsub.f32 %v15567_v7, %v15674_v62  ;;  %v15569_v44 = vmul.f32 %v31740_v59, %v23371_v52  ;;  %v12596_v24 = vpop.f32.mrb[93].mxu0 }
 0xa8e   : > { %24787 = vmatpush3.bf16.msra.mxu0 %v31902_v45  ;;  %v15877_v16 = vand.u32 4294901760, %v15876_v15  ;;  %v15897_v3 = vsub.f32 %v15895_v35, %v15896_v10  ;;  %v15902_v42 = vsub.f32 %v15566_v27, %v15671_v39  ;;  %v15568_v20 = vmul.f32 %v31742_v48, %v12596_v24 }
 0xa8f   : > { %24849 = vmatprep.subr.bf16.mxu1 %v24848_v51  ;;  %v32045_v56 = vpack.c.bf16 %v15674_v62, %v15671_v39  ;;  %v15890_v31 = vsub.f32 %v15888_v60, %v15889_v34  ;;  %v15910_v58 = vand.u32 4294901760, %v15909_v0  ;;  %v15680_v13 = vand.u32 4294901760, %v15569_v44 }
 0xa90   : > { %v35239_v18 = vpack.c.bf16 %v31897_v19, %v31904_v22  ;;  %v32050_v8 = vpack.c.bf16 %v15884_v12, %v15877_v16  ;;  %v15898_v59 = vand.u32 4294901760, %v15897_v3  ;;  %v15903_v7 = vand.u32 4294901760, %v15902_v42  ;;  %v23374_v5 = vpop.f32.mrb[94].mxu0 }
 0xa91   : > { %v15677_v23 = vand.u32 4294901760, %v15568_v20  ;;  %24789 = vmatprep.subr.bf16.mxu0 %v32045_v56  ;;  %v24852_v35 = vpack.c.bf16 %v15909_v0, %v15902_v42  ;;  %v15891_v48 = vand.u32 4294901760, %v15890_v31  ;;  %v15923_v27 = vsub.f32 %v15569_v44, %v15680_v13  ;;  %v12608_v60 = vpop.f32.mrb[95].mxu0 }
 0xa92   : > { %24851 = vmatpush3.bf16.msra.mxu1 %v35239_v18  ;;  %v15571_v62 = vmul.f32 %v31744_v63, %v23374_v5  ;;  %24791 = vmatpush3.bf16.msra.mxu0 %v31920_v29  ;;  %v32055_v15 = vpack.c.bf16 %v15896_v10, %v15889_v34  ;;  %v15911_v19 = vsub.f32 %v15909_v0, %v15910_v58 }
 0xa93   : > { %v15916_v22 = vsub.f32 %v15568_v20, %v15677_v23  ;;  %v15570_v12 = vmul.f32 %v31746_v11, %v12608_v60  ;;  %24853 = vmatprep.subr.bf16.mxu1 %v24852_v35  ;;  %v32058_v39 = vpack.c.bf16 %v15680_v13, %v15677_v23  ;;  %v32060_v52 = vpack.c.bf16 %v15898_v59, %v15891_v48 }
 0xa94   : > { %v15924_v51 = vand.u32 4294901760, %v15923_v27  ;;  %v15686_v24 = vand.u32 4294901760, %v15571_v62  ;;  %v35240_v44 = vpack.c.bf16 %v31914_v2, %v31922_v1  ;;  %v15904_v63 = vsub.f32 %v15902_v42, %v15903_v7  ;;  %v23377_v34 = vpop.f32.mrb[96].mxu0 }
 0xa95   : > { %v15912_v16 = vand.u32 4294901760, %v15911_v19  ;;  %v15917_v3 = vand.u32 4294901760, %v15916_v22  ;;  %v15683_v10 = vand.u32 4294901760, %v15570_v12  ;;  %24793 = vmatprep.subr.bf16.mxu0 %v32058_v39  ;;  %v24856_v0 = vpack.c.bf16 %v15923_v27, %v15916_v22  ;;  %v12620_v13 = vpop.f32.mrb[97].mxu0 }
 0xa96   : > { %24855 = vmatpush3.bf16.msra.mxu1 %v35240_v44  ;;  %v32066_v11 = vpack.c.bf16 %v15910_v58, %v15903_v7  ;;  %v15937_v20 = vsub.f32 %v15571_v62, %v15686_v24  ;;  %v15573_v31 = vmul.f32 %v31748_v54, %v23377_v34  ;;  %24795 = vmatpush3.bf16.msra.mxu0 %v31938_v47  ;;  %v15905_v18 = vand.u32 4294901760, %v15904_v63 }
 0xa97   : > { %v15925_v59 = vsub.f32 %v15923_v27, %v15924_v51  ;;  %v15930_v2 = vsub.f32 %v15570_v12, %v15683_v10  ;;  %v15572_v1 = vmul.f32 %v31750_v50, %v12620_v13  ;;  %24857 = vmatprep.subr.bf16.mxu1 %v24856_v0  ;;  %v32071_v42 = vpack.c.bf16 %v15686_v24, %v15683_v10 }
 0xa98   : > { %v15918_v23 = vsub.f32 %v15916_v22, %v15917_v3  ;;  %v15938_v5 = vand.u32 4294901760, %v15937_v20  ;;  %v15692_v35 = vand.u32 4294901760, %v15573_v31  ;;  %v35242_v58 = vpack.c.bf16 %v31932_v41, %v31940_v30  ;;  %v23380_v60 = vpop.f32.mrb[98].mxu0 }
 0xa99   : > { %35241 = vst [vmem:[#allocation135_spill] sm:$0xff] %v32071_v42  ;;  %v32076_v7 = vpack.c.bf16 %v15912_v16, %v15905_v18  ;;  %v15926_v54 = vand.u32 4294901760, %v15925_v59  ;;  %v15931_v48 = vand.u32 4294901760, %v15930_v2  ;;  %v15689_v62 = vand.u32 4294901760, %v15572_v1  ;;  %24797 = vmatprep.subr.bf16.mxu0 %v32071_v42  ;;  %v12632_v22 = vpop.f32.mrb[99].mxu0  ;;  %v35311_v42 = vld [vmem:[#allocation24_spill] sm:$0xff] }
 0xa9a   : > { %24859 = vmatpush3.bf16.msra.mxu1 %v35242_v58  ;;  %v24860_v27 = vpack.c.bf16 %v15937_v20, %v15930_v2  ;;  %v15919_v50 = vand.u32 4294901760, %v15918_v23  ;;  %v15951_v19 = vsub.f32 %v15573_v31, %v15692_v35  ;;  %v15575_v12 = vmul.f32 %v31752_v17, %v23380_v60  ;;  %24799 = vmatpush3.bf16.msra.mxu0 %v31956_v53 }
 0xa9b   : > { %v32081_v24 = vpack.c.bf16 %v15924_v51, %v15917_v3  ;;  %v15939_v41 = vsub.f32 %v15937_v20, %v15938_v5  ;;  %v15944_v30 = vsub.f32 %v15572_v1, %v15689_v62  ;;  %v15574_v44 = vmul.f32 %v31757_v49, %v12632_v22 }
 0xa9c   : > { %24861 = vmatprep.subr.bf16.mxu1 %v24860_v27  ;;  %v32084_v63 = vpack.c.bf16 %v15692_v35, %v15689_v62  ;;  %v32086_v16 = vpack.c.bf16 %v15926_v54, %v15919_v50  ;;  %v15952_v10 = vand.u32 4294901760, %v15951_v19  ;;  %v15698_v34 = vand.u32 4294901760, %v15575_v12  ;;  %v23383_v3 = vpop.f32.mrb[100].mxu0 }
 0xa9d   : > { %v35244_v0 = vpack.c.bf16 %v31950_v26, %v31958_v40  ;;  %v15932_v17 = vsub.f32 %v15930_v2, %v15931_v48  ;;  %v15940_v31 = vand.u32 4294901760, %v15939_v41  ;;  %v15945_v13 = vand.u32 4294901760, %v15944_v30  ;;  %v12644_v1 = vpop.f32.mrb[101].mxu0  ;;  %v35248_v41 = vld [vmem:[#allocation45_spill] sm:$0xff] }
 0xa9e   : > { %35243 = vst [vmem:[#allocation142_spill] sm:$0xff] %v32084_v63  ;;  %v15695_v51 = vand.u32 4294901760, %v15574_v44  ;;  %24801 = vmatprep.subr.bf16.mxu0 %v32084_v63  ;;  %v24864_v20 = vpack.c.bf16 %v15951_v19, %v15944_v30  ;;  %v32092_v49 = vpack.c.bf16 %v15938_v5, %v15931_v48  ;;  %v32094_v18 = vsub.f32 %v15575_v12, %v15698_v34  ;;  %v35246_v48 = vld [vmem:[#allocation116_spill] sm:$0xff] }
 0xa9f   : > { %24863 = vmatpush3.bf16.msra.mxu1 %v35244_v0  ;;  %v15577_v59 = vmul.f32 %v31764_v57, %v23383_v3  ;;  %24803 = vmatpush3.bf16.msra.mxu0 %v31974_v55  ;;  %v15933_v23 = vand.u32 4294901760, %v15932_v17  ;;  %v15953_v26 = vsub.f32 %v15951_v19, %v15952_v10  ;;  %v15576_v2 = vmul.f32 %v31766_v14, %v12644_v1  ;;  %v35301_v63 = vld [vmem:[#allocation136_spill] sm:$0xff] }
 0xaa0   : > { %v32098_v40 = vsub.f32 %v15574_v44, %v15695_v51  ;;  %24865 = vmatprep.subr.bf16.mxu1 %v24864_v20  ;;  %v32101_v35 = vpack.c.bf16 %v15698_v34, %v15695_v51  ;;  %v15946_v58 = vsub.f32 %v15944_v30, %v15945_v13  ;;  %v34058_v5 = vand.u32 4294901760, %v32094_v18  ;;  %v23386_v19 = vpop.f32.mrb[102].mxu0  ;;  %v35251_v51 = vld [vmem:[#allocation47_spill] sm:$0xff]  ;;  %v35252_v20 = vld [vmem:[#allocation58_spill] sm:$0xff] }
 0xaa1   : > { %v16582_v54 = vand.u32 4294901760, %v15577_v59  ;;  %v35247_v62 = vpack.c.bf16 %v31968_v32, %v35246_v48  ;;  %v32107_v57 = vpack.c.bf16 %v15940_v31, %v15933_v23  ;;  %v15954_v60 = vand.u32 4294901760, %v15953_v26  ;;  %v12656_v44 = vpop.f32.mrb[103].mxu0  ;;  %v35249_v32 = vld [vmem:[#allocation131_spill] sm:$0xff] }
 0xaa2   : > { %35245 = vst [vmem:[#allocation140_spill] sm:$0xff] %v32101_v35  ;;  %v15959_v27 = vand.u32 4294901760, %v32098_v40  ;;  %v16579_v50 = vand.u32 4294901760, %v15576_v2  ;;  %24805 = vmatprep.subr.bf16.mxu0 %v32101_v35  ;;  %v24868_v14 = vpack.c.bf16 %v32094_v18, %v32098_v40  ;;  %v15947_v12 = vand.u32 4294901760, %v15946_v58  ;;  %v35253_v23 = vld [vmem:[#allocation7_spill] sm:$0xff]  ;;  %v35288_v35 = vld [vmem:[#allocation78_spill] sm:$0xff] }
 0xaa3   : > { %24867 = vmatpush3.bf16.msra.mxu1 %v35247_v62  ;;  %v32113_v22 = vsub.f32 %v15577_v59, %v16582_v54  ;;  %v15579_v30 = vmul.f32 %v35248_v41, %v23386_v19  ;;  %24807 = vmatpush3.bf16.msra.mxu0 %v35249_v32  ;;  %v32117_v34 = vpack.c.bf16 %v15952_v10, %v15945_v13  ;;  %v15725_v59 = vand.u32 4294901760, %v35252_v20  ;;  %v35259_v19 = vld [vmem:[#allocation60_spill] sm:$0xff] }
 0xaa4   : > { %v15967_v0 = vsub.f32 %v32094_v18, %v34058_v5  ;;  %v32122_v17 = vpack.c.bf16 %v16582_v54, %v16579_v50  ;;  %v32124_v31 = vsub.f32 %v15576_v2, %v16579_v50  ;;  %v15578_v3 = vmul.f32 %v35251_v51, %v12656_v44  ;;  %24809 = vmatprep.subr.bf16.mxu0 %v32034_v46  ;;  %v35255_v2 = vld [vmem:[#allocation50_spill] sm:$0xff]  ;;  %v23389_v62 = vpop.f32.mrb[104].mxu0  ;;  %v35257_v50 = vld [vmem:[#allocation44_spill] sm:$0xff]  ;;  %v35261_v44 = vld [vmem:[#allocation51_spill] sm:$0xff] }
 0xaa5   : > { %24869 = vmatprep.subr.bf16.mxu1 %v24868_v14  ;;  %v16588_v1 = vand.u32 4294901760, %v15579_v30  ;;  %v35254_v10 = vpack.c.bf16 %v35253_v23, %v31994_v37  ;;  %v32132_v13 = vpack.c.bf16 %v15954_v60, %v15947_v12  ;;  %v15960_v26 = vsub.f32 %v32098_v40, %v15959_v27  ;;  %v12668_v20 = vpop.f32.mrb[105].mxu0  ;;  %v35262_v23 = vld [vmem:[#allocation74_spill] sm:$0xff] }
 0xaa6   : > { %35250 = vst [vmem:[#allocation106_spill] sm:$0xff] %v32122_v17  ;;  %v35256_v58 = vand.u32 4294901760, %v35255_v2  ;;  %v16585_v48 = vand.u32 4294901760, %v15578_v3  ;;  %v35258_v37 = vand.u32 4294901760, %v35257_v50  ;;  %v15968_v60 = vand.u32 4294901760, %v15967_v0 }
 0xaa7   : > { %24871 = vmatpush3.bf16.msra.mxu1 %v35254_v10  ;;  %v35260_v14 = vand.u32 4294901760, %v35259_v19  ;;  %v32148_v41 = vsub.f32 %v15579_v30, %v16588_v1  ;;  %v15581_v51 = vmul.f32 %v35261_v44, %v23389_v62  ;;  %v35263_v10 = vld [vmem:[#allocation46_spill] sm:$0xff]  ;;  %v15961_v46 = vand.u32 4294901760, %v15960_v26 }
 0xaa8   : > { %v15733_v54 = vsub.f32 %v35255_v2, %v35256_v58  ;;  %24905 = vmatprep.subr.bf16.mxu1 %v32024_v28  ;;  %15711 = vmatmul.mubr.f32.vlgmr.msra.gmra.mrb[118].mxu0 %v35258_v37  ;;  %v35264_v58 = vand.u32 4294901760, %v35263_v10  ;;  %v34059_v28 = vand.u32 4294901760, %v32113_v22  ;;  %v32155_v50 = vpack.c.bf16 %v16588_v1, %v16585_v48  ;;  %v35266_v37 = vld [vmem:[#allocation57_spill] sm:$0xff] }
 0xaa9   : > { %v15739_v12 = vsub.f32 %v35259_v19, %v35260_v14  ;;  %24811 = vmatpush3.bf16.msra.mxu0 %v35262_v23  ;;  %v32157_v0 = vsub.f32 %v15578_v3, %v16585_v48  ;;  %v15580_v5 = vmul.f32 %v35266_v37, %v12668_v20  ;;  %v34060_v30 = vand.u32 4294901760, %v32124_v31  ;;  %v35267_v14 = vld [vmem:[#allocation27_spill] sm:$0xff]  ;;  %v35268_v3 = vld [vmem:[#allocation73_spill] sm:$0xff]  ;;  %v23392_v48 = vpop.f32.mrb[106].mxu0 }
 0xaaa   : > { %15720 = vmatprep.mubr.f32.mxu0 %v35264_v58  ;;  %35265 = vst [vmem:[#allocation145_spill] sm:$0xff] %v32155_v50  ;;  %24813 = vmatprep.subr.bf16.mxu0 %v32050_v8  ;;  %v16594_v62 = vand.u32 4294901760, %v15581_v51  ;;  %v32163_v44 = vpack.c.bf16 %v15968_v60, %v15961_v46  ;;  %v15734_v23 = vand.u32 4294901760, %v15733_v54  ;;  %v34061_v26 = vand.u32 4294901760, %v32148_v41  ;;  %v35269_v58 = vld [vmem:[#allocation59_spill] sm:$0xff]  ;;  %v12680_v46 = vpop.f32.mrb[107].mxu0 }
 0xaab   : > { %16125 = vmatmul.mubr.f32.vlgmr.msra.gmra.mrb[114].mxu1 %v35267_v14  ;;  %v16591_v10 = vand.u32 4294901760, %v15580_v5  ;;  %v15740_v20 = vand.u32 4294901760, %v15739_v12  ;;  %v15583_v37 = vmul.f32 %v35269_v58, %v23392_v48  ;;  %v35270_v60 = vld [vmem:[#allocation83_spill] sm:$0xff]  ;;  %v32177_v54 = vsub.f32 %v32113_v22, %v34059_v28 }
 0xaac   : > { %24907 = vmatpush3.bf16.msra.mxu1 %v35268_v3  ;;  %15726 = vmatmul.mubr.f32.gmra.mrb[120].mxu0 %v15725_v59  ;;  %v32169_v8 = vsub.f32 %v15581_v51, %v16594_v62  ;;  %v35272_v59 = vld [vmem:[#allocation63_spill] sm:$0xff]  ;;  %v32191_v51 = vsub.f32 %v32124_v31, %v34060_v30  ;;  %v23395_v28 = vpop.f32.mrb[108].mxu0 }
 0xaad   : > { %24909 = vmatprep.subr.bf16.mxu1 %v32040_v36  ;;  %24815 = vmatpush3.bf16.msra.mxu0 %v35270_v60  ;;  %v32179_v1 = vpack.c.bf16 %v16594_v62, %v16591_v10  ;;  %v32181_v3 = vsub.f32 %v15580_v5, %v16591_v10  ;;  %v15582_v12 = vmul.f32 %v35272_v59, %v12680_v46  ;;  %v15535_v36 = vld [vmem:[%s33247_s24 + $0x18] sm:$0xff]  ;;  %v16600_v58 = vand.u32 4294901760, %v15583_v37  ;;  %v35273_v62 = vld [vmem:[#allocation28_spill] sm:$0xff]  ;;  %v35275_v59 = vld [vmem:[#allocation82_spill] sm:$0xff] }
 0xaae   : > { %24817 = vmatprep.subr.bf16.mxu0 %v32060_v52  ;;  %16131 = vmatprep.mubr.f32.mxu1 %v35273_v62  ;;  %v35274_v5 = vand.u32 4294901760, %v32094_v18  ;;  %v32204_v10 = vsub.f32 %v32148_v41, %v34061_v26  ;;  %v35276_v18 = vld [vmem:[#allocation67_spill] sm:$0xff]  ;;  %v15596_v26 = vsel %vm15594_vm8, %v15535_v36, 0 }
 0xaaf   : > { %35271 = vst [vmem:[#allocation149_spill] sm:$0xff] %v32179_v1  ;;  %15735 = vmatprep.mubr.f32.mxu0 %v15734_v23  ;;  %v16597_v60 = vand.u32 4294901760, %v15582_v12  ;;  %v34065_v23 = vand.u32 4294901760, %v32169_v8  ;;  %v32210_v40 = vsub.f32 %v15583_v37, %v16600_v58  ;;  %v35277_v30 = vld [vmem:[#allocation107_spill] sm:$0xff]  ;;  %v35289_v37 = vand.u32 4294901760, %v32181_v3 }
 0xab0   : > { %v32199_v52 = vpack.c.bf16 %v35274_v5, %v15959_v27  ;;  %24911 = vmatpush3.bf16.msra.mxu1 %v35275_v59  ;;  %15741 = vmatmul.mubr.f32.gmra.mrb[122].mxu0 %v15740_v20  ;;  %v15585_v27 = vmul.f32 %v35276_v18, %v23395_v28  ;;  %v12692_v5 = vpop.f32.mrb[109].mxu0  ;;  %v35279_v20 = vld [vmem:[#allocation75_spill] sm:$0xff]  ;;  %v35280_v28 = vand.u32 4294901760, %v32157_v0 }
 0xab1   : > { %24913 = vmatprep.subr.bf16.mxu1 %v32055_v15  ;;  %24819 = vmatpush3.bf16.msra.mxu0 %v35277_v30  ;;  %v32217_v48 = vpack.c.bf16 %v16600_v58, %v16597_v60  ;;  %v32219_v59 = vsub.f32 %v15582_v12, %v16597_v60  ;;  %v15584_v62 = vmul.f32 %v35279_v20, %v12692_v5  ;;  %v35281_v18 = vld [vmem:[#allocation71_spill] sm:$0xff]  ;;  %v35282_v58 = vld [vmem:[#allocation37_spill] sm:$0xff]  ;;  %v35283_v5 = vld [vmem:[#allocation96_spill] sm:$0xff]  ;;  %v23398_v20 = vpop.f32.mrb[110].mxu0 }
 0xab2   : > { %24821 = vmatprep.subr.bf16.mxu0 %v32076_v7  ;;  %v32227_v15 = vsub.f32 %v32157_v0, %v35280_v28  ;;  %v16606_v36 = vand.u32 4294901760, %v15585_v27  ;;  %16134 = vmatmul.mubr.f32.gmra.mrb[116].mxu1 %v35281_v18  ;;  %v32237_v28 = vand.u32 4294901760, %v15596_v26  ;;  %v32242_v46 = vsub.f32 %v32169_v8, %v34065_v23  ;;  %v35285_v12 = vld [vmem:[#allocation77_spill] sm:$0xff]  ;;  %v12704_v60 = vpop.f32.mrb[111].mxu0 }
 0xab3   : > { %35278 = vst [vmem:[#allocation148_spill] sm:$0xff] %v32217_v48  ;;  %15971 = vmatprep.mubr.f32.mxu0 %v35282_v58  ;;  %v16603_v7 = vand.u32 4294901760, %v15584_v62  ;;  %16140 = vmatprep.mubr.f32.mxu1 %v35255_v2  ;;  %v15587_v18 = vmul.f32 %v35285_v12, %v23398_v20  ;;  %v15586_v23 = vmul.f32 %v35288_v35, %v12704_v60  ;;  %v35290_v60 = vld [vmem:[#allocation113_spill] sm:$0xff]  ;;  %v35293_v2 = vld [vmem:[#allocation16_spill] sm:$0xff] }
 0xab4   : > { %24915 = vmatpush3.bf16.msra.mxu1 %v35283_v5  ;;  %35284 = vst [vmem:[#allocation153_spill] sm:$0xff] %v32237_v28  ;;  %v32245_v30 = vsub.f32 %v15585_v27, %v16606_v36  ;;  %v35286_v5 = vld [vmem:[#allocation102_spill] sm:$0xff]  ;;  %v32261_v12 = vsub.f32 %v32181_v3, %v35289_v37 }
 0xab5   : > { %24917 = vmatprep.subr.bf16.mxu1 %v32066_v11  ;;  %24823 = vmatpush3.bf16.msra.mxu0 %v35286_v5  ;;  %v32251_v14 = vpack.c.bf16 %v16606_v36, %v16603_v7  ;;  %v32253_v32 = vsub.f32 %v15584_v62, %v16603_v7  ;;  %v16612_v20 = vand.u32 4294901760, %v15587_v18  ;;  %v16609_v35 = vand.u32 4294901760, %v15586_v23  ;;  %v35292_v11 = vld [vmem:[#allocation92_spill] sm:$0xff] }
 0xab6   : > { %24825 = vmatprep.subr.bf16.mxu0 %v32086_v16  ;;  %16143 = vmatmul.mubr.f32.gmra.mrb[118].mxu1 %v35259_v19  ;;  %v23401_v16 = vpop.f32.mrb[112].mxu0  ;;  %v32271_v7 = vsub.f32 %v15596_v26, %v32237_v28  ;;  %v35291_v5 = vand.u32 4294901760, %v32210_v40 }
 0xab7   : > { %35287 = vst [vmem:[#allocation152_spill] sm:$0xff] %v32251_v14  ;;  %16439 = vmatprep.mubr.f32.mxu1 %v35282_v58  ;;  %v32279_v36 = vsub.f32 %v15587_v18, %v16612_v20  ;;  %v15589_v62 = vmul.f32 %v35292_v11, %v23401_v16  ;;  %v35294_v58 = vand.u32 4294901760, %v32219_v59  ;;  %v32289_v37 = vpack.c.bf16 %v16612_v20, %v16609_v35 }
 0xab8   : > { %24919 = vmatpush3.bf16.msra.mxu1 %v35290_v60  ;;  %v32277_v27 = vsub.f32 %v32210_v40, %v35291_v5  ;;  %v12716_v60 = vpop.f32.mrb[113].mxu0  ;;  %v32291_v28 = vsub.f32 %v15586_v23, %v16609_v35  ;;  %v35296_v5 = vld [vmem:[#allocation97_spill] sm:$0xff] }
 0xab9   : > { %24921 = vmatprep.subr.bf16.mxu1 %v32081_v24  ;;  %24827 = vmatpush3.bf16.msra.mxu0 %v35293_v2  ;;  %v32287_v26 = vsub.f32 %v32219_v59, %v35294_v58  ;;  %35295 = vst [vmem:[#allocation157_spill] sm:$0xff] %v32289_v37  ;;  %v15588_v19 = vmul.f32 %v35296_v5, %v12716_v60  ;;  %v35297_v24 = vand.u32 4294901760, %v32245_v30  ;;  %v34078_v2 = vand.u32 4294901760, %v32279_v36  ;;  %v35299_v60 = vld [vmem:[#allocation110_spill] sm:$0xff]  ;;  %v23404_v5 = vpop.f32.mrb[114].mxu0 }
 0xaba   : > { %24829 = vmatprep.subr.bf16.mxu0 %v32107_v57  ;;  %v16618_v16 = vand.u32 4294901760, %v15589_v62  ;;  %v35298_v58 = vand.u32 4294901760, %v32253_v32  ;;  %v12728_v23 = vpop.f32.mrb[115].mxu0 }
 0xabb   : > { %v32299_v11 = vsub.f32 %v32245_v30, %v35297_v24  ;;  %v16615_v35 = vand.u32 4294901760, %v15588_v19  ;;  %v16760_v24 = vand.u32 4294901760, %v32277_v27  ;;  %v32315_v18 = vsub.f32 %v32279_v36, %v34078_v2  ;;  %v35304_v27 = vld [vmem:[#allocation109_spill] sm:$0xff] }
 0xabc   : > { %v32305_v20 = vsub.f32 %v32253_v32, %v35298_v58  ;;  %24923 = vmatpush3.bf16.msra.mxu1 %v35299_v60  ;;  %v32317_v55 = vsub.f32 %v15589_v62, %v16618_v16  ;;  %v35300_v58 = vld [vmem:[#allocation100_spill] sm:$0xff]  ;;  %v16753_v57 = vand.u32 4294901760, %v32287_v26  ;;  %v15590_v14 = vmul.f32 %v35304_v27, %v12728_v23  ;;  %v35308_v27 = vld [vmem:[#allocation115_spill] sm:$0xff] }
 0xabd   : > { %v15591_v37 = vmul.f32 %v35300_v58, %v23404_v5  ;;  %24925 = vmatprep.subr.bf16.mxu1 %v32092_v49  ;;  %24831 = vmatpush3.bf16.msra.mxu0 %v35301_v63  ;;  %v32323_v60 = vpack.c.bf16 %v16618_v16, %v16615_v35  ;;  %v32325_v53 = vsub.f32 %v15588_v19, %v16615_v35  ;;  %v16774_v62 = vand.u32 4294901760, %v32299_v11  ;;  %v35306_v23 = vld [vmem:[#allocation132_spill] sm:$0xff] }
 0xabe   : > { %24833 = vmatprep.subr.bf16.mxu0 %v32132_v13  ;;  %v35305_v2 = vand.u32 4294901760, %v32291_v28  ;;  %v34084_v49 = vand.u32 4294901760, %v32317_v55  ;;  %v16767_v63 = vand.u32 4294901760, %v32305_v20  ;;  %v16621_v16 = vand.u32 4294901760, %v15590_v14  ;;  %v23407_v13 = vpop.f32.mrb[116].mxu0 }
 0xabf   : > { %35302 = vst [vmem:[#allocation156_spill] sm:$0xff] %v32323_v60  ;;  %35303 = vst [vmem:[#allocation161_spill] sm:$0xff] %v32325_v53  ;;  %v16624_v58 = vand.u32 4294901760, %v15591_v37  ;;  %v34086_v26 = vand.u32 4294901760, %v32325_v53  ;;  %v16788_v11 = vand.u32 4294901760, %v32315_v18  ;;  %v15593_v60 = vmul.f32 %v35308_v27, %v23407_v13  ;;  %v12740_v20 = vpop.f32.mrb[117].mxu0 }
 0xac0   : > { %v16780_v5 = vsub.f32 %v32291_v28, %v35305_v2  ;;  %24927 = vmatpush3.bf16.msra.mxu1 %v35306_v23  ;;  %v16801_v2 = vsub.f32 %v32317_v55, %v34084_v49  ;;  %v32353_v18 = vsub.f32 %v15590_v14, %v16621_v16  ;;  %v15592_v47 = vmul.f32 %v35311_v42, %v12740_v20 }
 0xac1   : > { %v32343_v35 = vsub.f32 %v15591_v37, %v16624_v58  ;;  %24929 = vmatprep.subr.bf16.mxu1 %v32117_v34  ;;  %24835 = vmatpush3.bf16.msra.mxu0 %v32011_v6  ;;  %v16794_v23 = vsub.f32 %v32325_v53, %v34086_v26  ;;  %v32351_v19 = vpack.c.bf16 %v16624_v58, %v16621_v16  ;;  %v16630_v27 = vand.u32 4294901760, %v15593_v60 }
 0xac2   : > { %35310 = vst [vmem:[#allocation164_spill] sm:$0xff] %v32353_v18  ;;  %24837 = vmatprep.subr.bf16.mxu0 %v32163_v44  ;;  %v16781_v37 = vand.u32 4294901760, %v16780_v5  ;;  %v35312_v34 = vand.u32 4294901760, %v32191_v51  ;;  %v35313_v6 = vand.u32 4294901760, %v32177_v54  ;;  %v16802_v48 = vand.u32 4294901760, %v16801_v2 }
 0xac3   : > { %35307 = vst [vmem:[#allocation160_spill] sm:$0xff] %v32343_v35  ;;  %35309 = vst [vmem:[#allocation165_spill] sm:$0xff] %v32351_v19  ;;  %v16814_v13 = vand.u32 4294901760, %v32343_v35  ;;  %v16807_v58 = vand.u32 4294901760, %v32353_v18  ;;  %v16627_v16 = vand.u32 4294901760, %v15592_v47  ;;  %v16795_v42 = vand.u32 4294901760, %v16794_v23 }
 0xac4   : > { %v32362_v49 = vpack.c.bf16 %v35313_v6, %v35312_v34  ;;  %24931 = vmatpush3.bf16.msra.mxu1 %v32005_v21  ;;  %v32369_v5 = vsub.f32 %v15593_v60, %v16630_v27  ;;  %v35315_v54 = vand.u32 4294901760, %v32227_v15  ;;  %v35316_v51 = vand.u32 4294901760, %v32204_v10 }
 0xac5   : > { %v16815_v44 = vsub.f32 %v32343_v35, %v16814_v13  ;;  %24933 = vmatprep.subr.bf16.mxu1 %v32199_v52  ;;  %24839 = vmatpush3.bf16.msra.mxu0 %v32029_v25  ;;  %v16808_v20 = vsub.f32 %v32353_v18, %v16807_v58  ;;  %v32380_v34 = vpack.c.bf16 %v16630_v27, %v16627_v16  ;;  %v35318_v60 = vand.u32 4294901760, %v32261_v12  ;;  %v35320_v12 = vld [vmem:[#allocation32_spill] sm:$0xff] }
 0xac6   : > { %35314 = vst [vmem:[#allocation169_spill] sm:$0xff] %v32369_v5  ;;  %v32377_v2 = vpack.c.bf16 %v35316_v51, %v35315_v54  ;;  %v32382_v21 = vsub.f32 %v15592_v47, %v16627_v16  ;;  %24873 = vmatprep.subr.bf16.mxu0 %v32009_v33  ;;  %v35319_v52 = vand.u32 4294901760, %v32242_v46  ;;  %v16828_v15 = vand.u32 4294901760, %v32369_v5  ;;  %v35323_v51 = vld [vmem:[#allocation35_spill] sm:$0xff] }
 0xac7   : > { %v16816_v25 = vand.u32 4294901760, %v16815_v44  ;;  %v32392_v10 = vpack.c.bf16 %v16760_v24, %v16753_v57  ;;  %v32394_v6 = vpack.c.bf16 %v16774_v62, %v16767_v63  ;;  %v16809_v54 = vand.u32 4294901760, %v16808_v20  ;;  %v35322_v63 = vld [vmem:[#allocation34_spill] sm:$0xff] }
 0xac8   : > { %35317 = vst [vmem:[#allocation168_spill] sm:$0xff] %v32382_v21  ;;  %v32389_v23 = vpack.c.bf16 %v35319_v52, %v35318_v60  ;;  %v16821_v27 = vand.u32 4294901760, %v32382_v21  ;;  %24935 = vmatpush3.bf16.msra.mxu1 %v32016_v43  ;;  %15973 = vmatmul.mubr.f32.vlgmr.msra.gmra.mrb[124].mxu0 %v35320_v12  ;;  %v32401_v46 = vpack.c.bf16 %v16788_v11, %v16781_v37  ;;  %v35321_v57 = vmov 0.0|0.0  }
 0xac9   : > { %v16829_v16 = vsub.f32 %v32369_v5, %v16828_v15  ;;  %24875 = vmatpush3.bf16.msra.mxu0 %v31860_v4  ;;  %24968 = vmatprep.subr.bf16.mxu1 %v35321_v57  ;;  %v32406_v24 = vpack.c.bf16 %v16802_v48, %v16795_v42  ;;  %v32411_v44 = vpack.c.bf16 %v16816_v25, %v16809_v54  ;;  %v35324_v48 = vand.u32 4294901760, %v32124_v31 }
 0xaca   : > { %v16822_v62 = vsub.f32 %v32382_v21, %v16821_v27  ;;  %24877 = vmatprep.subr.bf16.mxu0 %v32019_v9  ;;  %15978 = vmatprep.mubr.f32.mxu0 %v35322_v63  ;;  %v35325_v42 = vand.u32 4294901760, %v32113_v22  ;;  %v35327_v60 = vand.u32 4294901760, %v32157_v0  ;;  %v35328_v52 = vand.u32 4294901760, %v32148_v41 }
 0xacb   : > { %v16830_v43 = vand.u32 4294901760, %v16829_v16  ;;  %16441 = vmatmul.mubr.f32.vlgmr.msra.gmra.mrb[120].mxu1 %v35320_v12  ;;  %v35330_v54 = vand.u32 4294901760, %v32181_v3  ;;  %v35331_v16 = vand.u32 4294901760, %v32169_v8  ;;  %v35334_v47 = vand.u32 4294901760, %v32219_v59 }
 0xacc   : > { %v16823_v37 = vand.u32 4294901760, %v16822_v62  ;;  %24970 = vmatpush1.bf16.msra.mxu1 %v32122_v17  ;;  %15980 = vmatmul.mubr.f32.gmra.mrb[126].mxu0 %v35323_v51  ;;  %v32421_v20 = vpack.c.bf16 %v35325_v42, %v35324_v48  ;;  %v32427_v25 = vpack.c.bf16 %v35328_v52, %v35327_v60  ;;  %v35333_v48 = vld [vmem:[#allocation40_spill] sm:$0xff]  ;;  %v35335_v60 = vand.u32 4294901760, %v32210_v40  ;;  %v35363_v17 = vld [vmem:[#allocation131_spill] sm:$0xff] }
 0xacd   : > { %24879 = vmatpush3.bf16.msra.mxu0 %v31885_v61  ;;  %24971 = vmatprep.subr.bf16.mxu1 %v35321_v57  ;;  %v32435_v62 = vpack.c.bf16 %v35331_v16, %v35330_v54  ;;  %v35337_v14 = vand.u32 4294901760, %v32253_v32  ;;  %v35338_v26 = vand.u32 4294901760, %v32245_v30  ;;  %v35340_v54 = vand.u32 4294901760, %v32271_v7 }
 0xace   : > { %35326 = vst [vmem:[#allocation173_spill] sm:$0xff] %v32421_v20  ;;  %35329 = vst [vmem:[#allocation76_spill] sm:$0xff] %v32427_v25  ;;  %24881 = vmatprep.subr.bf16.mxu0 %v32032_v38  ;;  %15985 = vmatprep.mubr.f32.mxu0 %v35333_v48  ;;  %v32439_v42 = vpack.c.bf16 %v16830_v43, %v16823_v37  ;;  %v32445_v52 = vpack.c.bf16 %v35335_v60, %v35334_v47  ;;  %v35341_v43 = vand.u32 4294901760, %v32291_v28  ;;  %v35344_v47 = vld [vmem:[#allocation54_spill] sm:$0xff] }
 0xacf   : > { %35332 = vst [vmem:[#allocation80_spill] sm:$0xff] %v32435_v62  ;;  %v32451_v11 = vpack.c.bf16 %v35338_v26, %v35337_v14  ;;  %16446 = vmatprep.mubr.f32.mxu1 %v35322_v63  ;;  %v16663_v16 = vsub.f32 %v32271_v7, %v35340_v54  ;;  %v35342_v37 = vand.u32 4294901760, %v32279_v36  ;;  %v35345_v60 = vand.u32 4294901760, %v32325_v53  ;;  %v35360_v20 = vld [vmem:[#allocation114_spill] sm:$0xff] }
 0xad0   : > { %35336 = vst [vmem:[#allocation172_spill] sm:$0xff] %v32445_v52  ;;  %24973 = vmatpush1.bf16.msra.mxu1 %v32155_v50  ;;  %15987 = vmatmul.mubr.f32.gmra.mrb[128].mxu0 %v35344_v47  ;;  %v35346_v26 = vand.u32 4294901760, %v32317_v55  ;;  %v32475_v54 = vpack.c.bf16 %v16828_v15, %v16821_v27  ;;  %v35353_v15 = vld [vmem:[#allocation98_spill] sm:$0xff]  ;;  %v15539_v27 = vld [vmem:[%s33247_s24 + $0x38] sm:$0xff]  ;;  %v15538_v52 = vld [vmem:[%s33247_s24 + $0x30] sm:$0xff] }
 0xad1   : > { %35339 = vst [vmem:[#allocation177_spill] sm:$0xff] %v32451_v11  ;;  %v32461_v62 = vpack.c.bf16 %v35342_v37, %v35341_v43  ;;  %v32471_v11 = vpack.c.bf16 %v16814_v13, %v16807_v58  ;;  %24883 = vmatpush3.bf16.msra.mxu0 %v31902_v45  ;;  %24974 = vmatprep.subr.bf16.mxu1 %v35321_v57  ;;  %v35350_v43 = vld [vmem:[#allocation38_spill] sm:$0xff]  ;;  %v35352_v13 = vld [vmem:[#allocation148_spill] sm:$0xff] }
 0xad2   : > { %v32469_v14 = vpack.c.bf16 %v35346_v26, %v35345_v60  ;;  %35349 = vst [vmem:[#allocation185_spill] sm:$0xff] %v32475_v54  ;;  %24885 = vmatprep.subr.bf16.mxu0 %v32045_v56  ;;  %16448 = vmatmul.mubr.f32.gmra.mrb[122].mxu1 %v35323_v51  ;;  %v35351_v37 = vand.u32 4294901760, %v35350_v43  ;;  %v15534_v58 = vld [vmem:[%s33247_s24 + $0x10] sm:$0xff]  ;;  %v35356_v43 = vld [vmem:[#allocation119_spill] sm:$0xff]  ;;  %v35357_v54 = vld [vmem:[#allocation142_spill] sm:$0xff] }
 0xad3   : > { %35343 = vst [vmem:[#allocation176_spill] sm:$0xff] %v32461_v62  ;;  %35348 = vst [vmem:[#allocation180_spill] sm:$0xff] %v32471_v11  ;;  %16453 = vmatprep.mubr.f32.mxu1 %v35333_v48  ;;  %v16664_v62 = vand.u32 4294901760, %v16663_v16  ;;  %v35354_v16 = vld [vmem:[#allocation135_spill] sm:$0xff]  ;;  %v32497_v60 = vand.u32 4294901760, %v15534_v58  ;;  %v35355_v26 = vld [vmem:[#allocation152_spill] sm:$0xff] }
 0xad4   : > { %35347 = vst [vmem:[#allocation181_spill] sm:$0xff] %v32469_v14  ;;  %16247 = vmatprep.mubr.f32.mxu0 %v35351_v37  ;;  %24976 = vmatpush1.bf16.msra.mxu1 %v32179_v1  ;;  %v15543_v37 = vld [vmem:[%s33247_s24 + $0x58] sm:$0xf] }
 0xad5   : > { %24887 = vmatpush3.bf16.msra.mxu0 %v31920_v29  ;;  %24977 = vmatprep.subr.bf16.mxu1 %v35321_v57  ;;  %v32508_v11 = vsub.f32 %v15534_v58, %v32497_v60  ;;  %v15602_v25 = vsel %vm15594_vm8, %v15543_v37, 0  ;;  %v35362_v37 = vld [vmem:[#allocation156_spill] sm:$0xff] }
 0xad6   : > { %24889 = vmatprep.subr.bf16.mxu0 %v32058_v39  ;;  %16455 = vmatmul.mubr.f32.gmra.mrb[124].mxu1 %v35344_v47  ;;  %v32526_v50 = vand.u32 4294901760, %v15602_v25 }
 0xad7   : > { %16665 = vmatprep.mubr.f32.mxu1 %v16664_v62  ;;  %v15599_v62 = vsel %vm15594_vm8, %v15539_v27, 0  ;;  %35358 = vst [vmem:[#allocation184_spill] sm:$0xff] %v32508_v11  ;;  %v35359_v27 = vld [vmem:[#allocation157_spill] sm:$0xff] }
 0xad8   : > { %24979 = vmatpush1.bf16.msra.mxu1 %v35352_v13  ;;  %v32510_v14 = vand.u32 4294901760, %v15599_v62  ;;  %v32520_v13 = vand.u32 4294901760, %v15538_v52  ;;  %v32545_v35 = vsub.f32 %v15602_v25, %v32526_v50 }
 0xad9   : > { %24891 = vmatpush3.bf16.msra.mxu0 %v35353_v15  ;;  %24980 = vmatprep.subr.bf16.mxu1 %v35321_v57 }
 0xada   : > { %24893 = vmatprep.subr.bf16.mxu0 %v35354_v16  ;;  %v32524_v1 = vsub.f32 %v15599_v62, %v32510_v14  ;;  %v32536_v21 = vsub.f32 %v15538_v52, %v32520_v13  ;;  %v35364_v62 = vand.u32 4294901760, %v32508_v11 }
 0xadc   : > { %24982 = vmatpush1.bf16.msra.mxu1 %v35355_v26  ;;  %v35361_v26 = vld [vmem:[#allocation140_spill] sm:$0xff]  ;;  %v16669_v5 = vsub.f32 %v32508_v11, %v35364_v62  ;;  %v16683_v62 = vand.u32 4294901760, %v32536_v21 }
 0xadd   : > { %24895 = vmatpush3.bf16.msra.mxu0 %v35356_v43  ;;  %24983 = vmatprep.subr.bf16.mxu1 %v35321_v57 }
 0xade   : > { %24897 = vmatprep.subr.bf16.mxu0 %v35357_v54  ;;  %v16670_v25 = vand.u32 4294901760, %v16669_v5 }
 0xae0   : > { %24985 = vmatpush1.bf16.msra.mxu1 %v35359_v27  ;;  %v15542_v27 = vld [vmem:[%s33247_s24 + $0x50] sm:$0xf] }
 0xae1   : > { %24899 = vmatpush3.bf16.msra.mxu0 %v35360_v20  ;;  %24986 = vmatprep.subr.bf16.mxu1 %v35321_v57  ;;  %v32538_v58 = vand.u32 4294901760, %v15542_v27 }
 0xae2   : > { %24901 = vmatprep.subr.bf16.mxu0 %v35361_v26 }
 0xae3   : > { %v32557_v18 = vsub.f32 %v15542_v27, %v32538_v58 }
 0xae4   : > { %24988 = vmatpush1.bf16.msra.mxu1 %v35362_v37  ;;  %v35365_v37 = vld [vmem:[#allocation27_spill] sm:$0xff] }
 0xae5   : > { %24903 = vmatpush3.bf16.msra.mxu0 %v35363_v17  ;;  %24989 = vmatprep.subr.bf16.mxu1 %v35321_v57  ;;  %v35366_v53 = vand.u32 4294901760, %v35365_v37  ;;  %v16698_v5 = vand.u32 4294901760, %v32557_v18 }
 0xae6   : > { %24937 = vmatprep.subr.bf16.mxu0 %v32009_v33  ;;  %v35367_v33 = vld [vmem:[#allocation28_spill] sm:$0xff] }
 0xae7   : > { %v35368_v52 = vand.u32 4294901760, %v35367_v33 }
 0xae8   : > { %24991 = vmatpush1.bf16.msra.mxu1 %v32351_v19  ;;  %16251 = vmatmul.mubr.f32.vlgmr.msra.gmra.mrb[130].mxu0 %v35366_v53  ;;  %v35369_v19 = vand.u32 4294901760, %v32524_v1  ;;  %v16692_v53 = vand.u32 4294901760, %v32545_v35 }
 0xae9   : > { %24939 = vmatpush3.bf16.msra.mxu0 %v31860_v4  ;;  %24992 = vmatprep.subr.bf16.mxu1 %v35321_v57  ;;  %v35370_v4 = vld [vmem:[#allocation71_spill] sm:$0xff] }
 0xaea   : > { %24941 = vmatprep.subr.bf16.mxu0 %v32019_v9  ;;  %16258 = vmatprep.mubr.f32.mxu0 %v35368_v52  ;;  %v16678_v37 = vsub.f32 %v32524_v1, %v35369_v19  ;;  %v35371_v11 = vand.u32 4294901760, %v35370_v4  ;;  %v35372_v9 = vld [vmem:[#allocation50_spill] sm:$0xff]  ;;  %v16684_v19 = vsub.f32 %v32536_v21, %v16683_v62 }
 0xaeb   : > { %v35373_v27 = vand.u32 4294901760, %v35372_v9 }
 0xaec   : > { %24994 = vmatpush1.bf16.msra.mxu1 %v32380_v34  ;;  %16262 = vmatmul.mubr.f32.gmra.mrb[132].mxu0 %v35371_v11  ;;  %v16679_v33 = vand.u32 4294901760, %v16678_v37  ;;  %v16693_v11 = vsub.f32 %v32545_v35, %v16692_v53  ;;  %v16685_v4 = vand.u32 4294901760, %v16684_v19 }
 0xaed   : > { %24943 = vmatpush3.bf16.msra.mxu0 %v31885_v61  ;;  %24995 = vmatprep.subr.bf16.mxu1 %v35321_v57  ;;  %v35374_v61 = vld [vmem:[#allocation60_spill] sm:$0xff] }
 0xaee   : > { %24945 = vmatprep.subr.bf16.mxu0 %v32032_v38  ;;  %16269 = vmatprep.mubr.f32.mxu0 %v35373_v27  ;;  %v35375_v52 = vand.u32 4294901760, %v35374_v61  ;;  %v35376_v38 = vld [vmem:[#allocation37_spill] sm:$0xff]  ;;  %v16694_v37 = vand.u32 4294901760, %v16693_v11 }
 0xaef   : > { %16671 = vmatmul.mubr.f32.vlgmr.msra.gmra.mrb[126].mxu1 %v16670_v25  ;;  %v16699_v25 = vsub.f32 %v32557_v18, %v16698_v5 }
 0xaf0   : > { %24997 = vmatpush1.bf16.msra.mxu1 %v32362_v49  ;;  %16273 = vmatmul.mubr.f32.gmra.mrb[134].mxu0 %v35375_v52 }
 0xaf1   : > { %24947 = vmatpush3.bf16.msra.mxu0 %v31902_v45  ;;  %24998 = vmatprep.subr.bf16.mxu1 %v35321_v57  ;;  %v16700_v45 = vand.u32 4294901760, %v16699_v25 }
 0xaf2   : > { %24949 = vmatprep.subr.bf16.mxu0 %v32045_v56  ;;  %16557 = vmatprep.mubr.f32.mxu0 %v35376_v38  ;;  %v35377_v56 = vld [vmem:[#allocation153_spill] sm:$0xff] }
 0xaf3   : > { %16680 = vmatprep.mubr.f32.mxu1 %v16679_v33 }
 0xaf4   : > { %25000 = vmatpush1.bf16.msra.mxu1 %v32377_v2 }
 0xaf5   : > { %24951 = vmatpush3.bf16.msra.mxu0 %v31920_v29  ;;  %25001 = vmatprep.subr.bf16.mxu1 %v35321_v57  ;;  %v35378_v29 = vmov 0.0  }
 0xaf6   : > { %24953 = vmatprep.subr.bf16.mxu0 %v32058_v39  ;;  %16686 = vmatmul.mubr.f32.gmra.mrb[128].mxu1 %v16685_v4  ;;  %v35379_v39 = vpack.c.bf16 %v32113_v22, %v32124_v31  ;;  %v35381_v22 = vpack.c.bf16 %v32169_v8, %v32181_v3  ;;  %v35382_v31 = vpack.c.bf16 %v32210_v40, %v32219_v59  ;;  %v35385_v8 = vld [vmem:[#allocation161_spill] sm:$0xff]  ;;  %v35387_v40 = vld [vmem:[#allocation160_spill] sm:$0xff] }
 0xaf7   : > { %16695 = vmatprep.mubr.f32.mxu1 %v16694_v37  ;;  %v35386_v3 = vpack.c.bf16 %v32317_v55, %v35385_v8  ;;  %v35388_v59 = vld [vmem:[#allocation164_spill] sm:$0xff]  ;;  %v35395_v55 = vld [vmem:[#allocation145_spill] sm:$0xff] }
 0xaf8   : > { %25003 = vmatpush1.bf16.msra.mxu1 %v32389_v23  ;;  %v35389_v49 = vpack.c.bf16 %v35387_v40, %v35388_v59  ;;  %v35396_v23 = vld [vmem:[#allocation149_spill] sm:$0xff] }
 0xaf9   : > { %24955 = vmatpush3.bf16.msra.mxu0 %v35353_v15  ;;  %25004 = vmatprep.subr.bf16.mxu1 %v35321_v57 }
 0xafa   : > { %24957 = vmatprep.subr.bf16.mxu0 %v35354_v16  ;;  %16701 = vmatmul.mubr.f32.gmra.mrb[130].mxu1 %v16700_v45 }
 0xafb   : > { %16861 = vmatprep.mubr.f32.mxu1 %v35377_v56 }
 0xafc   : > { %25006 = vmatpush1.bf16.msra.mxu1 %v32392_v10  ;;  %v35397_v10 = vand.u32 4294901760, %v32271_v7 }
 0xafd   : > { %24959 = vmatpush3.bf16.msra.mxu0 %v35356_v43  ;;  %25007 = vmatprep.subr.bf16.mxu1 %v35321_v57 }
 0xafe   : > { %24961 = vmatprep.subr.bf16.mxu0 %v35357_v54  ;;  %v35413_v54 = vld [vmem:[#allocation185_spill] sm:$0xff] }
 0xb00   : > { %25009 = vmatpush1.bf16.msra.mxu1 %v32394_v6  ;;  %v35398_v6 = vld [vmem:[#allocation148_spill] sm:$0xff] }
 0xb01   : > { %24963 = vmatpush3.bf16.msra.mxu0 %v35360_v20  ;;  %25010 = vmatprep.subr.bf16.mxu1 %v35321_v57  ;;  %v35406_v20 = vld [vmem:[#allocation76_spill] sm:$0xff] }
 0xb02   : > { %24965 = vmatprep.subr.bf16.mxu0 %v35361_v26 }
 0xb04   : > { %25012 = vmatpush1.bf16.msra.mxu1 %v32401_v46  ;;  %v35400_v46 = vld [vmem:[#allocation157_spill] sm:$0xff] }
 0xb05   : > { %24967 = vmatpush3.bf16.msra.mxu0 %v35363_v17  ;;  %25013 = vmatprep.subr.bf16.mxu1 %v35321_v57  ;;  %v35380_v17 = vpack.c.bf16 %v32148_v41, %v32157_v0  ;;  %v35383_v41 = vpack.c.bf16 %v32245_v30, %v32253_v32  ;;  %v35384_v0 = vpack.c.bf16 %v32279_v36, %v32291_v28  ;;  %v35390_v32 = vld [vmem:[#allocation169_spill] sm:$0xff]  ;;  %v35391_v30 = vld [vmem:[#allocation168_spill] sm:$0xff]  ;;  %v35394_v36 = vld [vmem:[#allocation106_spill] sm:$0xff] }
 0xb06   : > { %25130 = vmatprep.subr.bf16.mxu0 %v35321_v57  ;;  %v35392_v2 = vpack.c.bf16 %v35390_v32, %v35391_v30  ;;  %v35393_v28 = vld [vmem:[#allocation184_spill] sm:$0xff] }
 0xb08   : > { %25015 = vmatpush1.bf16.msra.mxu1 %v32406_v24  ;;  %16559 = vmatmul.mubr.f32.vlgmr.msra.gmra.mrb[136].mxu0 %v35320_v12  ;;  %v35399_v12 = vld [vmem:[#allocation152_spill] sm:$0xff] }
 0xb09   : > { %25016 = vmatprep.subr.bf16.mxu1 %v35321_v57  ;;  %16564 = vmatprep.mubr.f32.mxu0 %v35322_v63  ;;  %v35401_v24 = vld [vmem:[#allocation156_spill] sm:$0xff]  ;;  %v35403_v63 = vand.u32 4294901760, %v35393_v28 }
 0xb0c   : > { %25018 = vmatpush1.bf16.msra.mxu1 %v32411_v44  ;;  %16566 = vmatmul.mubr.f32.gmra.mrb[138].mxu0 %v35323_v51  ;;  %v35404_v44 = vld [vmem:[#allocation173_spill] sm:$0xff]  ;;  %v35405_v51 = vand.u32 4294901760, %v32524_v1 }
 0xb0d   : > { %25019 = vmatprep.subr.bf16.mxu1 %v35321_v57  ;;  %16571 = vmatprep.mubr.f32.mxu0 %v35333_v48  ;;  %v35407_v48 = vld [vmem:[#allocation80_spill] sm:$0xff] }
 0xb10   : > { %25021 = vmatpush1.bf16.msra.mxu1 %v32439_v42  ;;  %16573 = vmatmul.mubr.f32.gmra.mrb[140].mxu0 %v35344_v47  ;;  %v35412_v42 = vld [vmem:[#allocation180_spill] sm:$0xff] }
 0xb11   : > { %25022 = vmatprep.subr.bf16.mxu1 %v35321_v57  ;;  %23902 = vmatprep.mubr.msk.f32.mxu0 %vm26566_vm2, %v35378_v29 }
 0xb13   : > { %16863 = vmatmul.mubr.f32.vlgmr.msra.gmra.mrb[126].mxu1 %v32497_v60 }
 0xb14   : > { %25024 = vmatpush1.bf16.msra.mxu1 %v35379_v39  ;;  %16868 = vmatprep.mubr.f32.mxu1 %v32510_v14 }
 0xb15   : > { %25025 = vmatprep.subr.bf16.mxu1 %v35321_v57 }
 0xb17   : > { %16870 = vmatmul.mubr.f32.gmra.mrb[128].mxu1 %v32520_v13 }
 0xb18   : > { %25027 = vmatpush1.bf16.msra.mxu1 %v35380_v17  ;;  %16875 = vmatprep.mubr.f32.mxu1 %v32526_v50 }
 0xb19   : > { %25028 = vmatprep.subr.bf16.mxu1 %v35321_v57 }
 0xb1b   : > { %16877 = vmatmul.mubr.f32.gmra.mrb[130].mxu1 %v32538_v58 }
 0xb1c   : > { %25030 = vmatpush1.bf16.msra.mxu1 %v35381_v22  ;;  %16984 = vmatprep.mubr.f32.mxu1 %v32271_v7  ;;  %v35402_v7 = vld [vmem:[#allocation165_spill] sm:$0xff] }
 0xb1d   : > { %25031 = vmatprep.subr.bf16.mxu1 %v35321_v57 }
 0xb20   : > { %25033 = vmatpush1.bf16.msra.mxu1 %v35382_v31 }
 0xb21   : > { %25034 = vmatprep.subr.bf16.mxu1 %v35321_v57 }
 0xb24   : > { %25036 = vmatpush1.bf16.msra.mxu1 %v35383_v41 }
 0xb25   : > { %25037 = vmatprep.subr.bf16.mxu1 %v35321_v57 }
 0xb28   : > { %25039 = vmatpush1.bf16.msra.mxu1 %v35384_v0 }
 0xb29   : > { %25040 = vmatprep.subr.bf16.mxu1 %v35321_v57 }
 0xb2c   : > { %25042 = vmatpush1.bf16.msra.mxu1 %v35386_v3 }
 0xb2d   : > { %25043 = vmatprep.subr.bf16.mxu1 %v35321_v57 }
 0xb30   : > { %25045 = vmatpush1.bf16.msra.mxu1 %v35389_v49 }
 0xb31   : > { %25046 = vmatprep.subr.bf16.mxu1 %v35321_v57 }
 0xb34   : > { %25048 = vmatpush1.bf16.msra.mxu1 %v35392_v2 }
 0xb35   : > { %25049 = vmatprep.subr.bf16.mxu1 %v35321_v57 }
 0xb37   : > { %16987 = vmatmul.mubr.f32.vlgmr.msra.gmra.mrb[126].mxu1 %v35393_v28 }
 0xb38   : > { %25051 = vmatpush1.bf16.msra.mxu1 %v35394_v36  ;;  %16993 = vmatprep.mubr.f32.mxu1 %v32524_v1  ;;  %v35408_v1 = vld [vmem:[#allocation172_spill] sm:$0xff] }
 0xb39   : > { %25052 = vmatprep.subr.bf16.mxu1 %v35321_v57 }
 0xb3b   : > { %16996 = vmatmul.mubr.f32.gmra.mrb[128].mxu1 %v32536_v21  ;;  %v35409_v21 = vld [vmem:[#allocation177_spill] sm:$0xff] }
 0xb3c   : > { %25054 = vmatpush1.bf16.msra.mxu1 %v35395_v55  ;;  %17002 = vmatprep.mubr.f32.mxu1 %v32545_v35  ;;  %v35410_v35 = vld [vmem:[#allocation176_spill] sm:$0xff] }
 0xb3d   : > { %25055 = vmatprep.subr.bf16.mxu1 %v35321_v57 }
 0xb3f   : > { %17005 = vmatmul.mubr.f32.gmra.mrb[130].mxu1 %v32557_v18  ;;  %v35411_v18 = vld [vmem:[#allocation181_spill] sm:$0xff] }
 0xb40   : > { %25057 = vmatpush1.bf16.msra.mxu1 %v35396_v23  ;;  %17095 = vmatprep.mubr.f32.mxu1 %v35397_v10 }
 0xb41   : > { %25058 = vmatprep.subr.bf16.mxu1 %v35321_v57 }
 0xb44   : > { %25060 = vmatpush1.bf16.msra.mxu1 %v35398_v6 }
 0xb45   : > { %25061 = vmatprep.subr.bf16.mxu1 %v35321_v57 }
 0xb48   : > { %25063 = vmatpush1.bf16.msra.mxu1 %v35399_v12 }
 0xb49   : > { %25064 = vmatprep.subr.bf16.mxu1 %v35321_v57 }
 0xb4c   : > { %25066 = vmatpush1.bf16.msra.mxu1 %v35400_v46 }
 0xb4d   : > { %25067 = vmatprep.subr.bf16.mxu1 %v35321_v57 }
 0xb50   : > { %25069 = vmatpush1.bf16.msra.mxu1 %v35401_v24 }
 0xb51   : > { %25070 = vmatprep.subr.bf16.mxu1 %v35321_v57 }
 0xb54   : > { %25072 = vmatpush1.bf16.msra.mxu1 %v35402_v7 }
 0xb55   : > { %25073 = vmatprep.subr.bf16.mxu1 %v35321_v57 }
 0xb58   : > { %25075 = vmatpush1.bf16.msra.mxu1 %v32380_v34 }
 0xb59   : > { %25076 = vmatprep.subr.bf16.mxu1 %v35321_v57 }
 0xb5b   : > { %17099 = vmatmul.mubr.f32.vlgmr.msra.gmra.mrb[126].mxu1 %v35403_v63 }
 0xb5c   : > { %25078 = vmatpush1.bf16.msra.mxu1 %v35404_v44  ;;  %17106 = vmatprep.mubr.f32.mxu1 %v35405_v51 }
 0xb5d   : > { %25079 = vmatprep.subr.bf16.mxu1 %v35321_v57 }
 0xb5f   : > { %17110 = vmatmul.mubr.f32.gmra.mrb[128].mxu1 %v16683_v62 }
 0xb60   : > { %25081 = vmatpush1.bf16.msra.mxu1 %v35406_v20  ;;  %17117 = vmatprep.mubr.f32.mxu1 %v16692_v53 }
 0xb61   : > { %25082 = vmatprep.subr.bf16.mxu1 %v35321_v57 }
 0xb63   : > { %17121 = vmatmul.mubr.f32.gmra.mrb[130].mxu1 %v16698_v5 }
 0xb64   : > { %25084 = vmatpush1.bf16.msra.mxu1 %v35407_v48  ;;  %17245 = vmatprep.mubr.f32.mxu1 %v35377_v56 }
 0xb65   : > { %25085 = vmatprep.subr.bf16.mxu1 %v35321_v57 }
 0xb68   : > { %25087 = vmatpush1.bf16.msra.mxu1 %v35408_v1 }
 0xb69   : > { %25088 = vmatprep.subr.bf16.mxu1 %v35321_v57 }
 0xb6c   : > { %25090 = vmatpush1.bf16.msra.mxu1 %v35409_v21 }
 0xb6d   : > { %25091 = vmatprep.subr.bf16.mxu1 %v35321_v57 }
 0xb70   : > { %25093 = vmatpush1.bf16.msra.mxu1 %v35410_v35 }
 0xb71   : > { %25094 = vmatprep.subr.bf16.mxu1 %v35321_v57 }
 0xb74   : > { %25096 = vmatpush1.bf16.msra.mxu1 %v35411_v18 }
 0xb75   : > { %25097 = vmatprep.subr.bf16.mxu1 %v35321_v57 }
 0xb78   : > { %25099 = vmatpush1.bf16.msra.mxu1 %v35412_v42 }
 0xb79   : > { %25100 = vmatprep.subr.bf16.mxu1 %v35321_v57 }
 0xb7b   : > { %v20980_v47 = vpop.f32.mrb[118].mxu0 }
 0xb7c   : > { %25102 = vmatpush1.bf16.msra.mxu1 %v35413_v54  ;;  %v20981_v15 = vpop.f32.mrb[119].mxu0 }
 0xb7d   : > { %25103 = vmatprep.subr.bf16.mxu1 %v35321_v57  ;;  %v20982_v16 = vadd.f32 %v20981_v15, %v20980_v47 }
 0xb7e   : > { %v21062_v26 = vpop.f32.mrb[114].mxu1 }
 0xb7f   : > { %17247 = vmatmul.mubr.f32.vlgmr.msra.gmra.mrb[126].mxu1 %v32497_v60  ;;  %v20983_v43 = vpop.f32.mrb[120].mxu0  ;;  %v21063_v62 = vpop.f32.mrb[115].mxu1 }
 0xb80   : > { %25105 = vmatpush1.bf16.msra.mxu1 %v35394_v36  ;;  %17252 = vmatprep.mubr.f32.mxu1 %v32510_v14  ;;  %v20984_v53 = vpop.f32.mrb[121].mxu0  ;;  %v21064_v9 = vadd.f32 %v21063_v62, %v21062_v26 }
 0xb81   : > { %25106 = vmatprep.subr.bf16.mxu1 %v35321_v57  ;;  %v20985_v27 = vadd.f32 %v20984_v53, %v20983_v43 }
 0xb83   : > { %17254 = vmatmul.mubr.f32.gmra.mrb[128].mxu1 %v32520_v13  ;;  %v20986_v19 = vpop.f32.mrb[122].mxu0 }
 0xb84   : > { %25108 = vmatpush1.bf16.msra.mxu1 %v35395_v55  ;;  %17259 = vmatprep.mubr.f32.mxu1 %v32526_v50  ;;  %v20987_v5 = vpop.f32.mrb[123].mxu0 }
 0xb85   : > { %25109 = vmatprep.subr.bf16.mxu1 %v35321_v57  ;;  %v20988_v33 = vadd.f32 %v20987_v5, %v20986_v19  ;;  %v21065_v11 = vpop.f32.mrb[116].mxu1 }
 0xb86   : > { %v21066_v61 = vpop.f32.mrb[117].mxu1 }
 0xb87   : > { %17261 = vmatmul.mubr.f32.gmra.mrb[130].mxu1 %v32538_v58  ;;  %v21067_v52 = vadd.f32 %v21066_v61, %v21065_v11  ;;  %v17373_v11 = vld [vmem:[%s35414_s1 + $0x18] sm:$0xff] }
 0xb88   : > { %25111 = vmatpush1.bf16.msra.mxu1 %v35396_v23  ;;  %17349 = vmatprep.mubr.f32.mxu1 %v35377_v56 }
 0xb89   : > { %25112 = vmatprep.subr.bf16.mxu1 %v35321_v57  ;;  %v21068_v38 = vpop.f32.mrb[118].mxu1 }
 0xb8a   : > { %v21069_v4 = vpop.f32.mrb[119].mxu1 }
 0xb8b   : > { %v21070_v25 = vadd.f32 %v21069_v4, %v21068_v38 }
 0xb8c   : > { %25114 = vmatpush1.bf16.msra.mxu1 %v35398_v6 }
 0xb8d   : > { %25115 = vmatprep.subr.bf16.mxu1 %v35321_v57 }
 0xb90   : > { %25117 = vmatpush1.bf16.msra.mxu1 %v35399_v12 }
 0xb91   : > { %25118 = vmatprep.subr.bf16.mxu1 %v35321_v57 }
 0xb94   : > { %25120 = vmatpush1.bf16.msra.mxu1 %v35400_v46 }
 0xb95   : > { %25121 = vmatprep.subr.bf16.mxu1 %v35321_v57 }
 0xb98   : > { %25123 = vmatpush1.bf16.msra.mxu1 %v35401_v24 }
 0xb99   : > { %25124 = vmatprep.subr.bf16.mxu1 %v35321_v57 }
 0xb9b   : > { %v21021_v37 = vpop.f32.mrb[124].mxu0 }
 0xb9c   : > { %25126 = vmatpush1.bf16.msra.mxu1 %v35402_v7  ;;  %v21022_v45 = vpop.f32.mrb[125].mxu0 }
 0xb9d   : > { %25127 = vmatprep.subr.bf16.mxu1 %v35321_v57  ;;  %v21023_v56 = vadd.f32 %v21022_v45, %v21021_v37 }
 0xb9e   : > { %v21144_v39 = vpop.f32.mrb[120].mxu1 }
 0xb9f   : > { %v15975_v17 = vadd.f32 %v21023_v56, %v20982_v16  ;;  %v21024_v22 = vpop.f32.mrb[126].mxu0  ;;  %v21145_v31 = vpop.f32.mrb[121].mxu1 }
 0xba0   : > { %25129 = vmatpush1.bf16.msra.mxu1 %v32380_v34  ;;  %v21025_v41 = vpop.f32.mrb[127].mxu0  ;;  %v21146_v0 = vadd.f32 %v21145_v31, %v21144_v39 }
 0xba1   : > { %v21026_v8 = vadd.f32 %v21025_v41, %v21024_v22  ;;  %v16127_v3 = vadd.f32 %v21064_v9, %v15975_v17  ;;  %25250 = vmatprep.subr.bf16.mxu1 %v35321_v57  ;;  %v17370_v9 = vld [vmem:[%s35414_s1] sm:$0xff] }
 0xba2   : > { %v17391_v19 = vand.u32 4294901760, %v17370_v9 }
 0xba3   : > { %17351 = vmatmul.mubr.f32.vlgmr.msra.gmra.mrb[126].mxu1 %v32497_v60  ;;  %v15982_v40 = vadd.f32 %v21026_v8, %v20985_v27  ;;  %v21027_v59 = vpop.f32.mrb[128].mxu0  ;;  %v17371_v27 = vld [vmem:[%s35414_s1 + $0x8] sm:$0xff] }
 0xba4   : > { %17356 = vmatprep.mubr.f32.mxu1 %v32510_v14  ;;  %v21028_v49 = vpop.f32.mrb[129].mxu0  ;;  %v17394_v5 = vand.u32 4294901760, %v17371_v27 }
 0xba5   : > { %v21029_v32 = vadd.f32 %v21028_v49, %v21027_v59  ;;  %v16136_v30 = vadd.f32 %v21067_v52, %v15982_v40  ;;  %v21147_v2 = vpop.f32.mrb[122].mxu1  ;;  %v32763_v52 = vsub.f32 %v17370_v9, %v17391_v19 }
 0xba6   : > { %v21148_v28 = vpop.f32.mrb[123].mxu1  ;;  %v32761_v61 = vpack.c.bf16 %v17394_v5, %v17391_v19  ;;  %v32765_v38 = vsub.f32 %v17371_v27, %v17394_v5  ;;  %v19393_v27 = vld [vmem:[%s35415_s6] ss:$0 sm:$0xff] }
 0xba7   : > { %17358 = vmatmul.mubr.f32.gmra.mrb[128].mxu1 %v32520_v13  ;;  %v15989_v34 = vadd.f32 %v21029_v32, %v20988_v33  ;;  %v21149_v36 = vadd.f32 %v21148_v28, %v21147_v2  ;;  %v17372_v33 = vld [vmem:[%s35414_s1 + $0x10] sm:$0xff]  ;;  %v17492_v39 = vand.u32 4294901760, %v32763_v52 }
 0xba8   : > { %17363 = vmatprep.mubr.f32.mxu1 %v32526_v50  ;;  %v17397_v4 = vand.u32 4294901760, %v17372_v33  ;;  %25132 = vmatpush3.bf16.msra.mxu0 %v32761_v61  ;;  %v17499_v17 = vand.u32 4294901760, %v32765_v38  ;;  %v25143_v28 = vpack.c.bf16 %v32765_v38, %v32763_v52 }
 0xba9   : > { %v16145_v55 = vadd.f32 %v21070_v25, %v15989_v34  ;;  %v21150_v23 = vpop.f32.mrb[124].mxu1  ;;  %v17400_v25 = vand.u32 4294901760, %v17373_v11  ;;  %25133 = vmatprep.subr.bf16.mxu0 %v35321_v57  ;;  %v17493_v22 = vsub.f32 %v32763_v52, %v17492_v39 }
 0xbaa   : > { %v21151_v10 = vpop.f32.mrb[125].mxu1  ;;  %v32768_v37 = vsub.f32 %v17372_v33, %v17397_v4  ;;  %v17500_v31 = vsub.f32 %v32765_v38, %v17499_v17 }
 0xbab   : > { %17365 = vmatmul.mubr.f32.gmra.mrb[130].mxu1 %v32538_v58  ;;  %v21152_v60 = vadd.f32 %v21151_v10, %v21150_v23  ;;  %v32771_v45 = vpack.c.bf16 %v17400_v25, %v17397_v4  ;;  %v32773_v56 = vsub.f32 %v17373_v11, %v17400_v25  ;;  %v17494_v41 = vand.u32 4294901760, %v17493_v22 }
 0xbac   : > { %24214 = vmatprep.mubr.msk.f32.mxu1 %vm26566_vm2, %v35378_v29  ;;  %v17506_v8 = vand.u32 4294901760, %v32768_v37 }
 0xbad   : > { %25135 = vmatpush3.bf16.msra.mxu0 %v32771_v45  ;;  %v25146_v34 = vpack.c.bf16 %v32773_v56, %v32768_v37 }
 0xbae   : > { %25136 = vmatprep.subr.bf16.mxu0 %v35321_v57  ;;  %v17507_v59 = vsub.f32 %v32768_v37, %v17506_v8 }
 0xbb0   : > { %v17508_v32 = vand.u32 4294901760, %v17507_v59 }
 0xbbb   : > { %v21103_v14 = vpop.f32.mrb[130].mxu0 }
 0xbbc   : > { %v21104_v6 = vpop.f32.mrb[131].mxu0 }
 0xbbd   : > { %v21105_v12 = vadd.f32 %v21104_v6, %v21103_v14 }
 0xbbf   : > { %v16253_v46 = vadd.f32 %v21105_v12, %v16127_v3  ;;  %v21106_v24 = vpop.f32.mrb[132].mxu0  ;;  %v17513_v3 = vand.u32 4294901760, %v32773_v56 }
 0xbc0   : > { %v21107_v7 = vpop.f32.mrb[133].mxu0 }
 0xbc1   : > { %v16443_v13 = vadd.f32 %v21146_v0, %v16253_v46  ;;  %v21108_v63 = vadd.f32 %v21107_v7, %v21106_v24  ;;  %v17501_v0 = vand.u32 4294901760, %v17500_v31  ;;  %v17514_v49 = vsub.f32 %v32773_v56, %v17513_v3 }
 0xbc3   : > { %v16264_v44 = vadd.f32 %v21108_v63, %v16136_v30  ;;  %v21109_v51 = vpop.f32.mrb[134].mxu0  ;;  %v25137_v40 = vpack.c.bf16 %v17501_v0, %v17494_v41  ;;  %v17515_v30 = vand.u32 4294901760, %v17514_v49 }
 0xbc4   : > { %v21110_v50 = vpop.f32.mrb[135].mxu0 }
 0xbc5   : > { %v21111_v20 = vadd.f32 %v21110_v50, %v21109_v51  ;;  %v16450_v48 = vadd.f32 %v21149_v36, %v16264_v44  ;;  %v25140_v2 = vpack.c.bf16 %v17515_v30, %v17508_v32  ;;  %v25155_v36 = vpack.c.bf16 %v17499_v17, %v17492_v39 }
 0xbc7   : > { %v16275_v1 = vadd.f32 %v21111_v20, %v16145_v55  ;;  %v32789_v55 = vpack.c.bf16 %v17513_v3, %v17506_v8 }
 0xbc9   : > { %v16457_v21 = vadd.f32 %v21152_v60, %v16275_v1 }
 0xbdb   : > { %v21185_v58 = vpop.f32.mrb[136].mxu0 }
 0xbdc   : > { %v21186_v35 = vpop.f32.mrb[137].mxu0 }
 0xbdd   : > { %v21187_v18 = vadd.f32 %v21186_v35, %v21185_v58 }
 0xbdf   : > { %v21188_v42 = vpop.f32.mrb[138].mxu0  ;;  %v16561_v47 = vadd.f32 %v21187_v18, %v16443_v13 }
 0xbe0   : > { %v21189_v54 = vpop.f32.mrb[139].mxu0 }
 0xbe1   : > { %v21190_v15 = vadd.f32 %v21189_v54, %v21188_v42 }
 0xbe3   : > { %v21191_v16 = vpop.f32.mrb[140].mxu0  ;;  %v16568_v26 = vadd.f32 %v21190_v15, %v16450_v48 }
 0xbe4   : > { %v21192_v43 = vpop.f32.mrb[141].mxu0 }
 0xbe5   : > { %v21193_v62 = vadd.f32 %v21192_v43, %v21191_v16 }
 0xbe7   : > { %v16575_v53 = vadd.f32 %v21193_v62, %v16457_v21 }
 0xc76   : > { %v17352_v23 = vpop.f32.mrb[126].mxu1 }
 0xc77   : > { %v25290_v10 = vadd.f32 %v17352_v23, %v16561_v47  ;;  %v17354_v60 = vpop.f32.mrb[127].mxu1 }
 0xc79   : > { %v17382_v14 = vsel %vm843_vm0, %v25290_v10, 0 }
 0xc7a   : > { %v32792_v6 = vand.u32 4294901760, %v17382_v14  ;;  %v17359_v12 = vpop.f32.mrb[128].mxu1 }
 0xc7b   : > { %v25291_v46 = vadd.f32 %v17359_v12, %v16568_v26  ;;  %v17361_v24 = vpop.f32.mrb[129].mxu1 }
 0xc7c   : > { %v17460_v7 = vsub.f32 %v17382_v14, %v32792_v6 }
 0xc7d   : > { %v17385_v13 = vsel %vm843_vm0, %v25291_v46, 0 }
 0xc7e   : > { %v17461_v63 = vand.u32 4294901760, %v17460_v7  ;;  %v32796_v44 = vand.u32 4294901760, %v17385_v13  ;;  %v17366_v51 = vpop.f32.mrb[130].mxu1 }
 0xc7f   : > { %v25292_v50 = vadd.f32 %v17366_v51, %v16575_v53  ;;  %v17368_v20 = vpop.f32.mrb[131].mxu1 }
 0xc80   : > { %v17462_v48 = vsub.f32 %v17460_v7, %v17461_v63  ;;  %v17470_v1 = vsub.f32 %v17385_v13, %v32796_v44  ;;  %v26553_v20 = vld [vmem:[%s26717_s29] sm:$0xff] }
 0xc81   : > { %v17388_v21 = vsel %vm843_vm0, %v25292_v50, 0 }
 0xc82   : > { %v17463_v58 = vand.u32 4294901760, %v17462_v48  ;;  %v17479_v35 = vand.u32 4294901760, %v17388_v21  ;;  %v17471_v18 = vand.u32 4294901760, %v17470_v1 }
 0xc84   : > { %v17480_v42 = vsub.f32 %v17388_v21, %v17479_v35  ;;  %23903 = vmatmul.mubr.f32.vlgmr.msra.gmra.mrb[142].mxu0 %v17463_v58  ;;  %v17472_v47 = vsub.f32 %v17470_v1, %v17471_v18 }
 0xc85   : > { %23905 = vmatprep.mubr.msk.f32.mxu0 %vm26566_vm2, %v35378_v29  ;;  %25138 = vmatpush3.bf16.msra.mxu0 %v25137_v40 }
 0xc86   : > { %v17473_v54 = vand.u32 4294901760, %v17472_v47  ;;  %v17481_v15 = vand.u32 4294901760, %v17480_v42  ;;  %25139 = vmatprep.subr.bf16.mxu0 %v35321_v57 }
 0xc88   : > { %23906 = vmatmul.mubr.f32.gmra.mrb[144].mxu0 %v17473_v54  ;;  %v17482_v16 = vsub.f32 %v17480_v42, %v17481_v15 }
 0xc89   : > { %23908 = vmatprep.mubr.msk.f32.mxu0 %vm26566_vm2, %v35378_v29  ;;  %25141 = vmatpush3.bf16.msra.mxu0 %v25140_v2 }
 0xc8a   : > { %v17483_v26 = vand.u32 4294901760, %v17482_v16  ;;  %25142 = vmatprep.subr.bf16.mxu0 %v35321_v57 }
 0xc8c   : > { %23909 = vmatmul.mubr.f32.gmra.mrb[146].mxu0 %v17483_v26  ;;  %v26555_v26 = vld [vmem:[%s26717_s29 + $0x10] sm:$0xf] }
 0xc8d   : > { %23919 = vmatprep.mubr.msk.f32.mxu0 %vm26566_vm2, %v35378_v29 }
 0xc90   : > { %23920 = vmatmul.mubr.f32.vlgmr.msra.gmra.mrb[148].mxu0 %v32792_v6 }
 0xc91   : > { %23922 = vmatprep.mubr.msk.f32.mxu0 %vm26566_vm2, %v35378_v29  ;;  %25144 = vmatpush3.bf16.msra.mxu0 %v25143_v28 }
 0xc92   : > { %25145 = vmatprep.subr.bf16.mxu0 %v35321_v57 }
 0xc94   : > { %23923 = vmatmul.mubr.f32.gmra.mrb[150].mxu0 %v32796_v44 }
 0xc95   : > { %23925 = vmatprep.mubr.msk.f32.mxu0 %vm26566_vm2, %v35378_v29  ;;  %25147 = vmatpush3.bf16.msra.mxu0 %v25146_v34 }
 0xc96   : > { %25148 = vmatprep.subr.bf16.mxu0 %v35321_v57 }
 0xc98   : > { %23926 = vmatmul.mubr.f32.gmra.mrb[152].mxu0 %v17479_v35 }
 0xc99   : > { %23936 = vmatprep.mubr.msk.f32.mxu0 %vm26566_vm2, %v35378_v29 }
 0xc9c   : > { %23937 = vmatmul.mubr.f32.vlgmr.msra.gmra.mrb[154].mxu0 %v17460_v7 }
 0xc9d   : > { %23939 = vmatprep.mubr.msk.f32.mxu0 %vm26566_vm2, %v35378_v29  ;;  %25150 = vmatpush3.bf16.msra.mxu0 %v32761_v61 }
 0xc9e   : > { %25151 = vmatprep.subr.bf16.mxu0 %v35321_v57 }
 0xca0   : > { %23940 = vmatmul.mubr.f32.gmra.mrb[156].mxu0 %v17470_v1 }
 0xca1   : > { %23942 = vmatprep.mubr.msk.f32.mxu0 %vm26566_vm2, %v35378_v29  ;;  %25153 = vmatpush3.bf16.msra.mxu0 %v32771_v45 }
 0xca2   : > { %25154 = vmatprep.subr.bf16.mxu0 %v35321_v57 }
 0xca4   : > { %23943 = vmatmul.mubr.f32.gmra.mrb[158].mxu0 %v17480_v42 }
 0xca5   : > { %23953 = vmatprep.mubr.msk.f32.mxu0 %vm26566_vm2, %v35378_v29 }
 0xca8   : > { %23954 = vmatmul.mubr.f32.vlgmr.msra.gmra.mrb[160].mxu0 %v17461_v63 }
 0xca9   : > { %23956 = vmatprep.mubr.msk.f32.mxu0 %vm26566_vm2, %v35378_v29  ;;  %25156 = vmatpush3.bf16.msra.mxu0 %v25155_v36 }
 0xcaa   : > { %25157 = vmatprep.subr.bf16.mxu0 %v35321_v57 }
 0xcac   : > { %23957 = vmatmul.mubr.f32.gmra.mrb[162].mxu0 %v17471_v18  ;;  %v26554_v18 = vld [vmem:[%s26717_s29 + $0x8] sm:$0xff] }
 0xcad   : > { %23959 = vmatprep.mubr.msk.f32.mxu0 %vm26566_vm2, %v35378_v29  ;;  %25159 = vmatpush3.bf16.msra.mxu0 %v32789_v55 }
 0xcae   : > { %25160 = vmatprep.subr.bf16.mxu0 %v35321_v57 }
 0xcb0   : > { %23960 = vmatmul.mubr.f32.gmra.mrb[164].mxu0 %v17481_v15 }
 0xcb1   : > { %23970 = vmatprep.mubr.msk.f32.mxu0 %vm26566_vm2, %v35378_v29 }
 0xcb4   : > { %23971 = vmatmul.mubr.f32.vlgmr.msra.gmra.mrb[166].mxu0 %v32792_v6 }
 0xcb5   : > { %23973 = vmatprep.mubr.msk.f32.mxu0 %vm26566_vm2, %v35378_v29  ;;  %25162 = vmatpush3.bf16.msra.mxu0 %v32761_v61 }
 0xcb6   : > { %25163 = vmatprep.subr.bf16.mxu0 %v35321_v57 }
 0xcb8   : > { %23974 = vmatmul.mubr.f32.gmra.mrb[168].mxu0 %v32796_v44 }
 0xcb9   : > { %23976 = vmatprep.mubr.msk.f32.mxu0 %vm26566_vm2, %v35378_v29  ;;  %25165 = vmatpush3.bf16.msra.mxu0 %v32771_v45 }
 0xcba   : > { %25166 = vmatprep.subr.bf16.mxu0 %v35321_v57 }
 0xcbc   : > { %23977 = vmatmul.mubr.f32.gmra.mrb[170].mxu0 %v17479_v35 }
 0xcbd   : > { %23987 = vmatprep.mubr.msk.f32.mxu0 %vm26566_vm2, %v35378_v29 }
 0xcc0   : > { %23988 = vmatmul.mubr.f32.vlgmr.msra.gmra.mrb[172].mxu0 %v32792_v6 }
 0xcc1   : > { %23990 = vmatprep.mubr.msk.f32.mxu0 %vm26566_vm2, %v35378_v29 }
 0xcc4   : > { %23991 = vmatmul.mubr.f32.gmra.mrb[174].mxu0 %v32796_v44 }
 0xcc5   : > { %23993 = vmatprep.mubr.msk.f32.mxu0 %vm26566_vm2, %v35378_v29 }
 0xcc8   : > { %23994 = vmatmul.mubr.f32.gmra.mrb[176].mxu0 %v17479_v35 }
 0xcc9   : > { %24004 = vmatprep.mubr.msk.f32.mxu0 %vm26566_vm2, %v35378_v29 }
 0xd57   : > { %v17465_v43 = vpop.f32.mrb[142].mxu0 }
 0xd58   : > { %v23904_v62 = vpop.f32.mrb[143].mxu0  ;;  %v17466_v33 = vadd.f32 %v19393_v27, %v17465_v43 }
 0xd5b   : > { %v17475_v53 = vpop.f32.mrb[144].mxu0 }
 0xd5c   : > { %v23907_v9 = vpop.f32.mrb[145].mxu0  ;;  %v17476_v38 = vadd.f32 %v19393_v27, %v17475_v53 }
 0xd5f   : > { %v17485_v19 = vpop.f32.mrb[146].mxu0 }
 0xd60   : > { %v23910_v5 = vpop.f32.mrb[147].mxu0  ;;  %v17486_v45 = vadd.f32 %v19393_v27, %v17485_v19 }
 0xd63   : > { %v17576_v11 = vpop.f32.mrb[148].mxu0 }
 0xd64   : > { %v17577_v61 = vadd.f32 %v17576_v11, %v17466_v33  ;;  %v23921_v52 = vpop.f32.mrb[149].mxu0 }
 0xd67   : > { %v17582_v4 = vpop.f32.mrb[150].mxu0 }
 0xd68   : > { %v17583_v25 = vadd.f32 %v17582_v4, %v17476_v38  ;;  %v23924_v37 = vpop.f32.mrb[151].mxu0 }
 0xd6b   : > { %v17588_v56 = vpop.f32.mrb[152].mxu0 }
 0xd6c   : > { %v17589_v39 = vadd.f32 %v17588_v56, %v17486_v45  ;;  %v23927_v17 = vpop.f32.mrb[153].mxu0 }
 0xd6d   : > { %v18024_v17 = vld [vmem:[%s33236_s13 + $0x8] sm:$0xff] }
 0xd6f   : > { %v17668_v22 = vpop.f32.mrb[154].mxu0 }
 0xd70   : > { %v17669_v31 = vadd.f32 %v17668_v22, %v17577_v61  ;;  %v23938_v41 = vpop.f32.mrb[155].mxu0  ;;  %v18025_v22 = vld [vmem:[%s33236_s13 + $0x10] sm:$0xff] }
 0xd71   : > { %v18047_v41 = vand.u32 4294901760, %v18024_v17 }
 0xd73   : > { %v17675_v0 = vpop.f32.mrb[156].mxu0 }
 0xd74   : > { %v17676_v8 = vadd.f32 %v17675_v0, %v17583_v25  ;;  %v23941_v3 = vpop.f32.mrb[157].mxu0  ;;  %v18026_v0 = vld [vmem:[%s33236_s13 + $0x18] sm:$0xff] }
 0xd75   : > { %v18053_v3 = vand.u32 4294901760, %v18026_v0 }
 0xd77   : > { %v17682_v40 = vpop.f32.mrb[158].mxu0 }
 0xd78   : > { %v17683_v59 = vadd.f32 %v17682_v40, %v17589_v39  ;;  %v23944_v49 = vpop.f32.mrb[159].mxu0  ;;  %v18023_v39 = vld [vmem:[%s33236_s13] sm:$0xff] }
 0xd79   : > { %v32909_v49 = vsub.f32 %v18024_v17, %v18047_v41 }
 0xd7b   : > { %v17759_v32 = vpop.f32.mrb[160].mxu0 }
 0xd7c   : > { %v17760_v30 = vadd.f32 %v17759_v32, %v17669_v31  ;;  %v23955_v2 = vpop.f32.mrb[161].mxu0  ;;  %v18044_v31 = vand.u32 4294901760, %v18023_v39 }
 0xd7e   : > { %v32905_v40 = vpack.c.bf16 %v18047_v41, %v18044_v31 }
 0xd7f   : > { %v17767_v28 = vpop.f32.mrb[162].mxu0 }
 0xd80   : > { %v17768_v34 = vadd.f32 %v17767_v28, %v17676_v8  ;;  %v23958_v36 = vpop.f32.mrb[163].mxu0  ;;  %v18050_v8 = vand.u32 4294901760, %v18025_v22  ;;  %25168 = vmatpush3.bf16.msra.mxu0 %v32905_v40 }
 0xd81   : > { %25169 = vmatprep.subr.bf16.mxu0 %v35321_v57 }
 0xd82   : > { %v32911_v32 = vsub.f32 %v18025_v22, %v18050_v8  ;;  %v32916_v2 = vpack.c.bf16 %v18053_v3, %v18050_v8 }
 0xd83   : > { %v17775_v55 = vpop.f32.mrb[164].mxu0 }
 0xd84   : > { %v17776_v23 = vadd.f32 %v17775_v55, %v17683_v59  ;;  %v23961_v10 = vpop.f32.mrb[165].mxu0  ;;  %v32907_v59 = vsub.f32 %v18023_v39, %v18044_v31  ;;  %25171 = vmatpush3.bf16.msra.mxu0 %v32916_v2 }
 0xd85   : > { %25172 = vmatprep.subr.bf16.mxu0 %v35321_v57 }
 0xd86   : > { %v18145_v28 = vand.u32 4294901760, %v32907_v59 }
 0xd87   : > { %v17858_v60 = vpop.f32.mrb[166].mxu0 }
 0xd88   : > { %v17859_v14 = vadd.f32 %v17858_v60, %v17760_v30  ;;  %v23972_v6 = vpop.f32.mrb[167].mxu0  ;;  %v32913_v30 = vsub.f32 %v18026_v0, %v18053_v3  ;;  %v18146_v36 = vsub.f32 %v32907_v59, %v18145_v28  ;;  %v18159_v60 = vand.u32 4294901760, %v32911_v32 }
 0xd8b   : > { %v17864_v12 = vpop.f32.mrb[168].mxu0 }
 0xd8c   : > { %v17865_v46 = vadd.f32 %v17864_v12, %v17768_v34  ;;  %v23975_v24 = vpop.f32.mrb[169].mxu0  ;;  %v18152_v34 = vand.u32 4294901760, %v32909_v49  ;;  %v18160_v12 = vsub.f32 %v32911_v32, %v18159_v60 }
 0xd8e   : > { %v18153_v55 = vsub.f32 %v32909_v49, %v18152_v34  ;;  %v18161_v24 = vand.u32 4294901760, %v18160_v12 }
 0xd8f   : > { %v17870_v7 = vpop.f32.mrb[170].mxu0 }
 0xd90   : > { %v17871_v13 = vadd.f32 %v17870_v7, %v17776_v23  ;;  %v23978_v63 = vpop.f32.mrb[171].mxu0  ;;  %v18147_v23 = vand.u32 4294901760, %v18146_v36  ;;  %v18154_v10 = vand.u32 4294901760, %v18153_v55 }
 0xd91   : > { %v25179_v63 = vpack.c.bf16 %v32909_v49, %v32907_v59 }
 0xd92   : > { %v25173_v6 = vpack.c.bf16 %v18154_v10, %v18147_v23  ;;  %v18644_v10 = vld [vmem:[%s33238_s15 + $0x18] sm:$0xff] }
 0xd93   : > { %v17945_v44 = vpop.f32.mrb[172].mxu0  ;;  %v18676_v12 = vand.u32 4294901760, %v18644_v10 }
 0xd94   : > { %v17946_v51 = vadd.f32 %v17945_v44, %v17859_v14  ;;  %v23989_v50 = vpop.f32.mrb[173].mxu0  ;;  %v18166_v14 = vand.u32 4294901760, %v32913_v30  ;;  %v25182_v44 = vpack.c.bf16 %v32913_v30, %v32911_v32  ;;  %v18642_v32 = vld [vmem:[%s33238_s15 + $0x8] sm:$0xff] }
 0xd95   : > { %v18670_v23 = vand.u32 4294901760, %v18642_v32 }
 0xd96   : > { %v32861_v48 = vadd.f32 %v26553_v20, %v17946_v51  ;;  %v32933_v51 = vpack.c.bf16 %v18152_v34, %v18145_v28  ;;  %v32935_v50 = vpack.c.bf16 %v18166_v14, %v18159_v60 }
 0xd97   : > { %v17951_v1 = vpop.f32.mrb[174].mxu0 }
 0xd98   : > { %v17952_v21 = vadd.f32 %v17951_v1, %v17865_v46  ;;  %v23992_v58 = vpop.f32.mrb[175].mxu0  ;;  %v17966_v35 = vsel %vm843_vm0, %v32861_v48, 0.0  ;;  %v18167_v46 = vsub.f32 %v32913_v30, %v18166_v14  ;;  %v18643_v30 = vld [vmem:[%s33238_s15 + $0x10] sm:$0xff]  ;;  %v18645_v14 = vld [vmem:[%s33238_s15 + $0x20] sm:$0xff] }
 0xd99   : > { %17967 = vadd.xlane.f32.xlu0 %v17966_v35  ;;  %v18673_v60 = vand.u32 4294901760, %v18643_v30 }
 0xd9a   : > { %v32866_v42 = vadd.f32 %v26554_v18, %v17952_v21  ;;  %v18168_v7 = vand.u32 4294901760, %v18167_v46  ;;  %v18679_v46 = vand.u32 4294901760, %v18645_v14 }
 0xd9b   : > { %v17957_v47 = vpop.f32.mrb[176].mxu0 }
 0xd9c   : > { %v17958_v54 = vadd.f32 %v17957_v47, %v17871_v13  ;;  %v23995_v15 = vpop.f32.mrb[177].mxu0  ;;  %v17969_v16 = vsel %vm843_vm0, %v32866_v42, 0.0  ;;  %v25176_v13 = vpack.c.bf16 %v18168_v7, %v18161_v24  ;;  %v18647_v7 = vld [vmem:[%s33238_s15 + $0x30] sm:$0xff] }
 0xd9d   : > { %17970 = vadd.xlane.f32.xlu1 %v17969_v16 }
 0xd9e   : > { %v32871_v43 = vadd.f32 %v26555_v26, %v17958_v54  ;;  %v19394_v26 = vld [vmem:[%s33234_s11] ss:$0 sm:$0xff] }
 0xda0   : > { %v17972_v62 = vsel %vm850_vm1, %v32871_v43, 0.0 }
 0xda1   : > { %17973 = vadd.xlane.f32.xlu0 %v17972_v62 }
 0xe26   : > { %v17968_v53 = vpop.xlane.xlu0 %17967 }
 0xe27   : > { %v17975_v9 = vmul.f32 0.03125, %v17968_v53  ;;  %v19395_v53 = vld [vmem:[%s33235_s12] ss:$0 sm:$0xff] }
 0xe29   : > { %v32876_v27 = vsub.f32 %v32861_v48, %v17975_v9 }
 0xe2a   : > { %v17971_v19 = vpop.xlane.xlu1 %17970 }
 0xe2b   : > { %v17976_v5 = vmul.f32 0.03125, %v17971_v19  ;;  %v17981_v33 = vmul.f32 %v32876_v27, %v32876_v27 }
 0xe2d   : > { %v32881_v11 = vsub.f32 %v32866_v42, %v17976_v5  ;;  %v17984_v61 = vsel %vm843_vm0, %v17981_v33, 0.0 }
 0xe2e   : > { %17985 = vadd.xlane.f32.xlu0 %v17984_v61  ;;  %v17974_v52 = vpop.xlane.xlu0 %17973 }
 0xe2f   : > { %v17977_v38 = vmul.f32 0.03125, %v17974_v52  ;;  %v17982_v4 = vmul.f32 %v32881_v11, %v32881_v11 }
 0xe31   : > { %v32887_v25 = vsub.f32 %v32871_v43, %v17977_v38  ;;  %v17987_v37 = vsel %vm843_vm0, %v17982_v4, 0.0 }
 0xe32   : > { %17988 = vadd.xlane.f32.xlu1 %v17987_v37 }
 0xe33   : > { %v17983_v45 = vmul.f32 %v32887_v25, %v32887_v25 }
 0xe35   : > { %v17990_v56 = vsel %vm850_vm1, %v17983_v45, 0.0 }
 0xe36   : > { %17991 = vadd.xlane.f32.xlu0 %v17990_v56 }
 0xebb   : > { %v17986_v20 = vpop.xlane.xlu0 %17985 }
 0xebc   : > { %v17993_v1 = vmul.f32 0.03125, %v17986_v20  ;;  %v33048_v20 = vsub.f32 %v18644_v10, %v18676_v12  ;;  %v19396_v10 = vld [vmem:[%s33237_s14] ss:$0 sm:$0xff] }
 0xebe   : > { %v17996_v21 = vadd.f32 1e-05, %v17993_v1  ;;  %v33050_v1 = vsub.f32 %v18645_v14, %v18679_v46 }
 0xebf   : > { %v17989_v58 = vpop.xlane.xlu1 %17988 }
 0xec0   : > { %26537 = vrsqrt.f32 %v17996_v21  ;;  %v17994_v35 = vmul.f32 0.03125, %v17989_v58  ;;  %v33054_v58 = vpack.c.bf16 %v18676_v12, %v18673_v60 }
 0xec2   : > { %v17997_v18 = vadd.f32 1e-05, %v17994_v35 }
 0xec3   : > { %v17992_v47 = vpop.xlane.xlu0 %17991 }
 0xec4   : > { %26539 = vrsqrt.f32 %v17997_v18  ;;  %v17995_v54 = vmul.f32 0.03125, %v17992_v47 }
 0xec6   : > { %v17998_v15 = vadd.f32 1e-05, %v17995_v54  ;;  %v18685_v54 = vand.u32 4294901760, %v18647_v7 }
 0xec8   : > { %26541 = vrsqrt.f32 %v17998_v15  ;;  %v18793_v15 = vand.u32 4294901760, %v33048_v20 }
 0xeca   : > { %v26538_v16 = vpop.eup %26537 }
 0xecb   : > { %v18002_v62 = vmul.f32 %v26538_v16, %v32876_v27 }
 0xecd   : > { %v18011_v9 = vmul.f32 %v19394_v26, %v18002_v62  ;;  %v18800_v62 = vand.u32 4294901760, %v33050_v1 }
 0xece   : > { %v26540_v19 = vpop.eup %26539 }
 0xecf   : > { %v18020_v5 = vadd.f32 %v19395_v53, %v18011_v9  ;;  %v18003_v33 = vmul.f32 %v26540_v19, %v32881_v11 }
 0xed1   : > { %v18012_v61 = vmul.f32 %v19394_v26, %v18003_v33  ;;  %v18035_v52 = vsel %vm843_vm0, %v18020_v5, 0 }
 0xed2   : > { %v26542_v38 = vpop.eup %26541  ;;  %v32946_v4 = vand.u32 4294901760, %v18035_v52 }
 0xed3   : > { %v18004_v37 = vmul.f32 %v26542_v38, %v32887_v25  ;;  %v18021_v45 = vadd.f32 %v19395_v53, %v18012_v61 }
 0xed4   : > { %v18113_v27 = vsub.f32 %v18035_v52, %v32946_v4 }
 0xed5   : > { %v18013_v56 = vmul.f32 %v19394_v26, %v18004_v37  ;;  %v18038_v39 = vsel %vm843_vm0, %v18021_v45, 0 }
 0xed6   : > { %v18114_v17 = vand.u32 4294901760, %v18113_v27  ;;  %v32951_v22 = vand.u32 4294901760, %v18038_v39 }
 0xed7   : > { %v18022_v31 = vadd.f32 %v19395_v53, %v18013_v56  ;;  %v33063_v53 = vsub.f32 %v18647_v7, %v18685_v54 }
 0xed8   : > { %v18115_v41 = vsub.f32 %v18113_v27, %v18114_v17  ;;  %v18123_v11 = vsub.f32 %v18038_v39, %v32951_v22 }
 0xed9   : > { %v18041_v0 = vsel %vm843_vm0, %v18022_v31, 0  ;;  %v18814_v52 = vand.u32 4294901760, %v33063_v53  ;;  %v18794_v31 = vsub.f32 %v33048_v20, %v18793_v15 }
 0xeda   : > { %v18116_v8 = vand.u32 4294901760, %v18115_v41  ;;  %v18124_v3 = vand.u32 4294901760, %v18123_v11  ;;  %v18132_v59 = vand.u32 4294901760, %v18041_v0 }
 0xedc   : > { %24005 = vmatmul.mubr.f32.vlgmr.msra.gmra.mrb[178].mxu0 %v18116_v8  ;;  %v18125_v25 = vsub.f32 %v18123_v11, %v18124_v3  ;;  %v18133_v49 = vsub.f32 %v18041_v0, %v18132_v59  ;;  %v18801_v8 = vsub.f32 %v33050_v1, %v18800_v62 }
 0xedd   : > { %24007 = vmatprep.mubr.msk.f32.mxu0 %vm26566_vm2, %v35378_v29  ;;  %25174 = vmatpush3.bf16.msra.mxu0 %v25173_v6  ;;  %v18646_v6 = vld [vmem:[%s33238_s15 + $0x28] sm:$0xff] }
 0xede   : > { %v18126_v28 = vand.u32 4294901760, %v18125_v25  ;;  %v18134_v34 = vand.u32 4294901760, %v18133_v49  ;;  %25175 = vmatprep.subr.bf16.mxu0 %v35321_v57  ;;  %v18682_v24 = vand.u32 4294901760, %v18646_v6 }
 0xee0   : > { %24008 = vmatmul.mubr.f32.gmra.mrb[180].mxu0 %v18126_v28  ;;  %v18135_v36 = vsub.f32 %v18133_v49, %v18134_v34  ;;  %v33052_v21 = vsub.f32 %v18646_v6, %v18682_v24  ;;  %v33069_v33 = vpack.c.bf16 %v18682_v24, %v18679_v46 }
 0xee1   : > { %24010 = vmatprep.mubr.msk.f32.mxu0 %vm26566_vm2, %v35378_v29  ;;  %25177 = vmatpush3.bf16.msra.mxu0 %v25176_v13 }
 0xee2   : > { %v18136_v55 = vand.u32 4294901760, %v18135_v36  ;;  %25178 = vmatprep.subr.bf16.mxu0 %v35321_v57  ;;  %v18807_v19 = vand.u32 4294901760, %v33052_v21 }
 0xee4   : > { %24011 = vmatmul.mubr.f32.gmra.mrb[182].mxu0 %v18136_v55  ;;  %v25257_v61 = vpack.c.bf16 %v18807_v19, %v18800_v62 }
 0xee5   : > { %24021 = vmatprep.mubr.msk.f32.mxu0 %vm26566_vm2, %v35378_v29 }
 0xee8   : > { %24022 = vmatmul.mubr.f32.vlgmr.msra.gmra.mrb[178].mxu0 %v32946_v4 }
 0xee9   : > { %24024 = vmatprep.mubr.msk.f32.mxu0 %vm26566_vm2, %v35378_v29  ;;  %25180 = vmatpush3.bf16.msra.mxu0 %v25179_v63  ;;  %v33039_v63 = vsub.f32 %v18642_v32, %v18670_v23 }
 0xeea   : > { %25181 = vmatprep.subr.bf16.mxu0 %v35321_v57 }
 0xeeb   : > { %v18779_v18 = vand.u32 4294901760, %v33039_v63 }
 0xeec   : > { %24025 = vmatmul.mubr.f32.gmra.mrb[180].mxu0 %v32951_v22 }
 0xeed   : > { %24027 = vmatprep.mubr.msk.f32.mxu0 %vm26566_vm2, %v35378_v29  ;;  %25183 = vmatpush3.bf16.msra.mxu0 %v25182_v44  ;;  %v33041_v44 = vsub.f32 %v18643_v30, %v18673_v60  ;;  %v18780_v45 = vsub.f32 %v33039_v63, %v18779_v18 }
 0xeee   : > { %25184 = vmatprep.subr.bf16.mxu0 %v35321_v57 }
 0xeef   : > { %v18786_v47 = vand.u32 4294901760, %v33041_v44  ;;  %v18781_v39 = vand.u32 4294901760, %v18780_v45  ;;  %v25230_v30 = vpack.c.bf16 %v33048_v20, %v33041_v44 }
 0xef0   : > { %24028 = vmatmul.mubr.f32.gmra.mrb[182].mxu0 %v18132_v59 }
 0xef1   : > { %24038 = vmatprep.mubr.msk.f32.mxu0 %vm26566_vm2, %v35378_v29  ;;  %v25254_v9 = vpack.c.bf16 %v18793_v15, %v18786_v47 }
 0xef4   : > { %24039 = vmatmul.mubr.f32.vlgmr.msra.gmra.mrb[178].mxu0 %v18113_v27 }
 0xef5   : > { %24041 = vmatprep.mubr.msk.f32.mxu0 %vm26566_vm2, %v35378_v29  ;;  %25186 = vmatpush3.bf16.msra.mxu0 %v32905_v40 }
 0xef6   : > { %25187 = vmatprep.subr.bf16.mxu0 %v35321_v57 }
 0xef8   : > { %24042 = vmatmul.mubr.f32.gmra.mrb[180].mxu0 %v18123_v11  ;;  %v18795_v11 = vand.u32 4294901760, %v18794_v31 }
 0xef9   : > { %24044 = vmatprep.mubr.msk.f32.mxu0 %vm26566_vm2, %v35378_v29  ;;  %25189 = vmatpush3.bf16.msra.mxu0 %v32916_v2 }
 0xefa   : > { %25190 = vmatprep.subr.bf16.mxu0 %v35321_v57 }
 0xefc   : > { %24045 = vmatmul.mubr.f32.gmra.mrb[182].mxu0 %v18133_v49  ;;  %v18815_v49 = vsub.f32 %v33063_v53, %v18814_v52 }
 0xefd   : > { %24055 = vmatprep.mubr.msk.f32.mxu0 %vm26566_vm2, %v35378_v29 }
 0xefe   : > { %v18816_v36 = vand.u32 4294901760, %v18815_v49 }
 0xf00   : > { %24056 = vmatmul.mubr.f32.vlgmr.msra.gmra.mrb[178].mxu0 %v18114_v17 }
 0xf01   : > { %24058 = vmatprep.mubr.msk.f32.mxu0 %vm26566_vm2, %v35378_v29  ;;  %25192 = vmatpush3.bf16.msra.mxu0 %v32933_v51 }
 0xf02   : > { %25193 = vmatprep.subr.bf16.mxu0 %v35321_v57 }
 0xf04   : > { %24059 = vmatmul.mubr.f32.gmra.mrb[180].mxu0 %v18124_v3  ;;  %v18808_v3 = vsub.f32 %v33052_v21, %v18807_v19 }
 0xf05   : > { %24061 = vmatprep.mubr.msk.f32.mxu0 %vm26566_vm2, %v35378_v29  ;;  %25195 = vmatpush3.bf16.msra.mxu0 %v32935_v50  ;;  %v18648_v50 = vld [vmem:[%s33238_s15 + $0x38] sm:$0xff] }
 0xf06   : > { %25196 = vmatprep.subr.bf16.mxu0 %v35321_v57  ;;  %v18688_v16 = vand.u32 4294901760, %v18648_v50  ;;  %v18809_v25 = vand.u32 4294901760, %v18808_v3 }
 0xf08   : > { %24062 = vmatmul.mubr.f32.gmra.mrb[182].mxu0 %v18134_v34  ;;  %v33067_v5 = vsub.f32 %v18648_v50, %v18688_v16 }
 0xf09   : > { %24072 = vmatprep.mubr.msk.f32.mxu0 %vm26566_vm2, %v35378_v29 }
 0xf0a   : > { %v18821_v38 = vand.u32 4294901760, %v33067_v5 }
 0xf0c   : > { %24073 = vmatmul.mubr.f32.vlgmr.msra.gmra.mrb[178].mxu0 %v32946_v4  ;;  %v25260_v27 = vpack.c.bf16 %v18821_v38, %v18814_v52  ;;  %v18822_v28 = vsub.f32 %v33067_v5, %v18821_v38 }
 0xf0d   : > { %24075 = vmatprep.mubr.msk.f32.mxu0 %vm26566_vm2, %v35378_v29  ;;  %25198 = vmatpush3.bf16.msra.mxu0 %v32905_v40  ;;  %v18641_v40 = vld [vmem:[%s33238_s15] sm:$0xff] }
 0xf0e   : > { %25199 = vmatprep.subr.bf16.mxu0 %v35321_v57  ;;  %v18823_v55 = vand.u32 4294901760, %v18822_v28 }
 0xf10   : > { %24076 = vmatmul.mubr.f32.gmra.mrb[180].mxu0 %v32951_v22 }
 0xf11   : > { %24078 = vmatprep.mubr.msk.f32.mxu0 %vm26566_vm2, %v35378_v29  ;;  %25201 = vmatpush3.bf16.msra.mxu0 %v32916_v2  ;;  %v18667_v2 = vand.u32 4294901760, %v18641_v40 }
 0xf12   : > { %25202 = vmatprep.subr.bf16.mxu0 %v35321_v57 }
 0xf13   : > { %v33037_v13 = vsub.f32 %v18641_v40, %v18667_v2  ;;  %v33043_v51 = vpack.c.bf16 %v18670_v23, %v18667_v2  ;;  %v33097_v40 = vpack.c.bf16 %v18823_v55, %v18816_v36  ;;  %v25233_v2 = vpack.c.bf16 %v33052_v21, %v33050_v1 }
 0xf14   : > { %24079 = vmatmul.mubr.f32.gmra.mrb[182].mxu0 %v18132_v59  ;;  %v25236_v23 = vpack.c.bf16 %v33067_v5, %v33063_v53 }
 0xf15   : > { %24089 = vmatprep.mubr.msk.f32.mxu0 %vm26566_vm2, %v35378_v29  ;;  %v18772_v35 = vand.u32 4294901760, %v33037_v13  ;;  %v25227_v32 = vpack.c.bf16 %v33039_v63, %v33037_v13 }
 0xf17   : > { %v25251_v26 = vpack.c.bf16 %v18779_v18, %v18772_v35  ;;  %v18773_v37 = vsub.f32 %v33037_v13, %v18772_v35 }
 0xf18   : > { %24090 = vmatmul.mubr.f32.vlgmr.msra.gmra.mrb[178].mxu0 %v32946_v4  ;;  %v33076_v4 = vpack.c.bf16 %v18688_v16, %v18685_v54 }
 0xf19   : > { %24092 = vmatprep.mubr.msk.f32.mxu0 %vm26566_vm2, %v35378_v29  ;;  %25204 = vmatpush3.bf16.msra.mxu0 %v33043_v51  ;;  %v18774_v56 = vand.u32 4294901760, %v18773_v37 }
 0xf1a   : > { %25205 = vmatprep.subr.bf16.mxu0 %v35321_v57  ;;  %25252 = vmatpush3.bf16.msra.mxu1 %v25251_v26 }
 0xf1b   : > { %25253 = vmatprep.subr.bf16.mxu1 %v35321_v57  ;;  %v33085_v17 = vpack.c.bf16 %v18781_v39, %v18774_v56 }
 0xf1c   : > { %24093 = vmatmul.mubr.f32.gmra.mrb[180].mxu0 %v32951_v22  ;;  %v18787_v22 = vsub.f32 %v33041_v44, %v18786_v47 }
 0xf1d   : > { %24095 = vmatprep.mubr.msk.f32.mxu0 %vm26566_vm2, %v35378_v29  ;;  %25207 = vmatpush3.bf16.msra.mxu0 %v33054_v58 }
 0xf1e   : > { %25208 = vmatprep.subr.bf16.mxu0 %v35321_v57  ;;  %25255 = vmatpush3.bf16.msra.mxu1 %v25254_v9  ;;  %v18788_v41 = vand.u32 4294901760, %v18787_v22 }
 0xf1f   : > { %25256 = vmatprep.subr.bf16.mxu1 %v35321_v57 }
 0xf20   : > { %24096 = vmatmul.mubr.f32.gmra.mrb[182].mxu0 %v18132_v59  ;;  %v33089_v0 = vpack.c.bf16 %v18795_v11, %v18788_v41  ;;  %v18802_v59 = vand.u32 4294901760, %v18801_v8 }
 0xf21   : > { %24114 = vmatprep.mubr.msk.f32.mxu0 %vm26566_vm2, %v35378_v29  ;;  %25210 = vmatpush3.bf16.msra.mxu0 %v33069_v33 }
 0xf22   : > { %25211 = vmatprep.subr.bf16.mxu0 %v35321_v57  ;;  %25258 = vmatpush3.bf16.msra.mxu1 %v25257_v61  ;;  %v33095_v34 = vpack.c.bf16 %v18809_v25, %v18802_v59 }
 0xf23   : > { %25259 = vmatprep.subr.bf16.mxu1 %v35321_v57 }
 0xf25   : > { %25213 = vmatpush3.bf16.msra.mxu0 %v33076_v4 }
 0xf26   : > { %25214 = vmatprep.subr.bf16.mxu0 %v35321_v57  ;;  %25261 = vmatpush3.bf16.msra.mxu1 %v25260_v27 }
 0xfeb   : > { %v18598_v60 = vpop.f32.mrb[178].mxu0 }
 0xfec   : > { %v25293_v14 = vadd.f32 %v19396_v10, %v18598_v60  ;;  %v24091_v6 = vpop.f32.mrb[179].mxu0 }
 0xfee   : > { %v18617_v12 = vmul.f32 0.044715, %v25293_v14  ;;  %v18614_v39 = vmul.f32 0.5, %v25293_v14 }
 0xfef   : > { %v18604_v46 = vpop.f32.mrb[180].mxu0 }
 0xff0   : > { %v18620_v24 = vmul.f32 %v25293_v14, %v18617_v12  ;;  %v25294_v7 = vadd.f32 %v19396_v10, %v18604_v46  ;;  %v24094_v50 = vpop.f32.mrb[181].mxu0 }
 0xff2   : > { %v18623_v35 = vmul.f32 %v25293_v14, %v18620_v24  ;;  %v18618_v18 = vmul.f32 0.044715, %v25294_v7  ;;  %v18615_v8 = vmul.f32 0.5, %v25294_v7 }
 0xff3   : > { %v18610_v47 = vpop.f32.mrb[182].mxu0 }
 0xff4   : > { %v18626_v54 = vadd.f32 %v25293_v14, %v18623_v35  ;;  %v18621_v15 = vmul.f32 %v25294_v7, %v18618_v18  ;;  %v25295_v16 = vadd.f32 %v19396_v10, %v18610_v47  ;;  %v24097_v26 = vpop.f32.mrb[183].mxu0 }
 0xff6   : > { %v18629_v62 = vmul.f32 0.7978846, %v18626_v54  ;;  %v18624_v9 = vmul.f32 %v25294_v7, %v18621_v15  ;;  %v18619_v19 = vmul.f32 0.044715, %v25295_v16  ;;  %v18616_v55 = vmul.f32 0.5, %v25295_v16 }
 0xff8   : > { %26543 = vtanh.f32 %v18629_v62  ;;  %v18627_v61 = vadd.f32 %v25294_v7, %v18624_v9  ;;  %v18622_v52 = vmul.f32 %v25295_v16, %v18619_v19 }
 0xffa   : > { %v18630_v38 = vmul.f32 0.7978846, %v18627_v61  ;;  %v18625_v37 = vmul.f32 %v25295_v16, %v18622_v52 }
 0xffc   : > { %26545 = vtanh.f32 %v18630_v38  ;;  %v18628_v45 = vadd.f32 %v25295_v16, %v18625_v37 }
 0xffe   : > { %v18631_v27 = vmul.f32 0.7978846, %v18628_v45 }
0x1000   : > { %26547 = vtanh.f32 %v18631_v27 }
0x1002   : > { %v26544_v56 = vpop.eup %26543 }
0x1003   : > { %v18635_v22 = vadd.f32 1.0, %v26544_v56 }
0x1005   : > { %v18638_v31 = vmul.f32 %v18635_v22, %v18614_v39 }
0x1006   : > { %v26546_v41 = vpop.eup %26545 }
0x1007   : > { %v18658_v11 = vsel %vm18656_vm9, %v18638_v31, 0  ;;  %v18636_v3 = vadd.f32 1.0, %v26546_v41 }
0x1008   : > { %v33111_v59 = vand.u32 4294901760, %v18658_v11 }
0x1009   : > { %v18639_v25 = vmul.f32 %v18636_v3, %v18615_v8 }
0x100a   : > { %v26548_v49 = vpop.eup %26547  ;;  %v33114_v28 = vsub.f32 %v18658_v11, %v33111_v59  ;;  %24215 = vmatmul.mubr.f32.vlgmr.msra.gmra.mrb[132].mxu1 %v33111_v59 }
0x100b   : > { %24217 = vmatprep.mubr.msk.f32.mxu1 %vm26566_vm2, %v35378_v29  ;;  %v18661_v36 = vsel %vm18656_vm9, %v18639_v25, 0  ;;  %v18637_v10 = vadd.f32 1.0, %v26548_v49 }
0x100c   : > { %v33120_v60 = vand.u32 4294901760, %v18661_v36  ;;  %v18741_v14 = vand.u32 4294901760, %v33114_v28 }
0x100d   : > { %v18640_v6 = vmul.f32 %v18637_v10, %v18616_v55 }
0x100e   : > { %24218 = vmatmul.mubr.f32.gmra.mrb[134].mxu1 %v33120_v60  ;;  %v18742_v12 = vsub.f32 %v33114_v28, %v18741_v14  ;;  %v18750_v46 = vsub.f32 %v18661_v36, %v33120_v60 }
0x100f   : > { %24220 = vmatprep.mubr.msk.f32.mxu1 %vm26566_vm2, %v35378_v29  ;;  %v18664_v24 = vsel %vm18656_vm9, %v18640_v6, 0 }
0x1010   : > { %v18743_v7 = vand.u32 4294901760, %v18742_v12  ;;  %v33129_v50 = vand.u32 4294901760, %v18664_v24  ;;  %v18751_v35 = vand.u32 4294901760, %v18750_v46 }
0x1012   : > { %24115 = vmatmul.mubr.f32.vlgmr.msra.gmra.mrb[184].mxu0 %v18743_v7  ;;  %24221 = vmatmul.mubr.f32.gmra.mrb[136].mxu1 %v33129_v50  ;;  %v18752_v18 = vsub.f32 %v18750_v46, %v18751_v35  ;;  %v18760_v47 = vsub.f32 %v18664_v24, %v33129_v50 }
0x1013   : > { %25216 = vmatpush3.bf16.msra.mxu0 %v33085_v17  ;;  %24117 = vmatprep.mubr.msk.f32.mxu0 %vm26566_vm2, %v35378_v29 }
0x1014   : > { %25217 = vmatprep.subr.bf16.mxu0 %v35321_v57  ;;  %v18753_v54 = vand.u32 4294901760, %v18752_v18  ;;  %v18761_v15 = vand.u32 4294901760, %v18760_v47 }
0x1016   : > { %24118 = vmatmul.mubr.f32.gmra.mrb[186].mxu0 %v18753_v54  ;;  %v18762_v16 = vsub.f32 %v18760_v47, %v18761_v15 }
0x1017   : > { %25219 = vmatpush3.bf16.msra.mxu0 %v33089_v0  ;;  %24120 = vmatprep.mubr.msk.f32.mxu0 %vm26566_vm2, %v35378_v29 }
0x1018   : > { %25220 = vmatprep.subr.bf16.mxu0 %v35321_v57  ;;  %v18763_v26 = vand.u32 4294901760, %v18762_v16 }
0x101a   : > { %24121 = vmatmul.mubr.f32.gmra.mrb[188].mxu0 %v18763_v26 }
0x101b   : > { %25222 = vmatpush3.bf16.msra.mxu0 %v33095_v34  ;;  %24139 = vmatprep.mubr.msk.f32.mxu0 %vm26566_vm2, %v35378_v29 }
0x101c   : > { %25223 = vmatprep.subr.bf16.mxu0 %v35321_v57 }
0x101f   : > { %25225 = vmatpush3.bf16.msra.mxu0 %v33097_v40 }
0x1020   : > { %25226 = vmatprep.subr.bf16.mxu0 %v35321_v57 }
0x1022   : > { %24140 = vmatmul.mubr.f32.vlgmr.msra.gmra.mrb[190].mxu0 %v33111_v59 }
0x1023   : > { %25228 = vmatpush3.bf16.msra.mxu0 %v25227_v32  ;;  %24142 = vmatprep.mubr.msk.f32.mxu0 %vm26566_vm2, %v35378_v29 }
0x1024   : > { %25229 = vmatprep.subr.bf16.mxu0 %v35321_v57 }
0x1026   : > { %24143 = vmatmul.mubr.f32.gmra.mrb[192].mxu0 %v33120_v60 }
0x1027   : > { %25231 = vmatpush3.bf16.msra.mxu0 %v25230_v30  ;;  %24145 = vmatprep.mubr.msk.f32.mxu0 %vm26566_vm2, %v35378_v29 }
0x1028   : > { %25232 = vmatprep.subr.bf16.mxu0 %v35321_v57 }
0x102a   : > { %24146 = vmatmul.mubr.f32.gmra.mrb[194].mxu0 %v33129_v50 }
0x102b   : > { %25234 = vmatpush3.bf16.msra.mxu0 %v25233_v2  ;;  %24164 = vmatprep.mubr.msk.f32.mxu0 %vm26566_vm2, %v35378_v29 }
0x102c   : > { %25235 = vmatprep.subr.bf16.mxu0 %v35321_v57 }
0x102f   : > { %25237 = vmatpush3.bf16.msra.mxu0 %v25236_v23 }
0x1030   : > { %25238 = vmatprep.subr.bf16.mxu0 %v35321_v57 }
0x1032   : > { %24165 = vmatmul.mubr.f32.vlgmr.msra.gmra.mrb[196].mxu0 %v33114_v28 }
0x1033   : > { %25240 = vmatpush3.bf16.msra.mxu0 %v33043_v51  ;;  %24167 = vmatprep.mubr.msk.f32.mxu0 %vm26566_vm2, %v35378_v29 }
0x1034   : > { %25241 = vmatprep.subr.bf16.mxu0 %v35321_v57 }
0x1036   : > { %24168 = vmatmul.mubr.f32.gmra.mrb[198].mxu0 %v18750_v46 }
0x1037   : > { %25243 = vmatpush3.bf16.msra.mxu0 %v33054_v58  ;;  %24170 = vmatprep.mubr.msk.f32.mxu0 %vm26566_vm2, %v35378_v29 }
0x1038   : > { %25244 = vmatprep.subr.bf16.mxu0 %v35321_v57 }
0x103a   : > { %24171 = vmatmul.mubr.f32.gmra.mrb[200].mxu0 %v18760_v47 }
0x103b   : > { %25246 = vmatpush3.bf16.msra.mxu0 %v33069_v33  ;;  %24189 = vmatprep.mubr.msk.f32.mxu0 %vm26566_vm2, %v35378_v29 }
0x103c   : > { %25247 = vmatprep.subr.bf16.mxu0 %v35321_v57 }
0x103f   : > { %25249 = vmatpush3.bf16.msra.mxu0 %v33076_v4 }
0x1040   : > { %25262 = vmatprep.subr.bf16.mxu0 %v35321_v57 }
0x1042   : > { %24190 = vmatmul.mubr.f32.vlgmr.msra.gmra.mrb[202].mxu0 %v18741_v14 }
0x1043   : > { %25264 = vmatpush3.bf16.msra.mxu0 %v33043_v51  ;;  %24192 = vmatprep.mubr.msk.f32.mxu0 %vm26566_vm2, %v35378_v29 }
0x1044   : > { %25265 = vmatprep.subr.bf16.mxu0 %v35321_v57 }
0x1046   : > { %24193 = vmatmul.mubr.f32.gmra.mrb[204].mxu0 %v18751_v35 }
0x1047   : > { %25267 = vmatpush3.bf16.msra.mxu0 %v33054_v58  ;;  %24195 = vmatprep.mubr.msk.f32.mxu0 %vm26566_vm2, %v35378_v29 }
0x1048   : > { %25268 = vmatprep.subr.bf16.mxu0 %v35321_v57 }
0x104a   : > { %24196 = vmatmul.mubr.f32.gmra.mrb[206].mxu0 %v18761_v15 }
0x104b   : > { %25270 = vmatpush3.bf16.msra.mxu0 %v33069_v33  ;;  %24239 = vmatprep.mubr.msk.f32.mxu0 %vm26566_vm2, %v35378_v29 }
0x104c   : > { %25271 = vmatprep.subr.bf16.mxu0 %v35321_v57 }
0x104f   : > { %25273 = vmatpush3.bf16.msra.mxu0 %v33076_v4  ;;  %v19397_v4 = vld [vmem:[%s33239_s16] ss:$0 sm:$0xff] }
0x1052   : > { %24240 = vmatmul.mubr.f32.vlgmr.msra.gmra.mrb[208].mxu0 %v33111_v59 }
0x1053   : > { %24242 = vmatprep.mubr.msk.f32.mxu0 %vm26566_vm2, %v35378_v29 }
0x1056   : > { %24243 = vmatmul.mubr.f32.gmra.mrb[210].mxu0 %v33120_v60 }
0x1057   : > { %24245 = vmatprep.mubr.msk.f32.mxu0 %vm26566_vm2, %v35378_v29 }
0x105a   : > { %24246 = vmatmul.mubr.f32.gmra.mrb[212].mxu0 %v33129_v50 }
0x10dd   : > { %v19182_v13 = vpop.f32.mrb[132].mxu1 }
0x10de   : > { %v24216_v63 = vpop.f32.mrb[133].mxu1 }
0x10e1   : > { %v19188_v44 = vpop.f32.mrb[134].mxu1 }
0x10e2   : > { %v24219_v51 = vpop.f32.mrb[135].mxu1 }
0x10e5   : > { %v18745_v20 = vpop.f32.mrb[184].mxu0  ;;  %v19194_v57 = vpop.f32.mrb[136].mxu1 }
0x10e6   : > { %v24116_v1 = vpop.f32.mrb[185].mxu0  ;;  %v24222_v21 = vpop.f32.mrb[137].mxu1  ;;  %v18746_v17 = vadd.f32 %v19397_v4, %v18745_v20 }
0x10e9   : > { %v18755_v58 = vpop.f32.mrb[186].mxu0 }
0x10ea   : > { %v24119_v53 = vpop.f32.mrb[187].mxu0  ;;  %v18756_v40 = vadd.f32 %v19397_v4, %v18755_v58 }
0x10ed   : > { %v18765_v5 = vpop.f32.mrb[188].mxu0 }
0x10ee   : > { %v24122_v33 = vpop.f32.mrb[189].mxu0  ;;  %v18766_v23 = vadd.f32 %v19397_v4, %v18765_v5 }
0x10f5   : > { %v18876_v29 = vpop.f32.mrb[190].mxu0 }
0x10f6   : > { %v18877_v0 = vadd.f32 %v18876_v29, %v18746_v17  ;;  %v24141_v34 = vpop.f32.mrb[191].mxu0 }
0x10f9   : > { %v18882_v32 = vpop.f32.mrb[192].mxu0 }
0x10fa   : > { %v18883_v30 = vadd.f32 %v18882_v32, %v18756_v40  ;;  %v24144_v2 = vpop.f32.mrb[193].mxu0 }
0x10fd   : > { %v18888_v62 = vpop.f32.mrb[194].mxu0 }
0x10fe   : > { %v18889_v9 = vadd.f32 %v18888_v62, %v18766_v23  ;;  %v24147_v19 = vpop.f32.mrb[195].mxu0 }
0x1105   : > { %v18976_v61 = vpop.f32.mrb[196].mxu0 }
0x1106   : > { %v18977_v52 = vadd.f32 %v18976_v61, %v18877_v0  ;;  %v24166_v38 = vpop.f32.mrb[197].mxu0 }
0x1109   : > { %v18983_v37 = vpop.f32.mrb[198].mxu0 }
0x110a   : > { %v18984_v45 = vadd.f32 %v18983_v37, %v18883_v30  ;;  %v24169_v27 = vpop.f32.mrb[199].mxu0 }
0x110d   : > { %v18990_v56 = vpop.f32.mrb[200].mxu0 }
0x110e   : > { %v18991_v39 = vadd.f32 %v18990_v56, %v18889_v9  ;;  %v24172_v22 = vpop.f32.mrb[201].mxu0 }
0x1115   : > { %v19071_v31 = vpop.f32.mrb[202].mxu0 }
0x1116   : > { %v19072_v41 = vadd.f32 %v19071_v31, %v18977_v52  ;;  %v24191_v11 = vpop.f32.mrb[203].mxu0 }
0x1118   : > { %v19183_v8 = vadd.f32 %v19182_v13, %v19072_v41 }
0x1119   : > { %v19079_v3 = vpop.f32.mrb[204].mxu0 }
0x111a   : > { %v19080_v59 = vadd.f32 %v19079_v3, %v18984_v45  ;;  %v24194_v25 = vpop.f32.mrb[205].mxu0 }
0x111c   : > { %v19189_v49 = vadd.f32 %v19188_v44, %v19080_v59 }
0x111d   : > { %v19087_v28 = vpop.f32.mrb[206].mxu0 }
0x111e   : > { %v19088_v36 = vadd.f32 %v19087_v28, %v18991_v39  ;;  %v24197_v55 = vpop.f32.mrb[207].mxu0 }
0x1120   : > { %v19195_v10 = vadd.f32 %v19194_v57, %v19088_v36 }
0x1125   : > { %v19273_v60 = vpop.f32.mrb[208].mxu0 }
0x1126   : > { %v19274_v14 = vadd.f32 %v19273_v60, %v19183_v8  ;;  %v24241_v6 = vpop.f32.mrb[209].mxu0 }
0x1128   : > { %v19289_v12 = vadd.f32 %v19274_v14, %v32861_v48 }
0x1129   : > { %v19279_v46 = vpop.f32.mrb[210].mxu0 }
0x112a   : > { %19292 = vst.msk [vmem:[%s831_s4] sm:$0xff] %vm843_vm0, %v19289_v12  ;;  %v19280_v24 = vadd.f32 %v19279_v46, %v19189_v49  ;;  %v24244_v7 = vpop.f32.mrb[211].mxu0 }
0x112c   : > { %v19290_v50 = vadd.f32 %v19280_v24, %v32866_v42 }
0x112d   : > { %v19285_v35 = vpop.f32.mrb[212].mxu0 }
0x112e   : > { %19293 = vst.msk [vmem:[%s831_s4 + $0x8] sm:$0xff] %vm843_vm0, %v19290_v50  ;;  %v19286_v18 = vadd.f32 %v19285_v35, %v19195_v10  ;;  %v24247_v47 = vpop.f32.mrb[213].mxu0 }
0x1130   : > { %v19291_v54 = vadd.f32 %v19286_v18, %v32871_v43 }
0x1132   : > { %19294 = vst.msk [vmem:[%s831_s4 + $0x10] sm:$0xf] %vm850_vm1, %v19291_v54 }
0x1133 PF: > { %s36_s27 = sadd.s32 1, %s26562_s27  }
0x1134   : > { %p33_p4 = scmp.ge.s32.totalorder %s36_s27, 4  }
0x1136   :  { %35 = sbr.rel (!%p33_p4) target bundleno = 12 (0xc), region = 160 }

</bundles_post_ra>
